<compile_context>
chip_gen: v6e
topology: v6e:2x2x1
jax: 0.10.0
libtpu: 0.0.40
codegen_flags: <defaults>
</compile_context>

<pallas_src>
import jax
import jax.numpy as jnp
from jax.experimental import pallas as pl
from jax.experimental.pallas import tpu as pltpu


IN_DIM = 1433
H1 = 512
H2 = 256
OUT_DIM = 1


def _leaky_relu(x, slope=0.2):
    return jnp.where(x > 0, x, slope * x)


def discriminator_kernel(x_ref, w1_ref, b1_ref, w2_ref, b2_ref, w3t_ref, b3_ref,
                         o_ref):
    # x tile arrives as raw f32 (no wrapper pad/cast HBM pass); cast to bf16 on
    # the VPU right before the MXU.  K=1433 is ragged; Mosaic masks the padded
    # tail lanes when feeding the MXU, so the contraction stays exact.
    x = x_ref[...].astype(jnp.bfloat16)

    h1 = jnp.dot(x, w1_ref[...], preferred_element_type=jnp.float32)    # (T, H1) f32
    h1 = _leaky_relu(h1 + b1_ref[...])

    h2 = jnp.dot(h1.astype(jnp.bfloat16), w2_ref[...],
                 preferred_element_type=jnp.float32)                    # (T, H2) f32
    h2 = _leaky_relu(h2 + b2_ref[...])

    # Final H2 -> 1 projection as a trans-B contraction so the result is a
    # lane-dense (1, TILE_N) row (no 1-wide masked output stores).  Even if
    # Mosaic lowers the transposed operand via an XLU transpose of h2, its cost
    # is negligible next to the K=1433 layer-1 matmul and the XLU slot is
    # otherwise idle here.
    z = jax.lax.dot_general(
        w3t_ref[...], h2.astype(jnp.bfloat16),
        dimension_numbers=(((1,), (1,)), ((), ())),
        preferred_element_type=jnp.float32)                             # (1, T)
    z = z + b3_ref[...]                                                  # (1, 1) bcast

    # Sigmoid with the reciprocal on the (otherwise idle) EUP slot.
    o_ref[...] = pl.reciprocal(1.0 + jnp.exp(-z), approx=True)


def prepare_params(params):
    """One-time weight prep, hoisted out of the per-call hot path:
    bf16 casts for the MXU operands, transposed W3, 2-D biases."""
    w1, b1, w2, b2, w3, b3 = params
    return (
        w1.astype(jnp.bfloat16),                    # (1433, 512)
        b1.reshape(1, H1).astype(jnp.float32),
        w2.astype(jnp.bfloat16),                    # (512, 256)
        b2.reshape(1, H2).astype(jnp.float32),
        w3.T.astype(jnp.bfloat16),                  # (1, 256)
        b3.reshape(1, OUT_DIM).astype(jnp.float32),
    )


def _pick_tile(n):
    # Largest tile that still leaves >= 2 grid blocks (so both v7x TensorCores
    # get work under dimension_semantics=("parallel",)); 512 amortizes per-step
    # overhead for large batches on v5e/v6e.
    for t in (512, 256, 128):
        if -(-n // t) >= 2:
            return t
    return 128


@jax.jit
def discriminator_forward(x, prepared):
    """x: (N, 1433) float32, prepared = prepare_params(params). Returns (N, 1) f32."""
    w1_b, b1_2d, w2_b, b2_2d, w3t_b, b3_2d = prepared
    n = x.shape[0]
    tile_n = _pick_tile(n)
    n_blocks = -(-n // tile_n)
    n_pad = n_blocks * tile_n          # output allocation only; x stays unpadded

    fixed = lambda i: (0, 0)           # weights/biases: same (only) block every step

    out_row = pl.pallas_call(
        discriminator_kernel,
        out_shape=jax.ShapeDtypeStruct((1, n_pad), jnp.float32),
        grid_spec=pltpu.PrefetchScalarGridSpec(
            num_scalar_prefetch=0,
            grid=(n_blocks,),
            in_specs=[
                pl.BlockSpec((tile_n, IN_DIM), lambda i: (i, 0)),   # x tile (f32, ragged K)
                pl.BlockSpec((IN_DIM, H1), fixed),                  # W1 (bf16)
                pl.BlockSpec((1, H1), fixed),                       # b1 (f32)
                pl.BlockSpec((H1, H2), fixed),                      # W2 (bf16)
                pl.BlockSpec((1, H2), fixed),                       # b2 (f32)
                pl.BlockSpec((1, H2), fixed),                       # W3^T (bf16)
                pl.BlockSpec((1, OUT_DIM), fixed),                  # b3 (f32)
            ],
            out_specs=pl.BlockSpec((1, tile_n), lambda i: (0, i)),  # lane-dense out
        ),
        compiler_params=pltpu.CompilerParams(
            dimension_semantics=("parallel",),
            vmem_limit_bytes=32 * 1024 * 1024,   # headroom for TILE_N=512 on v5e
        ),
    )(x, w1_b, b1_2d, w2_b, b2_2d, w3t_b, b3_2d)

    return out_row.reshape(n_pad, OUT_DIM)[:n]


def init_params(key):
    """Deterministic PyTorch-style init: U(-1/sqrt(fan_in), 1/sqrt(fan_in))."""
    ks = jax.random.split(key, 6)

    def lin(kw, kb, fan_in, fan_out):
        bound = 1.0 / jnp.sqrt(jnp.float32(fan_in))
        w = jax.random.uniform(kw, (fan_in, fan_out), jnp.float32, -bound, bound)
        b = jax.random.uniform(kb, (fan_out,), jnp.float32, -bound, bound)
        return w, b

    w1, b1 = lin(ks[0], ks[1], IN_DIM, H1)
    w2, b2 = lin(ks[2], ks[3], H1, H2)
    w3, b3 = lin(ks[4], ks[5], H2, OUT_DIM)
    return (w1, b1, w2, b2, w3, b3)


def reference_forward(x, params):
    """Pure-JAX f32 reference matching the PyTorch module."""
    w1, b1, w2, b2, w3, b3 = params
    h1 = _leaky_relu(x @ w1 + b1)
    h2 = _leaky_relu(h1 @ w2 + b2)
    return jax.nn.sigmoid(h2 @ w3 + b3)


if __name__ == "__main__":
    key = jax.random.PRNGKey(0)
    k_params, k_x = jax.random.split(key)

    params = init_params(k_params)
    prepared = prepare_params(params)   # one-time, outside the hot path

    batch = 300  # not a tile multiple on purpose; exercises the ragged last block
    x = jax.random.normal(k_x, (batch, IN_DIM), jnp.float32)

    out = jax.block_until_ready(discriminator_forward(x, prepared))
    ref = reference_forward(x, params)

    assert out.shape == (batch, OUT_DIM)
    # bf16 matmul inputs with f32 accumulation (+ approx reciprocal) -> loosened
    # tolerance vs the f32 reference.
    assert jnp.allclose(out, ref, atol=2e-2, rtol=2e-2), "mismatch vs JAX reference"

    print("KERNEL_OK")
</pallas_src>

<mosaic_0001>
module attributes {stable_mosaic.version = 11 : i64} {
  func.func @discriminator_kernel(%arg0: i32, %arg1: memref<256x1433xf32, #tpu.memory_space<vmem>>, %arg2: memref<1433x512xbf16, #tpu.memory_space<vmem>>, %arg3: memref<1x512xf32, #tpu.memory_space<vmem>>, %arg4: memref<512x256xbf16, #tpu.memory_space<vmem>>, %arg5: memref<1x256xf32, #tpu.memory_space<vmem>>, %arg6: memref<1x256xbf16, #tpu.memory_space<vmem>>, %arg7: memref<1x1xf32, #tpu.memory_space<vmem>>, %arg8: memref<1x256xf32, #tpu.memory_space<vmem>>) attributes {dimension_semantics = [#tpu.dimension_semantics<parallel>], iteration_bounds = array<i64: 2>, scalar_prefetch = 0 : i64, scratch_operands = 0 : i64, tpu.core_type = #tpu.core_type<tc>, window_params = [{transform_indices = @transform_0, window_bounds = array<i64: 256, 1433>}, {pipeline_mode = #tpu.pipeline_mode<synchronous>, transform_indices = @transform_1, window_bounds = array<i64: 1433, 512>}, {pipeline_mode = #tpu.pipeline_mode<synchronous>, transform_indices = @transform_2, window_bounds = array<i64: 1, 512>}, {pipeline_mode = #tpu.pipeline_mode<synchronous>, transform_indices = @transform_3, window_bounds = array<i64: 512, 256>}, {pipeline_mode = #tpu.pipeline_mode<synchronous>, transform_indices = @transform_4, window_bounds = array<i64: 1, 256>}, {pipeline_mode = #tpu.pipeline_mode<synchronous>, transform_indices = @transform_5, window_bounds = array<i64: 1, 256>}, {pipeline_mode = #tpu.pipeline_mode<synchronous>, transform_indices = @transform_6, window_bounds = array<i64: 1, 1>}, {transform_indices = @transform_7, window_bounds = array<i64: 1, 256>}]} {
    %c0 = arith.constant 0 : index
    %c0_0 = arith.constant 0 : index
    %0 = vector.load %arg1[%c0, %c0_0] : memref<256x1433xf32, #tpu.memory_space<vmem>>, vector<256x1433xf32>
    %1 = arith.truncf %0 : vector<256x1433xf32> to vector<256x1433xbf16>
    %c0_1 = arith.constant 0 : index
    %c0_2 = arith.constant 0 : index
    %2 = vector.load %arg2[%c0_1, %c0_2] : memref<1433x512xbf16, #tpu.memory_space<vmem>>, vector<1433x512xbf16>
    %cst = arith.constant dense<0.000000e+00> : vector<256x512xf32>
    %3 = tpu.matmul %1, %2, %cst {dimension_numbers = #tpu.dot_dimension_numbers<[1], [0], [0], [1], [0, 0, 1, 1], [], []>} : vector<256x1433xbf16>, vector<1433x512xbf16>, vector<256x512xf32> -> vector<256x512xf32>
    %c0_3 = arith.constant 0 : index
    %c0_4 = arith.constant 0 : index
    %4 = vector.load %arg3[%c0_3, %c0_4] : memref<1x512xf32, #tpu.memory_space<vmem>>, vector<1x512xf32>
    %5 = vector.broadcast %4 : vector<1x512xf32> to vector<256x512xf32>
    %6 = arith.addf %3, %5 : vector<256x512xf32>
    %cst_5 = arith.constant 0.000000e+00 : f32
    %7 = vector.broadcast %cst_5 : f32 to vector<256x512xf32>
    %8 = arith.cmpf ogt, %6, %7 : vector<256x512xf32>
    %cst_6 = arith.constant 2.000000e-01 : f32
    %9 = vector.broadcast %cst_6 : f32 to vector<256x512xf32>
    %10 = arith.mulf %9, %6 : vector<256x512xf32>
    %11 = arith.select %8, %6, %10 : vector<256x512xi1>, vector<256x512xf32>
    %12 = arith.truncf %11 : vector<256x512xf32> to vector<256x512xbf16>
    %c0_7 = arith.constant 0 : index
    %c0_8 = arith.constant 0 : index
    %13 = vector.load %arg4[%c0_7, %c0_8] : memref<512x256xbf16, #tpu.memory_space<vmem>>, vector<512x256xbf16>
    %cst_9 = arith.constant dense<0.000000e+00> : vector<256x256xf32>
    %14 = tpu.matmul %12, %13, %cst_9 {dimension_numbers = #tpu.dot_dimension_numbers<[1], [0], [0], [1], [0, 0, 1, 1], [], []>} : vector<256x512xbf16>, vector<512x256xbf16>, vector<256x256xf32> -> vector<256x256xf32>
    %c0_10 = arith.constant 0 : index
    %c0_11 = arith.constant 0 : index
    %15 = vector.load %arg5[%c0_10, %c0_11] : memref<1x256xf32, #tpu.memory_space<vmem>>, vector<1x256xf32>
    %16 = vector.broadcast %15 : vector<1x256xf32> to vector<256x256xf32>
    %17 = arith.addf %14, %16 : vector<256x256xf32>
    %cst_12 = arith.constant 0.000000e+00 : f32
    %18 = vector.broadcast %cst_12 : f32 to vector<256x256xf32>
    %19 = arith.cmpf ogt, %17, %18 : vector<256x256xf32>
    %cst_13 = arith.constant 2.000000e-01 : f32
    %20 = vector.broadcast %cst_13 : f32 to vector<256x256xf32>
    %21 = arith.mulf %20, %17 : vector<256x256xf32>
    %22 = arith.select %19, %17, %21 : vector<256x256xi1>, vector<256x256xf32>
    %c0_14 = arith.constant 0 : index
    %c0_15 = arith.constant 0 : index
    %23 = vector.load %arg6[%c0_14, %c0_15] : memref<1x256xbf16, #tpu.memory_space<vmem>>, vector<1x256xbf16>
    %24 = arith.truncf %22 : vector<256x256xf32> to vector<256x256xbf16>
    %cst_16 = arith.constant dense<0.000000e+00> : vector<1x256xf32>
    %25 = tpu.matmul %23, %24, %cst_16 {dimension_numbers = #tpu.dot_dimension_numbers<[1], [1], [0], [0], [0, 0, 1, 0], [], []>} : vector<1x256xbf16>, vector<256x256xbf16>, vector<1x256xf32> -> vector<1x256xf32>
    %c0_17 = arith.constant 0 : index
    %c0_18 = arith.constant 0 : index
    %26 = vector.load %arg7[%c0_17, %c0_18] : memref<1x1xf32, #tpu.memory_space<vmem>>, vector<1x1xf32>
    %27 = vector.broadcast %26 : vector<1x1xf32> to vector<1x256xf32>
    %28 = arith.addf %25, %27 : vector<1x256xf32>
    %cst_19 = arith.constant 0.000000e+00 : f32
    %29 = vector.broadcast %cst_19 : f32 to vector<1x256xf32>
    %30 = arith.subf %29, %28 : vector<1x256xf32>
    %31 = math.exp %30 : vector<1x256xf32>
    %cst_20 = arith.constant 1.000000e+00 : f32
    %32 = vector.broadcast %cst_20 : f32 to vector<1x256xf32>
    %33 = arith.addf %32, %31 : vector<1x256xf32>
    %34 = tpu.reciprocal %33 {approx = true} : vector<1x256xf32> -> vector<1x256xf32>
    %c0_21 = arith.constant 0 : index
    %c0_22 = arith.constant 0 : index
    %35 = vector.load %arg8[%c0_21, %c0_22] : memref<1x256xf32, #tpu.memory_space<vmem>>, vector<1x256xf32>
    tpu.vector_store %arg8[%c0_21, %c0_22], %34 {strides = array<i32>} : memref<1x256xf32, #tpu.memory_space<vmem>>, vector<1x256xf32>,
    return
  }
  func.func @transform_0(%arg0: i32) -> (i32, i32) {
    %c0_i32 = arith.constant 0 : i32
    %c0_i32_0 = arith.constant 0 : i32
    return %arg0, %c0_i32 : i32, i32
  }
  func.func @transform_1(%arg0: i32) -> (i32, i32) {
    %c0_i32 = arith.constant 0 : i32
    %c0_i32_0 = arith.constant 0 : i32
    %c0_i32_1 = arith.constant 0 : i32
    return %c0_i32, %c0_i32_0 : i32, i32
  }
  func.func @transform_2(%arg0: i32) -> (i32, i32) {
    %c0_i32 = arith.constant 0 : i32
    %c0_i32_0 = arith.constant 0 : i32
    %c0_i32_1 = arith.constant 0 : i32
    return %c0_i32, %c0_i32_0 : i32, i32
  }
  func.func @transform_3(%arg0: i32) -> (i32, i32) {
    %c0_i32 = arith.constant 0 : i32
    %c0_i32_0 = arith.constant 0 : i32
    %c0_i32_1 = arith.constant 0 : i32
    return %c0_i32, %c0_i32_0 : i32, i32
  }
  func.func @transform_4(%arg0: i32) -> (i32, i32) {
    %c0_i32 = arith.constant 0 : i32
    %c0_i32_0 = arith.constant 0 : i32
    %c0_i32_1 = arith.constant 0 : i32
    return %c0_i32, %c0_i32_0 : i32, i32
  }
  func.func @transform_5(%arg0: i32) -> (i32, i32) {
    %c0_i32 = arith.constant 0 : i32
    %c0_i32_0 = arith.constant 0 : i32
    %c0_i32_1 = arith.constant 0 : i32
    return %c0_i32, %c0_i32_0 : i32, i32
  }
  func.func @transform_6(%arg0: i32) -> (i32, i32) {
    %c0_i32 = arith.constant 0 : i32
    %c0_i32_0 = arith.constant 0 : i32
    %c0_i32_1 = arith.constant 0 : i32
    return %c0_i32, %c0_i32_0 : i32, i32
  }
  func.func @transform_7(%arg0: i32) -> (i32, i32) {
    %c0_i32 = arith.constant 0 : i32
    %c0_i32_0 = arith.constant 0 : i32
    return %c0_i32, %arg0 : i32, i32
  }
}

</mosaic_0001>

<bundles_post_ra>
// kernel: discriminator_forward.1
= control target key start
LH: loop header
LB: loop body
LE: loop exit
PB: predicated region body
PF: predicated region fallthrough
CT: control target
= control target key end

     0   :  { %s11849_s0 = inlined_call_operand.hbm [shape: f32[300,1433], index: 0, kind: input, shape index: {}]   ;;  %s11850_s1 = inlined_call_operand.hbm [shape: bf16[1433,512], index: 1, kind: input, shape index: {}]   ;;  %s11851_s2 = inlined_call_operand.hbm [shape: f32[1,512], index: 2, kind: input, shape index: {}]   ;;  %s11852_s3 = inlined_call_operand.hbm [shape: bf16[512,256], index: 3, kind: input, shape index: {}]   ;;  %s11853_s4 = inlined_call_operand.hbm [shape: f32[1,256], index: 4, kind: input, shape index: {}]   ;;  %s11854_s5 = inlined_call_operand.hbm [shape: bf16[1,256], index: 5, kind: input, shape index: {}]   ;;  %s11855_s6 = inlined_call_operand.<no memory space> [shape: f32[1,1], index: 6, kind: input, shape index: {}]   ;;  %s11856_s7 = inlined_call_operand.vmem [shape: f32[1,512], index: 7, kind: output, shape index: {}]  }
   0x1   :  { %v12_v0 = vstv %s11855_s6 }
   0x2   :  { %13 = vst [vmem:[#allocation2] sm:$0x1] %v12_v0 }
   0x3   :  { %14 = vsyncpa [#allocation4], 0 }
   0x4   :  { %16 = vsyncpa [#allocation4 + $0x1], 0 }
   0x5   :  { %17 = vsyncpa [#allocation6], 0 }
   0x6   :  { %18 = vsyncpa [#allocation9], 0 }
   0x7   :  { %19 = vsyncpa [#allocation12], 0  ;;  %s8676_s26 = smov 0   ;;  %s8678_s27 = smov 0  }
   0x8   :  { %s8680_s28 = smov 0   ;;  %s8682_s29 = smov 0  }
   0x9 LB: > { %s7190_s6 = sadd.s32 4294967295, %s8616_s29   ;;  %s8696_s30 = sadd.s32 1, %s8616_s29   ;;  %s8616_s29 = sphi %s8682_s29, %s12948_s29   ;;  %s8612_s28 = sphi %s8680_s28, %s12947_s28   ;;  %s8608_s27 = sphi %s8678_s27, %s12946_s27   ;;  %s8604_s26 = sphi %s8676_s26, %s12945_s26  }
   0xa   : > { %s29_s8 = ssub.s32 %s8616_s29, %s8696_s30  ;;  %s32_s9 = sadd.s32 1, %s8612_s28 }
   0xb   : > { %p30_p0 = scmp.eq.s32.totalorder %s29_s8, 0  ;;  %p39_p1 = scmp.ne.s32.totalorder %s8612_s28, %s8608_s27 }
   0xc   : > { %p40_p2 = scmp.eq.s32.totalorder %s8616_s29, 0  ;;  %p45_p3 = scmp.ne.s32.totalorder %s8608_s27, %s8604_s26 }
   0xd   : > { %s8706_s10 = scalar_select %p30_p0, %s8612_s28, %s32_s9  }
   0xe   : > { %p8708_p4 = por %p40_p2, %p39_p1  ;;  %p8714_p5 = scmp.eq.s32.totalorder %s7190_s6, 0 }
   0xf   : > { %p7192_p6 = scmp.ge.s32.totalorder %s8616_s29, 1  ;;  %p208_p7 = scmp.lt.s32.totalorder %s8616_s29, 3 }
  0x10   : > { %s12137_s11 = scalar_select %p8708_p4, 1, 0 }
  0x11   : > { %s12138_s12 = scalar_select %p8714_p5, 1, 0 }
  0x12   : > { %p8722_p8 = por %p8714_p5, %p45_p3  ;;  %p8726_p9 = pnand %p7192_p6, %p208_p7 }
  0x13   : > { %s8618_s15 = smov [#allocation5]   ;;  %s8619_s18 = smov [#allocation8]  }
  0x14   : > { %s12139_s13 = scalar_select %p8722_p8, 1, 0 }
  0x15   : > { %s12140_s14 = scalar_select %p8726_p9, 1, 0 }
  0x16   : > { %s220_s16 = sshll.u32 %s8618_s15, 4  ;;  %p7696_p10 = pneg %p8726_p9  ;;  %s221_s16 = int_to_ptr.vmem [resolvable:$true] %s220_s16 }
  0x17   : > { %s244_s19 = sshll.u32 %s8619_s18, 4  ;;  %s8425_s21 = scalar_lea.vmem %s221_s16, 46080  ;;  %s245_s19 = int_to_ptr.vmem [resolvable:$true] %s244_s19 }
  0x18   : > { %p8734_p11 = pnand %p7696_p10, %p8714_p5  ;;  %p8426_p13 = scmp.ne.s32.totalorder %s221_s16, %s8425_s21 }
  0x19   : > { %p8433_p2 = scmp.lt.s32.totalorder %s221_s16, %s221_s16  ;;  %p8434_p3 = scmp.lt.s32.totalorder %s8425_s21, %s8425_s21 }
  0x1a   : > { %p8740_p12 = pneg %p8734_p11 }
  0x1b   : > { %p8435_p6 = por %p8434_p3, %p8433_p2 }
  0x1c   : > { %p8428_p0 = pnand %p8426_p13, %p8740_p12 }
  0x1e   : > { %p8429_p1 = pneg %p8428_p0 }
  0x20   : > { %p8436_p7 = pnand %p8435_p6, %p8429_p1 }
  0x22   : > { %8439 = shalt.err (!%p8436_p7)
}
  0x23   : > { %s8620_s22 = smov 256   ;;  %s8621_s23 = smov 16  }
  0x24   : > { %7699 = dma.hbm_to_vmem [thread:$0]  (!%p8734_p11), %s11850_s1, 46080, %s221_s16, [#allocation6], %s8620_s22, %s8620_s22, %s8621_s23  }
  0x25   : > { %s8451_s26 = scalar_lea.vmem %s245_s19, 8192  ;;  %p8459_p0 = scmp.lt.s32.totalorder %s245_s19, %s245_s19 }
  0x26   : > { %p8452_p10 = scmp.ne.s32.totalorder %s245_s19, %s8451_s26  ;;  %p8460_p8 = scmp.lt.s32.totalorder %s8451_s26, %s8451_s26 }
  0x28   : > { %p8454_p5 = pnand %p8452_p10, %p8740_p12  ;;  %p8461_p9 = por %p8460_p8, %p8459_p0 }
  0x2a   : > { %p8455_p13 = pneg %p8454_p5 }
  0x2c   : > { %p8462_p2 = pnand %p8461_p9, %p8455_p13 }
  0x2e   : > { %8465 = shalt.err (!%p8462_p2)
}
  0x2f   : > { %s8622_s8 = smov 128   ;;  %s8623_s9 = smov 8  }
  0x30   : > { %7705 = dma.hbm_to_vmem [thread:$0]  (!%p8734_p11), %s11852_s3, 8192, %s245_s19, [#allocation9], %s8622_s8, %s8622_s8, %s8623_s9  }
  0x31   : > { %s8624_s16 = smov [#allocation7]   ;;  %s8625_s22 = smov [#allocation10]  }
  0x32   : > { %s234_s21 = sshll.u32 %s8624_s16, 4  ;;  %s258_s23 = sshll.u32 %s8625_s22, 4  ;;  %s235_s21 = int_to_ptr.vmem [resolvable:$true] %s234_s21  ;;  %s259_s23 = int_to_ptr.vmem [resolvable:$true] %s258_s23 }
  0x33   : > { %s8477_s24 = scalar_lea.vmem %s235_s21, 64  ;;  %p8485_p1 = scmp.lt.s32.totalorder %s235_s21, %s235_s21 }
  0x34   : > { %p8478_p5 = scmp.ne.s32.totalorder %s235_s21, %s8477_s24  ;;  %p8486_p3 = scmp.lt.s32.totalorder %s8477_s24, %s8477_s24 }
  0x36   : > { %p8480_p8 = pnand %p8478_p5, %p8740_p12  ;;  %p8487_p6 = por %p8486_p3, %p8485_p1 }
  0x38   : > { %p8481_p9 = pneg %p8480_p8 }
  0x3a   : > { %p8488_p7 = pnand %p8487_p6, %p8481_p9 }
  0x3c   : > { %8491 = shalt.err (!%p8488_p7)
}
  0x3d   : > { %7702 = dma.hbm_to_vmem [thread:$0]  (!%p8734_p11), %s11851_s2, 64, %s235_s21, [#allocation6]  }
  0x3e   : > { %s8503_s26 = scalar_lea.vmem %s259_s23, 32  ;;  %p8511_p2 = scmp.lt.s32.totalorder %s259_s23, %s259_s23 }
  0x3f   : > { %p8504_p10 = scmp.ne.s32.totalorder %s259_s23, %s8503_s26  ;;  %p8512_p5 = scmp.lt.s32.totalorder %s8503_s26, %s8503_s26 }
  0x41   : > { %p8506_p13 = pnand %p8504_p10, %p8740_p12  ;;  %p8513_p8 = por %p8512_p5, %p8511_p2 }
  0x43   : > { %p8507_p0 = pneg %p8506_p13 }
  0x45   : > { %p8514_p4 = pnand %p8513_p8, %p8507_p0 }
  0x47   : > { %8517 = shalt.err (!%p8514_p4)
}
  0x48   : > { %7708 = dma.hbm_to_vmem [thread:$0]  (!%p8734_p11), %s11853_s4, 32, %s259_s23, [#allocation9]  }
  0x49   : > { %s8626_s15 = smov [#allocation11]  }
  0x4a   : > { %s269_s18 = sshll.u32 %s8626_s15, 4  ;;  %s270_s18 = int_to_ptr.vmem [resolvable:$true] %s269_s18 }
  0x4b   : > { %s8529_s16 = scalar_lea.vmem %s270_s18, 32  ;;  %p8537_p6 = scmp.lt.s32.totalorder %s270_s18, %s270_s18 }
  0x4c   : > { %p8530_p9 = scmp.ne.s32.totalorder %s270_s18, %s8529_s16  ;;  %p8538_p7 = scmp.lt.s32.totalorder %s8529_s16, %s8529_s16 }
  0x4e   : > { %p8532_p1 = pnand %p8530_p9, %p8740_p12  ;;  %p8539_p10 = por %p8538_p7, %p8537_p6 }
  0x50   : > { %p8533_p3 = pneg %p8532_p1 }
  0x52   : > { %p8540_p13 = pnand %p8539_p10, %p8533_p3 }
  0x54   : > { %8543 = shalt.err (!%p8540_p13)
}
  0x55   : > { %7711 = dma.hbm_to_vmem [thread:$0]  (!%p8734_p11), %s11854_s5, 32, %s270_s18, [#allocation12]  }
  0x56   : > { %p7198_p4 = scmp.ge.s32.totalorder %s8616_s29, 2 }
  0x57   : > { %p12143_p0 = scmp.ne.s32.totalorder (!%p7198_p4), %s12137_s11, 0 }
  0x58   : > { %279 = sbr.rel (%p7198_p4) target bundleno = 127 (0x7f), region = 40 }
  0x5d   : > { %282 = sbr.rel (!%p12143_p0) target bundleno = 127 (0x7f), region = 44  ;;  %s283_s20 = sand.u32 (%p12143_p0), 1, %s8612_s28  }
  0x5e   : > { %s7199_s23 = sshll.u32 (%p12143_p0), %s8616_s29, 5  ;;  %s7672_s24 = smul.u32 (%p12143_p0), 3072, %s283_s20 }
  0x5f   : > { %s289_s25 = ssub.s32 (%p12143_p0), 38, %s7199_s23  ;;  %s8787_s26 = scalar_lea.sflag (%p12143_p0), [#allocation4], %s283_s20 }
  0x60   : > { %p290_p12 = scmp.lt.s32.totalorder (%p12143_p0), %s289_s25, 32  ;;  %s287_s8 = scalar_lea.vmem (%p12143_p0), [#allocation3], %s7672_s24 }
  0x62   : > { %s12950_s25 = smov (!%p290_p12, %s289_s25), 32 }
  0x63   : > { %s8784_s19 = smul.u32 1536, %s12950_s25 }
  0x65   : > { %s295_s17 = ssub.s32 49152, %s8784_s19 }
  0x66   : > { %296 = vsyncadd %s8787_s26, %s295_s17  ;;  %p7202_p11 = scmp.ne.s32.totalorder %s8784_s19, 0  ;;  %s7673_s11 = smul.u32 49152, %s8616_s29 }
  0x67   : > { %s302_s9 = sshll.u32 %s287_s8, 4  ;;  %s8548_s23 = scalar_lea.hbm %s11849_s0, 58368  ;;  %s8797_s9 = int_to_ptr.vmem [resolvable:$true] %s302_s9 }
  0x68   : > { %s8795_s16 = scalar_lea.hbm %s11849_s0, %s7673_s11 }
  0x69   : > { %s8544_s21 = scalar_lea.hbm %s8795_s16, %s8784_s19  ;;  %p8549_p9 = scmp.lt.s32.totalorder %s8795_s16, %s11849_s0 }
  0x6a   : > { %p8545_p2 = scmp.ne.s32.totalorder %s8795_s16, %s8544_s21  ;;  %p8550_p1 = scmp.lt.s32.totalorder %s8548_s23, %s8544_s21 }
  0x6c   : > { %p8546_p5 = pnand %p8545_p2, %p7202_p11  ;;  %p8551_p3 = por %p8550_p1, %p8549_p9 }
  0x6e   : > { %p8547_p8 = pneg %p8546_p5 }
  0x70   : > { %p8552_p6 = pnand %p8551_p3, %p8547_p8 }
  0x72   : > { %8555 = shalt.err (!%p8552_p6)
}
  0x73   : > { %s8556_s17 = scalar_lea.vmem %s8797_s9, %s8784_s19  ;;  %s8627_s8 = smov [#allocation3]  }
  0x74   : > { %p8557_p7 = scmp.ne.s32.totalorder %s8797_s9, %s8556_s17  ;;  %s8560_s11 = sshll.u32 %s8627_s8, 4  ;;  %s8561_s11 = int_to_ptr.vmem [resolvable:$false] %s8560_s11 }
  0x75   : > { %s8562_s15 = scalar_lea.vmem %s8561_s11, 98304  ;;  %p8563_p4 = scmp.lt.s32.totalorder %s8797_s9, %s8561_s11 }
  0x76   : > { %p8558_p10 = pnand %p8557_p7, %p7202_p11  ;;  %p8564_p0 = scmp.lt.s32.totalorder %s8562_s15, %s8556_s17 }
  0x78   : > { %p8559_p13 = pneg %p8558_p10  ;;  %p8565_p12 = por %p8564_p0, %p8563_p4 }
  0x7a   : > { %p8566_p2 = pnand %p8565_p12, %p8559_p13 }
  0x7c   : > { %8569 = shalt.err (!%p8566_p2)
}
  0x7d   : > { %s8628_s18 = smov 1536   ;;  %s8629_s21 = smov 96  }
  0x7e   : > { %308 = dma.hbm_to_vmem [thread:$0]  (%p7202_p11), %s8795_s16, %s8784_s19, %s8797_s9, %s8787_s26, %s8628_s18, %s8628_s18, %s8629_s21  }
  0x7f PF: > { %p12144_p5 = scmp.ne.s32.totalorder %s12140_s14, 0 }
  0x81   : > { %314 = sbr.rel (%p12144_p5) target bundleno = 1692 (0x69c), region = 48 }
  0x86   : > { %s316_s22 = sand.u32 1, %s8608_s27   ;;  %p12145_p8 = scmp.ne.s32.totalorder %s12139_s13, 0 }
  0x87   : > { %s7674_s20 = smul.u32 3072, %s316_s22  ;;  %s317_s23 = scalar_lea.sflag [#allocation4], %s316_s22 }
  0x89   : > { %s8826_s24 = scalar_lea.vmem [#allocation3], %s7674_s20 }
  0x8a   : > { %8587 = dma.done.wait (%p12145_p8), %s317_s23, 49152  }
  0x8b   : > { %8589 = vsyncadd (%p12145_p8), %s317_s23, 4294918144  ;;  %p12146_p9 = scmp.ne.s32.totalorder %s12138_s12, 0 }
  0x8d   : > { %8591 = dma.done.wait (%p12146_p9), [#allocation6], 46144  }
  0x8e   : > { %8593 = vsyncadd (%p12146_p9), [#allocation6], 4294921152 }
  0x8f   : > { %8595 = dma.done.wait (%p12146_p9), [#allocation9], 8224  }
  0x90   : > { %8597 = vsyncadd (%p12146_p9), [#allocation9], 4294959072 }
  0x91   : > { %8599 = dma.done.wait (%p12146_p9), [#allocation12], 32  }
  0x92   : > { %8601 = vsyncadd (%p12146_p9), [#allocation12], 4294967264  ;;  %v7769_v1 = vld [vmem:[#allocation5 + $0xe4] ss:$16 sps:$4 sm:$0xff]   ;;  %v7773_v3 = vld [vmem:[#allocation5 + $0xe0] ss:$16 sps:$4 sm:$0xff]  }
  0x93   : > { %v7771_v2 = vld [vmem:[#allocation5 + $0x2e4] ss:$16 sps:$4 sm:$0xff]   ;;  %3201 = vmatprep.subr.bf16.mxu0 %v7769_v1  ;;  %v7774_v4 = vld [vmem:[#allocation5 + $0x2e0] ss:$16 sps:$4 sm:$0xff]   ;;  %v383_v47 = vld [vmem:[%s8826_s24 + $0x8] sm:$0xff]  ;;  %vm3185_vm0 = vcmask 1043456  }
  0x94   : > { %3394 = vmatprep.subr.bf16.mxu1 %v7771_v2  ;;  %v7775_v5 = vld [vmem:[#allocation5 + $0xc4] ss:$16 sps:$4 sm:$0xff]   ;;  %3202 = vmatpush1.bf16.msra.mxu0 %v7773_v3  ;;  %v7779_v7 = vld [vmem:[#allocation5 + $0xc0] ss:$16 sps:$4 sm:$0xff]   ;;  %v395_v48 = vld [vmem:[%s8826_s24 + $0x68] sm:$0xff]  ;;  %vm3186_vm1 = vcmask 1044480  }
  0x95   : > { %3395 = vmatpush1.bf16.msra.mxu1 %v7774_v4  ;;  %v7777_v6 = vld [vmem:[#allocation5 + $0x2c4] ss:$16 sps:$4 sm:$0xff]   ;;  %3203 = vmatprep.subr.bf16.mxu0 %v7775_v5  ;;  %v7780_v8 = vld [vmem:[#allocation5 + $0x2c0] ss:$16 sps:$4 sm:$0xff]   ;;  %v385_v49 = vld [vmem:[%s8826_s24 + $0x18] sm:$0xff]  ;;  %v8848_v54 = vpack.c.bf16 %v395_v48, %v383_v47  ;;  %vm3136_vm2 = vcmask 203776  }
  0x96   : > { %3396 = vmatprep.subr.bf16.mxu1 %v7777_v6  ;;  %v7781_v9 = vld [vmem:[#allocation5 + $0xa4] ss:$16 sps:$4 sm:$0xff]   ;;  %v7785_v11 = vld [vmem:[#allocation5 + $0xa0] ss:$16 sps:$4 sm:$0xff]   ;;  %v397_v50 = vld [vmem:[%s8826_s24 + $0x78] sm:$0xff]  ;;  %s7212_s12 = sshll.u32 %s7190_s6, 1 }
  0x97   : > { %v7783_v10 = vld [vmem:[#allocation5 + $0x2a4] ss:$16 sps:$4 sm:$0xff]   ;;  %v7786_v12 = vld [vmem:[#allocation5 + $0x2a0] ss:$16 sps:$4 sm:$0xff]   ;;  %v8850_v55 = vpack.c.bf16 %v397_v50, %v385_v49  ;;  %3233 = vmatprep.mubr.bf16.mxu0 %v8848_v54  ;;  %v455_v49 = vld [vmem:[%s8826_s24 + $0x248] sm:$0xff]  ;;  %p377_p11 = scmp.lt.s32.totalorder %s7212_s12, 3 }
  0x98   : > { %3204 = vmatpush1.bf16.msra.mxu0 %v7779_v7  ;;  %v7787_v13 = vld [vmem:[#allocation5 + $0x84] ss:$16 sps:$4 sm:$0xff]   ;;  %v7791_v15 = vld [vmem:[#allocation5 + $0x80] ss:$16 sps:$4 sm:$0xff]   ;;  %v467_v50 = vld [vmem:[%s8826_s24 + $0x2a8] sm:$0xff] }
  0x99   : > { %3397 = vmatpush1.bf16.msra.mxu1 %v7780_v8  ;;  %3205 = vmatprep.subr.bf16.mxu0 %v7781_v9  ;;  %v7789_v14 = vld [vmem:[#allocation5 + $0x284] ss:$16 sps:$4 sm:$0xff]   ;;  %v7792_v16 = vld [vmem:[#allocation5 + $0x280] ss:$16 sps:$4 sm:$0xff]   ;;  %s12952_s12 = smov (!%p377_p11, %s7212_s12), 3 }
  0x9a   : > { %3398 = vmatprep.subr.bf16.mxu1 %v7783_v10  ;;  %v7793_v17 = vld [vmem:[#allocation5 + $0x64] ss:$16 sps:$4 sm:$0xff]   ;;  %v7797_v19 = vld [vmem:[#allocation5 + $0x60] ss:$16 sps:$4 sm:$0xff]   ;;  %3426 = vmatprep.mubr.bf16.mxu1 %v8850_v55  ;;  %s379_s19 = scalar_lea.vmem %s11856_s7, %s12952_s12 }
  0x9b   : > { %v7795_v18 = vld [vmem:[#allocation5 + $0x264] ss:$16 sps:$4 sm:$0xff]   ;;  %v7798_v20 = vld [vmem:[#allocation5 + $0x260] ss:$16 sps:$4 sm:$0xff]  }
  0x9c   : > { %3206 = vmatpush1.bf16.msra.mxu0 %v7785_v11  ;;  %v7799_v21 = vld [vmem:[#allocation5 + $0x44] ss:$16 sps:$4 sm:$0xff]   ;;  %v7803_v23 = vld [vmem:[#allocation5 + $0x40] ss:$16 sps:$4 sm:$0xff]  }
  0x9d   : > { %3399 = vmatpush1.bf16.msra.mxu1 %v7786_v12  ;;  %3207 = vmatprep.subr.bf16.mxu0 %v7787_v13  ;;  %v7801_v22 = vld [vmem:[#allocation5 + $0x244] ss:$16 sps:$4 sm:$0xff]   ;;  %v7804_v24 = vld [vmem:[#allocation5 + $0x240] ss:$16 sps:$4 sm:$0xff]   ;;  %v407_v13 = vld [vmem:[%s8826_s24 + $0xc8] sm:$0xff] }
  0x9e   : > { %3400 = vmatprep.subr.bf16.mxu1 %v7789_v14  ;;  %v7805_v25 = vld [vmem:[#allocation5 + $0x24] ss:$16 sps:$4 sm:$0xff]   ;;  %v7809_v27 = vld [vmem:[#allocation5 + $0x20] ss:$16 sps:$4 sm:$0xff]   ;;  %v419_v14 = vld [vmem:[%s8826_s24 + $0x128] sm:$0xff] }
  0x9f   : > { %v7807_v26 = vld [vmem:[#allocation5 + $0x224] ss:$16 sps:$4 sm:$0xff]   ;;  %v7810_v28 = vld [vmem:[#allocation5 + $0x220] ss:$16 sps:$4 sm:$0xff]  }
  0xa0   : > { %3208 = vmatpush1.bf16.msra.mxu0 %v7791_v15  ;;  %v7811_v29 = vld [vmem:[#allocation5 + $0x4] ss:$16 sps:$4 sm:$0xff]   ;;  %v7815_v31 = vld [vmem:[#allocation5] ss:$16 sps:$4 sm:$0xff]   ;;  %v409_v15 = vld [vmem:[%s8826_s24 + $0xd8] sm:$0xff] }
  0xa1   : > { %3401 = vmatpush1.bf16.msra.mxu1 %v7792_v16  ;;  %3209 = vmatprep.subr.bf16.mxu0 %v7793_v17  ;;  %v7813_v30 = vld [vmem:[#allocation5 + $0x204] ss:$16 sps:$4 sm:$0xff]   ;;  %v7816_v32 = vld [vmem:[#allocation5 + $0x200] ss:$16 sps:$4 sm:$0xff]   ;;  %v421_v16 = vld [vmem:[%s8826_s24 + $0x138] sm:$0xff] }
  0xa2   : > { %3402 = vmatprep.subr.bf16.mxu1 %v7795_v18  ;;  %v7817_v33 = vld [vmem:[#allocation5 + $0x1e4] ss:$16 sps:$4 sm:$0xff]   ;;  %v7821_v35 = vld [vmem:[#allocation5 + $0x1e0] ss:$16 sps:$4 sm:$0xff]  }
  0xa3   : > { %v7819_v34 = vld [vmem:[#allocation5 + $0x3e4] ss:$16 sps:$4 sm:$0xff]   ;;  %v7822_v36 = vld [vmem:[#allocation5 + $0x3e0] ss:$16 sps:$4 sm:$0xff]  }
  0xa4   : > { %3210 = vmatpush1.bf16.msra.mxu0 %v7797_v19  ;;  %v7823_v37 = vld [vmem:[#allocation5 + $0x1c4] ss:$16 sps:$4 sm:$0xff]   ;;  %v7827_v39 = vld [vmem:[#allocation5 + $0x1c0] ss:$16 sps:$4 sm:$0xff]  }
  0xa5   : > { %3403 = vmatpush1.bf16.msra.mxu1 %v7798_v20  ;;  %3211 = vmatprep.subr.bf16.mxu0 %v7799_v21  ;;  %v7825_v38 = vld [vmem:[#allocation5 + $0x3c4] ss:$16 sps:$4 sm:$0xff]   ;;  %v7828_v40 = vld [vmem:[#allocation5 + $0x3c0] ss:$16 sps:$4 sm:$0xff]   ;;  %v8866_v21 = vpack.c.bf16 %v419_v14, %v407_v13 }
  0xa6   : > { %3404 = vmatprep.subr.bf16.mxu1 %v7801_v22  ;;  %v7829_v41 = vld [vmem:[#allocation5 + $0x1a4] ss:$16 sps:$4 sm:$0xff]   ;;  %v7833_v43 = vld [vmem:[#allocation5 + $0x1a0] ss:$16 sps:$4 sm:$0xff]   ;;  %v8868_v22 = vpack.c.bf16 %v421_v16, %v409_v15 }
  0xa7   : > { %v7831_v42 = vld [vmem:[#allocation5 + $0x3a4] ss:$16 sps:$4 sm:$0xff]   ;;  %v7834_v44 = vld [vmem:[#allocation5 + $0x3a0] ss:$16 sps:$4 sm:$0xff]   ;;  %12149 = vst [vmem:[#allocation19_spill] sm:$0xff] %v8866_v21 }
  0xa8   : > { %3212 = vmatpush1.bf16.msra.mxu0 %v7803_v23  ;;  %v7835_v45 = vld [vmem:[#allocation5 + $0x184] ss:$16 sps:$4 sm:$0xff]   ;;  %v7839_v51 = vld [vmem:[#allocation5 + $0x180] ss:$16 sps:$4 sm:$0xff]   ;;  %12150 = vst [vmem:[#allocation20_spill] sm:$0xff] %v8868_v22 }
  0xa9   : > { %3405 = vmatpush1.bf16.msra.mxu1 %v7804_v24  ;;  %3213 = vmatprep.subr.bf16.mxu0 %v7805_v25  ;;  %v7837_v46 = vld [vmem:[#allocation5 + $0x384] ss:$16 sps:$4 sm:$0xff]   ;;  %v7840_v52 = vld [vmem:[#allocation5 + $0x380] ss:$16 sps:$4 sm:$0xff]  }
  0xaa   : > { %3406 = vmatprep.subr.bf16.mxu1 %v7807_v26  ;;  %v7841_v53 = vld [vmem:[#allocation5 + $0x164] ss:$16 sps:$4 sm:$0xff]   ;;  %v7845_v57 = vld [vmem:[#allocation5 + $0x160] ss:$16 sps:$4 sm:$0xff]  }
  0xab   : > { %v7843_v56 = vld [vmem:[#allocation5 + $0x364] ss:$16 sps:$4 sm:$0xff]   ;;  %v7846_v58 = vld [vmem:[#allocation5 + $0x360] ss:$16 sps:$4 sm:$0xff]  }
  0xac   : > { %3214 = vmatpush1.bf16.msra.mxu0 %v7809_v27  ;;  %v7847_v59 = vld [vmem:[#allocation5 + $0x144] ss:$16 sps:$4 sm:$0xff]   ;;  %v7851_v61 = vld [vmem:[#allocation5 + $0x140] ss:$16 sps:$4 sm:$0xff]  }
  0xad   : > { %3407 = vmatpush1.bf16.msra.mxu1 %v7810_v28  ;;  %3215 = vmatprep.subr.bf16.mxu0 %v7811_v29  ;;  %v7849_v60 = vld [vmem:[#allocation5 + $0x344] ss:$16 sps:$4 sm:$0xff]   ;;  %v7852_v62 = vld [vmem:[#allocation5 + $0x340] ss:$16 sps:$4 sm:$0xff]  }
  0xae   : > { %3408 = vmatprep.subr.bf16.mxu1 %v7813_v30  ;;  %v7853_v63 = vld [vmem:[#allocation5 + $0x124] ss:$16 sps:$4 sm:$0xff]   ;;  %v7857_v1 = vld [vmem:[#allocation5 + $0x120] ss:$16 sps:$4 sm:$0xff]  }
  0xaf   : > { %v7855_v0 = vld [vmem:[#allocation5 + $0x324] ss:$16 sps:$4 sm:$0xff]   ;;  %v7858_v2 = vld [vmem:[#allocation5 + $0x320] ss:$16 sps:$4 sm:$0xff]  }
  0xb0   : > { %3216 = vmatpush1.bf16.msra.mxu0 %v7815_v31  ;;  %v7859_v3 = vld [vmem:[#allocation5 + $0x104] ss:$16 sps:$4 sm:$0xff]   ;;  %v7863_v5 = vld [vmem:[#allocation5 + $0x100] ss:$16 sps:$4 sm:$0xff]   ;;  %v431_v31 = vld [vmem:[%s8826_s24 + $0x188] sm:$0xff] }
  0xb1   : > { %3409 = vmatpush1.bf16.msra.mxu1 %v7816_v32  ;;  %3217 = vmatprep.subr.bf16.mxu0 %v7817_v33  ;;  %v7861_v4 = vld [vmem:[#allocation5 + $0x304] ss:$16 sps:$4 sm:$0xff]   ;;  %v7864_v6 = vld [vmem:[#allocation5 + $0x300] ss:$16 sps:$4 sm:$0xff]   ;;  %v443_v32 = vld [vmem:[%s8826_s24 + $0x1e8] sm:$0xff] }
  0xb2   : > { %3410 = vmatprep.subr.bf16.mxu1 %v7819_v34  ;;  %v382_v7 = vld [vmem:[%s8826_s24] sm:$0xff]  ;;  %v384_v9 = vld [vmem:[%s8826_s24 + $0x10] sm:$0xff]  ;;  %v433_v33 = vld [vmem:[%s8826_s24 + $0x198] sm:$0xff] }
  0xb3   : > { %v394_v8 = vld [vmem:[%s8826_s24 + $0x60] sm:$0xff]  ;;  %v396_v10 = vld [vmem:[%s8826_s24 + $0x70] sm:$0xff]  ;;  %v445_v34 = vld [vmem:[%s8826_s24 + $0x1f8] sm:$0xff] }
  0xb4   : > { %3218 = vmatpush2.bf16.msra.mxu0 %v7821_v35  ;;  %v7867_v11 = vld [vmem:[#allocation5 + $0x4e4] ss:$16 sps:$4 sm:$0xff]   ;;  %v8862_v17 = vpack.c.bf16 %v394_v8, %v382_v7  ;;  %v8864_v18 = vpack.c.bf16 %v396_v10, %v384_v9  ;;  %v7865_v19 = vld [vmem:[#allocation5 + $0x4e0] ss:$16 sps:$4 sm:$0xff]   ;;  %v479_v7 = vld [vmem:[%s8826_s24 + $0x308] sm:$0xff] }
  0xb5   : > { %3411 = vmatpush2.bf16.msra.mxu1 %v7822_v36  ;;  %3219 = vmatprep.subr.bf16.mxu0 %v7823_v37  ;;  %v7870_v12 = vld [vmem:[#allocation5 + $0x6e4] ss:$16 sps:$4 sm:$0xff]   ;;  %v7868_v20 = vld [vmem:[#allocation5 + $0x6e0] ss:$16 sps:$4 sm:$0xff]   ;;  %v491_v8 = vld [vmem:[%s8826_s24 + $0x368] sm:$0xff] }
  0xb6   : > { %3412 = vmatprep.subr.bf16.mxu1 %v7825_v38  ;;  %12147 = vst [vmem:[#allocation17_spill] sm:$0xff] %v8862_v17  ;;  %12148 = vst [vmem:[#allocation18_spill] sm:$0xff] %v8864_v18  ;;  %v7873_v23 = vld [vmem:[#allocation5 + $0x4c4] ss:$16 sps:$4 sm:$0xff]   ;;  %v7871_v28 = vld [vmem:[#allocation5 + $0x4c0] ss:$16 sps:$4 sm:$0xff]  }
  0xb7   : > { %v406_v24 = vld [vmem:[%s8826_s24 + $0xc0] sm:$0xff]  ;;  %v408_v26 = vld [vmem:[%s8826_s24 + $0xd0] sm:$0xff]  ;;  %v481_v9 = vld [vmem:[%s8826_s24 + $0x318] sm:$0xff] }
  0xb8   : > { %3220 = vmatpush2.bf16.msra.mxu0 %v7827_v39  ;;  %v418_v25 = vld [vmem:[%s8826_s24 + $0x120] sm:$0xff]  ;;  %v420_v27 = vld [vmem:[%s8826_s24 + $0x130] sm:$0xff]  ;;  %v8886_v39 = vpack.c.bf16 %v443_v32, %v431_v31  ;;  %v493_v10 = vld [vmem:[%s8826_s24 + $0x378] sm:$0xff] }
  0xb9   : > { %3413 = vmatpush2.bf16.msra.mxu1 %v7828_v40  ;;  %3221 = vmatprep.subr.bf16.mxu0 %v7829_v41  ;;  %v7874_v29 = vld [vmem:[#allocation5 + $0x6c0] ss:$16 sps:$4 sm:$0xff]   ;;  %v7876_v30 = vld [vmem:[#allocation5 + $0x6c4] ss:$16 sps:$4 sm:$0xff]   ;;  %v8882_v37 = vpack.c.bf16 %v418_v25, %v406_v24  ;;  %v8884_v38 = vpack.c.bf16 %v420_v27, %v408_v26  ;;  %v8888_v40 = vpack.c.bf16 %v445_v34, %v433_v33  ;;  %v503_v31 = vld [vmem:[%s8826_s24 + $0x3c8] sm:$0xff] }
  0xba   : > { %3414 = vmatprep.subr.bf16.mxu1 %v7831_v42  ;;  %v7879_v35 = vld [vmem:[#allocation5 + $0x4a4] ss:$16 sps:$4 sm:$0xff]   ;;  %12153 = vst [vmem:[#allocation23_spill] sm:$0xff] %v8886_v39  ;;  %v7877_v41 = vld [vmem:[#allocation5 + $0x4a0] ss:$16 sps:$4 sm:$0xff]   ;;  %v515_v32 = vld [vmem:[%s8826_s24 + $0x428] sm:$0xff] }
  0xbb   : > { %v7882_v36 = vld [vmem:[#allocation5 + $0x6a4] ss:$16 sps:$4 sm:$0xff]   ;;  %12151 = vst [vmem:[#allocation21_spill] sm:$0xff] %v8882_v37  ;;  %12152 = vst [vmem:[#allocation22_spill] sm:$0xff] %v8884_v38  ;;  %v7880_v42 = vld [vmem:[#allocation5 + $0x6a0] ss:$16 sps:$4 sm:$0xff]  }
  0xbc   : > { %3222 = vmatpush2.bf16.msra.mxu0 %v7833_v43  ;;  %12154 = vst [vmem:[#allocation24_spill] sm:$0xff] %v8888_v40  ;;  %v430_v43 = vld [vmem:[%s8826_s24 + $0x180] sm:$0xff]  ;;  %v444_v48 = vld [vmem:[%s8826_s24 + $0x1f0] sm:$0xff]  ;;  %v505_v33 = vld [vmem:[%s8826_s24 + $0x3d8] sm:$0xff] }
  0xbd   : > { %3415 = vmatpush2.bf16.msra.mxu1 %v7834_v44  ;;  %3223 = vmatprep.subr.bf16.mxu0 %v7835_v45  ;;  %v442_v44 = vld [vmem:[%s8826_s24 + $0x1e0] sm:$0xff]  ;;  %v432_v45 = vld [vmem:[%s8826_s24 + $0x190] sm:$0xff]  ;;  %v517_v34 = vld [vmem:[%s8826_s24 + $0x438] sm:$0xff] }
  0xbe   : > { %3416 = vmatprep.subr.bf16.mxu1 %v7837_v46  ;;  %v7885_v46 = vld [vmem:[#allocation5 + $0x484] ss:$16 sps:$4 sm:$0xff]   ;;  %v7904_v24 = vld [vmem:[#allocation5 + $0x620] ss:$16 sps:$4 sm:$0xff]  }
  0xbf   : > { %v7888_v47 = vld [vmem:[#allocation5 + $0x684] ss:$16 sps:$4 sm:$0xff]  }
  0xc0   : > { %3224 = vmatpush2.bf16.msra.mxu0 %v7839_v51  ;;  %v457_v51 = vld [vmem:[%s8826_s24 + $0x258] sm:$0xff]  ;;  %v7903_v13 = vld [vmem:[#allocation5 + $0x424] ss:$16 sps:$4 sm:$0xff]  }
  0xc1   : > { %3417 = vmatpush2.bf16.msra.mxu1 %v7840_v52  ;;  %3225 = vmatprep.subr.bf16.mxu0 %v7841_v53  ;;  %v469_v52 = vld [vmem:[%s8826_s24 + $0x2b8] sm:$0xff]  ;;  %v7883_v53 = vld [vmem:[#allocation5 + $0x480] ss:$16 sps:$4 sm:$0xff]   ;;  %v7906_v14 = vld [vmem:[#allocation5 + $0x624] ss:$16 sps:$4 sm:$0xff]  }
  0xc2   : > { %3418 = vmatprep.subr.bf16.mxu1 %v7843_v56  ;;  %v7886_v56 = vld [vmem:[#allocation5 + $0x680] ss:$16 sps:$4 sm:$0xff]  }
  0xc3   : > { %v478_v25 = vld [vmem:[%s8826_s24 + $0x300] sm:$0xff]  ;;  %v480_v27 = vld [vmem:[%s8826_s24 + $0x310] sm:$0xff] }
  0xc4   : > { %3226 = vmatpush2.bf16.msra.mxu0 %v7845_v57  ;;  %v7891_v57 = vld [vmem:[#allocation5 + $0x464] ss:$16 sps:$4 sm:$0xff]  }
  0xc5   : > { %3419 = vmatpush2.bf16.msra.mxu1 %v7846_v58  ;;  %3227 = vmatprep.subr.bf16.mxu0 %v7847_v59  ;;  %v7894_v58 = vld [vmem:[#allocation5 + $0x664] ss:$16 sps:$4 sm:$0xff]   ;;  %v8902_v59 = vpack.c.bf16 %v442_v44, %v430_v43 }
  0xc6   : > { %3420 = vmatprep.subr.bf16.mxu1 %v7849_v60  ;;  %v8904_v60 = vpack.c.bf16 %v444_v48, %v432_v45  ;;  %v490_v26 = vld [vmem:[%s8826_s24 + $0x360] sm:$0xff]  ;;  %v8946_v45 = vpack.c.bf16 %v515_v32, %v503_v31 }
  0xc7   : > { %12155 = vst [vmem:[#allocation25_spill] sm:$0xff] %v8902_v59  ;;  %v8942_v43 = vpack.c.bf16 %v490_v26, %v478_v25  ;;  %v7916_v48 = vld [vmem:[#allocation5 + $0x7e0] ss:$16 sps:$4 sm:$0xff]   ;;  %v551_v25 = vld [vmem:[%s8826_s24 + $0x548] sm:$0xff]  ;;  %v7939_v31 = vld [vmem:[#allocation5 + $0x564] ss:$16 sps:$4 sm:$0xff]  }
  0xc8   : > { %3228 = vmatpush2.bf16.msra.mxu0 %v7851_v61  ;;  %12156 = vst [vmem:[#allocation26_spill] sm:$0xff] %v8904_v60  ;;  %v8906_v61 = vpack.c.bf16 %v467_v50, %v455_v49  ;;  %12165 = vst [vmem:[#allocation35_spill] sm:$0xff] %v8946_v45  ;;  %v502_v49 = vld [vmem:[%s8826_s24 + $0x3c0] sm:$0xff]  ;;  %v563_v26 = vld [vmem:[%s8826_s24 + $0x5a8] sm:$0xff] }
  0xc9   : > { %3421 = vmatpush2.bf16.msra.mxu1 %v7852_v62  ;;  %3229 = vmatprep.subr.bf16.mxu0 %v7853_v63  ;;  %v8908_v62 = vpack.c.bf16 %v469_v52, %v457_v51  ;;  %v7889_v63 = vld [vmem:[#allocation5 + $0x460] ss:$16 sps:$4 sm:$0xff]   ;;  %12163 = vst [vmem:[#allocation33_spill] sm:$0xff] %v8942_v43 }
  0xca   : > { %3422 = vmatprep.subr.bf16.mxu1 %v7855_v0  ;;  %12157 = vst [vmem:[#allocation27_spill] sm:$0xff] %v8906_v61  ;;  %v7892_v0 = vld [vmem:[#allocation5 + $0x660] ss:$16 sps:$4 sm:$0xff]  }
  0xcb   : > { %12158 = vst [vmem:[#allocation28_spill] sm:$0xff] %v8908_v62  ;;  %v514_v50 = vld [vmem:[%s8826_s24 + $0x420] sm:$0xff]  ;;  %v504_v51 = vld [vmem:[%s8826_s24 + $0x3d0] sm:$0xff] }
  0xcc   : > { %3230 = vmatpush2.bf16.msra.mxu0 %v7857_v1  ;;  %v454_v1 = vld [vmem:[%s8826_s24 + $0x240] sm:$0xff]  ;;  %v516_v52 = vld [vmem:[%s8826_s24 + $0x430] sm:$0xff] }
  0xcd   : > { %3423 = vmatpush2.bf16.msra.mxu1 %v7858_v2  ;;  %3231 = vmatprep.subr.bf16.mxu0 %v7859_v3  ;;  %v466_v2 = vld [vmem:[%s8826_s24 + $0x2a0] sm:$0xff]  ;;  %v456_v3 = vld [vmem:[%s8826_s24 + $0x250] sm:$0xff] }
  0xce   : > { %3424 = vmatprep.subr.bf16.mxu1 %v7861_v4  ;;  %v468_v4 = vld [vmem:[%s8826_s24 + $0x2b0] sm:$0xff]  ;;  %v8922_v15 = vpack.c.bf16 %v466_v2, %v454_v1 }
  0xcf   : > { %v8924_v16 = vpack.c.bf16 %v468_v4, %v456_v3  ;;  %v7919_v1 = vld [vmem:[#allocation5 + $0x5c0] ss:$16 sps:$4 sm:$0xff]   ;;  %v7927_v3 = vld [vmem:[#allocation5 + $0x5a4] ss:$16 sps:$4 sm:$0xff]  }
  0xd0   : > { %3232 = vmatpush2.bf16.msra.mxu0 %v7863_v5  ;;  %v7897_v5 = vld [vmem:[#allocation5 + $0x444] ss:$16 sps:$4 sm:$0xff]   ;;  %12159 = vst [vmem:[#allocation29_spill] sm:$0xff] %v8922_v15  ;;  %v7922_v2 = vld [vmem:[#allocation5 + $0x7c0] ss:$16 sps:$4 sm:$0xff]  }
  0xd1   : > { %3425 = vmatpush2.bf16.msra.mxu1 %v7864_v6  ;;  %3587 = vmatprep.subr.bf16.mxu0 %v7867_v11  ;;  %v7900_v6 = vld [vmem:[#allocation5 + $0x644] ss:$16 sps:$4 sm:$0xff]   ;;  %v7895_v11 = vld [vmem:[#allocation5 + $0x440] ss:$16 sps:$4 sm:$0xff]   ;;  %12160 = vst [vmem:[#allocation30_spill] sm:$0xff] %v8924_v16 }
  0xd2   : > { %3780 = vmatprep.subr.bf16.mxu1 %v7870_v12  ;;  %v7898_v12 = vld [vmem:[#allocation5 + $0x640] ss:$16 sps:$4 sm:$0xff]   ;;  %v7930_v4 = vld [vmem:[#allocation5 + $0x7a4] ss:$16 sps:$4 sm:$0xff]  }
  0xd3   : > { %3234 = vmatmul.mubr.bf16.vlgmr.msra.gmra.mxu0 %v8862_v17 }
  0xd4   : > { %3427 = vmatmul.mubr.bf16.vlgmr.msra.gmra.mxu1 %v8864_v18  ;;  %3588 = vmatpush1.bf16.msra.mxu0 %v7865_v19  ;;  %v8926_v19 = vpack.c.bf16 %v491_v8, %v479_v7 }
  0xd5   : > { %3781 = vmatpush1.bf16.msra.mxu1 %v7868_v20  ;;  %3243 = vmatprep.mubr.bf16.mxu0 %v8866_v21  ;;  %v8928_v20 = vpack.c.bf16 %v493_v10, %v481_v9  ;;  %v7925_v9 = vld [vmem:[#allocation5 + $0x5a0] ss:$16 sps:$4 sm:$0xff]  }
  0xd6   : > { %3436 = vmatprep.mubr.bf16.mxu1 %v8868_v22  ;;  %3589 = vmatprep.subr.bf16.mxu0 %v7873_v23  ;;  %12161 = vst [vmem:[#allocation31_spill] sm:$0xff] %v8926_v19  ;;  %v7901_v23 = vld [vmem:[#allocation5 + $0x420] ss:$16 sps:$4 sm:$0xff]  }
  0xd7   : > { %3782 = vmatprep.subr.bf16.mxu1 %v7876_v30  ;;  %12162 = vst [vmem:[#allocation32_spill] sm:$0xff] %v8928_v20  ;;  %v492_v30 = vld [vmem:[%s8826_s24 + $0x370] sm:$0xff] }
  0xd8   : > { %3590 = vmatpush1.bf16.msra.mxu0 %v7871_v28  ;;  %v7909_v28 = vld [vmem:[#allocation5 + $0x404] ss:$16 sps:$4 sm:$0xff]   ;;  %v8944_v44 = vpack.c.bf16 %v492_v30, %v480_v27  ;;  %v7928_v10 = vld [vmem:[#allocation5 + $0x7a0] ss:$16 sps:$4 sm:$0xff]   ;;  %v553_v27 = vld [vmem:[%s8826_s24 + $0x558] sm:$0xff] }
  0xd9   : > { %3783 = vmatpush1.bf16.msra.mxu1 %v7874_v29  ;;  %3591 = vmatprep.subr.bf16.mxu0 %v7879_v35  ;;  %v7912_v29 = vld [vmem:[#allocation5 + $0x604] ss:$16 sps:$4 sm:$0xff]   ;;  %v7907_v35 = vld [vmem:[#allocation5 + $0x400] ss:$16 sps:$4 sm:$0xff]  }
  0xda   : > { %3784 = vmatprep.subr.bf16.mxu1 %v7882_v36  ;;  %v7910_v36 = vld [vmem:[#allocation5 + $0x600] ss:$16 sps:$4 sm:$0xff]   ;;  %12164 = vst [vmem:[#allocation34_spill] sm:$0xff] %v8944_v44 }
  0xdb   : > { %3244 = vmatmul.mubr.bf16.gmra.mxu0 %v8882_v37  ;;  %v7934_v30 = vld [vmem:[#allocation5 + $0x780] ss:$16 sps:$4 sm:$0xff]   ;;  %v451_v37 = vld [vmem:[%s8826_s24 + $0x228] sm:$0xff] }
  0xdc   : > { %3437 = vmatmul.mubr.bf16.gmra.mxu1 %v8884_v38  ;;  %3253 = vmatprep.mubr.bf16.mxu0 %v8886_v39  ;;  %v8048_v39 = vld [vmem:[#allocation5 + $0x2c8] ss:$16 sps:$4 sm:$0xff]  }
  0xdd   : > { %3446 = vmatprep.mubr.bf16.mxu1 %v8888_v40  ;;  %3592 = vmatpush1.bf16.msra.mxu0 %v7877_v41  ;;  %v7915_v41 = vld [vmem:[#allocation5 + $0x5e4] ss:$16 sps:$4 sm:$0xff]   ;;  %v439_v38 = vld [vmem:[%s8826_s24 + $0x1c8] sm:$0xff] }
  0xde   : > { %3785 = vmatpush1.bf16.msra.mxu1 %v7880_v42  ;;  %3593 = vmatprep.subr.bf16.mxu0 %v7885_v46  ;;  %v7918_v42 = vld [vmem:[#allocation5 + $0x7e4] ss:$16 sps:$4 sm:$0xff]   ;;  %v8948_v46 = vpack.c.bf16 %v517_v34, %v505_v33 }
  0xdf   : > { %3786 = vmatprep.subr.bf16.mxu1 %v7888_v47  ;;  %v7913_v47 = vld [vmem:[#allocation5 + $0x5e0] ss:$16 sps:$4 sm:$0xff]   ;;  %v7942_v34 = vld [vmem:[#allocation5 + $0x764] ss:$16 sps:$4 sm:$0xff]  }
  0xe0   : > { %12166 = vst [vmem:[#allocation36_spill] sm:$0xff] %v8948_v46 }
  0xe1   : > { %3594 = vmatpush1.bf16.msra.mxu0 %v7883_v53  ;;  %v7921_v53 = vld [vmem:[#allocation5 + $0x5c4] ss:$16 sps:$4 sm:$0xff]  }
  0xe2   : > { %3787 = vmatpush1.bf16.msra.mxu1 %v7886_v56  ;;  %3595 = vmatprep.subr.bf16.mxu0 %v7891_v57  ;;  %v7924_v56 = vld [vmem:[#allocation5 + $0x7c4] ss:$16 sps:$4 sm:$0xff]   ;;  %v527_v57 = vld [vmem:[%s8826_s24 + $0x488] sm:$0xff] }
  0xe3   : > { %3788 = vmatprep.subr.bf16.mxu1 %v7894_v58  ;;  %3254 = vmatmul.mubr.bf16.gmra.mxu0 %v8902_v59  ;;  %v539_v58 = vld [vmem:[%s8826_s24 + $0x4e8] sm:$0xff] }
  0xe4   : > { %3447 = vmatmul.mubr.bf16.gmra.mxu1 %v8904_v60  ;;  %3263 = vmatprep.mubr.bf16.mxu0 %v8906_v61  ;;  %v8966_v7 = vpack.c.bf16 %v539_v58, %v527_v57  ;;  %v589_v57 = vld [vmem:[%s8826_s24 + $0x678] sm:$0xff]  ;;  %v7943_v58 = vld [vmem:[#allocation5 + $0x540] ss:$16 sps:$4 sm:$0xff]  }
  0xe5   : > { %3456 = vmatprep.mubr.bf16.mxu1 %v8908_v62  ;;  %3596 = vmatpush1.bf16.msra.mxu0 %v7889_v63  ;;  %v529_v63 = vld [vmem:[%s8826_s24 + $0x498] sm:$0xff] }
  0xe6   : > { %3789 = vmatpush1.bf16.msra.mxu1 %v7892_v0  ;;  %3597 = vmatprep.subr.bf16.mxu0 %v7897_v5  ;;  %v541_v0 = vld [vmem:[%s8826_s24 + $0x4f8] sm:$0xff]  ;;  %v8962_v5 = vpack.c.bf16 %v514_v50, %v502_v49  ;;  %12169 = vst [vmem:[#allocation39_spill] sm:$0xff] %v8966_v7  ;;  %v552_v49 = vld [vmem:[%s8826_s24 + $0x550] sm:$0xff] }
  0xe7   : > { %3790 = vmatprep.subr.bf16.mxu1 %v7900_v6  ;;  %v8964_v6 = vpack.c.bf16 %v516_v52, %v504_v51  ;;  %v8968_v8 = vpack.c.bf16 %v541_v0, %v529_v63  ;;  %v564_v50 = vld [vmem:[%s8826_s24 + $0x5b0] sm:$0xff]  ;;  %v575_v51 = vld [vmem:[%s8826_s24 + $0x608] sm:$0xff] }
  0xe8   : > { %12167 = vst [vmem:[#allocation37_spill] sm:$0xff] %v8962_v5  ;;  %v587_v52 = vld [vmem:[%s8826_s24 + $0x668] sm:$0xff]  ;;  %v7946_v63 = vld [vmem:[#allocation5 + $0x740] ss:$16 sps:$4 sm:$0xff]   ;;  %v7948_v0 = vld [vmem:[#allocation5 + $0x744] ss:$16 sps:$4 sm:$0xff]  }
  0xe9   : > { %3598 = vmatpush1.bf16.msra.mxu0 %v7895_v11  ;;  %12168 = vst [vmem:[#allocation38_spill] sm:$0xff] %v8964_v6  ;;  %12170 = vst [vmem:[#allocation40_spill] sm:$0xff] %v8968_v8  ;;  %v526_v11 = vld [vmem:[%s8826_s24 + $0x480] sm:$0xff] }
  0xea   : > { %3791 = vmatpush1.bf16.msra.mxu1 %v7898_v12  ;;  %3599 = vmatprep.subr.bf16.mxu0 %v7903_v13  ;;  %v538_v12 = vld [vmem:[%s8826_s24 + $0x4e0] sm:$0xff]  ;;  %v528_v13 = vld [vmem:[%s8826_s24 + $0x490] sm:$0xff] }
  0xeb   : > { %3792 = vmatprep.subr.bf16.mxu1 %v7906_v14  ;;  %3264 = vmatmul.mubr.bf16.gmra.mxu0 %v8922_v15  ;;  %v7933_v14 = vld [vmem:[#allocation5 + $0x584] ss:$16 sps:$4 sm:$0xff]   ;;  %v8982_v32 = vpack.c.bf16 %v538_v12, %v526_v11  ;;  %v7949_v11 = vld [vmem:[#allocation5 + $0x520] ss:$16 sps:$4 sm:$0xff]   ;;  %v8042_v15 = vld [vmem:[#allocation5 + $0x2e8] ss:$16 sps:$4 sm:$0xff]  }
  0xec   : > { %3457 = vmatmul.mubr.bf16.gmra.mxu1 %v8924_v16  ;;  %3273 = vmatprep.mubr.bf16.mxu0 %v8926_v19  ;;  %v7952_v12 = vld [vmem:[#allocation5 + $0x720] ss:$16 sps:$4 sm:$0xff]  }
  0xed   : > { %3466 = vmatprep.mubr.bf16.mxu1 %v8928_v20  ;;  %3600 = vmatpush1.bf16.msra.mxu0 %v7901_v23  ;;  %v7936_v23 = vld [vmem:[#allocation5 + $0x784] ss:$16 sps:$4 sm:$0xff]   ;;  %12171 = vst [vmem:[#allocation41_spill] sm:$0xff] %v8982_v32 }
  0xee   : > { %3793 = vmatpush1.bf16.msra.mxu1 %v7904_v24  ;;  %3601 = vmatprep.subr.bf16.mxu0 %v7909_v28  ;;  %v540_v24 = vld [vmem:[%s8826_s24 + $0x4f0] sm:$0xff]  ;;  %v565_v28 = vld [vmem:[%s8826_s24 + $0x5b8] sm:$0xff] }
  0xef   : > { %3794 = vmatprep.subr.bf16.mxu1 %v7912_v29  ;;  %v7931_v29 = vld [vmem:[#allocation5 + $0x580] ss:$16 sps:$4 sm:$0xff]   ;;  %v8984_v33 = vpack.c.bf16 %v540_v24, %v528_v13  ;;  %v7954_v13 = vld [vmem:[#allocation5 + $0x724] ss:$16 sps:$4 sm:$0xff]  }
  0xf0   : > { %v588_v24 = vld [vmem:[%s8826_s24 + $0x670] sm:$0xff] }
  0xf1   : > { %3602 = vmatpush1.bf16.msra.mxu0 %v7907_v35  ;;  %12172 = vst [vmem:[#allocation42_spill] sm:$0xff] %v8984_v33  ;;  %v8986_v35 = vpack.c.bf16 %v563_v26, %v551_v25  ;;  %v599_v25 = vld [vmem:[%s8826_s24 + $0x6c8] sm:$0xff] }
  0xf2   : > { %3795 = vmatpush1.bf16.msra.mxu1 %v7910_v36  ;;  %3603 = vmatprep.subr.bf16.mxu0 %v7915_v41  ;;  %v8988_v36 = vpack.c.bf16 %v565_v28, %v553_v27  ;;  %v7937_v41 = vld [vmem:[#allocation5 + $0x560] ss:$16 sps:$4 sm:$0xff]   ;;  %v611_v26 = vld [vmem:[%s8826_s24 + $0x728] sm:$0xff]  ;;  %v601_v27 = vld [vmem:[%s8826_s24 + $0x6d8] sm:$0xff] }
  0xf3   : > { %3796 = vmatprep.subr.bf16.mxu1 %v7918_v42  ;;  %3274 = vmatmul.mubr.bf16.gmra.mxu0 %v8942_v43  ;;  %12173 = vst [vmem:[#allocation43_spill] sm:$0xff] %v8986_v35  ;;  %v7940_v42 = vld [vmem:[#allocation5 + $0x760] ss:$16 sps:$4 sm:$0xff]   ;;  %v613_v28 = vld [vmem:[%s8826_s24 + $0x738] sm:$0xff] }
  0xf4   : > { %3467 = vmatmul.mubr.bf16.gmra.mxu1 %v8944_v44  ;;  %3283 = vmatprep.mubr.bf16.mxu0 %v8946_v45  ;;  %12174 = vst [vmem:[#allocation44_spill] sm:$0xff] %v8988_v36 }
  0xf5   : > { %3476 = vmatprep.mubr.bf16.mxu1 %v8948_v46  ;;  %3604 = vmatpush2.bf16.msra.mxu0 %v7913_v47  ;;  %v550_v47 = vld [vmem:[%s8826_s24 + $0x540] sm:$0xff] }
  0xf6   : > { %3797 = vmatpush2.bf16.msra.mxu1 %v7916_v48  ;;  %3605 = vmatprep.subr.bf16.mxu0 %v7921_v53  ;;  %v562_v48 = vld [vmem:[%s8826_s24 + $0x5a0] sm:$0xff]  ;;  %v577_v53 = vld [vmem:[%s8826_s24 + $0x618] sm:$0xff] }
  0xf7   : > { %3798 = vmatprep.subr.bf16.mxu1 %v7924_v56  ;;  %v7945_v56 = vld [vmem:[#allocation5 + $0x544] ss:$16 sps:$4 sm:$0xff]  }
  0xf9   : > { %3606 = vmatpush2.bf16.msra.mxu0 %v7919_v1  ;;  %v9002_v1 = vpack.c.bf16 %v562_v48, %v550_v47  ;;  %v9026_v47 = vpack.c.bf16 %v611_v26, %v599_v25  ;;  %v9028_v48 = vpack.c.bf16 %v613_v28, %v601_v27  ;;  %v647_v25 = vld [vmem:[%s8826_s24 + $0x848] sm:$0xff]  ;;  %v649_v27 = vld [vmem:[%s8826_s24 + $0x858] sm:$0xff] }
  0xfa   : > { %3799 = vmatpush2.bf16.msra.mxu1 %v7922_v2  ;;  %3607 = vmatprep.subr.bf16.mxu0 %v7927_v3  ;;  %v9004_v2 = vpack.c.bf16 %v564_v50, %v552_v49  ;;  %v9006_v3 = vpack.c.bf16 %v587_v52, %v575_v51  ;;  %v598_v49 = vld [vmem:[%s8826_s24 + $0x6c0] sm:$0xff]  ;;  %v600_v51 = vld [vmem:[%s8826_s24 + $0x6d0] sm:$0xff]  ;;  %v659_v26 = vld [vmem:[%s8826_s24 + $0x8a8] sm:$0xff] }
  0xfb   : > { %3800 = vmatprep.subr.bf16.mxu1 %v7930_v4  ;;  %3284 = vmatmul.mubr.bf16.gmra.mxu0 %v8962_v5  ;;  %12175 = vst [vmem:[#allocation45_spill] sm:$0xff] %v9002_v1  ;;  %v9008_v4 = vpack.c.bf16 %v589_v57, %v577_v53  ;;  %12181 = vst [vmem:[#allocation51_spill] sm:$0xff] %v9026_v47  ;;  %v610_v50 = vld [vmem:[%s8826_s24 + $0x720] sm:$0xff]  ;;  %v612_v52 = vld [vmem:[%s8826_s24 + $0x730] sm:$0xff] }
  0xfc   : > { %3477 = vmatmul.mubr.bf16.gmra.mxu1 %v8964_v6  ;;  %3293 = vmatprep.mubr.bf16.mxu0 %v8966_v7  ;;  %12176 = vst [vmem:[#allocation46_spill] sm:$0xff] %v9004_v2  ;;  %12177 = vst [vmem:[#allocation47_spill] sm:$0xff] %v9006_v3  ;;  %v623_v53 = vld [vmem:[%s8826_s24 + $0x788] sm:$0xff]  ;;  %v661_v28 = vld [vmem:[%s8826_s24 + $0x8b8] sm:$0xff] }
  0xfd   : > { %3486 = vmatprep.mubr.bf16.mxu1 %v8968_v8  ;;  %3608 = vmatpush2.bf16.msra.mxu0 %v7925_v9  ;;  %12178 = vst [vmem:[#allocation48_spill] sm:$0xff] %v9008_v4  ;;  %v7951_v9 = vld [vmem:[#allocation5 + $0x524] ss:$16 sps:$4 sm:$0xff]   ;;  %12182 = vst [vmem:[#allocation52_spill] sm:$0xff] %v9028_v48  ;;  %v635_v57 = vld [vmem:[%s8826_s24 + $0x7e8] sm:$0xff] }
  0xfe   : > { %3801 = vmatpush2.bf16.msra.mxu1 %v7928_v10  ;;  %3609 = vmatprep.subr.bf16.mxu0 %v7933_v14  ;;  %v574_v10 = vld [vmem:[%s8826_s24 + $0x600] sm:$0xff] }
  0xff   : > { %3802 = vmatprep.subr.bf16.mxu1 %v7936_v23  ;;  %v586_v14 = vld [vmem:[%s8826_s24 + $0x660] sm:$0xff]  ;;  %v576_v23 = vld [vmem:[%s8826_s24 + $0x610] sm:$0xff] }
 0x101   : > { %3610 = vmatpush2.bf16.msra.mxu0 %v7931_v29  ;;  %v7955_v29 = vld [vmem:[#allocation5 + $0x500] ss:$16 sps:$4 sm:$0xff]  }
 0x102   : > { %3803 = vmatpush2.bf16.msra.mxu1 %v7934_v30  ;;  %3611 = vmatprep.subr.bf16.mxu0 %v7939_v31  ;;  %v7957_v30 = vld [vmem:[#allocation5 + $0x504] ss:$16 sps:$4 sm:$0xff]   ;;  %v9022_v31 = vpack.c.bf16 %v586_v14, %v574_v10  ;;  %v9044_v10 = vpack.c.bf16 %v612_v52, %v600_v51 }
 0x103   : > { %3804 = vmatprep.subr.bf16.mxu1 %v7942_v34  ;;  %3294 = vmatmul.mubr.bf16.gmra.mxu0 %v8982_v32  ;;  %v9024_v34 = vpack.c.bf16 %v588_v24, %v576_v23  ;;  %v634_v14 = vld [vmem:[%s8826_s24 + $0x7e0] sm:$0xff]  ;;  %v624_v23 = vld [vmem:[%s8826_s24 + $0x790] sm:$0xff] }
 0x104   : > { %3487 = vmatmul.mubr.bf16.gmra.mxu1 %v8984_v33  ;;  %3303 = vmatprep.mubr.bf16.mxu0 %v8986_v35  ;;  %12179 = vst [vmem:[#allocation49_spill] sm:$0xff] %v9022_v31  ;;  %12184 = vst [vmem:[#allocation54_spill] sm:$0xff] %v9044_v10  ;;  %v636_v24 = vld [vmem:[%s8826_s24 + $0x7f0] sm:$0xff] }
 0x105   : > { %3496 = vmatprep.mubr.bf16.mxu1 %v8988_v36  ;;  %3612 = vmatpush2.bf16.msra.mxu0 %v7937_v41  ;;  %12180 = vst [vmem:[#allocation50_spill] sm:$0xff] %v9024_v34  ;;  %v7958_v41 = vld [vmem:[#allocation5 + $0x700] ss:$16 sps:$4 sm:$0xff]  }
 0x106   : > { %3805 = vmatpush2.bf16.msra.mxu1 %v7940_v42  ;;  %3613 = vmatprep.subr.bf16.mxu0 %v7945_v56  ;;  %v7960_v42 = vld [vmem:[#allocation5 + $0x704] ss:$16 sps:$4 sm:$0xff]  }
 0x107   : > { %3806 = vmatprep.subr.bf16.mxu1 %v7948_v0  ;;  %v7963_v56 = vld [vmem:[#allocation5 + $0x8e4] ss:$16 sps:$4 sm:$0xff]  }
 0x108   : > { %v7966_v0 = vld [vmem:[#allocation5 + $0xae4] ss:$16 sps:$4 sm:$0xff]  }
 0x109   : > { %3614 = vmatpush2.bf16.msra.mxu0 %v7943_v58  ;;  %v625_v58 = vld [vmem:[%s8826_s24 + $0x798] sm:$0xff]  ;;  %v648_v51 = vld [vmem:[%s8826_s24 + $0x850] sm:$0xff] }
 0x10a   : > { %3807 = vmatpush2.bf16.msra.mxu1 %v7946_v63  ;;  %3615 = vmatprep.subr.bf16.mxu0 %v7951_v9  ;;  %v637_v63 = vld [vmem:[%s8826_s24 + $0x7f8] sm:$0xff]  ;;  %v9042_v9 = vpack.c.bf16 %v610_v50, %v598_v49  ;;  %v646_v49 = vld [vmem:[%s8826_s24 + $0x840] sm:$0xff]  ;;  %v660_v52 = vld [vmem:[%s8826_s24 + $0x8b0] sm:$0xff] }
 0x10b   : > { %3304 = vmatmul.mubr.bf16.gmra.mxu0 %v9002_v1  ;;  %3808 = vmatprep.subr.bf16.mxu1 %v7954_v13  ;;  %v622_v13 = vld [vmem:[%s8826_s24 + $0x780] sm:$0xff] }
 0x10c   : > { %3497 = vmatmul.mubr.bf16.gmra.mxu1 %v9004_v2  ;;  %3313 = vmatprep.mubr.bf16.mxu0 %v9006_v3  ;;  %12183 = vst [vmem:[#allocation53_spill] sm:$0xff] %v9042_v9  ;;  %v658_v50 = vld [vmem:[%s8826_s24 + $0x8a0] sm:$0xff] }
 0x10d   : > { %3506 = vmatprep.mubr.bf16.mxu1 %v9008_v4  ;;  %3616 = vmatpush2.bf16.msra.mxu0 %v7949_v11  ;;  %v9046_v11 = vpack.c.bf16 %v635_v57, %v623_v53  ;;  %v671_v53 = vld [vmem:[%s8826_s24 + $0x908] sm:$0xff]  ;;  %v673_v57 = vld [vmem:[%s8826_s24 + $0x918] sm:$0xff] }
 0x10e   : > { %3809 = vmatpush2.bf16.msra.mxu1 %v7952_v12  ;;  %3617 = vmatprep.subr.bf16.mxu0 %v7957_v30  ;;  %v9048_v12 = vpack.c.bf16 %v637_v63, %v625_v58  ;;  %v9064_v30 = vpack.c.bf16 %v636_v24, %v624_v23  ;;  %v685_v58 = vld [vmem:[%s8826_s24 + $0x978] sm:$0xff]  ;;  %v9082_v63 = vpack.c.bf16 %v658_v50, %v646_v49  ;;  %v670_v23 = vld [vmem:[%s8826_s24 + $0x900] sm:$0xff] }
 0x10f   : > { %3810 = vmatprep.subr.bf16.mxu1 %v7960_v42  ;;  %12185 = vst [vmem:[#allocation55_spill] sm:$0xff] %v9046_v11  ;;  %v9068_v42 = vpack.c.bf16 %v661_v28, %v649_v27  ;;  %v682_v24 = vld [vmem:[%s8826_s24 + $0x960] sm:$0xff]  ;;  %v695_v27 = vld [vmem:[%s8826_s24 + $0x9c8] sm:$0xff]  ;;  %v697_v49 = vld [vmem:[%s8826_s24 + $0x9d8] sm:$0xff] }
 0x110   : > { %12186 = vst [vmem:[#allocation56_spill] sm:$0xff] %v9048_v12  ;;  %12188 = vst [vmem:[#allocation58_spill] sm:$0xff] %v9064_v30  ;;  %v707_v28 = vld [vmem:[%s8826_s24 + $0xa28] sm:$0xff]  ;;  %v709_v50 = vld [vmem:[%s8826_s24 + $0xa38] sm:$0xff] }
 0x111   : > { %3618 = vmatpush2.bf16.msra.mxu0 %v7955_v29  ;;  %v9062_v29 = vpack.c.bf16 %v634_v14, %v622_v13  ;;  %12190 = vst [vmem:[#allocation60_spill] sm:$0xff] %v9068_v42  ;;  %12191 = vst [vmem:[#allocation61_spill] sm:$0xff] %v9082_v63  ;;  %v9088_v14 = vpack.c.bf16 %v685_v58, %v673_v57  ;;  %v694_v57 = vld [vmem:[%s8826_s24 + $0x9c0] sm:$0xff] }
 0x112   : > { %3811 = vmatpush2.bf16.msra.mxu1 %v7958_v41  ;;  %3973 = vmatprep.subr.bf16.mxu0 %v7963_v56  ;;  %v9066_v41 = vpack.c.bf16 %v659_v26, %v647_v25  ;;  %v683_v56 = vld [vmem:[%s8826_s24 + $0x968] sm:$0xff]  ;;  %v672_v25 = vld [vmem:[%s8826_s24 + $0x910] sm:$0xff]  ;;  %v706_v58 = vld [vmem:[%s8826_s24 + $0xa20] sm:$0xff] }
 0x113   : > { %3314 = vmatmul.mubr.bf16.gmra.mxu0 %v9022_v31  ;;  %4166 = vmatprep.subr.bf16.mxu1 %v7966_v0  ;;  %12187 = vst [vmem:[#allocation57_spill] sm:$0xff] %v9062_v29  ;;  %v9084_v0 = vpack.c.bf16 %v660_v52, %v648_v51  ;;  %v9086_v13 = vpack.c.bf16 %v683_v56, %v671_v53  ;;  %12194 = vst [vmem:[#allocation64_spill] sm:$0xff] %v9088_v14  ;;  %v684_v26 = vld [vmem:[%s8826_s24 + $0x970] sm:$0xff] }
 0x114   : > { %3507 = vmatmul.mubr.bf16.gmra.mxu1 %v9024_v34  ;;  %3323 = vmatprep.mubr.bf16.mxu0 %v9026_v47  ;;  %12189 = vst [vmem:[#allocation59_spill] sm:$0xff] %v9066_v41  ;;  %v9102_v51 = vpack.c.bf16 %v682_v24, %v670_v23  ;;  %v9104_v52 = vpack.c.bf16 %v684_v26, %v672_v25  ;;  %v719_v23 = vld [vmem:[%s8826_s24 + $0xa88] sm:$0xff]  ;;  %v721_v25 = vld [vmem:[%s8826_s24 + $0xa98] sm:$0xff] }
 0x115   : > { %3516 = vmatprep.mubr.bf16.mxu1 %v9028_v48  ;;  %12192 = vst [vmem:[#allocation62_spill] sm:$0xff] %v9084_v0  ;;  %12193 = vst [vmem:[#allocation63_spill] sm:$0xff] %v9086_v13  ;;  %v9106_v53 = vpack.c.bf16 %v707_v28, %v695_v27  ;;  %v9108_v56 = vpack.c.bf16 %v709_v50, %v697_v49  ;;  %v731_v24 = vld [vmem:[%s8826_s24 + $0xae8] sm:$0xff]  ;;  %v733_v26 = vld [vmem:[%s8826_s24 + $0xaf8] sm:$0xff]  ;;  %v9122_v27 = vpack.c.bf16 %v706_v58, %v694_v57 }
 0x116   : > { %12195 = vst [vmem:[#allocation65_spill] sm:$0xff] %v9102_v51  ;;  %12196 = vst [vmem:[#allocation66_spill] sm:$0xff] %v9104_v52  ;;  %v9126_v49 = vpack.c.bf16 %v731_v24, %v719_v23  ;;  %v9128_v50 = vpack.c.bf16 %v733_v26, %v721_v25  ;;  %v743_v57 = vld [vmem:[%s8826_s24 + $0xb48] sm:$0xff]  ;;  %v745_v23 = vld [vmem:[%s8826_s24 + $0xb58] sm:$0xff] }
 0x117   : > { %12197 = vst [vmem:[#allocation67_spill] sm:$0xff] %v9106_v53  ;;  %12198 = vst [vmem:[#allocation68_spill] sm:$0xff] %v9108_v56  ;;  %v755_v58 = vld [vmem:[%s8826_s24 + $0xba8] sm:$0xff]  ;;  %v757_v24 = vld [vmem:[%s8826_s24 + $0xbb8] sm:$0xff] }
 0x118   : > { %12199 = vst [vmem:[#allocation69_spill] sm:$0xff] %v9122_v27  ;;  %12201 = vst [vmem:[#allocation71_spill] sm:$0xff] %v9126_v49 }
 0x119   : > { %12202 = vst [vmem:[#allocation72_spill] sm:$0xff] %v9128_v50 }
 0x11b   : > { %3324 = vmatmul.mubr.bf16.gmra.mxu0 %v9042_v9 }
 0x11c   : > { %3517 = vmatmul.mubr.bf16.gmra.mxu1 %v9044_v10  ;;  %3333 = vmatprep.mubr.bf16.mxu0 %v9046_v11 }
 0x11d   : > { %3526 = vmatprep.mubr.bf16.mxu1 %v9048_v12 }
 0x123   : > { %3334 = vmatmul.mubr.bf16.gmra.mxu0 %v9062_v29  ;;  %v482_v29 = vld [vmem:[%s8826_s24 + $0x320] sm:$0xff] }
 0x124   : > { %3527 = vmatmul.mubr.bf16.gmra.mxu1 %v9064_v30  ;;  %3343 = vmatprep.mubr.bf16.mxu0 %v9066_v41  ;;  %v7969_v41 = vld [vmem:[#allocation5 + $0x8c4] ss:$16 sps:$4 sm:$0xff]  }
 0x125   : > { %3536 = vmatprep.mubr.bf16.mxu1 %v9068_v42  ;;  %v7967_v42 = vld [vmem:[#allocation5 + $0x8c0] ss:$16 sps:$4 sm:$0xff]   ;;  %v7972_v30 = vld [vmem:[#allocation5 + $0xac4] ss:$16 sps:$4 sm:$0xff]  }
 0x12b   : > { %3344 = vmatmul.mubr.bf16.gmra.mxu0 %v9082_v63  ;;  %v424_v63 = vld [vmem:[%s8826_s24 + $0x150] sm:$0xff] }
 0x12c   : > { %3537 = vmatmul.mubr.bf16.gmra.mxu1 %v9084_v0  ;;  %3353 = vmatprep.mubr.bf16.mxu0 %v9086_v13  ;;  %v708_v13 = vld [vmem:[%s8826_s24 + $0xa30] sm:$0xff] }
 0x12d   : > { %3546 = vmatprep.mubr.bf16.mxu1 %v9088_v14  ;;  %v696_v14 = vld [vmem:[%s8826_s24 + $0x9d0] sm:$0xff] }
 0x12e   : > { %v9124_v28 = vpack.c.bf16 %v708_v13, %v696_v14  ;;  %v720_v13 = vld [vmem:[%s8826_s24 + $0xa90] sm:$0xff] }
 0x12f   : > { %v732_v14 = vld [vmem:[%s8826_s24 + $0xaf0] sm:$0xff] }
 0x130   : > { %12200 = vst [vmem:[#allocation70_spill] sm:$0xff] %v9124_v28  ;;  %v9144_v26 = vpack.c.bf16 %v732_v14, %v720_v13  ;;  %v389_v13 = vld [vmem:[%s8826_s24 + $0x38] sm:$0xff]  ;;  %v412_v0 = vld [vmem:[%s8826_s24 + $0xf0] sm:$0xff] }
 0x131   : > { %v401_v14 = vld [vmem:[%s8826_s24 + $0x98] sm:$0xff] }
 0x132   : > { %12204 = vst [vmem:[#allocation74_spill] sm:$0xff] %v9144_v26 }
 0x133   : > { %3354 = vmatmul.mubr.bf16.gmra.mxu0 %v9102_v51  ;;  %v756_v51 = vld [vmem:[%s8826_s24 + $0xbb0] sm:$0xff] }
 0x134   : > { %3547 = vmatmul.mubr.bf16.gmra.mxu1 %v9104_v52  ;;  %3363 = vmatprep.mubr.bf16.mxu0 %v9106_v53  ;;  %v718_v53 = vld [vmem:[%s8826_s24 + $0xa80] sm:$0xff]  ;;  %v744_v52 = vld [vmem:[%s8826_s24 + $0xb50] sm:$0xff] }
 0x135   : > { %3556 = vmatprep.mubr.bf16.mxu1 %v9108_v56  ;;  %v730_v56 = vld [vmem:[%s8826_s24 + $0xae0] sm:$0xff] }
 0x136   : > { %v9142_v25 = vpack.c.bf16 %v730_v56, %v718_v53  ;;  %v387_v53 = vld [vmem:[%s8826_s24 + $0x28] sm:$0xff] }
 0x137   : > { %v399_v56 = vld [vmem:[%s8826_s24 + $0x88] sm:$0xff] }
 0x138   : > { %12203 = vst [vmem:[#allocation73_spill] sm:$0xff] %v9142_v25 }
 0x13b   : > { %3364 = vmatmul.mubr.bf16.gmra.mxu0 %v9122_v27  ;;  %v754_v27 = vld [vmem:[%s8826_s24 + $0xba0] sm:$0xff] }
 0x13c   : > { %3557 = vmatmul.mubr.bf16.gmra.mxu1 %v9124_v28  ;;  %3373 = vmatprep.mubr.bf16.mxu0 %v9126_v49  ;;  %v9146_v28 = vpack.c.bf16 %v755_v58, %v743_v57  ;;  %v9148_v49 = vpack.c.bf16 %v757_v24, %v745_v23  ;;  %v9164_v58 = vpack.c.bf16 %v756_v51, %v744_v52  ;;  %v388_v51 = vld [vmem:[%s8826_s24 + $0x30] sm:$0xff] }
 0x13d   : > { %3566 = vmatprep.mubr.bf16.mxu1 %v9128_v50  ;;  %v742_v50 = vld [vmem:[%s8826_s24 + $0xb40] sm:$0xff]  ;;  %v9166_v23 = vpack.c.bf16 %v399_v56, %v387_v53  ;;  %v9168_v24 = vpack.c.bf16 %v401_v14, %v389_v13  ;;  %v400_v52 = vld [vmem:[%s8826_s24 + $0x90] sm:$0xff]  ;;  %v423_v53 = vld [vmem:[%s8826_s24 + $0x148] sm:$0xff] }
 0x13e   : > { %12205 = vst [vmem:[#allocation75_spill] sm:$0xff] %v9146_v28  ;;  %12206 = vst [vmem:[#allocation76_spill] sm:$0xff] %v9148_v49  ;;  %v9162_v57 = vpack.c.bf16 %v754_v27, %v742_v50  ;;  %v398_v27 = vld [vmem:[%s8826_s24 + $0x80] sm:$0xff]  ;;  %v411_v50 = vld [vmem:[%s8826_s24 + $0xe8] sm:$0xff] }
 0x13f   : > { %12208 = vst [vmem:[#allocation78_spill] sm:$0xff] %v9164_v58  ;;  %12209 = vst [vmem:[#allocation79_spill] sm:$0xff] %v9166_v23  ;;  %v413_v56 = vld [vmem:[%s8826_s24 + $0xf8] sm:$0xff] }
 0x140   : > { %12207 = vst [vmem:[#allocation77_spill] sm:$0xff] %v9162_v57  ;;  %12210 = vst [vmem:[#allocation80_spill] sm:$0xff] %v9168_v24  ;;  %v425_v13 = vld [vmem:[%s8826_s24 + $0x158] sm:$0xff] }
 0x143   : > { %3374 = vmatmul.mubr.bf16.gmra.mxu0 %v9142_v25  ;;  %v422_v25 = vld [vmem:[%s8826_s24 + $0x140] sm:$0xff] }
 0x144   : > { %3567 = vmatmul.mubr.bf16.gmra.mxu1 %v9144_v26  ;;  %3383 = vmatprep.mubr.bf16.mxu0 %v9146_v28  ;;  %v9186_v28 = vpack.c.bf16 %v423_v53, %v411_v50  ;;  %v410_v26 = vld [vmem:[%s8826_s24 + $0xe0] sm:$0xff]  ;;  %v449_v50 = vld [vmem:[%s8826_s24 + $0x218] sm:$0xff] }
 0x145   : > { %3576 = vmatprep.mubr.bf16.mxu1 %v9148_v49  ;;  %v386_v49 = vld [vmem:[%s8826_s24 + $0x20] sm:$0xff] }
 0x146   : > { %v9182_v14 = vpack.c.bf16 %v398_v27, %v386_v49  ;;  %12213 = vst [vmem:[#allocation83_spill] sm:$0xff] %v9186_v28  ;;  %v435_v49 = vld [vmem:[%s8826_s24 + $0x1a8] sm:$0xff]  ;;  %v7975_v53 = vld [vmem:[#allocation5 + $0x8a4] ss:$16 sps:$4 sm:$0xff]  }
 0x147   : > { %v447_v27 = vld [vmem:[%s8826_s24 + $0x208] sm:$0xff] }
 0x148   : > { %12211 = vst [vmem:[#allocation81_spill] sm:$0xff] %v9182_v14 }
 0x14b   : > { %3384 = vmatmul.mubr.bf16.gmra.mxu0 %v9162_v57  ;;  %v7961_v57 = vld [vmem:[#allocation5 + $0x8e0] ss:$16 sps:$4 sm:$0xff]  }
 0x14c   : > { %3577 = vmatmul.mubr.bf16.gmra.mxu1 %v9164_v58  ;;  %3619 = vmatprep.mubr.bf16.mxu0 %v9166_v23  ;;  %v9184_v58 = vpack.c.bf16 %v400_v52, %v388_v51  ;;  %v7964_v23 = vld [vmem:[#allocation5 + $0xae0] ss:$16 sps:$4 sm:$0xff]   ;;  %v437_v51 = vld [vmem:[%s8826_s24 + $0x1b8] sm:$0xff] }
 0x14d   : > { %3812 = vmatprep.mubr.bf16.mxu1 %v9168_v24  ;;  %v9188_v24 = vpack.c.bf16 %v425_v13, %v413_v56  ;;  %v7970_v52 = vld [vmem:[#allocation5 + $0xac0] ss:$16 sps:$4 sm:$0xff]   ;;  %v7981_v56 = vld [vmem:[#allocation5 + $0xaa4] ss:$16 sps:$4 sm:$0xff]   ;;  %v9202_v13 = vpack.c.bf16 %v422_v25, %v410_v26  ;;  %v459_v26 = vld [vmem:[%s8826_s24 + $0x268] sm:$0xff] }
 0x14e   : > { %12212 = vst [vmem:[#allocation82_spill] sm:$0xff] %v9184_v58  ;;  %v436_v25 = vld [vmem:[%s8826_s24 + $0x1b0] sm:$0xff] }
 0x14f   : > { %12214 = vst [vmem:[#allocation84_spill] sm:$0xff] %v9188_v24  ;;  %12215 = vst [vmem:[#allocation85_spill] sm:$0xff] %v9202_v13 }
 0x153   : > { %3620 = vmatmul.mubr.bf16.vlgmr.msra.gmra.mxu0 %v9182_v14  ;;  %v8009_v14 = vld [vmem:[#allocation5 + $0xa20] ss:$16 sps:$4 sm:$0xff]  }
 0x154   : > { %3813 = vmatmul.mubr.bf16.vlgmr.msra.gmra.mxu1 %v9184_v58  ;;  %3974 = vmatpush1.bf16.msra.mxu0 %v7961_v57  ;;  %v9204_v58 = vpack.c.bf16 %v424_v63, %v412_v0  ;;  %v9206_v57 = vpack.c.bf16 %v447_v27, %v435_v49  ;;  %v7978_v63 = vld [vmem:[#allocation5 + $0x884] ss:$16 sps:$4 sm:$0xff]   ;;  %v471_v49 = vld [vmem:[%s8826_s24 + $0x2c8] sm:$0xff]  ;;  %v461_v27 = vld [vmem:[%s8826_s24 + $0x278] sm:$0xff] }
 0x155   : > { %4167 = vmatpush1.bf16.msra.mxu1 %v7964_v23  ;;  %3629 = vmatprep.mubr.bf16.mxu0 %v9186_v28  ;;  %v9208_v23 = vpack.c.bf16 %v449_v50, %v437_v51  ;;  %v7979_v28 = vld [vmem:[#allocation5 + $0xaa0] ss:$16 sps:$4 sm:$0xff]   ;;  %v7990_v0 = vld [vmem:[#allocation5 + $0xa84] ss:$16 sps:$4 sm:$0xff]   ;;  %v473_v51 = vld [vmem:[%s8826_s24 + $0x2d8] sm:$0xff] }
 0x156   : > { %3822 = vmatprep.mubr.bf16.mxu1 %v9188_v24  ;;  %3975 = vmatprep.subr.bf16.mxu0 %v7969_v41  ;;  %12216 = vst [vmem:[#allocation86_spill] sm:$0xff] %v9204_v58  ;;  %12217 = vst [vmem:[#allocation87_spill] sm:$0xff] %v9206_v57  ;;  %v7973_v24 = vld [vmem:[#allocation5 + $0x8a0] ss:$16 sps:$4 sm:$0xff]  }
 0x157   : > { %4168 = vmatprep.subr.bf16.mxu1 %v7972_v30  ;;  %12218 = vst [vmem:[#allocation88_spill] sm:$0xff] %v9208_v23  ;;  %v434_v30 = vld [vmem:[%s8826_s24 + $0x1a0] sm:$0xff] }
 0x158   : > { %3976 = vmatpush1.bf16.msra.mxu0 %v7967_v42  ;;  %v446_v41 = vld [vmem:[%s8826_s24 + $0x200] sm:$0xff]  ;;  %v448_v42 = vld [vmem:[%s8826_s24 + $0x210] sm:$0xff] }
 0x159   : > { %4169 = vmatpush1.bf16.msra.mxu1 %v7970_v52  ;;  %3977 = vmatprep.subr.bf16.mxu0 %v7975_v53  ;;  %v7976_v52 = vld [vmem:[#allocation5 + $0x880] ss:$16 sps:$4 sm:$0xff]   ;;  %v7984_v53 = vld [vmem:[#allocation5 + $0x864] ss:$16 sps:$4 sm:$0xff]  }
 0x15a   : > { %4170 = vmatprep.subr.bf16.mxu1 %v7981_v56  ;;  %v7988_v50 = vld [vmem:[#allocation5 + $0xa80] ss:$16 sps:$4 sm:$0xff]   ;;  %v7996_v56 = vld [vmem:[#allocation5 + $0xa64] ss:$16 sps:$4 sm:$0xff]  }
 0x15b   : > { %3630 = vmatmul.mubr.bf16.gmra.mxu0 %v9202_v13  ;;  %v9224_v13 = vpack.c.bf16 %v448_v42, %v436_v25  ;;  %v460_v25 = vld [vmem:[%s8826_s24 + $0x270] sm:$0xff] }
 0x15c   : > { %3823 = vmatmul.mubr.bf16.gmra.mxu1 %v9204_v58  ;;  %3639 = vmatprep.mubr.bf16.mxu0 %v9206_v57  ;;  %v9222_v58 = vpack.c.bf16 %v446_v41, %v434_v30  ;;  %v9226_v57 = vpack.c.bf16 %v471_v49, %v459_v26  ;;  %v7987_v30 = vld [vmem:[#allocation5 + $0x844] ss:$16 sps:$4 sm:$0xff]   ;;  %v483_v26 = vld [vmem:[%s8826_s24 + $0x328] sm:$0xff] }
 0x15d   : > { %3832 = vmatprep.mubr.bf16.mxu1 %v9208_v23  ;;  %3978 = vmatpush1.bf16.msra.mxu0 %v7973_v24  ;;  %12220 = vst [vmem:[#allocation90_spill] sm:$0xff] %v9224_v13  ;;  %v9228_v24 = vpack.c.bf16 %v473_v51, %v461_v27  ;;  %v7982_v23 = vld [vmem:[#allocation5 + $0x860] ss:$16 sps:$4 sm:$0xff]   ;;  %v8005_v41 = vld [vmem:[#allocation5 + $0xa44] ss:$16 sps:$4 sm:$0xff]   ;;  %v495_v49 = vld [vmem:[%s8826_s24 + $0x388] sm:$0xff] }
 0x15e   : > { %4171 = vmatpush1.bf16.msra.mxu1 %v7979_v28  ;;  %3979 = vmatprep.subr.bf16.mxu0 %v7978_v63  ;;  %12219 = vst [vmem:[#allocation89_spill] sm:$0xff] %v9222_v58  ;;  %12221 = vst [vmem:[#allocation91_spill] sm:$0xff] %v9226_v57  ;;  %v7994_v28 = vld [vmem:[#allocation5 + $0xa60] ss:$16 sps:$4 sm:$0xff]   ;;  %v485_v27 = vld [vmem:[%s8826_s24 + $0x338] sm:$0xff] }
 0x15f   : > { %4172 = vmatprep.subr.bf16.mxu1 %v7990_v0  ;;  %12222 = vst [vmem:[#allocation92_spill] sm:$0xff] %v9228_v24  ;;  %v458_v63 = vld [vmem:[%s8826_s24 + $0x260] sm:$0xff]  ;;  %v472_v42 = vld [vmem:[%s8826_s24 + $0x2d0] sm:$0xff] }
 0x160   : > { %v470_v0 = vld [vmem:[%s8826_s24 + $0x2c0] sm:$0xff] }
 0x161   : > { %3980 = vmatpush1.bf16.msra.mxu0 %v7976_v52  ;;  %v7985_v51 = vld [vmem:[#allocation5 + $0x840] ss:$16 sps:$4 sm:$0xff]   ;;  %v497_v52 = vld [vmem:[%s8826_s24 + $0x398] sm:$0xff] }
 0x162   : > { %4173 = vmatpush1.bf16.msra.mxu1 %v7988_v50  ;;  %3981 = vmatprep.subr.bf16.mxu0 %v7984_v53  ;;  %v8003_v50 = vld [vmem:[#allocation5 + $0xa40] ss:$16 sps:$4 sm:$0xff]   ;;  %v7993_v53 = vld [vmem:[#allocation5 + $0x824] ss:$16 sps:$4 sm:$0xff]  }
 0x163   : > { %4174 = vmatprep.subr.bf16.mxu1 %v7996_v56  ;;  %3640 = vmatmul.mubr.bf16.gmra.mxu0 %v9222_v58  ;;  %v8011_v56 = vld [vmem:[#allocation5 + $0xa24] ss:$16 sps:$4 sm:$0xff]   ;;  %v9248_v58 = vpack.c.bf16 %v497_v52, %v485_v27  ;;  %v519_v27 = vld [vmem:[%s8826_s24 + $0x448] sm:$0xff] }
 0x164   : > { %3833 = vmatmul.mubr.bf16.gmra.mxu1 %v9224_v13  ;;  %3649 = vmatprep.mubr.bf16.mxu0 %v9226_v57  ;;  %v9242_v13 = vpack.c.bf16 %v470_v0, %v458_v63  ;;  %v9244_v57 = vpack.c.bf16 %v472_v42, %v460_v25  ;;  %v494_v63 = vld [vmem:[%s8826_s24 + $0x380] sm:$0xff]  ;;  %v484_v0 = vld [vmem:[%s8826_s24 + $0x330] sm:$0xff] }
 0x165   : > { %3842 = vmatprep.mubr.bf16.mxu1 %v9228_v24  ;;  %3982 = vmatpush1.bf16.msra.mxu0 %v7982_v23  ;;  %v9246_v24 = vpack.c.bf16 %v495_v49, %v483_v26  ;;  %12226 = vst [vmem:[#allocation96_spill] sm:$0xff] %v9248_v58  ;;  %v8630_v23 = vmov 65535   ;;  %v496_v25 = vld [vmem:[%s8826_s24 + $0x390] sm:$0xff]  ;;  %v507_v49 = vld [vmem:[%s8826_s24 + $0x3e8] sm:$0xff]  ;;  %v9266_v12 = vpack.c.bf16 %v494_v63, %v482_v29  ;;  %v518_v29 = vld [vmem:[%s8826_s24 + $0x440] sm:$0xff] }
 0x166   : > { %4175 = vmatpush1.bf16.msra.mxu1 %v7994_v28  ;;  %3983 = vmatprep.subr.bf16.mxu0 %v7987_v30  ;;  %12223 = vst [vmem:[#allocation93_spill] sm:$0xff] %v9242_v13  ;;  %12224 = vst [vmem:[#allocation94_spill] sm:$0xff] %v9244_v57  ;;  %v3187_v28 = vsel %vm3185_vm0, 4294967295, %v8630_v23  ;;  %v7991_v30 = vld [vmem:[#allocation5 + $0x820] ss:$16 sps:$4 sm:$0xff]   ;;  %v521_v23 = vld [vmem:[%s8826_s24 + $0x458] sm:$0xff] }
 0x167   : > { %4176 = vmatprep.subr.bf16.mxu1 %v8005_v41  ;;  %12225 = vst [vmem:[#allocation95_spill] sm:$0xff] %v9246_v24  ;;  %v7999_v41 = vld [vmem:[#allocation5 + $0x804] ss:$16 sps:$4 sm:$0xff]   ;;  %v9260_v52 = vsel %vm3186_vm1, %v3187_v28, 0  ;;  %12228 = vst [vmem:[#allocation98_spill] sm:$0xff] %v9266_v12  ;;  %v9268_v28 = vpack.c.bf16 %v496_v25, %v484_v0 }
 0x168   : > { %v8020_v42 = vld [vmem:[#allocation5 + $0xa04] ss:$16 sps:$4 sm:$0xff]   ;;  %12227 = vst [vmem:[#allocation97_spill] sm:$0xff] %v9260_v52 }
 0x169   : > { %3984 = vmatpush1.bf16.msra.mxu0 %v7985_v51  ;;  %v8029_v26 = vld [vmem:[#allocation5 + $0xb24] ss:$16 sps:$4 sm:$0x1f]   ;;  %v509_v51 = vld [vmem:[%s8826_s24 + $0x3f8] sm:$0xff]  ;;  %12229 = vst [vmem:[#allocation99_spill] sm:$0xff] %v9268_v28 }
 0x16a   : > { %4177 = vmatpush1.bf16.msra.mxu1 %v8003_v50  ;;  %3985 = vmatprep.subr.bf16.mxu0 %v7993_v53  ;;  %v7997_v50 = vld [vmem:[#allocation5 + $0x800] ss:$16 sps:$4 sm:$0xff]   ;;  %v8008_v63 = vld [vmem:[#allocation5 + $0x9c4] ss:$16 sps:$4 sm:$0xff]  }
 0x16b   : > { %4178 = vmatprep.subr.bf16.mxu1 %v8011_v56  ;;  %3650 = vmatmul.mubr.bf16.gmra.mxu0 %v9242_v13  ;;  %v8018_v53 = vld [vmem:[#allocation5 + $0xa00] ss:$16 sps:$4 sm:$0xff]   ;;  %v3193_v13 = vand.u32 %v8029_v26, %v9260_v52  ;;  %v8035_v0 = vld [vmem:[#allocation5 + $0xb04] ss:$16 sps:$4 sm:$0xff]  }
 0x16c   : > { %3843 = vmatmul.mubr.bf16.gmra.mxu1 %v9244_v57  ;;  %3659 = vmatprep.mubr.bf16.mxu0 %v9246_v24  ;;  %v8027_v56 = vld [vmem:[#allocation5 + $0xb20] ss:$16 sps:$4 sm:$0x1f]   ;;  %v8002_v57 = vld [vmem:[#allocation5 + $0x9e4] ss:$16 sps:$4 sm:$0xff]  }
 0x16d   : > { %3852 = vmatprep.mubr.bf16.mxu1 %v9248_v58  ;;  %3986 = vmatpush1.bf16.msra.mxu0 %v7991_v30  ;;  %v9270_v58 = vpack.c.bf16 %v519_v27, %v507_v49  ;;  %v9272_v30 = vpack.c.bf16 %v521_v23, %v509_v51  ;;  %v508_v25 = vld [vmem:[%s8826_s24 + $0x3f0] sm:$0xff]  ;;  %v531_v49 = vld [vmem:[%s8826_s24 + $0x4a8] sm:$0xff]  ;;  %v533_v51 = vld [vmem:[%s8826_s24 + $0x4b8] sm:$0xff] }
 0x16e   : > { %4179 = vmatpush1.bf16.msra.mxu1 %v8009_v14  ;;  %3987 = vmatprep.subr.bf16.mxu0 %v7999_v41  ;;  %v8000_v14 = vld [vmem:[#allocation5 + $0x9e0] ss:$16 sps:$4 sm:$0xff]   ;;  %v3190_v41 = vand.u32 %v8027_v56, %v9260_v52  ;;  %v543_v27 = vld [vmem:[%s8826_s24 + $0x508] sm:$0xff]  ;;  %v8014_v23 = vld [vmem:[#allocation5 + $0x9a4] ss:$16 sps:$4 sm:$0xff]  }
 0x16f   : > { %4180 = vmatprep.subr.bf16.mxu1 %v8020_v42  ;;  %12230 = vst [vmem:[#allocation100_spill] sm:$0xff] %v9270_v58  ;;  %12231 = vst [vmem:[#allocation101_spill] sm:$0xff] %v9272_v30  ;;  %v506_v42 = vld [vmem:[%s8826_s24 + $0x3e0] sm:$0xff]  ;;  %v520_v26 = vld [vmem:[%s8826_s24 + $0x450] sm:$0xff] }
 0x170   : > { %v9287_v56 = vpack.c.bf16 %v518_v29, %v506_v42  ;;  %v8017_v42 = vld [vmem:[#allocation5 + $0x984] ss:$16 sps:$4 sm:$0xff]   ;;  %v555_v29 = vld [vmem:[%s8826_s24 + $0x568] sm:$0xff] }
 0x171   : > { %3988 = vmatpush1.bf16.msra.mxu0 %v7997_v50  ;;  %v545_v50 = vld [vmem:[%s8826_s24 + $0x518] sm:$0xff] }
 0x172   : > { %4181 = vmatpush1.bf16.msra.mxu1 %v8018_v53  ;;  %3989 = vmatprep.subr.bf16.mxu0 %v8002_v57  ;;  %v8006_v57 = vld [vmem:[#allocation5 + $0x9c0] ss:$16 sps:$4 sm:$0xff]   ;;  %v8044_v53 = vld [vmem:[#allocation5 + $0x2ec] ss:$16 sps:$4 sm:$0xff]   ;;  %12232 = vst [vmem:[#allocation102_spill] sm:$0xff] %v9287_v56 }
 0x173   : > { %4194 = vmatprep.subr.bf16.mxu1 %v3193_v13  ;;  %3660 = vmatmul.mubr.bf16.gmra.mxu0 %v9266_v12  ;;  %v8033_v13 = vld [vmem:[#allocation5 + $0xb00] ss:$16 sps:$4 sm:$0xff]  }
 0x174   : > { %3853 = vmatmul.mubr.bf16.gmra.mxu1 %v9268_v28  ;;  %3669 = vmatprep.mubr.bf16.mxu0 %v9270_v58  ;;  %v9289_v58 = vpack.c.bf16 %v520_v26, %v508_v25  ;;  %v530_v28 = vld [vmem:[%s8826_s24 + $0x4a0] sm:$0xff]  ;;  %v532_v12 = vld [vmem:[%s8826_s24 + $0x4b0] sm:$0xff]  ;;  %v567_v25 = vld [vmem:[%s8826_s24 + $0x5c8] sm:$0xff] }
 0x175   : > { %3862 = vmatprep.mubr.bf16.mxu1 %v9272_v30  ;;  %3990 = vmatpush2.bf16.msra.mxu0 %v8000_v14  ;;  %v9291_v30 = vpack.c.bf16 %v543_v27, %v531_v49  ;;  %v9293_v14 = vpack.c.bf16 %v545_v50, %v533_v51  ;;  %v557_v26 = vld [vmem:[%s8826_s24 + $0x578] sm:$0xff]  ;;  %v8015_v27 = vld [vmem:[#allocation5 + $0x980] ss:$16 sps:$4 sm:$0xff]   ;;  %v8023_v51 = vld [vmem:[#allocation5 + $0x964] ss:$16 sps:$4 sm:$0xff]  }
 0x176   : > { %4195 = vmatpush2.bf16.msra.mxu1 %v3190_v41  ;;  %3991 = vmatprep.subr.bf16.mxu0 %v8008_v63  ;;  %12233 = vst [vmem:[#allocation103_spill] sm:$0xff] %v9289_v58  ;;  %v8012_v41 = vld [vmem:[#allocation5 + $0x9a0] ss:$16 sps:$4 sm:$0xff]   ;;  %v569_v49 = vld [vmem:[%s8826_s24 + $0x5d8] sm:$0xff] }
 0x177   : > { %4196 = vmatprep.subr.bf16.mxu1 %v8035_v0  ;;  %12234 = vst [vmem:[#allocation104_spill] sm:$0xff] %v9291_v30  ;;  %12235 = vst [vmem:[#allocation105_spill] sm:$0xff] %v9293_v14  ;;  %v542_v63 = vld [vmem:[%s8826_s24 + $0x500] sm:$0xff]  ;;  %v544_v0 = vld [vmem:[%s8826_s24 + $0x510] sm:$0xff] }
 0x178   : > { %v9307_v50 = vpack.c.bf16 %v542_v63, %v530_v28  ;;  %v579_v28 = vld [vmem:[%s8826_s24 + $0x628] sm:$0xff]  ;;  %v581_v63 = vld [vmem:[%s8826_s24 + $0x638] sm:$0xff] }
 0x179   : > { %3992 = vmatpush2.bf16.msra.mxu0 %v8006_v57  ;;  %v9309_v57 = vpack.c.bf16 %v544_v0, %v532_v12  ;;  %v591_v12 = vld [vmem:[%s8826_s24 + $0x688] sm:$0xff]  ;;  %v593_v0 = vld [vmem:[%s8826_s24 + $0x698] sm:$0xff] }
 0x17a   : > { %4197 = vmatpush2.bf16.msra.mxu1 %v8033_v13  ;;  %3993 = vmatprep.subr.bf16.mxu0 %v8014_v23  ;;  %12236 = vst [vmem:[#allocation106_spill] sm:$0xff] %v9307_v50  ;;  %v9311_v13 = vpack.c.bf16 %v567_v25, %v555_v29  ;;  %v9313_v23 = vpack.c.bf16 %v569_v49, %v557_v26  ;;  %v8024_v29 = vld [vmem:[#allocation5 + $0x940] ss:$16 sps:$4 sm:$0xff]   ;;  %v11912_v25 = vlaneseq  ;;  %v8032_v26 = vld [vmem:[#allocation5 + $0x924] ss:$16 sps:$4 sm:$0xff]  }
 0x17b   : > { %4552 = vmatprep.subr.bf16.mxu1 %v8044_v53  ;;  %3670 = vmatmul.mubr.bf16.gmra.mxu0 %v9287_v56  ;;  %12237 = vst [vmem:[#allocation107_spill] sm:$0xff] %v9309_v57  ;;  %v8021_v53 = vld [vmem:[#allocation5 + $0x960] ss:$16 sps:$4 sm:$0xff]  }
 0x17c   : > { %3863 = vmatmul.mubr.bf16.gmra.mxu1 %v9289_v58  ;;  %3679 = vmatprep.mubr.bf16.mxu0 %v9291_v30  ;;  %12238 = vst [vmem:[#allocation108_spill] sm:$0xff] %v9311_v13  ;;  %12239 = vst [vmem:[#allocation109_spill] sm:$0xff] %v9313_v23  ;;  %v554_v30 = vld [vmem:[%s8826_s24 + $0x560] sm:$0xff] }
 0x17d   : > { %3872 = vmatprep.mubr.bf16.mxu1 %v9293_v14  ;;  %3994 = vmatpush2.bf16.msra.mxu0 %v8012_v41  ;;  %v566_v58 = vld [vmem:[%s8826_s24 + $0x5c0] sm:$0xff]  ;;  %v556_v14 = vld [vmem:[%s8826_s24 + $0x570] sm:$0xff] }
 0x17e   : > { %3995 = vmatprep.subr.bf16.mxu0 %v8017_v42  ;;  %v568_v41 = vld [vmem:[%s8826_s24 + $0x5d0] sm:$0xff]  ;;  %v9327_v49 = vpack.c.bf16 %v566_v58, %v554_v30 }
 0x17f   : > { %v8026_v42 = vld [vmem:[#allocation5 + $0x944] ss:$16 sps:$4 sm:$0xff]  }
 0x180   : > { %12240 = vst [vmem:[#allocation110_spill] sm:$0xff] %v9327_v49  ;;  %v592_v58 = vld [vmem:[%s8826_s24 + $0x690] sm:$0xff] }
 0x181   : > { %3996 = vmatpush2.bf16.msra.mxu0 %v8015_v27  ;;  %v9329_v27 = vpack.c.bf16 %v568_v41, %v556_v14  ;;  %v8038_v30 = vld [vmem:[#allocation5 + $0x904] ss:$16 sps:$4 sm:$0xff]   ;;  %v1318_v14 = vld [vmem:[#allocation7] sm:$0xf]  ;;  %v603_v41 = vld [vmem:[%s8826_s24 + $0x6e8] sm:$0xff] }
 0x182   : > { %3997 = vmatprep.subr.bf16.mxu0 %v8023_v51  ;;  %v9331_v51 = vpack.c.bf16 %v591_v12, %v579_v28  ;;  %v615_v28 = vld [vmem:[%s8826_s24 + $0x748] sm:$0xff]  ;;  %v605_v12 = vld [vmem:[%s8826_s24 + $0x6f8] sm:$0xff] }
 0x183   : > { %3680 = vmatmul.mubr.bf16.gmra.mxu0 %v9307_v50  ;;  %12241 = vst [vmem:[#allocation111_spill] sm:$0xff] %v9329_v27  ;;  %v580_v50 = vld [vmem:[%s8826_s24 + $0x630] sm:$0xff] }
 0x184   : > { %3873 = vmatmul.mubr.bf16.gmra.mxu1 %v9309_v57  ;;  %3689 = vmatprep.mubr.bf16.mxu0 %v9311_v13  ;;  %12242 = vst [vmem:[#allocation112_spill] sm:$0xff] %v9331_v51  ;;  %v9333_v57 = vpack.c.bf16 %v593_v0, %v581_v63  ;;  %v9336_v13 = vshrl.u32 %v11912_v25, 7  ;;  %v617_v63 = vld [vmem:[%s8826_s24 + $0x758] sm:$0xff]  ;;  %v8036_v0 = vld [vmem:[#allocation5 + $0x900] ss:$16 sps:$4 sm:$0xff]  }
 0x185   : > { %3882 = vmatprep.mubr.bf16.mxu1 %v9313_v23  ;;  %3998 = vmatpush2.bf16.msra.mxu0 %v8021_v53  ;;  %v8030_v23 = vld [vmem:[#allocation5 + $0x920] ss:$16 sps:$4 sm:$0xff]   ;;  %v8041_v25 = vld [vmem:[#allocation5 + $0xec] ss:$16 sps:$4 sm:$0xff]   ;;  %v9363_v56 = vpack.c.bf16 %v617_v63, %v605_v12 }
 0x186   : > { %3999 = vmatprep.subr.bf16.mxu0 %v8026_v42  ;;  %12243 = vst [vmem:[#allocation113_spill] sm:$0xff] %v9333_v57  ;;  %12244 = vst [vmem:[#allocation114_spill] sm:$0xff] %v9336_v13  ;;  %v578_v53 = vld [vmem:[%s8826_s24 + $0x620] sm:$0xff]  ;;  %v629_v12 = vld [vmem:[%s8826_s24 + $0x7b8] sm:$0xff] }
 0x187   : > { %v590_v42 = vld [vmem:[%s8826_s24 + $0x680] sm:$0xff]  ;;  %12249 = vst [vmem:[#allocation119_spill] sm:$0xff] %v9363_v56  ;;  %v641_v63 = vld [vmem:[%s8826_s24 + $0x818] sm:$0xff] }
 0x189   : > { %4000 = vmatpush2.bf16.msra.mxu0 %v8024_v29  ;;  %v9351_v29 = vsub.s32 0, %v9336_v13 }
 0x18a   : > { %4001 = vmatprep.subr.bf16.mxu0 %v8032_v26  ;;  %v11920_v26 = vsub.s32 1, %v9336_v13 }
 0x18b   : > { %3690 = vmatmul.mubr.bf16.gmra.mxu0 %v9327_v49  ;;  %12245 = vst [vmem:[#allocation115_spill] sm:$0xff] %v9351_v29  ;;  %v9356_v49 = vpack.c.bf16 %v592_v58, %v580_v50  ;;  %v616_v50 = vld [vmem:[%s8826_s24 + $0x750] sm:$0xff] }
 0x18c   : > { %3883 = vmatmul.mubr.bf16.gmra.mxu1 %v9329_v27  ;;  %3699 = vmatprep.mubr.bf16.mxu0 %v9331_v51  ;;  %v9354_v27 = vpack.c.bf16 %v590_v42, %v578_v53  ;;  %v9359_v51 = vrot.slane %v1318_v14, %v9351_v29  ;;  %v602_v53 = vld [vmem:[%s8826_s24 + $0x6e0] sm:$0xff] }
 0x18d   : > { %3892 = vmatprep.mubr.bf16.mxu1 %v9333_v57  ;;  %4002 = vmatpush2.bf16.msra.mxu0 %v8030_v23  ;;  %12247 = vst [vmem:[#allocation117_spill] sm:$0xff] %v9356_v49  ;;  %v9361_v57 = vpack.c.bf16 %v615_v28, %v603_v41  ;;  %v9367_v23 = vrot.slane %v1318_v14, %v11920_v26  ;;  %v614_v42 = vld [vmem:[%s8826_s24 + $0x740] sm:$0xff]  ;;  %v627_v41 = vld [vmem:[%s8826_s24 + $0x7a8] sm:$0xff] }
 0x18e   : > { %4003 = vmatprep.subr.bf16.mxu0 %v8038_v30  ;;  %12246 = vst [vmem:[#allocation116_spill] sm:$0xff] %v9354_v27  ;;  %v604_v30 = vld [vmem:[%s8826_s24 + $0x6f0] sm:$0xff]  ;;  %v639_v28 = vld [vmem:[%s8826_s24 + $0x808] sm:$0xff]  ;;  %v9385_v13 = vpack.c.bf16 %v614_v42, %v602_v53  ;;  %v626_v42 = vld [vmem:[%s8826_s24 + $0x7a0] sm:$0xff] }
 0x18f   : > { %12248 = vst [vmem:[#allocation118_spill] sm:$0xff] %v9361_v57  ;;  %v9387_v24 = vpack.c.bf16 %v616_v50, %v604_v30  ;;  %v638_v30 = vld [vmem:[%s8826_s24 + $0x800] sm:$0xff] }
 0x190   : > { %12250 = vst [vmem:[#allocation120_spill] sm:$0xff] %v9385_v13 }
 0x191   : > { %4004 = vmatpush2.bf16.msra.mxu0 %v8036_v0  ;;  %12251 = vst [vmem:[#allocation121_spill] sm:$0xff] %v9387_v24 }
 0x192   : > { %4359 = vmatprep.subr.bf16.mxu0 %v8041_v25 }
 0x193   : > { %v3235_v58 = vpop.f32.mrf.mxu0  ;;  %3700 = vmatmul.mubr.bf16.gmra.mxu0 %v9354_v27 }
 0x194   : > { %v3428_v52 = vpop.f32.mrf.mxu1  ;;  %3893 = vmatmul.mubr.bf16.gmra.mxu1 %v9356_v49  ;;  %v3236_v0 = vadd.f32 %v3235_v58, %v9359_v51  ;;  %3709 = vmatprep.mubr.bf16.mxu0 %v9361_v57  ;;  %v9392_v57 = vpack.c.bf16 %v639_v28, %v627_v41  ;;  %v663_v41 = vld [vmem:[%s8826_s24 + $0x8c8] sm:$0xff]  ;;  %v653_v28 = vld [vmem:[%s8826_s24 + $0x878] sm:$0xff] }
 0x195   : > { %3902 = vmatprep.mubr.bf16.mxu1 %v9363_v56  ;;  %v3237_v14 = vpop.f32.mrf.mxu0 }
 0x196   : > { %v3430_v26 = vpop.f32.mrf.mxu1  ;;  %v9382_v25 = vadd.f32 %v3428_v52, %v3236_v0  ;;  %v3238_v29 = vadd.f32 %v3237_v14, %v9367_v23  ;;  %12252 = vst [vmem:[#allocation122_spill] sm:$0xff] %v9392_v57  ;;  %v9394_v52 = vpack.c.bf16 %v641_v63, %v629_v12  ;;  %v665_v12 = vld [vmem:[%s8826_s24 + $0x8d8] sm:$0xff] }
 0x197   : > { %v3239_v49 = vpop.f32.mrf.mxu0 }
 0x198   : > { %v3432_v27 = vpop.f32.mrf.mxu1  ;;  %v9389_v58 = vadd.f32 %v3430_v26, %v3238_v29  ;;  %v3240_v56 = vadd.f32 %v3239_v49, %v9359_v51  ;;  %12253 = vst [vmem:[#allocation123_spill] sm:$0xff] %v9394_v52  ;;  %v628_v29 = vld [vmem:[%s8826_s24 + $0x7b0] sm:$0xff]  ;;  %v651_v49 = vld [vmem:[%s8826_s24 + $0x868] sm:$0xff] }
 0x199   : > { %v3241_v0 = vpop.f32.mrf.mxu0  ;;  %v640_v26 = vld [vmem:[%s8826_s24 + $0x810] sm:$0xff] }
 0x19a   : > { %v3434_v14 = vpop.f32.mrf.mxu1  ;;  %v9396_v11 = vadd.f32 %v3432_v27, %v3240_v56  ;;  %v3242_v53 = vadd.f32 %v3241_v0, %v9367_v23 }
 0x19b   : > { %v3245_v50 = vpop.f32.mrf.mxu0  ;;  %3710 = vmatmul.mubr.bf16.gmra.mxu0 %v9385_v13 }
 0x19c   : > { %v3438_v10 = vpop.f32.mrf.mxu1  ;;  %3903 = vmatmul.mubr.bf16.gmra.mxu1 %v9387_v24  ;;  %v9409_v63 = vadd.f32 %v3434_v14, %v3242_v53  ;;  %v3246_v56 = vadd.f32 %v3245_v50, %v9359_v51  ;;  %3719 = vmatprep.mubr.bf16.mxu0 %v9392_v57  ;;  %v9417_v14 = vpack.c.bf16 %v638_v30, %v626_v42  ;;  %v650_v30 = vld [vmem:[%s8826_s24 + $0x860] sm:$0xff] }
 0x19d   : > { %3912 = vmatprep.mubr.bf16.mxu1 %v9394_v52  ;;  %v3247_v27 = vpop.f32.mrf.mxu0  ;;  %v9419_v53 = vpack.c.bf16 %v640_v26, %v628_v29  ;;  %v9424_v57 = vpack.c.bf16 %v663_v41, %v651_v49  ;;  %v662_v29 = vld [vmem:[%s8826_s24 + $0x8c0] sm:$0xff]  ;;  %v664_v26 = vld [vmem:[%s8826_s24 + $0x8d0] sm:$0xff]  ;;  %v687_v49 = vld [vmem:[%s8826_s24 + $0x988] sm:$0xff] }
 0x19e   : > { %v3440_v0 = vpop.f32.mrf.mxu1  ;;  %v9414_v9 = vadd.f32 %v3438_v10, %v3246_v56  ;;  %v3248_v24 = vadd.f32 %v3247_v27, %v9367_v23  ;;  %12254 = vst [vmem:[#allocation124_spill] sm:$0xff] %v9417_v14  ;;  %v9426_v10 = vpack.c.bf16 %v665_v12, %v653_v28  ;;  %v677_v41 = vld [vmem:[%s8826_s24 + $0x938] sm:$0xff] }
 0x19f   : > { %v3249_v13 = vpop.f32.mrf.mxu0  ;;  %12255 = vst [vmem:[#allocation125_spill] sm:$0xff] %v9419_v53  ;;  %12256 = vst [vmem:[#allocation126_spill] sm:$0xff] %v9424_v57  ;;  %v689_v28 = vld [vmem:[%s8826_s24 + $0x998] sm:$0xff] }
 0x1a0   : > { %v3442_v48 = vpop.f32.mrf.mxu1  ;;  %v9421_v50 = vadd.f32 %v3440_v0, %v3248_v24  ;;  %v3250_v52 = vadd.f32 %v3249_v13, %v9359_v51  ;;  %12257 = vst [vmem:[#allocation127_spill] sm:$0xff] %v9426_v10  ;;  %v652_v24 = vld [vmem:[%s8826_s24 + $0x870] sm:$0xff]  ;;  %v675_v13 = vld [vmem:[%s8826_s24 + $0x928] sm:$0xff] }
 0x1a1   : > { %v3251_v56 = vpop.f32.mrf.mxu0 }
 0x1a2   : > { %v3444_v27 = vpop.f32.mrf.mxu1  ;;  %v9428_v47 = vadd.f32 %v3442_v48, %v3250_v52  ;;  %v3252_v42 = vadd.f32 %v3251_v56, %v9367_v23 }
 0x1a3   : > { %v3255_v0 = vpop.f32.mrf.mxu0  ;;  %3720 = vmatmul.mubr.bf16.gmra.mxu0 %v9417_v14 }
 0x1a4   : > { %v3448_v34 = vpop.f32.mrf.mxu1  ;;  %3913 = vmatmul.mubr.bf16.gmra.mxu1 %v9419_v53  ;;  %v9441_v12 = vadd.f32 %v3444_v27, %v3252_v42  ;;  %v3256_v48 = vadd.f32 %v3255_v0, %v9359_v51  ;;  %3729 = vmatprep.mubr.bf16.mxu0 %v9424_v57  ;;  %v9449_v27 = vpack.c.bf16 %v662_v29, %v650_v30  ;;  %v674_v29 = vld [vmem:[%s8826_s24 + $0x920] sm:$0xff] }
 0x1a5   : > { %3922 = vmatprep.mubr.bf16.mxu1 %v9426_v10  ;;  %v3257_v52 = vpop.f32.mrf.mxu0  ;;  %v9451_v42 = vpack.c.bf16 %v664_v26, %v652_v24  ;;  %v9456_v57 = vpack.c.bf16 %v687_v49, %v675_v13  ;;  %v686_v24 = vld [vmem:[%s8826_s24 + $0x980] sm:$0xff]  ;;  %v688_v26 = vld [vmem:[%s8826_s24 + $0x990] sm:$0xff]  ;;  %v711_v13 = vld [vmem:[%s8826_s24 + $0xa48] sm:$0xff] }
 0x1a6   : > { %v3450_v56 = vpop.f32.mrf.mxu1  ;;  %v9446_v31 = vadd.f32 %v3448_v34, %v3256_v48  ;;  %v3258_v53 = vadd.f32 %v3257_v52, %v9367_v23  ;;  %12258 = vst [vmem:[#allocation128_spill] sm:$0xff] %v9449_v27  ;;  %v9458_v34 = vpack.c.bf16 %v689_v28, %v677_v41  ;;  %v701_v49 = vld [vmem:[%s8826_s24 + $0x9f8] sm:$0xff] }
 0x1a7   : > { %v3259_v14 = vpop.f32.mrf.mxu0  ;;  %12259 = vst [vmem:[#allocation129_spill] sm:$0xff] %v9451_v42  ;;  %12260 = vst [vmem:[#allocation130_spill] sm:$0xff] %v9456_v57  ;;  %v713_v41 = vld [vmem:[%s8826_s24 + $0xa58] sm:$0xff] }
 0x1a8   : > { %v3452_v4 = vpop.f32.mrf.mxu1  ;;  %v9453_v0 = vadd.f32 %v3450_v56, %v3258_v53  ;;  %v3260_v10 = vadd.f32 %v3259_v14, %v9359_v51  ;;  %12261 = vst [vmem:[#allocation131_spill] sm:$0xff] %v9458_v34  ;;  %v676_v53 = vld [vmem:[%s8826_s24 + $0x930] sm:$0xff]  ;;  %v699_v14 = vld [vmem:[%s8826_s24 + $0x9e8] sm:$0xff] }
 0x1a9   : > { %v3261_v48 = vpop.f32.mrf.mxu0 }
 0x1aa   : > { %v3454_v52 = vpop.f32.mrf.mxu1  ;;  %v9460_v3 = vadd.f32 %v3452_v4, %v3260_v10  ;;  %v3262_v30 = vadd.f32 %v3261_v48, %v9367_v23 }
 0x1ab   : > { %v3265_v56 = vpop.f32.mrf.mxu0  ;;  %3730 = vmatmul.mubr.bf16.gmra.mxu0 %v9449_v27 }
 0x1ac   : > { %v3458_v2 = vpop.f32.mrf.mxu1  ;;  %3923 = vmatmul.mubr.bf16.gmra.mxu1 %v9451_v42  ;;  %v9473_v28 = vadd.f32 %v3454_v52, %v3262_v30  ;;  %v3266_v4 = vadd.f32 %v3265_v56, %v9359_v51  ;;  %3739 = vmatprep.mubr.bf16.mxu0 %v9456_v57  ;;  %v9481_v52 = vpack.c.bf16 %v686_v24, %v674_v29  ;;  %v698_v24 = vld [vmem:[%s8826_s24 + $0x9e0] sm:$0xff] }
 0x1ad   : > { %3932 = vmatprep.mubr.bf16.mxu1 %v9458_v34  ;;  %v3267_v10 = vpop.f32.mrf.mxu0  ;;  %v9483_v30 = vpack.c.bf16 %v688_v26, %v676_v53  ;;  %v9488_v57 = vpack.c.bf16 %v711_v13, %v699_v14  ;;  %v710_v53 = vld [vmem:[%s8826_s24 + $0xa40] sm:$0xff]  ;;  %v712_v26 = vld [vmem:[%s8826_s24 + $0xa50] sm:$0xff]  ;;  %v735_v14 = vld [vmem:[%s8826_s24 + $0xb08] sm:$0xff] }
 0x1ae   : > { %v3460_v48 = vpop.f32.mrf.mxu1  ;;  %v9478_v1 = vadd.f32 %v3458_v2, %v3266_v4  ;;  %v3268_v42 = vadd.f32 %v3267_v10, %v9367_v23  ;;  %12262 = vst [vmem:[#allocation132_spill] sm:$0xff] %v9481_v52  ;;  %v9490_v2 = vpack.c.bf16 %v713_v41, %v701_v49  ;;  %v725_v13 = vld [vmem:[%s8826_s24 + $0xab8] sm:$0xff] }
 0x1af   : > { %v3269_v27 = vpop.f32.mrf.mxu0  ;;  %12263 = vst [vmem:[#allocation133_spill] sm:$0xff] %v9483_v30  ;;  %12264 = vst [vmem:[#allocation134_spill] sm:$0xff] %v9488_v57  ;;  %v737_v49 = vld [vmem:[%s8826_s24 + $0xb18] sm:$0xff] }
 0x1b0   : > { %v3462_v36 = vpop.f32.mrf.mxu1  ;;  %v9485_v56 = vadd.f32 %v3460_v48, %v3268_v42  ;;  %v3270_v34 = vadd.f32 %v3269_v27, %v9359_v51  ;;  %12265 = vst [vmem:[#allocation135_spill] sm:$0xff] %v9490_v2  ;;  %v700_v42 = vld [vmem:[%s8826_s24 + $0x9f0] sm:$0xff]  ;;  %v723_v27 = vld [vmem:[%s8826_s24 + $0xaa8] sm:$0xff] }
 0x1b1   : > { %v3271_v4 = vpop.f32.mrf.mxu0 }
 0x1b2   : > { %v3464_v10 = vpop.f32.mrf.mxu1  ;;  %v9492_v35 = vadd.f32 %v3462_v36, %v3270_v34  ;;  %v3272_v29 = vadd.f32 %v3271_v4, %v9367_v23 }
 0x1b3   : > { %v3275_v48 = vpop.f32.mrf.mxu0  ;;  %3740 = vmatmul.mubr.bf16.gmra.mxu0 %v9481_v52 }
 0x1b4   : > { %v3468_v33 = vpop.f32.mrf.mxu1  ;;  %3933 = vmatmul.mubr.bf16.gmra.mxu1 %v9483_v30  ;;  %v9505_v41 = vadd.f32 %v3464_v10, %v3272_v29  ;;  %v3276_v36 = vadd.f32 %v3275_v48, %v9359_v51  ;;  %3749 = vmatprep.mubr.bf16.mxu0 %v9488_v57  ;;  %v9513_v10 = vpack.c.bf16 %v710_v53, %v698_v24  ;;  %v722_v53 = vld [vmem:[%s8826_s24 + $0xaa0] sm:$0xff] }
 0x1b5   : > { %3942 = vmatprep.mubr.bf16.mxu1 %v9490_v2  ;;  %v3277_v34 = vpop.f32.mrf.mxu0  ;;  %v9515_v29 = vpack.c.bf16 %v712_v26, %v700_v42  ;;  %v9520_v57 = vpack.c.bf16 %v735_v14, %v723_v27  ;;  %v734_v42 = vld [vmem:[%s8826_s24 + $0xb00] sm:$0xff]  ;;  %v736_v26 = vld [vmem:[%s8826_s24 + $0xb10] sm:$0xff]  ;;  %v759_v27 = vld [vmem:[%s8826_s24 + $0xbc8] sm:$0xff] }
 0x1b6   : > { %v3470_v4 = vpop.f32.mrf.mxu1  ;;  %v9510_v32 = vadd.f32 %v3468_v33, %v3276_v36  ;;  %v3278_v30 = vadd.f32 %v3277_v34, %v9367_v23  ;;  %12266 = vst [vmem:[#allocation136_spill] sm:$0xff] %v9513_v10  ;;  %v9522_v33 = vpack.c.bf16 %v737_v49, %v725_v13  ;;  %v749_v14 = vld [vmem:[%s8826_s24 + $0xb78] sm:$0xff] }
 0x1b7   : > { %v3279_v52 = vpop.f32.mrf.mxu0  ;;  %12267 = vst [vmem:[#allocation137_spill] sm:$0xff] %v9515_v29  ;;  %12268 = vst [vmem:[#allocation138_spill] sm:$0xff] %v9520_v57  ;;  %v761_v13 = vld [vmem:[%s8826_s24 + $0xbd8] sm:$0xff] }
 0x1b8   : > { %v3472_v8 = vpop.f32.mrf.mxu1  ;;  %v9517_v48 = vadd.f32 %v3470_v4, %v3278_v30  ;;  %v3280_v2 = vadd.f32 %v3279_v52, %v9359_v51  ;;  %12269 = vst [vmem:[#allocation139_spill] sm:$0xff] %v9522_v33  ;;  %v724_v30 = vld [vmem:[%s8826_s24 + $0xab0] sm:$0xff]  ;;  %v747_v52 = vld [vmem:[%s8826_s24 + $0xb68] sm:$0xff] }
 0x1b9   : > { %v3281_v36 = vpop.f32.mrf.mxu0 }
 0x1ba   : > { %v3474_v34 = vpop.f32.mrf.mxu1  ;;  %v9524_v7 = vadd.f32 %v3472_v8, %v3280_v2  ;;  %v3282_v24 = vadd.f32 %v3281_v36, %v9367_v23 }
 0x1bb   : > { %v3285_v4 = vpop.f32.mrf.mxu0  ;;  %3750 = vmatmul.mubr.bf16.gmra.mxu0 %v9513_v10 }
 0x1bc   : > { %v3478_v6 = vpop.f32.mrf.mxu1  ;;  %3943 = vmatmul.mubr.bf16.gmra.mxu1 %v9515_v29  ;;  %v9537_v49 = vadd.f32 %v3474_v34, %v3282_v24  ;;  %v3286_v8 = vadd.f32 %v3285_v4, %v9359_v51  ;;  %3759 = vmatprep.mubr.bf16.mxu0 %v9520_v57  ;;  %v9545_v34 = vpack.c.bf16 %v734_v42, %v722_v53  ;;  %v746_v42 = vld [vmem:[%s8826_s24 + $0xb60] sm:$0xff] }
 0x1bd   : > { %3952 = vmatprep.mubr.bf16.mxu1 %v9522_v33  ;;  %v3287_v2 = vpop.f32.mrf.mxu0  ;;  %v9547_v24 = vpack.c.bf16 %v736_v26, %v724_v30  ;;  %v9552_v57 = vpack.c.bf16 %v759_v27, %v747_v52  ;;  %v758_v30 = vld [vmem:[%s8826_s24 + $0xbc0] sm:$0xff]  ;;  %v760_v26 = vld [vmem:[%s8826_s24 + $0xbd0] sm:$0xff]  ;;  %v403_v52 = vld [vmem:[%s8826_s24 + $0xa8] sm:$0xff] }
 0x1be   : > { %v3480_v36 = vpop.f32.mrf.mxu1  ;;  %v9542_v5 = vadd.f32 %v3478_v6, %v3286_v8  ;;  %v3288_v29 = vadd.f32 %v3287_v2, %v9367_v23  ;;  %12270 = vst [vmem:[#allocation140_spill] sm:$0xff] %v9545_v34  ;;  %v9554_v6 = vpack.c.bf16 %v761_v13, %v749_v14  ;;  %v393_v27 = vld [vmem:[%s8826_s24 + $0x58] sm:$0xff] }
 0x1bf   : > { %v3289_v10 = vpop.f32.mrf.mxu0  ;;  %12271 = vst [vmem:[#allocation141_spill] sm:$0xff] %v9547_v24  ;;  %12272 = vst [vmem:[#allocation142_spill] sm:$0xff] %v9552_v57  ;;  %v405_v14 = vld [vmem:[%s8826_s24 + $0xb8] sm:$0xff] }
 0x1c0   : > { %v3482_v46 = vpop.f32.mrf.mxu1  ;;  %v9549_v4 = vadd.f32 %v3480_v36, %v3288_v29  ;;  %v3290_v33 = vadd.f32 %v3289_v10, %v9359_v51  ;;  %12273 = vst [vmem:[#allocation143_spill] sm:$0xff] %v9554_v6  ;;  %v748_v29 = vld [vmem:[%s8826_s24 + $0xb70] sm:$0xff]  ;;  %v391_v10 = vld [vmem:[%s8826_s24 + $0x48] sm:$0xff]  ;;  %v9586_v19 = vpack.c.bf16 %v405_v14, %v393_v27 }
 0x1c1   : > { %v3291_v8 = vpop.f32.mrf.mxu0  ;;  %v415_v27 = vld [vmem:[%s8826_s24 + $0x108] sm:$0xff] }
 0x1c2   : > { %v3484_v2 = vpop.f32.mrf.mxu1  ;;  %v9556_v45 = vadd.f32 %v3482_v46, %v3290_v33  ;;  %v3292_v53 = vadd.f32 %v3291_v8, %v9367_v23  ;;  %12277 = vst [vmem:[#allocation147_spill] sm:$0xff] %v9586_v19  ;;  %v427_v14 = vld [vmem:[%s8826_s24 + $0x168] sm:$0xff] }
 0x1c3   : > { %v3295_v36 = vpop.f32.mrf.mxu0  ;;  %3760 = vmatmul.mubr.bf16.gmra.mxu0 %v9545_v34  ;;  %v9617_v59 = vpack.c.bf16 %v427_v14, %v415_v27  ;;  %v453_v27 = vld [vmem:[%s8826_s24 + $0x238] sm:$0xff] }
 0x1c4   : > { %v3488_v44 = vpop.f32.mrf.mxu1  ;;  %3953 = vmatmul.mubr.bf16.gmra.mxu1 %v9547_v24  ;;  %v9569_v13 = vadd.f32 %v3484_v2, %v3292_v53  ;;  %v3296_v46 = vadd.f32 %v3295_v36, %v9359_v51  ;;  %3769 = vmatprep.mubr.bf16.mxu0 %v9552_v57  ;;  %v9577_v2 = vpack.c.bf16 %v758_v30, %v746_v42  ;;  %v390_v42 = vld [vmem:[%s8826_s24 + $0x40] sm:$0xff]  ;;  %v8053_v14 = vld [vmem:[#allocation5 + $0xac] ss:$16 sps:$4 sm:$0xff]  }
 0x1c5   : > { %3962 = vmatprep.mubr.bf16.mxu1 %v9554_v6  ;;  %v3297_v33 = vpop.f32.mrf.mxu0  ;;  %v9579_v53 = vpack.c.bf16 %v760_v26, %v748_v29  ;;  %v9584_v57 = vpack.c.bf16 %v403_v52, %v391_v10  ;;  %v402_v30 = vld [vmem:[%s8826_s24 + $0xa0] sm:$0xff]  ;;  %v392_v29 = vld [vmem:[%s8826_s24 + $0x50] sm:$0xff]  ;;  %12280 = vst [vmem:[#allocation150_spill] sm:$0xff] %v9617_v59 }
 0x1c6   : > { %v3490_v8 = vpop.f32.mrf.mxu1  ;;  %v9574_v43 = vadd.f32 %v3488_v44, %v3296_v46  ;;  %v3298_v24 = vadd.f32 %v3297_v33, %v9367_v23  ;;  %12274 = vst [vmem:[#allocation144_spill] sm:$0xff] %v9577_v2 }
 0x1c7   : > { %v3299_v34 = vpop.f32.mrf.mxu0  ;;  %12275 = vst [vmem:[#allocation145_spill] sm:$0xff] %v9579_v53  ;;  %12276 = vst [vmem:[#allocation146_spill] sm:$0xff] %v9584_v57 }
 0x1c8   : > { %v3492_v20 = vpop.f32.mrf.mxu1  ;;  %v9581_v36 = vadd.f32 %v3490_v8, %v3298_v24  ;;  %v3300_v6 = vadd.f32 %v3299_v34, %v9359_v51  ;;  %v404_v24 = vld [vmem:[%s8826_s24 + $0xb0] sm:$0xff] }
 0x1c9   : > { %v3301_v44 = vpop.f32.mrf.mxu0 }
 0x1ca   : > { %v3494_v46 = vpop.f32.mrf.mxu1  ;;  %v9588_v33 = vadd.f32 %v3492_v20, %v3300_v6  ;;  %v3302_v16 = vadd.f32 %v3301_v44, %v9367_v23 }
 0x1cb   : > { %v3305_v26 = vpop.f32.mrf.mxu0  ;;  %3770 = vmatmul.mubr.bf16.gmra.mxu0 %v9577_v2  ;;  %v8039_v2 = vld [vmem:[#allocation5 + $0xe8] ss:$16 sps:$4 sm:$0xff]  }
 0x1cc   : > { %v3498_v34 = vpop.f32.mrf.mxu1  ;;  %3963 = vmatmul.mubr.bf16.gmra.mxu1 %v9579_v53  ;;  %v9597_v10 = vadd.f32 %v3494_v46, %v3302_v16  ;;  %v3306_v20 = vadd.f32 %v3305_v26, %v9359_v51  ;;  %4005 = vmatprep.mubr.bf16.mxu0 %v9584_v57  ;;  %v417_v53 = vld [vmem:[%s8826_s24 + $0x118] sm:$0xff]  ;;  %v9610_v57 = vpack.c.bf16 %v402_v30, %v390_v42 }
 0x1cd   : > { %7573 = vmatprep.mubr.msk.bf16.mxu1 %vm3136_vm2, %v9586_v19  ;;  %v3307_v6 = vpop.f32.mrf.mxu0  ;;  %v429_v16 = vld [vmem:[%s8826_s24 + $0x178] sm:$0xff]  ;;  %v9612_v19 = vpack.c.bf16 %v404_v24, %v392_v29  ;;  %v414_v29 = vld [vmem:[%s8826_s24 + $0x100] sm:$0xff] }
 0x1ce   : > { %v3500_v52 = vpop.f32.mrf.mxu1  ;;  %v9605_v8 = vadd.f32 %v3498_v34, %v3306_v20  ;;  %v3308_v44 = vadd.f32 %v3307_v6, %v9367_v23  ;;  %12278 = vst [vmem:[#allocation148_spill] sm:$0xff] %v9610_v57  ;;  %v8047_v20 = vld [vmem:[#allocation5 + $0xcc] ss:$16 sps:$4 sm:$0xff]   ;;  %v9619_v40 = vpack.c.bf16 %v429_v16, %v417_v53  ;;  %v426_v24 = vld [vmem:[%s8826_s24 + $0x160] sm:$0xff] }
 0x1cf   : > { %v3309_v46 = vpop.f32.mrf.mxu0  ;;  %12279 = vst [vmem:[#allocation149_spill] sm:$0xff] %v9612_v19  ;;  %v8050_v6 = vld [vmem:[#allocation5 + $0x2cc] ss:$16 sps:$4 sm:$0xff]  }
 0x1d0   : > { %v3502_v26 = vpop.f32.mrf.mxu1  ;;  %v9614_v62 = vadd.f32 %v3500_v52, %v3308_v44  ;;  %v3310_v34 = vadd.f32 %v3309_v46, %v9359_v51  ;;  %12281 = vst [vmem:[#allocation151_spill] sm:$0xff] %v9619_v40  ;;  %v416_v52 = vld [vmem:[%s8826_s24 + $0x110] sm:$0xff]  ;;  %v8045_v46 = vld [vmem:[#allocation5 + $0xc8] ss:$16 sps:$4 sm:$0xff]   ;;  %v8056_v16 = vld [vmem:[#allocation5 + $0x2ac] ss:$16 sps:$4 sm:$0xff]  }
 0x1d1   : > { %v3311_v61 = vpop.f32.mrf.mxu0  ;;  %v428_v44 = vld [vmem:[%s8826_s24 + $0x170] sm:$0xff]  ;;  %v441_v53 = vld [vmem:[%s8826_s24 + $0x1d8] sm:$0xff] }
 0x1d2   : > { %v3504_v60 = vpop.f32.mrf.mxu1  ;;  %v9621_v42 = vadd.f32 %v3502_v26, %v3310_v34  ;;  %v3312_v30 = vadd.f32 %v3311_v61, %v9367_v23 }
 0x1d3   : > { %v3315_v22 = vpop.f32.mrf.mxu0  ;;  %4006 = vmatmul.mubr.bf16.vlgmr.msra.gmra.mxu0 %v9610_v57 }
 0x1d4   : > { %v3508_v21 = vpop.f32.mrf.mxu1  ;;  %4199 = vmatmul.mubr.bf16.vlgmr.msra.gmra.mxu1 %v9612_v19  ;;  %v9634_v26 = vadd.f32 %v3504_v60, %v3312_v30  ;;  %v3316_v61 = vadd.f32 %v3315_v22, %v9359_v51  ;;  %4360 = vmatpush1.bf16.msra.mxu0 %v8039_v2  ;;  %v9643_v30 = vpack.c.bf16 %v426_v24, %v414_v29  ;;  %v8051_v2 = vld [vmem:[#allocation5 + $0xa8] ss:$16 sps:$4 sm:$0xff]   ;;  %v8062_v29 = vld [vmem:[#allocation5 + $0x28c] ss:$16 sps:$4 sm:$0xff]  }
 0x1d5   : > { %4553 = vmatpush1.bf16.msra.mxu1 %v8042_v15  ;;  %v3317_v34 = vpop.f32.mrf.mxu0  ;;  %4015 = vmatprep.mubr.bf16.mxu0 %v9617_v59  ;;  %v9645_v22 = vpack.c.bf16 %v428_v44, %v416_v52  ;;  %v9647_v15 = vpack.c.bf16 %v451_v37, %v439_v38  ;;  %v8054_v59 = vld [vmem:[#allocation5 + $0x2a8] ss:$16 sps:$4 sm:$0xff]   ;;  %v440_v52 = vld [vmem:[%s8826_s24 + $0x1d0] sm:$0xff] }
 0x1d6   : > { %v3510_v18 = vpop.f32.mrf.mxu1  ;;  %7574 = vmatprep.mubr.msk.bf16.mxu1 %vm3136_vm2, %v9619_v40  ;;  %v9640_v57 = vadd.f32 %v3508_v21, %v3316_v61  ;;  %v3318_v19 = vadd.f32 %v3317_v34, %v9367_v23  ;;  %4361 = vmatprep.subr.bf16.mxu0 %v8047_v20  ;;  %12282 = vst [vmem:[#allocation152_spill] sm:$0xff] %v9643_v30  ;;  %v465_v61 = vld [vmem:[%s8826_s24 + $0x298] sm:$0xff] }
 0x1d7   : > { %4554 = vmatprep.subr.bf16.mxu1 %v8050_v6  ;;  %v3319_v17 = vpop.f32.mrf.mxu0  ;;  %12283 = vst [vmem:[#allocation153_spill] sm:$0xff] %v9645_v22  ;;  %12284 = vst [vmem:[#allocation154_spill] sm:$0xff] %v9647_v15  ;;  %v9652_v20 = vpack.c.bf16 %v453_v27, %v441_v53  ;;  %v8059_v6 = vld [vmem:[#allocation5 + $0x8c] ss:$16 sps:$4 sm:$0xff]  }
 0x1d8   : > { %v3512_v60 = vpop.f32.mrf.mxu1  ;;  %v9649_v40 = vadd.f32 %v3510_v18, %v3318_v19  ;;  %v3320_v21 = vadd.f32 %v3319_v17, %v9359_v51  ;;  %4362 = vmatpush1.bf16.msra.mxu0 %v8045_v46  ;;  %v438_v19 = vld [vmem:[%s8826_s24 + $0x1c0] sm:$0xff]  ;;  %v463_v53 = vld [vmem:[%s8826_s24 + $0x288] sm:$0xff]  ;;  %v477_v34 = vld [vmem:[%s8826_s24 + $0x2f8] sm:$0xff] }
 0x1d9   : > { %4555 = vmatpush1.bf16.msra.mxu1 %v8048_v39  ;;  %12286 = vst [vmem:[#allocation156_spill] sm:$0xff] %v9652_v20  ;;  %v3321_v37 = vpop.f32.mrf.mxu0  ;;  %4363 = vmatprep.subr.bf16.mxu0 %v8053_v14  ;;  %v450_v17 = vld [vmem:[%s8826_s24 + $0x220] sm:$0xff]  ;;  %v452_v39 = vld [vmem:[%s8826_s24 + $0x230] sm:$0xff]  ;;  %v475_v27 = vld [vmem:[%s8826_s24 + $0x2e8] sm:$0xff] }
 0x1da   : > { %12285 = vst [vmem:[#allocation155_spill] sm:$0xff] %v9649_v40  ;;  %v3514_v38 = vpop.f32.mrf.mxu1  ;;  %4556 = vmatprep.subr.bf16.mxu1 %v8056_v16  ;;  %v9654_v24 = vadd.f32 %v3512_v60, %v3320_v21  ;;  %v3322_v18 = vadd.f32 %v3321_v37, %v9367_v23  ;;  %v8057_v14 = vld [vmem:[#allocation5 + $0x88] ss:$16 sps:$4 sm:$0xff]   ;;  %v8065_v40 = vld [vmem:[#allocation5 + $0x6c] ss:$16 sps:$4 sm:$0xff]  }
 0x1db   : > { %v3325_v44 = vpop.f32.mrf.mxu0  ;;  %4016 = vmatmul.mubr.bf16.gmra.mxu0 %v9643_v30  ;;  %v8060_v16 = vld [vmem:[#allocation5 + $0x288] ss:$16 sps:$4 sm:$0xff]  }
 0x1dc   : > { %12287 = vst [vmem:[#allocation157_spill] sm:$0xff] %v9654_v24  ;;  %v3518_v46 = vpop.f32.mrf.mxu1  ;;  %4209 = vmatmul.mubr.bf16.gmra.mxu1 %v9645_v22  ;;  %v9667_v60 = vadd.f32 %v3514_v38, %v3322_v18  ;;  %v3326_v21 = vadd.f32 %v3325_v44, %v9359_v51  ;;  %4025 = vmatprep.mubr.bf16.mxu0 %v9647_v15  ;;  %v8068_v38 = vld [vmem:[#allocation5 + $0x26c] ss:$16 sps:$4 sm:$0xff]  }
 0x1dd   : > { %7575 = vmatprep.mubr.msk.bf16.mxu1 %vm3136_vm2, %v9652_v20  ;;  %v3327_v37 = vpop.f32.mrf.mxu0  ;;  %4364 = vmatpush1.bf16.msra.mxu0 %v8051_v2  ;;  %v9676_v44 = vpack.c.bf16 %v450_v17, %v438_v19  ;;  %v9678_v15 = vpack.c.bf16 %v452_v39, %v440_v52  ;;  %v8063_v20 = vld [vmem:[#allocation5 + $0x68] ss:$16 sps:$4 sm:$0xff]   ;;  %v474_v39 = vld [vmem:[%s8826_s24 + $0x2e0] sm:$0xff] }
 0x1de   : > { %12288 = vst [vmem:[#allocation158_spill] sm:$0xff] %v9667_v60  ;;  %v3520_v24 = vpop.f32.mrf.mxu1  ;;  %4557 = vmatpush1.bf16.msra.mxu1 %v8054_v59  ;;  %v9673_v22 = vadd.f32 %v3518_v46, %v3326_v21  ;;  %v3328_v30 = vadd.f32 %v3327_v37, %v9367_v23  ;;  %4365 = vmatprep.subr.bf16.mxu0 %v8059_v6  ;;  %v8066_v2 = vld [vmem:[#allocation5 + $0x268] ss:$16 sps:$4 sm:$0xff]   ;;  %v8071_v21 = vld [vmem:[#allocation5 + $0x4c] ss:$16 sps:$4 sm:$0xff]  }
 0x1df   : > { %4558 = vmatprep.subr.bf16.mxu1 %v8062_v29  ;;  %v3329_v18 = vpop.f32.mrf.mxu0  ;;  %12290 = vst [vmem:[#allocation160_spill] sm:$0xff] %v9676_v44  ;;  %12291 = vst [vmem:[#allocation161_spill] sm:$0xff] %v9678_v15  ;;  %v9683_v6 = vpack.c.bf16 %v475_v27, %v463_v53  ;;  %v9685_v29 = vpack.c.bf16 %v477_v34, %v465_v61  ;;  %v8074_v37 = vld [vmem:[#allocation5 + $0x24c] ss:$16 sps:$4 sm:$0xff]   ;;  %v464_v53 = vld [vmem:[%s8826_s24 + $0x290] sm:$0xff] }
 0x1e0   : > { %12289 = vst [vmem:[#allocation159_spill] sm:$0xff] %v9673_v22  ;;  %v3522_v60 = vpop.f32.mrf.mxu1  ;;  %v9680_v59 = vadd.f32 %v3520_v24, %v3328_v30  ;;  %v3330_v46 = vadd.f32 %v3329_v18, %v9359_v51  ;;  %v462_v24 = vld [vmem:[%s8826_s24 + $0x280] sm:$0xff]  ;;  %v476_v27 = vld [vmem:[%s8826_s24 + $0x2f0] sm:$0xff]  ;;  %v499_v18 = vld [vmem:[%s8826_s24 + $0x3a8] sm:$0xff] }
 0x1e1   : > { %12293 = vst [vmem:[#allocation163_spill] sm:$0xff] %v9683_v6  ;;  %12294 = vst [vmem:[#allocation164_spill] sm:$0xff] %v9685_v29  ;;  %v3331_v19 = vpop.f32.mrf.mxu0  ;;  %4366 = vmatpush1.bf16.msra.mxu0 %v8057_v14  ;;  %v487_v14 = vld [vmem:[%s8826_s24 + $0x348] sm:$0xff] }
 0x1e2   : > { %12292 = vst [vmem:[#allocation162_spill] sm:$0xff] %v9680_v59  ;;  %v3524_v17 = vpop.f32.mrf.mxu1  ;;  %4559 = vmatpush1.bf16.msra.mxu1 %v8060_v16  ;;  %v9687_v52 = vadd.f32 %v3522_v60, %v3330_v46  ;;  %v3332_v30 = vadd.f32 %v3331_v19, %v9367_v23  ;;  %4367 = vmatprep.subr.bf16.mxu0 %v8065_v40  ;;  %v489_v16 = vld [vmem:[%s8826_s24 + $0x358] sm:$0xff] }
 0x1e3   : > { %4560 = vmatprep.subr.bf16.mxu1 %v8068_v38  ;;  %v3335_v61 = vpop.f32.mrf.mxu0  ;;  %4026 = vmatmul.mubr.bf16.gmra.mxu0 %v9676_v44  ;;  %v501_v59 = vld [vmem:[%s8826_s24 + $0x3b8] sm:$0xff] }
 0x1e4   : > { %12295 = vst [vmem:[#allocation165_spill] sm:$0xff] %v9687_v52  ;;  %v3528_v34 = vpop.f32.mrf.mxu1  ;;  %4219 = vmatmul.mubr.bf16.gmra.mxu1 %v9678_v15  ;;  %v8069_v60 = vld [vmem:[#allocation5 + $0x48] ss:$16 sps:$4 sm:$0xff]   ;;  %v9700_v52 = vadd.f32 %v3524_v17, %v3332_v30  ;;  %v3336_v19 = vadd.f32 %v3335_v61, %v9359_v51  ;;  %4035 = vmatprep.mubr.bf16.mxu0 %v9683_v6  ;;  %v8077_v22 = vld [vmem:[#allocation5 + $0x2c] ss:$16 sps:$4 sm:$0xff]  }
 0x1e5   : > { %v8072_v46 = vld [vmem:[#allocation5 + $0x248] ss:$16 sps:$4 sm:$0xff]   ;;  %7576 = vmatprep.mubr.msk.bf16.mxu1 %vm3136_vm2, %v9685_v29  ;;  %v3337_v40 = vpop.f32.mrf.mxu0  ;;  %4368 = vmatpush1.bf16.msra.mxu0 %v8063_v20  ;;  %v8080_v17 = vld [vmem:[#allocation5 + $0x22c] ss:$16 sps:$4 sm:$0xff]   ;;  %v9709_v61 = vpack.c.bf16 %v474_v39, %v462_v24  ;;  %v9711_v6 = vpack.c.bf16 %v476_v27, %v464_v53  ;;  %v486_v27 = vld [vmem:[%s8826_s24 + $0x340] sm:$0xff] }
 0x1e6   : > { %12296 = vst [vmem:[#allocation166_spill] sm:$0xff] %v9700_v52  ;;  %v3530_v38 = vpop.f32.mrf.mxu1  ;;  %4561 = vmatpush1.bf16.msra.mxu1 %v8066_v2  ;;  %v9706_v15 = vadd.f32 %v3528_v34, %v3336_v19  ;;  %v3338_v44 = vadd.f32 %v3337_v40, %v9367_v23  ;;  %4369 = vmatprep.subr.bf16.mxu0 %v8071_v21  ;;  %v8075_v29 = vld [vmem:[#allocation5 + $0x28] ss:$16 sps:$4 sm:$0xff]   ;;  %v8083_v19 = vld [vmem:[#allocation5 + $0xc] ss:$16 sps:$4 sm:$0xff]  }
 0x1e7   : > { %4562 = vmatprep.subr.bf16.mxu1 %v8074_v37  ;;  %v3339_v30 = vpop.f32.mrf.mxu0  ;;  %12298 = vst [vmem:[#allocation168_spill] sm:$0xff] %v9709_v61  ;;  %12299 = vst [vmem:[#allocation169_spill] sm:$0xff] %v9711_v6  ;;  %v8078_v20 = vld [vmem:[#allocation5 + $0x228] ss:$16 sps:$4 sm:$0xff]   ;;  %v9716_v21 = vpack.c.bf16 %v499_v18, %v487_v14  ;;  %v9718_v37 = vpack.c.bf16 %v501_v59, %v489_v16  ;;  %v8086_v40 = vld [vmem:[#allocation5 + $0x20c] ss:$16 sps:$4 sm:$0xff]  }
 0x1e8   : > { %12297 = vst [vmem:[#allocation167_spill] sm:$0xff] %v9706_v15  ;;  %v3532_v52 = vpop.f32.mrf.mxu1  ;;  %v9713_v2 = vadd.f32 %v3530_v38, %v3338_v44  ;;  %v3340_v34 = vadd.f32 %v3339_v30, %v9359_v51  ;;  %v498_v38 = vld [vmem:[%s8826_s24 + $0x3a0] sm:$0xff]  ;;  %v488_v14 = vld [vmem:[%s8826_s24 + $0x350] sm:$0xff]  ;;  %v523_v30 = vld [vmem:[%s8826_s24 + $0x468] sm:$0xff] }
 0x1e9   : > { %12301 = vst [vmem:[#allocation171_spill] sm:$0xff] %v9716_v21  ;;  %12302 = vst [vmem:[#allocation172_spill] sm:$0xff] %v9718_v37  ;;  %v3341_v24 = vpop.f32.mrf.mxu0  ;;  %4370 = vmatpush1.bf16.msra.mxu0 %v8069_v60  ;;  %v500_v18 = vld [vmem:[%s8826_s24 + $0x3b0] sm:$0xff]  ;;  %v511_v60 = vld [vmem:[%s8826_s24 + $0x408] sm:$0xff] }
 0x1ea   : > { %12300 = vst [vmem:[#allocation170_spill] sm:$0xff] %v9713_v2  ;;  %v3534_v39 = vpop.f32.mrf.mxu1  ;;  %4563 = vmatpush1.bf16.msra.mxu1 %v8072_v46  ;;  %v9720_v53 = vadd.f32 %v3532_v52, %v3340_v34  ;;  %v3342_v44 = vadd.f32 %v3341_v24, %v9367_v23  ;;  %4371 = vmatprep.subr.bf16.mxu0 %v8077_v22  ;;  %v513_v46 = vld [vmem:[%s8826_s24 + $0x418] sm:$0xff] }
 0x1eb   : > { %4564 = vmatprep.subr.bf16.mxu1 %v8080_v17  ;;  %v3345_v59 = vpop.f32.mrf.mxu0  ;;  %4036 = vmatmul.mubr.bf16.gmra.mxu0 %v9709_v61  ;;  %v525_v2 = vld [vmem:[%s8826_s24 + $0x478] sm:$0xff] }
 0x1ec   : > { %12303 = vst [vmem:[#allocation173_spill] sm:$0xff] %v9720_v53  ;;  %v3538_v16 = vpop.f32.mrf.mxu1  ;;  %4229 = vmatmul.mubr.bf16.gmra.mxu1 %v9711_v6  ;;  %v8081_v52 = vld [vmem:[#allocation5 + $0x8] ss:$16 sps:$4 sm:$0xff]   ;;  %v9733_v53 = vadd.f32 %v3534_v39, %v3342_v44  ;;  %v3346_v24 = vadd.f32 %v3345_v59, %v9359_v51  ;;  %4045 = vmatprep.mubr.bf16.mxu0 %v9716_v21  ;;  %v8089_v15 = vld [vmem:[#allocation5 + $0x1ec] ss:$16 sps:$4 sm:$0xff]  }
 0x1ed   : > { %v8084_v34 = vld [vmem:[#allocation5 + $0x208] ss:$16 sps:$4 sm:$0xff]   ;;  %7577 = vmatprep.mubr.msk.bf16.mxu1 %vm3136_vm2, %v9718_v37  ;;  %v3347_v22 = vpop.f32.mrf.mxu0  ;;  %4372 = vmatpush1.bf16.msra.mxu0 %v8075_v29  ;;  %v8092_v39 = vld [vmem:[#allocation5 + $0x3ec] ss:$16 sps:$4 sm:$0xff]   ;;  %v9742_v59 = vpack.c.bf16 %v498_v38, %v486_v27  ;;  %v9744_v21 = vpack.c.bf16 %v500_v18, %v488_v14 }
 0x1ee   : > { %12304 = vst [vmem:[#allocation174_spill] sm:$0xff] %v9733_v53  ;;  %v3540_v17 = vpop.f32.mrf.mxu1  ;;  %4565 = vmatpush1.bf16.msra.mxu1 %v8078_v20  ;;  %v9739_v6 = vadd.f32 %v3538_v16, %v3346_v24  ;;  %v3348_v61 = vadd.f32 %v3347_v22, %v9367_v23  ;;  %4373 = vmatprep.subr.bf16.mxu0 %v8083_v19  ;;  %v8087_v37 = vld [vmem:[#allocation5 + $0x1e8] ss:$16 sps:$4 sm:$0xff]   ;;  %v8095_v24 = vld [vmem:[#allocation5 + $0x1cc] ss:$16 sps:$4 sm:$0xff]  }
 0x1ef   : > { %4566 = vmatprep.subr.bf16.mxu1 %v8086_v40  ;;  %v3349_v44 = vpop.f32.mrf.mxu0  ;;  %12306 = vst [vmem:[#allocation176_spill] sm:$0xff] %v9742_v59  ;;  %12307 = vst [vmem:[#allocation177_spill] sm:$0xff] %v9744_v21  ;;  %v8090_v29 = vld [vmem:[#allocation5 + $0x3e8] ss:$16 sps:$4 sm:$0xff]   ;;  %v9749_v19 = vpack.c.bf16 %v523_v30, %v511_v60  ;;  %v9751_v40 = vpack.c.bf16 %v525_v2, %v513_v46  ;;  %v8098_v22 = vld [vmem:[#allocation5 + $0x3cc] ss:$16 sps:$4 sm:$0xff]  }
 0x1f0   : > { %12305 = vst [vmem:[#allocation175_spill] sm:$0xff] %v9739_v6  ;;  %v3542_v53 = vpop.f32.mrf.mxu1  ;;  %v9746_v20 = vadd.f32 %v3540_v17, %v3348_v61  ;;  %v3350_v16 = vadd.f32 %v3349_v44, %v9359_v51  ;;  %v510_v61 = vld [vmem:[%s8826_s24 + $0x400] sm:$0xff]  ;;  %v512_v44 = vld [vmem:[%s8826_s24 + $0x410] sm:$0xff]  ;;  %v535_v46 = vld [vmem:[%s8826_s24 + $0x4c8] sm:$0xff] }
 0x1f1   : > { %12309 = vst [vmem:[#allocation179_spill] sm:$0xff] %v9749_v19  ;;  %12310 = vst [vmem:[#allocation180_spill] sm:$0xff] %v9751_v40  ;;  %v3351_v27 = vpop.f32.mrf.mxu0  ;;  %4374 = vmatpush1.bf16.msra.mxu0 %v8081_v52  ;;  %v522_v17 = vld [vmem:[%s8826_s24 + $0x460] sm:$0xff]  ;;  %v524_v60 = vld [vmem:[%s8826_s24 + $0x470] sm:$0xff] }
 0x1f2   : > { %12308 = vst [vmem:[#allocation178_spill] sm:$0xff] %v9746_v20  ;;  %v3544_v38 = vpop.f32.mrf.mxu1  ;;  %4567 = vmatpush1.bf16.msra.mxu1 %v8084_v34  ;;  %v9753_v14 = vadd.f32 %v3542_v53, %v3350_v16  ;;  %v3352_v18 = vadd.f32 %v3351_v27, %v9367_v23  ;;  %4375 = vmatprep.subr.bf16.mxu0 %v8089_v15  ;;  %v547_v34 = vld [vmem:[%s8826_s24 + $0x528] sm:$0xff]  ;;  %v537_v16 = vld [vmem:[%s8826_s24 + $0x4d8] sm:$0xff] }
 0x1f3   : > { %4568 = vmatprep.subr.bf16.mxu1 %v8092_v39  ;;  %v3355_v2 = vpop.f32.mrf.mxu0  ;;  %4046 = vmatmul.mubr.bf16.gmra.mxu0 %v9742_v59  ;;  %v549_v27 = vld [vmem:[%s8826_s24 + $0x538] sm:$0xff]  ;;  %v9777_v20 = vpack.c.bf16 %v524_v60, %v512_v44  ;;  %v534_v60 = vld [vmem:[%s8826_s24 + $0x4c0] sm:$0xff] }
 0x1f4   : > { %12311 = vst [vmem:[#allocation181_spill] sm:$0xff] %v9753_v14  ;;  %v3548_v30 = vpop.f32.mrf.mxu1  ;;  %4239 = vmatmul.mubr.bf16.gmra.mxu1 %v9744_v21  ;;  %v9763_v53 = vadd.f32 %v3544_v38, %v3352_v18  ;;  %v3356_v52 = vadd.f32 %v3355_v2, %v9359_v51  ;;  %4055 = vmatprep.mubr.bf16.mxu0 %v9749_v19  ;;  %v8093_v59 = vld [vmem:[#allocation5 + $0x1c8] ss:$16 sps:$4 sm:$0xff]   ;;  %v8101_v18 = vld [vmem:[#allocation5 + $0x1ac] ss:$16 sps:$4 sm:$0xff]  }
 0x1f5   : > { %7578 = vmatprep.mubr.msk.bf16.mxu1 %vm3136_vm2, %v9751_v40  ;;  %v3357_v15 = vpop.f32.mrf.mxu0  ;;  %4376 = vmatpush2.bf16.msra.mxu0 %v8087_v37  ;;  %v8096_v14 = vld [vmem:[#allocation5 + $0x3c8] ss:$16 sps:$4 sm:$0xff]   ;;  %v8104_v2 = vld [vmem:[#allocation5 + $0x3ac] ss:$16 sps:$4 sm:$0xff]   ;;  %12315 = vst [vmem:[#allocation185_spill] sm:$0xff] %v9777_v20 }
 0x1f6   : > { %12312 = vst [vmem:[#allocation182_spill] sm:$0xff] %v9763_v53  ;;  %v3550_v39 = vpop.f32.mrf.mxu1  ;;  %4569 = vmatpush2.bf16.msra.mxu1 %v8090_v29  ;;  %v9772_v21 = vadd.f32 %v3548_v30, %v3356_v52  ;;  %v3358_v38 = vadd.f32 %v3357_v15, %v9367_v23  ;;  %4377 = vmatprep.subr.bf16.mxu0 %v8095_v24 }
 0x1f7   : > { %4570 = vmatprep.subr.bf16.mxu1 %v8098_v22  ;;  %v3359_v19 = vpop.f32.mrf.mxu0  ;;  %v9775_v53 = vpack.c.bf16 %v522_v17, %v510_v61  ;;  %v9782_v29 = vpack.c.bf16 %v547_v34, %v535_v46  ;;  %v9784_v30 = vpack.c.bf16 %v549_v27, %v537_v16  ;;  %v8099_v22 = vld [vmem:[#allocation5 + $0x1a8] ss:$16 sps:$4 sm:$0xff]   ;;  %v8110_v46 = vld [vmem:[#allocation5 + $0x38c] ss:$16 sps:$4 sm:$0xff]   ;;  %v548_v16 = vld [vmem:[%s8826_s24 + $0x530] sm:$0xff] }
 0x1f8   : > { %12313 = vst [vmem:[#allocation183_spill] sm:$0xff] %v9772_v21  ;;  %v3552_v40 = vpop.f32.mrf.mxu1  ;;  %v9779_v6 = vadd.f32 %v3550_v39, %v3358_v38  ;;  %v3360_v37 = vadd.f32 %v3359_v19, %v9359_v51  ;;  %v8102_v61 = vld [vmem:[#allocation5 + $0x3a8] ss:$16 sps:$4 sm:$0xff]   ;;  %v8107_v19 = vld [vmem:[#allocation5 + $0x18c] ss:$16 sps:$4 sm:$0xff]  }
 0x1f9   : > { %12314 = vst [vmem:[#allocation184_spill] sm:$0xff] %v9775_v53  ;;  %12317 = vst [vmem:[#allocation187_spill] sm:$0xff] %v9782_v29  ;;  %v3361_v52 = vpop.f32.mrf.mxu0  ;;  %4378 = vmatpush2.bf16.msra.mxu0 %v8093_v59  ;;  %v559_v27 = vld [vmem:[%s8826_s24 + $0x588] sm:$0xff] }
 0x1fa   : > { %12316 = vst [vmem:[#allocation186_spill] sm:$0xff] %v9779_v6  ;;  %12318 = vst [vmem:[#allocation188_spill] sm:$0xff] %v9784_v30  ;;  %v3554_v24 = vpop.f32.mrf.mxu1  ;;  %4571 = vmatpush2.bf16.msra.mxu1 %v8096_v14  ;;  %v9786_v17 = vadd.f32 %v3552_v40, %v3360_v37  ;;  %v3362_v44 = vadd.f32 %v3361_v52, %v9367_v23  ;;  %4379 = vmatprep.subr.bf16.mxu0 %v8101_v18  ;;  %v546_v14 = vld [vmem:[%s8826_s24 + $0x520] sm:$0xff]  ;;  %v536_v40 = vld [vmem:[%s8826_s24 + $0x4d0] sm:$0xff] }
 0x1fb   : > { %4572 = vmatprep.subr.bf16.mxu1 %v8104_v2  ;;  %v3365_v34 = vpop.f32.mrf.mxu0  ;;  %4056 = vmatmul.mubr.bf16.gmra.mxu0 %v9775_v53  ;;  %v571_v38 = vld [vmem:[%s8826_s24 + $0x5e8] sm:$0xff]  ;;  %v561_v18 = vld [vmem:[%s8826_s24 + $0x598] sm:$0xff]  ;;  %v9810_v6 = vpack.c.bf16 %v548_v16, %v536_v40  ;;  %v558_v16 = vld [vmem:[%s8826_s24 + $0x580] sm:$0xff] }
 0x1fc   : > { %12319 = vst [vmem:[#allocation189_spill] sm:$0xff] %v9786_v17  ;;  %v3558_v59 = vpop.f32.mrf.mxu1  ;;  %4249 = vmatmul.mubr.bf16.gmra.mxu1 %v9777_v20  ;;  %v9795_v15 = vadd.f32 %v3554_v24, %v3362_v44  ;;  %v3366_v39 = vadd.f32 %v3365_v34, %v9359_v51  ;;  %4065 = vmatprep.mubr.bf16.mxu0 %v9782_v29  ;;  %v573_v52 = vld [vmem:[%s8826_s24 + $0x5f8] sm:$0xff] }
 0x1fd   : > { %7579 = vmatprep.mubr.msk.bf16.mxu1 %vm3136_vm2, %v9784_v30  ;;  %v3367_v2 = vpop.f32.mrf.mxu0  ;;  %4380 = vmatpush2.bf16.msra.mxu0 %v8099_v22  ;;  %v8105_v20 = vld [vmem:[#allocation5 + $0x188] ss:$16 sps:$4 sm:$0xff]   ;;  %v8113_v44 = vld [vmem:[#allocation5 + $0x16c] ss:$16 sps:$4 sm:$0xff]   ;;  %12323 = vst [vmem:[#allocation193_spill] sm:$0xff] %v9810_v6 }
 0x1fe   : > { %12320 = vst [vmem:[#allocation190_spill] sm:$0xff] %v9795_v15  ;;  %v3560_v37 = vpop.f32.mrf.mxu1  ;;  %4573 = vmatpush2.bf16.msra.mxu1 %v8102_v61  ;;  %v8108_v53 = vld [vmem:[#allocation5 + $0x388] ss:$16 sps:$4 sm:$0xff]   ;;  %v9805_v17 = vadd.f32 %v3558_v59, %v3366_v39  ;;  %v3368_v24 = vadd.f32 %v3367_v2, %v9367_v23  ;;  %4381 = vmatprep.subr.bf16.mxu0 %v8107_v19  ;;  %v8116_v34 = vld [vmem:[#allocation5 + $0x36c] ss:$16 sps:$4 sm:$0xff]  }
 0x1ff   : > { %4574 = vmatprep.subr.bf16.mxu1 %v8110_v46  ;;  %v3369_v29 = vpop.f32.mrf.mxu0  ;;  %v9808_v15 = vpack.c.bf16 %v546_v14, %v534_v60  ;;  %v9815_v61 = vpack.c.bf16 %v571_v38, %v559_v27  ;;  %v9817_v59 = vpack.c.bf16 %v573_v52, %v561_v18  ;;  %v8111_v46 = vld [vmem:[#allocation5 + $0x168] ss:$16 sps:$4 sm:$0xff]   ;;  %v8122_v27 = vld [vmem:[#allocation5 + $0x34c] ss:$16 sps:$4 sm:$0xff]   ;;  %v572_v18 = vld [vmem:[%s8826_s24 + $0x5f0] sm:$0xff] }
 0x200   : > { %12321 = vst [vmem:[#allocation191_spill] sm:$0xff] %v9805_v17  ;;  %v3562_v30 = vpop.f32.mrf.mxu1  ;;  %v9812_v21 = vadd.f32 %v3560_v37, %v3368_v24  ;;  %v3370_v22 = vadd.f32 %v3369_v29, %v9359_v51  ;;  %v8114_v60 = vld [vmem:[#allocation5 + $0x368] ss:$16 sps:$4 sm:$0xff]   ;;  %v8119_v29 = vld [vmem:[#allocation5 + $0x14c] ss:$16 sps:$4 sm:$0xff]  }
 0x201   : > { %12322 = vst [vmem:[#allocation192_spill] sm:$0xff] %v9808_v15  ;;  %12325 = vst [vmem:[#allocation195_spill] sm:$0xff] %v9815_v61  ;;  %v3371_v39 = vpop.f32.mrf.mxu0  ;;  %4382 = vmatpush2.bf16.msra.mxu0 %v8105_v20  ;;  %v583_v52 = vld [vmem:[%s8826_s24 + $0x648] sm:$0xff] }
 0x202   : > { %12324 = vst [vmem:[#allocation194_spill] sm:$0xff] %v9812_v21  ;;  %12326 = vst [vmem:[#allocation196_spill] sm:$0xff] %v9817_v59  ;;  %v3564_v19 = vpop.f32.mrf.mxu1  ;;  %4575 = vmatpush2.bf16.msra.mxu1 %v8108_v53  ;;  %v9819_v14 = vadd.f32 %v3562_v30, %v3370_v22  ;;  %v3372_v40 = vadd.f32 %v3371_v39, %v9367_v23  ;;  %4383 = vmatprep.subr.bf16.mxu0 %v8113_v44  ;;  %v570_v53 = vld [vmem:[%s8826_s24 + $0x5e0] sm:$0xff]  ;;  %v560_v30 = vld [vmem:[%s8826_s24 + $0x590] sm:$0xff] }
 0x203   : > { %4576 = vmatprep.subr.bf16.mxu1 %v8116_v34  ;;  %v3375_v38 = vpop.f32.mrf.mxu0  ;;  %4066 = vmatmul.mubr.bf16.gmra.mxu0 %v9808_v15  ;;  %v595_v24 = vld [vmem:[%s8826_s24 + $0x6a8] sm:$0xff]  ;;  %v585_v44 = vld [vmem:[%s8826_s24 + $0x658] sm:$0xff]  ;;  %v9843_v21 = vpack.c.bf16 %v572_v18, %v560_v30  ;;  %v582_v18 = vld [vmem:[%s8826_s24 + $0x640] sm:$0xff] }
 0x204   : > { %12327 = vst [vmem:[#allocation197_spill] sm:$0xff] %v9819_v14  ;;  %v3568_v20 = vpop.f32.mrf.mxu1  ;;  %4259 = vmatmul.mubr.bf16.gmra.mxu1 %v9810_v6  ;;  %v9828_v2 = vadd.f32 %v3564_v19, %v3372_v40  ;;  %v3376_v37 = vadd.f32 %v3375_v38, %v9359_v51  ;;  %4075 = vmatprep.mubr.bf16.mxu0 %v9815_v61  ;;  %v597_v39 = vld [vmem:[%s8826_s24 + $0x6b8] sm:$0xff] }
 0x205   : > { %7580 = vmatprep.mubr.msk.bf16.mxu1 %vm3136_vm2, %v9817_v59  ;;  %v3377_v34 = vpop.f32.mrf.mxu0  ;;  %4384 = vmatpush2.bf16.msra.mxu0 %v8111_v46  ;;  %v8117_v6 = vld [vmem:[#allocation5 + $0x148] ss:$16 sps:$4 sm:$0xff]   ;;  %v8125_v40 = vld [vmem:[#allocation5 + $0x12c] ss:$16 sps:$4 sm:$0xff]   ;;  %12331 = vst [vmem:[#allocation201_spill] sm:$0xff] %v9843_v21 }
 0x206   : > { %12328 = vst [vmem:[#allocation198_spill] sm:$0xff] %v9828_v2  ;;  %v3570_v22 = vpop.f32.mrf.mxu1  ;;  %4577 = vmatpush2.bf16.msra.mxu1 %v8114_v60  ;;  %v8120_v15 = vld [vmem:[#allocation5 + $0x348] ss:$16 sps:$4 sm:$0xff]   ;;  %v9838_v14 = vadd.f32 %v3568_v20, %v3376_v37  ;;  %v3378_v19 = vadd.f32 %v3377_v34, %v9367_v23  ;;  %4385 = vmatprep.subr.bf16.mxu0 %v8119_v29  ;;  %v8128_v38 = vld [vmem:[#allocation5 + $0x32c] ss:$16 sps:$4 sm:$0xff]  }
 0x207   : > { %4578 = vmatprep.subr.bf16.mxu1 %v8122_v27  ;;  %v3379_v61 = vpop.f32.mrf.mxu0  ;;  %v9841_v2 = vpack.c.bf16 %v570_v53, %v558_v16  ;;  %v9848_v60 = vpack.c.bf16 %v595_v24, %v583_v52  ;;  %v9850_v20 = vpack.c.bf16 %v597_v39, %v585_v44  ;;  %v8123_v27 = vld [vmem:[#allocation5 + $0x128] ss:$16 sps:$4 sm:$0xff]   ;;  %v8134_v52 = vld [vmem:[#allocation5 + $0x30c] ss:$16 sps:$4 sm:$0xff]   ;;  %v596_v44 = vld [vmem:[%s8826_s24 + $0x6b0] sm:$0xff] }
 0x208   : > { %12329 = vst [vmem:[#allocation199_spill] sm:$0xff] %v9838_v14  ;;  %v3572_v59 = vpop.f32.mrf.mxu1  ;;  %v9845_v17 = vadd.f32 %v3570_v22, %v3378_v19  ;;  %v3380_v46 = vadd.f32 %v3379_v61, %v9359_v51  ;;  %v8126_v16 = vld [vmem:[#allocation5 + $0x328] ss:$16 sps:$4 sm:$0xff]   ;;  %v8131_v61 = vld [vmem:[#allocation5 + $0x10c] ss:$16 sps:$4 sm:$0xff]  }
 0x209   : > { %12330 = vst [vmem:[#allocation200_spill] sm:$0xff] %v9841_v2  ;;  %12333 = vst [vmem:[#allocation203_spill] sm:$0xff] %v9848_v60  ;;  %v3381_v37 = vpop.f32.mrf.mxu0  ;;  %4386 = vmatpush2.bf16.msra.mxu0 %v8117_v6  ;;  %v607_v39 = vld [vmem:[%s8826_s24 + $0x708] sm:$0xff] }
 0x20a   : > { %12332 = vst [vmem:[#allocation202_spill] sm:$0xff] %v9845_v17  ;;  %12334 = vst [vmem:[#allocation204_spill] sm:$0xff] %v9850_v20  ;;  %v3574_v29 = vpop.f32.mrf.mxu1  ;;  %4579 = vmatpush2.bf16.msra.mxu1 %v8120_v15  ;;  %v9852_v53 = vadd.f32 %v3572_v59, %v3380_v46  ;;  %v3382_v30 = vadd.f32 %v3381_v37, %v9367_v23  ;;  %4387 = vmatprep.subr.bf16.mxu0 %v8125_v40  ;;  %v594_v15 = vld [vmem:[%s8826_s24 + $0x6a0] sm:$0xff]  ;;  %v584_v59 = vld [vmem:[%s8826_s24 + $0x650] sm:$0xff] }
 0x20b   : > { %4580 = vmatprep.subr.bf16.mxu1 %v8128_v38  ;;  %v3385_v24 = vpop.f32.mrf.mxu0  ;;  %4076 = vmatmul.mubr.bf16.gmra.mxu0 %v9841_v2  ;;  %v619_v19 = vld [vmem:[%s8826_s24 + $0x768] sm:$0xff]  ;;  %v609_v40 = vld [vmem:[%s8826_s24 + $0x718] sm:$0xff]  ;;  %v9876_v17 = vpack.c.bf16 %v596_v44, %v584_v59  ;;  %v618_v59 = vld [vmem:[%s8826_s24 + $0x760] sm:$0xff] }
 0x20c   : > { %12335 = vst [vmem:[#allocation205_spill] sm:$0xff] %v9852_v53  ;;  %v3578_v6 = vpop.f32.mrf.mxu1  ;;  %4269 = vmatmul.mubr.bf16.gmra.mxu1 %v9843_v21  ;;  %v9861_v34 = vadd.f32 %v3574_v29, %v3382_v30  ;;  %v3386_v22 = vadd.f32 %v3385_v24, %v9359_v51  ;;  %4085 = vmatprep.mubr.bf16.mxu0 %v9848_v60  ;;  %v621_v37 = vld [vmem:[%s8826_s24 + $0x778] sm:$0xff]  ;;  %v620_v44 = vld [vmem:[%s8826_s24 + $0x770] sm:$0xff] }
 0x20d   : > { %7581 = vmatprep.mubr.msk.bf16.mxu1 %vm3136_vm2, %v9850_v20  ;;  %v3387_v38 = vpop.f32.mrf.mxu0  ;;  %4388 = vmatpush2.bf16.msra.mxu0 %v8123_v27  ;;  %v8129_v21 = vld [vmem:[#allocation5 + $0x108] ss:$16 sps:$4 sm:$0xff]   ;;  %v8137_v30 = vld [vmem:[#allocation5 + $0x4ec] ss:$16 sps:$4 sm:$0xff]   ;;  %12338 = vst [vmem:[#allocation208_spill] sm:$0xff] %v9876_v17 }
 0x20e   : > { %12336 = vst [vmem:[#allocation206_spill] sm:$0xff] %v9861_v34  ;;  %v3580_v46 = vpop.f32.mrf.mxu1  ;;  %4581 = vmatpush2.bf16.msra.mxu1 %v8126_v16  ;;  %v8132_v2 = vld [vmem:[#allocation5 + $0x308] ss:$16 sps:$4 sm:$0xff]   ;;  %v9871_v53 = vadd.f32 %v3578_v6, %v3386_v22  ;;  %v3388_v29 = vadd.f32 %v3387_v38, %v9367_v23  ;;  %4389 = vmatprep.subr.bf16.mxu0 %v8131_v61  ;;  %v8140_v24 = vld [vmem:[#allocation5 + $0x6ec] ss:$16 sps:$4 sm:$0xff]  }
 0x20f   : > { %4582 = vmatprep.subr.bf16.mxu1 %v8134_v52  ;;  %v3389_v60 = vpop.f32.mrf.mxu0  ;;  %v9874_v34 = vpack.c.bf16 %v594_v15, %v582_v18  ;;  %v9881_v16 = vpack.c.bf16 %v619_v19, %v607_v39  ;;  %v9883_v6 = vpack.c.bf16 %v621_v37, %v609_v40  ;;  %v631_v22 = vld [vmem:[%s8826_s24 + $0x7c8] sm:$0xff]  ;;  %v633_v38 = vld [vmem:[%s8826_s24 + $0x7d8] sm:$0xff] }
 0x210   : > { %v3582_v20 = vpop.f32.mrf.mxu1  ;;  %v9878_v14 = vadd.f32 %v3580_v46, %v3388_v29  ;;  %v3390_v27 = vadd.f32 %v3389_v60, %v9359_v51  ;;  %v643_v40 = vld [vmem:[%s8826_s24 + $0x828] sm:$0xff]  ;;  %v645_v46 = vld [vmem:[%s8826_s24 + $0x838] sm:$0xff] }
 0x211   : > { %12337 = vst [vmem:[#allocation207_spill] sm:$0xff] %v9874_v34  ;;  %12339 = vst [vmem:[#allocation209_spill] sm:$0xff] %v9881_v16  ;;  %v3391_v61 = vpop.f32.mrf.mxu0  ;;  %4390 = vmatpush2.bf16.msra.mxu0 %v8129_v21  ;;  %v606_v21 = vld [vmem:[%s8826_s24 + $0x700] sm:$0xff] }
 0x212   : > { %12340 = vst [vmem:[#allocation210_spill] sm:$0xff] %v9883_v6  ;;  %v3584_v52 = vpop.f32.mrf.mxu1  ;;  %4583 = vmatpush2.bf16.msra.mxu1 %v8132_v2  ;;  %v9885_v18 = vadd.f32 %v3582_v20, %v3390_v27  ;;  %v3392_v15 = vadd.f32 %v3391_v61, %v9367_v23  ;;  %4745 = vmatprep.subr.bf16.mxu0 %v8137_v30  ;;  %v608_v23 = vld [vmem:[%s8826_s24 + $0x710] sm:$0xff] }
 0x213   : > { %4938 = vmatprep.subr.bf16.mxu1 %v8140_v24  ;;  %v3621_v51 = vpop.f32.mrf.mxu0  ;;  %4086 = vmatmul.mubr.bf16.gmra.mxu0 %v9874_v34  ;;  %v9907_v24 = vpack.c.bf16 %v618_v59, %v606_v21  ;;  %v9909_v27 = vpack.c.bf16 %v620_v44, %v608_v23  ;;  %v642_v44 = vld [vmem:[%s8826_s24 + $0x820] sm:$0xff]  ;;  %v12390_v34 = vld [vmem:[#allocation170_spill] sm:$0xff] }
 0x214   : > { %v3814_v60 = vpop.f32.mrf.mxu1  ;;  %4279 = vmatmul.mubr.bf16.gmra.mxu1 %v9876_v17  ;;  %v9892_v2 = vadd.f32 %v3584_v52, %v3392_v15  ;;  %v3622_v20 = vadd.f32 %v3621_v51, %v9382_v25  ;;  %4095 = vmatprep.mubr.bf16.mxu0 %v9881_v16  ;;  %v9914_v15 = vpack.c.bf16 %v643_v40, %v631_v22  ;;  %v655_v40 = vld [vmem:[%s8826_s24 + $0x888] sm:$0xff] }
 0x215   : > { %7582 = vmatprep.mubr.msk.bf16.mxu1 %vm3136_vm2, %v9883_v6  ;;  %v3623_v39 = vpop.f32.mrf.mxu0  ;;  %12341 = vst [vmem:[#allocation211_spill] sm:$0xff] %v9907_v24  ;;  %12342 = vst [vmem:[#allocation212_spill] sm:$0xff] %v9909_v27  ;;  %v9916_v51 = vpack.c.bf16 %v645_v46, %v633_v38 }
 0x216   : > { %v3816_v19 = vpop.f32.mrf.mxu1  ;;  %v9904_v37 = vadd.f32 %v3814_v60, %v3622_v20  ;;  %v3624_v29 = vadd.f32 %v3623_v39, %v9389_v58  ;;  %12343 = vst [vmem:[#allocation213_spill] sm:$0xff] %v9914_v15 }
 0x217   : > { %v3625_v30 = vpop.f32.mrf.mxu0  ;;  %12344 = vst [vmem:[#allocation214_spill] sm:$0xff] %v9916_v51 }
 0x218   : > { %v3818_v25 = vpop.f32.mrf.mxu1  ;;  %v9911_v61 = vadd.f32 %v3816_v19, %v3624_v29  ;;  %v3626_v52 = vadd.f32 %v3625_v30, %v9396_v11  ;;  %v630_v11 = vld [vmem:[%s8826_s24 + $0x7c0] sm:$0xff]  ;;  %v644_v19 = vld [vmem:[%s8826_s24 + $0x830] sm:$0xff]  ;;  %v667_v29 = vld [vmem:[%s8826_s24 + $0x8e8] sm:$0xff] }
 0x219   : > { %v3627_v60 = vpop.f32.mrf.mxu0  ;;  %v657_v30 = vld [vmem:[%s8826_s24 + $0x898] sm:$0xff] }
 0x21a   : > { %v3820_v58 = vpop.f32.mrf.mxu1  ;;  %v9918_v20 = vadd.f32 %v3818_v25, %v3626_v52  ;;  %v3628_v21 = vadd.f32 %v3627_v60, %v9409_v63  ;;  %v632_v63 = vld [vmem:[%s8826_s24 + $0x7d0] sm:$0xff]  ;;  %v669_v25 = vld [vmem:[%s8826_s24 + $0x8f8] sm:$0xff] }
 0x21b   : > { %v3631_v59 = vpop.f32.mrf.mxu0  ;;  %4096 = vmatmul.mubr.bf16.gmra.mxu0 %v9907_v24  ;;  %v9949_v24 = vpack.c.bf16 %v669_v25, %v657_v30  ;;  %v691_v25 = vld [vmem:[%s8826_s24 + $0x9a8] sm:$0xff] }
 0x21c   : > { %v3824_v23 = vpop.f32.mrf.mxu1  ;;  %4289 = vmatmul.mubr.bf16.gmra.mxu1 %v9909_v27  ;;  %v9925_v22 = vadd.f32 %v3820_v58, %v3628_v21  ;;  %v3632_v39 = vadd.f32 %v3631_v59, %v9414_v9  ;;  %4105 = vmatprep.mubr.bf16.mxu0 %v9914_v15  ;;  %v9940_v21 = vpack.c.bf16 %v642_v44, %v630_v11 }
 0x21d   : > { %7583 = vmatprep.mubr.msk.bf16.mxu1 %vm3136_vm2, %v9916_v51  ;;  %v3633_v38 = vpop.f32.mrf.mxu0  ;;  %v9942_v59 = vpack.c.bf16 %v644_v19, %v632_v63  ;;  %v9947_v27 = vpack.c.bf16 %v667_v29, %v655_v40  ;;  %12348 = vst [vmem:[#allocation218_spill] sm:$0xff] %v9949_v24  ;;  %v666_v19 = vld [vmem:[%s8826_s24 + $0x8e0] sm:$0xff] }
 0x21e   : > { %v3826_v46 = vpop.f32.mrf.mxu1  ;;  %v9937_v52 = vadd.f32 %v3824_v23, %v3632_v39  ;;  %v3634_v60 = vadd.f32 %v3633_v38, %v9421_v50  ;;  %12345 = vst [vmem:[#allocation215_spill] sm:$0xff] %v9940_v21 }
 0x21f   : > { %v3635_v58 = vpop.f32.mrf.mxu0  ;;  %12346 = vst [vmem:[#allocation216_spill] sm:$0xff] %v9942_v59  ;;  %12347 = vst [vmem:[#allocation217_spill] sm:$0xff] %v9947_v27 }
 0x220   : > { %v3828_v9 = vpop.f32.mrf.mxu1  ;;  %v9944_v51 = vadd.f32 %v3826_v46, %v3634_v60  ;;  %v3636_v15 = vadd.f32 %v3635_v58, %v9428_v47  ;;  %v654_v47 = vld [vmem:[%s8826_s24 + $0x880] sm:$0xff]  ;;  %v679_v46 = vld [vmem:[%s8826_s24 + $0x948] sm:$0xff]  ;;  %v681_v60 = vld [vmem:[%s8826_s24 + $0x958] sm:$0xff] }
 0x221   : > { %v3637_v23 = vpop.f32.mrf.mxu0  ;;  %v693_v58 = vld [vmem:[%s8826_s24 + $0x9b8] sm:$0xff] }
 0x222   : > { %v3830_v50 = vpop.f32.mrf.mxu1  ;;  %v9951_v39 = vadd.f32 %v3828_v9, %v3636_v15  ;;  %v3638_v11 = vadd.f32 %v3637_v23, %v9441_v12  ;;  %v656_v12 = vld [vmem:[%s8826_s24 + $0x890] sm:$0xff] }
 0x223   : > { %v3641_v44 = vpop.f32.mrf.mxu0  ;;  %4106 = vmatmul.mubr.bf16.gmra.mxu0 %v9940_v21  ;;  %v668_v15 = vld [vmem:[%s8826_s24 + $0x8f0] sm:$0xff]  ;;  %v9982_v21 = vpack.c.bf16 %v693_v58, %v681_v60  ;;  %v715_v58 = vld [vmem:[%s8826_s24 + $0xa68] sm:$0xff] }
 0x224   : > { %v3834_v63 = vpop.f32.mrf.mxu1  ;;  %4299 = vmatmul.mubr.bf16.gmra.mxu1 %v9942_v59  ;;  %v9958_v40 = vadd.f32 %v3830_v50, %v3638_v11  ;;  %v3642_v38 = vadd.f32 %v3641_v44, %v9446_v31  ;;  %4115 = vmatprep.mubr.bf16.mxu0 %v9947_v27  ;;  %v9973_v11 = vpack.c.bf16 %v666_v19, %v654_v47 }
 0x225   : > { %7584 = vmatprep.mubr.msk.bf16.mxu1 %vm3136_vm2, %v9949_v24  ;;  %v3643_v29 = vpop.f32.mrf.mxu0  ;;  %v9975_v44 = vpack.c.bf16 %v668_v15, %v656_v12  ;;  %v9980_v59 = vpack.c.bf16 %v691_v25, %v679_v46  ;;  %12352 = vst [vmem:[#allocation222_spill] sm:$0xff] %v9982_v21  ;;  %v690_v15 = vld [vmem:[%s8826_s24 + $0x9a0] sm:$0xff] }
 0x226   : > { %v3836_v30 = vpop.f32.mrf.mxu1  ;;  %v9970_v9 = vadd.f32 %v3834_v63, %v3642_v38  ;;  %v3644_v23 = vadd.f32 %v3643_v29, %v9453_v0  ;;  %12349 = vst [vmem:[#allocation219_spill] sm:$0xff] %v9973_v11 }
 0x227   : > { %v3645_v50 = vpop.f32.mrf.mxu0  ;;  %12350 = vst [vmem:[#allocation220_spill] sm:$0xff] %v9975_v44  ;;  %12351 = vst [vmem:[#allocation221_spill] sm:$0xff] %v9980_v59 }
 0x228   : > { %v3838_v31 = vpop.f32.mrf.mxu1  ;;  %v9977_v24 = vadd.f32 %v3836_v30, %v3644_v23  ;;  %v3646_v27 = vadd.f32 %v3645_v50, %v9460_v3  ;;  %v678_v3 = vld [vmem:[%s8826_s24 + $0x940] sm:$0xff]  ;;  %v703_v30 = vld [vmem:[%s8826_s24 + $0xa08] sm:$0xff]  ;;  %v705_v23 = vld [vmem:[%s8826_s24 + $0xa18] sm:$0xff] }
 0x229   : > { %v3647_v63 = vpop.f32.mrf.mxu0  ;;  %v717_v50 = vld [vmem:[%s8826_s24 + $0xa78] sm:$0xff] }
 0x22a   : > { %v3840_v0 = vpop.f32.mrf.mxu1  ;;  %v9984_v38 = vadd.f32 %v3838_v31, %v3646_v27  ;;  %v3648_v47 = vadd.f32 %v3647_v63, %v9473_v28  ;;  %v680_v28 = vld [vmem:[%s8826_s24 + $0x950] sm:$0xff] }
 0x22b   : > { %v3651_v19 = vpop.f32.mrf.mxu0  ;;  %4116 = vmatmul.mubr.bf16.gmra.mxu0 %v9973_v11  ;;  %v692_v27 = vld [vmem:[%s8826_s24 + $0x9b0] sm:$0xff]  ;;  %v10015_v11 = vpack.c.bf16 %v717_v50, %v705_v23  ;;  %v739_v50 = vld [vmem:[%s8826_s24 + $0xb28] sm:$0xff] }
 0x22c   : > { %v3844_v12 = vpop.f32.mrf.mxu1  ;;  %4309 = vmatmul.mubr.bf16.gmra.mxu1 %v9975_v44  ;;  %v9991_v46 = vadd.f32 %v3840_v0, %v3648_v47  ;;  %v3652_v29 = vadd.f32 %v3651_v19, %v9478_v1  ;;  %4125 = vmatprep.mubr.bf16.mxu0 %v9980_v59  ;;  %v10006_v47 = vpack.c.bf16 %v690_v15, %v678_v3 }
 0x22d   : > { %7585 = vmatprep.mubr.msk.bf16.mxu1 %vm3136_vm2, %v9982_v21  ;;  %v3653_v25 = vpop.f32.mrf.mxu0  ;;  %v10008_v19 = vpack.c.bf16 %v692_v27, %v680_v28  ;;  %v10013_v44 = vpack.c.bf16 %v715_v58, %v703_v30  ;;  %12356 = vst [vmem:[#allocation226_spill] sm:$0xff] %v10015_v11  ;;  %v714_v27 = vld [vmem:[%s8826_s24 + $0xa60] sm:$0xff] }
 0x22e   : > { %v3846_v60 = vpop.f32.mrf.mxu1  ;;  %v10003_v31 = vadd.f32 %v3844_v12, %v3652_v29  ;;  %v3654_v63 = vadd.f32 %v3653_v25, %v9485_v56  ;;  %12353 = vst [vmem:[#allocation223_spill] sm:$0xff] %v10006_v47 }
 0x22f   : > { %v3655_v0 = vpop.f32.mrf.mxu0  ;;  %12354 = vst [vmem:[#allocation224_spill] sm:$0xff] %v10008_v19  ;;  %12355 = vst [vmem:[#allocation225_spill] sm:$0xff] %v10013_v44 }
 0x230   : > { %v3848_v1 = vpop.f32.mrf.mxu1  ;;  %v10010_v21 = vadd.f32 %v3846_v60, %v3654_v63  ;;  %v3656_v59 = vadd.f32 %v3655_v0, %v9492_v35  ;;  %v702_v35 = vld [vmem:[%s8826_s24 + $0xa00] sm:$0xff]  ;;  %v727_v60 = vld [vmem:[%s8826_s24 + $0xac8] sm:$0xff]  ;;  %v729_v63 = vld [vmem:[%s8826_s24 + $0xad8] sm:$0xff] }
 0x231   : > { %v3657_v12 = vpop.f32.mrf.mxu0  ;;  %v741_v0 = vld [vmem:[%s8826_s24 + $0xb38] sm:$0xff] }
 0x232   : > { %v3850_v56 = vpop.f32.mrf.mxu1  ;;  %v10017_v29 = vadd.f32 %v3848_v1, %v3656_v59  ;;  %v3658_v3 = vadd.f32 %v3657_v12, %v9505_v41  ;;  %v704_v41 = vld [vmem:[%s8826_s24 + $0xa10] sm:$0xff] }
 0x233   : > { %v3661_v15 = vpop.f32.mrf.mxu0  ;;  %4126 = vmatmul.mubr.bf16.gmra.mxu0 %v10006_v47  ;;  %v716_v59 = vld [vmem:[%s8826_s24 + $0xa70] sm:$0xff]  ;;  %v10048_v47 = vpack.c.bf16 %v741_v0, %v729_v63  ;;  %v763_v0 = vld [vmem:[%s8826_s24 + $0xbe8] sm:$0xff] }
 0x234   : > { %v3854_v28 = vpop.f32.mrf.mxu1  ;;  %4319 = vmatmul.mubr.bf16.gmra.mxu1 %v10008_v19  ;;  %v10024_v30 = vadd.f32 %v3850_v56, %v3658_v3  ;;  %v3662_v25 = vadd.f32 %v3661_v15, %v9510_v32  ;;  %4135 = vmatprep.mubr.bf16.mxu0 %v10013_v44  ;;  %v10039_v3 = vpack.c.bf16 %v714_v27, %v702_v35 }
 0x235   : > { %7586 = vmatprep.mubr.msk.bf16.mxu1 %vm3136_vm2, %v10015_v11  ;;  %v3663_v58 = vpop.f32.mrf.mxu0  ;;  %v10041_v15 = vpack.c.bf16 %v716_v59, %v704_v41  ;;  %v10046_v19 = vpack.c.bf16 %v739_v50, %v727_v60  ;;  %12360 = vst [vmem:[#allocation230_spill] sm:$0xff] %v10048_v47  ;;  %v738_v59 = vld [vmem:[%s8826_s24 + $0xb20] sm:$0xff] }
 0x236   : > { %v3856_v23 = vpop.f32.mrf.mxu1  ;;  %v10036_v1 = vadd.f32 %v3854_v28, %v3662_v25  ;;  %v3664_v12 = vadd.f32 %v3663_v58, %v9517_v48  ;;  %12357 = vst [vmem:[#allocation227_spill] sm:$0xff] %v10039_v3 }
 0x237   : > { %v3665_v56 = vpop.f32.mrf.mxu0  ;;  %12358 = vst [vmem:[#allocation228_spill] sm:$0xff] %v10041_v15  ;;  %12359 = vst [vmem:[#allocation229_spill] sm:$0xff] %v10046_v19 }
 0x238   : > { %v3858_v32 = vpop.f32.mrf.mxu1  ;;  %v10043_v11 = vadd.f32 %v3856_v23, %v3664_v12  ;;  %v3666_v44 = vadd.f32 %v3665_v56, %v9524_v7  ;;  %v726_v7 = vld [vmem:[%s8826_s24 + $0xac0] sm:$0xff]  ;;  %v751_v23 = vld [vmem:[%s8826_s24 + $0xb88] sm:$0xff]  ;;  %v753_v12 = vld [vmem:[%s8826_s24 + $0xb98] sm:$0xff] }
 0x239   : > { %v3667_v28 = vpop.f32.mrf.mxu0  ;;  %v765_v56 = vld [vmem:[%s8826_s24 + $0xbf8] sm:$0xff] }
 0x23a   : > { %v3860_v48 = vpop.f32.mrf.mxu1  ;;  %v10050_v25 = vadd.f32 %v3858_v32, %v3666_v44  ;;  %v3668_v35 = vadd.f32 %v3667_v28, %v9537_v49  ;;  %v728_v49 = vld [vmem:[%s8826_s24 + $0xad0] sm:$0xff] }
 0x23b   : > { %v3671_v27 = vpop.f32.mrf.mxu0  ;;  %4136 = vmatmul.mubr.bf16.gmra.mxu0 %v10039_v3  ;;  %v740_v44 = vld [vmem:[%s8826_s24 + $0xb30] sm:$0xff]  ;;  %v10081_v3 = vpack.c.bf16 %v765_v56, %v753_v12 }
 0x23c   : > { %v3864_v41 = vpop.f32.mrf.mxu1  ;;  %4329 = vmatmul.mubr.bf16.gmra.mxu1 %v10041_v15  ;;  %v10057_v60 = vadd.f32 %v3860_v48, %v3668_v35  ;;  %v3672_v58 = vadd.f32 %v3671_v27, %v9542_v5  ;;  %4145 = vmatprep.mubr.bf16.mxu0 %v10046_v19  ;;  %v10072_v35 = vpack.c.bf16 %v738_v59, %v726_v7 }
 0x23d   : > { %7587 = vmatprep.mubr.msk.bf16.mxu1 %vm3136_vm2, %v10048_v47  ;;  %v3673_v50 = vpop.f32.mrf.mxu0  ;;  %v10074_v27 = vpack.c.bf16 %v740_v44, %v728_v49  ;;  %v10079_v15 = vpack.c.bf16 %v763_v0, %v751_v23  ;;  %12364 = vst [vmem:[#allocation234_spill] sm:$0xff] %v10081_v3 }
 0x23e   : > { %v3866_v63 = vpop.f32.mrf.mxu1  ;;  %v10069_v32 = vadd.f32 %v3864_v41, %v3672_v58  ;;  %v3674_v28 = vadd.f32 %v3673_v50, %v9549_v4  ;;  %12361 = vst [vmem:[#allocation231_spill] sm:$0xff] %v10072_v35  ;;  %v752_v50 = vld [vmem:[%s8826_s24 + $0xb90] sm:$0xff] }
 0x23f   : > { %v3675_v48 = vpop.f32.mrf.mxu0  ;;  %12362 = vst [vmem:[#allocation232_spill] sm:$0xff] %v10074_v27  ;;  %12363 = vst [vmem:[#allocation233_spill] sm:$0xff] %v10079_v15 }
 0x240   : > { %v3868_v5 = vpop.f32.mrf.mxu1  ;;  %v10076_v47 = vadd.f32 %v3866_v63, %v3674_v28  ;;  %v3676_v19 = vadd.f32 %v3675_v48, %v9556_v45  ;;  %v750_v45 = vld [vmem:[%s8826_s24 + $0xb80] sm:$0xff]  ;;  %v764_v63 = vld [vmem:[%s8826_s24 + $0xbf0] sm:$0xff] }
 0x241   : > { %v3677_v41 = vpop.f32.mrf.mxu0 }
 0x242   : > { %v3870_v4 = vpop.f32.mrf.mxu1  ;;  %v10083_v58 = vadd.f32 %v3868_v5, %v3676_v19  ;;  %v3678_v7 = vadd.f32 %v3677_v41, %v9569_v13  ;;  %v762_v19 = vld [vmem:[%s8826_s24 + $0xbe0] sm:$0xff]  ;;  %v10103_v41 = vpack.c.bf16 %v764_v63, %v752_v50 }
 0x243   : > { %v3681_v59 = vpop.f32.mrf.mxu0  ;;  %4146 = vmatmul.mubr.bf16.gmra.mxu0 %v10072_v35  ;;  %v10101_v5 = vpack.c.bf16 %v762_v19, %v750_v45  ;;  %v12379_v35 = vld [vmem:[#allocation162_spill] sm:$0xff] }
 0x244   : > { %v3874_v49 = vpop.f32.mrf.mxu1  ;;  %4339 = vmatmul.mubr.bf16.gmra.mxu1 %v10074_v27  ;;  %v10089_v44 = vadd.f32 %v3870_v4, %v3678_v7  ;;  %v3682_v23 = vadd.f32 %v3681_v59, %v9574_v43  ;;  %4155 = vmatprep.mubr.bf16.mxu0 %v10079_v15  ;;  %12366 = vst [vmem:[#allocation236_spill] sm:$0xff] %v10103_v41 }
 0x245   : > { %7588 = vmatprep.mubr.msk.bf16.mxu1 %vm3136_vm2, %v10081_v3  ;;  %v3683_v13 = vpop.f32.mrf.mxu0  ;;  %12365 = vst [vmem:[#allocation235_spill] sm:$0xff] %v10101_v5 }
 0x246   : > { %v3876_v0 = vpop.f32.mrf.mxu1  ;;  %v10098_v12 = vadd.f32 %v3874_v49, %v3682_v23  ;;  %v3684_v56 = vadd.f32 %v3683_v13, %v9581_v36 }
 0x247   : > { %v3685_v28 = vpop.f32.mrf.mxu0 }
 0x248   : > { %v3878_v48 = vpop.f32.mrf.mxu1  ;;  %v10105_v43 = vadd.f32 %v3876_v0, %v3684_v56  ;;  %v3686_v4 = vadd.f32 %v3685_v28, %v9588_v33  ;;  %v8138_v28 = vld [vmem:[#allocation5 + $0x6e8] ss:$16 sps:$4 sm:$0xff]  }
 0x249   : > { %v3687_v7 = vpop.f32.mrf.mxu0 }
 0x24a   : > { %v3880_v59 = vpop.f32.mrf.mxu1  ;;  %v10108_v3 = vadd.f32 %v3878_v48, %v3686_v4  ;;  %v3688_v15 = vadd.f32 %v3687_v7, %v9597_v10  ;;  %v8146_v7 = vld [vmem:[#allocation5 + $0x6cc] ss:$16 sps:$4 sm:$0xff]  }
 0x24b   : > { %v3691_v49 = vpop.f32.mrf.mxu0  ;;  %4156 = vmatmul.mubr.bf16.gmra.mxu0 %v10101_v5  ;;  %v8147_v5 = vld [vmem:[#allocation5 + $0x4a8] ss:$16 sps:$4 sm:$0xff]  }
 0x24c   : > { %v3884_v23 = vpop.f32.mrf.mxu1  ;;  %4349 = vmatmul.mubr.bf16.gmra.mxu1 %v10103_v41  ;;  %v10113_v36 = vadd.f32 %v3880_v59, %v3688_v15  ;;  %v3692_v45 = vadd.f32 %v3691_v49, %v9605_v8  ;;  %4391 = vmatprep.mubr.bf16.mxu0 %v8848_v54  ;;  %v8135_v15 = vld [vmem:[#allocation5 + $0x4e8] ss:$16 sps:$4 sm:$0xff]  }
 0x24d   : > { %4584 = vmatprep.mubr.bf16.mxu1 %v8850_v55  ;;  %v3693_v33 = vpop.f32.mrf.mxu0  ;;  %v8143_v55 = vld [vmem:[#allocation5 + $0x4cc] ss:$16 sps:$4 sm:$0xff]  }
 0x24e   : > { %v3886_v19 = vpop.f32.mrf.mxu1  ;;  %v10118_v50 = vadd.f32 %v3884_v23, %v3692_v45  ;;  %v3694_v10 = vadd.f32 %v3693_v33, %v9614_v62  ;;  %v12367_v23 = vld [vmem:[#allocation17_spill] sm:$0xff]  ;;  %v12368_v62 = vld [vmem:[#allocation18_spill] sm:$0xff] }
 0x24f   : > { %v3695_v63 = vpop.f32.mrf.mxu0  ;;  %v8141_v33 = vld [vmem:[#allocation5 + $0x4c8] ss:$16 sps:$4 sm:$0xff]  }
 0x250   : > { %v3888_v13 = vpop.f32.mrf.mxu1  ;;  %v10121_v0 = vadd.f32 %v3886_v19, %v3694_v10  ;;  %v3696_v56 = vadd.f32 %v3695_v63, %v9621_v42  ;;  %v8144_v19 = vld [vmem:[#allocation5 + $0x6c8] ss:$16 sps:$4 sm:$0xff]  }
 0x251   : > { %v3697_v48 = vpop.f32.mrf.mxu0 }
 0x252   : > { %v3890_v8 = vpop.f32.mrf.mxu1  ;;  %v10124_v4 = vadd.f32 %v3888_v13, %v3696_v56  ;;  %v3698_v54 = vadd.f32 %v3697_v48, %v9634_v26  ;;  %v12369_v13 = vld [vmem:[#allocation19_spill] sm:$0xff]  ;;  %v12370_v26 = vld [vmem:[#allocation20_spill] sm:$0xff] }
 0x253   : > { %v3701_v59 = vpop.f32.mrf.mxu0  ;;  %4392 = vmatmul.mubr.bf16.vlgmr.msra.gmra.mxu0 %v12367_v23  ;;  %v8149_v56 = vld [vmem:[#allocation5 + $0x4ac] ss:$16 sps:$4 sm:$0xff]  }
 0x254   : > { %v3894_v49 = vpop.f32.mrf.mxu1  ;;  %4585 = vmatmul.mubr.bf16.vlgmr.msra.gmra.mxu1 %v12368_v62  ;;  %v10129_v45 = vadd.f32 %v3890_v8, %v3698_v54  ;;  %v3702_v42 = vadd.f32 %v3701_v59, %v9640_v57  ;;  %4746 = vmatpush1.bf16.msra.mxu0 %v8135_v15  ;;  %v8152_v48 = vld [vmem:[#allocation5 + $0x6ac] ss:$16 sps:$4 sm:$0xff]  }
 0x255   : > { %4939 = vmatpush1.bf16.msra.mxu1 %v8138_v28  ;;  %v3703_v10 = vpop.f32.mrf.mxu0  ;;  %4401 = vmatprep.mubr.bf16.mxu0 %v12369_v13  ;;  %v12371_v23 = vld [vmem:[#allocation155_spill] sm:$0xff]  ;;  %v12372_v28 = vld [vmem:[#allocation157_spill] sm:$0xff] }
 0x256   : > { %v3896_v63 = vpop.f32.mrf.mxu1  ;;  %4594 = vmatprep.mubr.bf16.mxu1 %v12370_v26  ;;  %v10134_v41 = vadd.f32 %v3894_v49, %v3702_v42  ;;  %v3704_v62 = vadd.f32 %v3703_v10, %v12371_v23  ;;  %4747 = vmatprep.subr.bf16.mxu0 %v8143_v55  ;;  %v8150_v26 = vld [vmem:[#allocation5 + $0x6a8] ss:$16 sps:$4 sm:$0xff]   ;;  %v12373_v42 = vld [vmem:[#allocation158_spill] sm:$0xff]  ;;  %v8155_v55 = vld [vmem:[#allocation5 + $0x48c] ss:$16 sps:$4 sm:$0xff]  }
 0x257   : > { %4940 = vmatprep.subr.bf16.mxu1 %v8146_v7  ;;  %v3705_v8 = vpop.f32.mrf.mxu0  ;;  %v8158_v7 = vld [vmem:[#allocation5 + $0x68c] ss:$16 sps:$4 sm:$0xff]  }
 0x258   : > { %v3898_v57 = vpop.f32.mrf.mxu1  ;;  %v10137_v15 = vadd.f32 %v3896_v63, %v3704_v62  ;;  %v3706_v54 = vadd.f32 %v3705_v8, %v12372_v28  ;;  %4748 = vmatpush1.bf16.msra.mxu0 %v8141_v33  ;;  %v12374_v63 = vld [vmem:[#allocation21_spill] sm:$0xff]  ;;  %v12375_v62 = vld [vmem:[#allocation22_spill] sm:$0xff]  ;;  %v12377_v28 = vld [vmem:[#allocation23_spill] sm:$0xff] }
 0x259   : > { %4941 = vmatpush1.bf16.msra.mxu1 %v8144_v19  ;;  %v3707_v59 = vpop.f32.mrf.mxu0  ;;  %4749 = vmatprep.subr.bf16.mxu0 %v8149_v56  ;;  %v12376_v19 = vld [vmem:[#allocation159_spill] sm:$0xff]  ;;  %v12378_v56 = vld [vmem:[#allocation24_spill] sm:$0xff] }
 0x25a   : > { %v3900_v13 = vpop.f32.mrf.mxu1  ;;  %4942 = vmatprep.subr.bf16.mxu1 %v8152_v48  ;;  %v10140_v49 = vadd.f32 %v3898_v57, %v3706_v54  ;;  %v3708_v10 = vadd.f32 %v3707_v59, %v12373_v42  ;;  %v8153_v54 = vld [vmem:[#allocation5 + $0x488] ss:$16 sps:$4 sm:$0xff]  }
 0x25b   : > { %v3711_v23 = vpop.f32.mrf.mxu0  ;;  %4402 = vmatmul.mubr.bf16.gmra.mxu0 %v12374_v63  ;;  %v8156_v59 = vld [vmem:[#allocation5 + $0x688] ss:$16 sps:$4 sm:$0xff]  }
 0x25c   : > { %v3904_v27 = vpop.f32.mrf.mxu1  ;;  %4595 = vmatmul.mubr.bf16.gmra.mxu1 %v12375_v62  ;;  %v10145_v33 = vadd.f32 %v3900_v13, %v3708_v10  ;;  %v3712_v8 = vadd.f32 %v3711_v23, %v12376_v19  ;;  %4411 = vmatprep.mubr.bf16.mxu0 %v12377_v28  ;;  %v8161_v13 = vld [vmem:[#allocation5 + $0x46c] ss:$16 sps:$4 sm:$0xff]  }
 0x25d   : > { %4604 = vmatprep.mubr.bf16.mxu1 %v12378_v56  ;;  %v3713_v48 = vpop.f32.mrf.mxu0  ;;  %4750 = vmatpush1.bf16.msra.mxu0 %v8147_v5  ;;  %v8164_v10 = vld [vmem:[#allocation5 + $0x66c] ss:$16 sps:$4 sm:$0xff]   ;;  %v8159_v5 = vld [vmem:[#allocation5 + $0x468] ss:$16 sps:$4 sm:$0xff]  }
 0x25e   : > { %v3906_v57 = vpop.f32.mrf.mxu1  ;;  %4943 = vmatpush1.bf16.msra.mxu1 %v8150_v26  ;;  %v10150_v42 = vadd.f32 %v3904_v27, %v3712_v8  ;;  %v3714_v63 = vadd.f32 %v3713_v48, %v12379_v35  ;;  %4751 = vmatprep.subr.bf16.mxu0 %v8155_v55  ;;  %v12380_v28 = vld [vmem:[#allocation165_spill] sm:$0xff]  ;;  %v12382_v8 = vld [vmem:[#allocation166_spill] sm:$0xff] }
 0x25f   : > { %4944 = vmatprep.subr.bf16.mxu1 %v8158_v7  ;;  %v3715_v62 = vpop.f32.mrf.mxu0  ;;  %v8162_v26 = vld [vmem:[#allocation5 + $0x668] ss:$16 sps:$4 sm:$0xff]   ;;  %v8167_v55 = vld [vmem:[#allocation5 + $0x44c] ss:$16 sps:$4 sm:$0xff]  }
 0x260   : > { %v3908_v23 = vpop.f32.mrf.mxu1  ;;  %v10153_v19 = vadd.f32 %v3906_v57, %v3714_v63  ;;  %v3716_v56 = vadd.f32 %v3715_v62, %v12380_v28  ;;  %v8170_v7 = vld [vmem:[#allocation5 + $0x64c] ss:$16 sps:$4 sm:$0xff]   ;;  %v12384_v63 = vld [vmem:[#allocation26_spill] sm:$0xff] }
 0x261   : > { %v3717_v6 = vpop.f32.mrf.mxu0  ;;  %4752 = vmatpush1.bf16.msra.mxu0 %v8153_v54  ;;  %v12383_v57 = vld [vmem:[#allocation25_spill] sm:$0xff]  ;;  %v12386_v54 = vld [vmem:[#allocation167_spill] sm:$0xff] }
 0x262   : > { %v3910_v16 = vpop.f32.mrf.mxu1  ;;  %4945 = vmatpush1.bf16.msra.mxu1 %v8156_v59  ;;  %v10156_v27 = vadd.f32 %v3908_v23, %v3716_v56  ;;  %v3718_v35 = vadd.f32 %v3717_v6, %v12382_v8  ;;  %4753 = vmatprep.subr.bf16.mxu0 %v8161_v13  ;;  %v12387_v28 = vld [vmem:[#allocation27_spill] sm:$0xff]  ;;  %v12388_v23 = vld [vmem:[#allocation28_spill] sm:$0xff] }
 0x263   : > { %4946 = vmatprep.subr.bf16.mxu1 %v8164_v10  ;;  %v3721_v48 = vpop.f32.mrf.mxu0  ;;  %4412 = vmatmul.mubr.bf16.gmra.mxu0 %v12383_v57  ;;  %v8165_v13 = vld [vmem:[#allocation5 + $0x448] ss:$16 sps:$4 sm:$0xff]  }
 0x264   : > { %12381 = vst [vmem:[#allocation17_spill] sm:$0xff] %v10156_v27  ;;  %v3914_v17 = vpop.f32.mrf.mxu1  ;;  %4605 = vmatmul.mubr.bf16.gmra.mxu1 %v12384_v63  ;;  %v10161_v62 = vadd.f32 %v3910_v16, %v3718_v35  ;;  %v3722_v59 = vadd.f32 %v3721_v48, %v12386_v54  ;;  %4421 = vmatprep.mubr.bf16.mxu0 %v12387_v28  ;;  %v8168_v10 = vld [vmem:[#allocation5 + $0x648] ss:$16 sps:$4 sm:$0xff]   ;;  %v8173_v16 = vld [vmem:[#allocation5 + $0x42c] ss:$16 sps:$4 sm:$0xff]  }
 0x265   : > { %4614 = vmatprep.mubr.bf16.mxu1 %v12388_v23  ;;  %v3723_v56 = vpop.f32.mrf.mxu0  ;;  %4754 = vmatpush1.bf16.msra.mxu0 %v8159_v5  ;;  %v8176_v35 = vld [vmem:[#allocation5 + $0x62c] ss:$16 sps:$4 sm:$0xff]   ;;  %v8171_v5 = vld [vmem:[#allocation5 + $0x428] ss:$16 sps:$4 sm:$0xff]  }
 0x266   : > { %12385 = vst [vmem:[#allocation18_spill] sm:$0xff] %v10161_v62  ;;  %v3916_v6 = vpop.f32.mrf.mxu1  ;;  %4947 = vmatpush1.bf16.msra.mxu1 %v8162_v26  ;;  %v10166_v8 = vadd.f32 %v3914_v17, %v3722_v59  ;;  %v3724_v57 = vadd.f32 %v3723_v56, %v12390_v34  ;;  %4755 = vmatprep.subr.bf16.mxu0 %v8167_v55  ;;  %v12392_v28 = vld [vmem:[#allocation173_spill] sm:$0xff]  ;;  %v12394_v59 = vld [vmem:[#allocation174_spill] sm:$0xff] }
 0x267   : > { %4948 = vmatprep.subr.bf16.mxu1 %v8170_v7  ;;  %v3725_v63 = vpop.f32.mrf.mxu0  ;;  %v8174_v26 = vld [vmem:[#allocation5 + $0x628] ss:$16 sps:$4 sm:$0xff]   ;;  %v8179_v55 = vld [vmem:[#allocation5 + $0x40c] ss:$16 sps:$4 sm:$0xff]  }
 0x268   : > { %12389 = vst [vmem:[#allocation19_spill] sm:$0xff] %v10166_v8  ;;  %v3918_v48 = vpop.f32.mrf.mxu1  ;;  %v10169_v54 = vadd.f32 %v3916_v6, %v3724_v57  ;;  %v3726_v23 = vadd.f32 %v3725_v63, %v12392_v28  ;;  %v8182_v7 = vld [vmem:[#allocation5 + $0x60c] ss:$16 sps:$4 sm:$0xff]   ;;  %v12396_v57 = vld [vmem:[#allocation30_spill] sm:$0xff] }
 0x269   : > { %v3727_v62 = vpop.f32.mrf.mxu0  ;;  %4756 = vmatpush1.bf16.msra.mxu0 %v8165_v13  ;;  %v12395_v6 = vld [vmem:[#allocation29_spill] sm:$0xff]  ;;  %v12398_v13 = vld [vmem:[#allocation175_spill] sm:$0xff] }
 0x26a   : > { %12391 = vst [vmem:[#allocation20_spill] sm:$0xff] %v10169_v54  ;;  %v3920_v27 = vpop.f32.mrf.mxu1  ;;  %4949 = vmatpush1.bf16.msra.mxu1 %v8168_v10  ;;  %v10172_v17 = vadd.f32 %v3918_v48, %v3726_v23  ;;  %v3728_v34 = vadd.f32 %v3727_v62, %v12394_v59  ;;  %4757 = vmatprep.subr.bf16.mxu0 %v8173_v16  ;;  %v12399_v28 = vld [vmem:[#allocation31_spill] sm:$0xff]  ;;  %v12400_v48 = vld [vmem:[#allocation32_spill] sm:$0xff] }
 0x26b   : > { %4950 = vmatprep.subr.bf16.mxu1 %v8176_v35  ;;  %v3731_v56 = vpop.f32.mrf.mxu0  ;;  %4422 = vmatmul.mubr.bf16.gmra.mxu0 %v12395_v6  ;;  %v8177_v16 = vld [vmem:[#allocation5 + $0x408] ss:$16 sps:$4 sm:$0xff]  }
 0x26c   : > { %12393 = vst [vmem:[#allocation155_spill] sm:$0xff] %v10172_v17  ;;  %v3924_v8 = vpop.f32.mrf.mxu1  ;;  %4615 = vmatmul.mubr.bf16.gmra.mxu1 %v12396_v57  ;;  %v10177_v63 = vadd.f32 %v3920_v27, %v3728_v34  ;;  %v3732_v10 = vadd.f32 %v3731_v56, %v12398_v13  ;;  %4431 = vmatprep.mubr.bf16.mxu0 %v12399_v28  ;;  %v8180_v35 = vld [vmem:[#allocation5 + $0x608] ss:$16 sps:$4 sm:$0xff]   ;;  %v12402_v17 = vld [vmem:[#allocation178_spill] sm:$0xff]  ;;  %v8185_v27 = vld [vmem:[#allocation5 + $0x5ec] ss:$16 sps:$4 sm:$0xff]  }
 0x26d   : > { %4624 = vmatprep.mubr.bf16.mxu1 %v12400_v48  ;;  %v3733_v23 = vpop.f32.mrf.mxu0  ;;  %4758 = vmatpush1.bf16.msra.mxu0 %v8171_v5  ;;  %v8188_v34 = vld [vmem:[#allocation5 + $0x7ec] ss:$16 sps:$4 sm:$0xff]   ;;  %v8183_v5 = vld [vmem:[#allocation5 + $0x5e8] ss:$16 sps:$4 sm:$0xff]  }
 0x26e   : > { %12397 = vst [vmem:[#allocation157_spill] sm:$0xff] %v10177_v63  ;;  %v3926_v62 = vpop.f32.mrf.mxu1  ;;  %4951 = vmatpush1.bf16.msra.mxu1 %v8174_v26  ;;  %v10182_v59 = vadd.f32 %v3924_v8, %v3732_v10  ;;  %v3734_v6 = vadd.f32 %v3733_v23, %v12402_v17  ;;  %4759 = vmatprep.subr.bf16.mxu0 %v8179_v55  ;;  %v12404_v28 = vld [vmem:[#allocation181_spill] sm:$0xff]  ;;  %v12406_v10 = vld [vmem:[#allocation182_spill] sm:$0xff] }
 0x26f   : > { %4952 = vmatprep.subr.bf16.mxu1 %v8182_v7  ;;  %v3735_v57 = vpop.f32.mrf.mxu0  ;;  %v8186_v26 = vld [vmem:[#allocation5 + $0x7e8] ss:$16 sps:$4 sm:$0xff]   ;;  %v8191_v55 = vld [vmem:[#allocation5 + $0x5cc] ss:$16 sps:$4 sm:$0xff]  }
 0x270   : > { %12401 = vst [vmem:[#allocation158_spill] sm:$0xff] %v10182_v59  ;;  %v3928_v56 = vpop.f32.mrf.mxu1  ;;  %v10185_v13 = vadd.f32 %v3926_v62, %v3734_v6  ;;  %v3736_v48 = vadd.f32 %v3735_v57, %v12404_v28  ;;  %v8194_v7 = vld [vmem:[#allocation5 + $0x7cc] ss:$16 sps:$4 sm:$0xff]   ;;  %v12408_v6 = vld [vmem:[#allocation34_spill] sm:$0xff] }
 0x271   : > { %v3737_v63 = vpop.f32.mrf.mxu0  ;;  %4760 = vmatpush1.bf16.msra.mxu0 %v8177_v16  ;;  %v12407_v62 = vld [vmem:[#allocation33_spill] sm:$0xff]  ;;  %v12410_v16 = vld [vmem:[#allocation183_spill] sm:$0xff] }
 0x272   : > { %12403 = vst [vmem:[#allocation21_spill] sm:$0xff] %v10185_v13  ;;  %v3930_v54 = vpop.f32.mrf.mxu1  ;;  %4953 = vmatpush1.bf16.msra.mxu1 %v8180_v35  ;;  %v10188_v8 = vadd.f32 %v3928_v56, %v3736_v48  ;;  %v3738_v17 = vadd.f32 %v3737_v63, %v12406_v10  ;;  %4761 = vmatprep.subr.bf16.mxu0 %v8185_v27  ;;  %v12411_v28 = vld [vmem:[#allocation35_spill] sm:$0xff]  ;;  %v12412_v56 = vld [vmem:[#allocation36_spill] sm:$0xff] }
 0x273   : > { %4954 = vmatprep.subr.bf16.mxu1 %v8188_v34  ;;  %v3741_v23 = vpop.f32.mrf.mxu0  ;;  %4432 = vmatmul.mubr.bf16.gmra.mxu0 %v12407_v62  ;;  %v8189_v27 = vld [vmem:[#allocation5 + $0x5c8] ss:$16 sps:$4 sm:$0xff]  }
 0x274   : > { %12405 = vst [vmem:[#allocation22_spill] sm:$0xff] %v10188_v8  ;;  %v3934_v59 = vpop.f32.mrf.mxu1  ;;  %4625 = vmatmul.mubr.bf16.gmra.mxu1 %v12408_v6  ;;  %v10193_v57 = vadd.f32 %v3930_v54, %v3738_v17  ;;  %v3742_v35 = vadd.f32 %v3741_v23, %v12410_v16  ;;  %4441 = vmatprep.mubr.bf16.mxu0 %v12411_v28  ;;  %v8192_v34 = vld [vmem:[#allocation5 + $0x7c8] ss:$16 sps:$4 sm:$0xff]   ;;  %v12414_v8 = vld [vmem:[#allocation186_spill] sm:$0xff]  ;;  %v8197_v54 = vld [vmem:[#allocation5 + $0x5ac] ss:$16 sps:$4 sm:$0xff]  }
 0x275   : > { %4634 = vmatprep.mubr.bf16.mxu1 %v12412_v56  ;;  %v3743_v48 = vpop.f32.mrf.mxu0  ;;  %4762 = vmatpush2.bf16.msra.mxu0 %v8183_v5  ;;  %v8200_v17 = vld [vmem:[#allocation5 + $0x7ac] ss:$16 sps:$4 sm:$0xff]   ;;  %v8195_v5 = vld [vmem:[#allocation5 + $0x5a8] ss:$16 sps:$4 sm:$0xff]  }
 0x276   : > { %12409 = vst [vmem:[#allocation159_spill] sm:$0xff] %v10193_v57  ;;  %v3936_v63 = vpop.f32.mrf.mxu1  ;;  %4955 = vmatpush2.bf16.msra.mxu1 %v8186_v26  ;;  %v10198_v10 = vadd.f32 %v3934_v59, %v3742_v35  ;;  %v3744_v62 = vadd.f32 %v3743_v48, %v12414_v8  ;;  %4763 = vmatprep.subr.bf16.mxu0 %v8191_v55  ;;  %v12416_v28 = vld [vmem:[#allocation189_spill] sm:$0xff]  ;;  %v12418_v35 = vld [vmem:[#allocation190_spill] sm:$0xff] }
 0x277   : > { %4956 = vmatprep.subr.bf16.mxu1 %v8194_v7  ;;  %v3745_v6 = vpop.f32.mrf.mxu0  ;;  %v8198_v26 = vld [vmem:[#allocation5 + $0x7a8] ss:$16 sps:$4 sm:$0xff]   ;;  %v8203_v55 = vld [vmem:[#allocation5 + $0x58c] ss:$16 sps:$4 sm:$0xff]  }
 0x278   : > { %12413 = vst [vmem:[#allocation23_spill] sm:$0xff] %v10198_v10  ;;  %v3938_v23 = vpop.f32.mrf.mxu1  ;;  %v10201_v16 = vadd.f32 %v3936_v63, %v3744_v62  ;;  %v3746_v56 = vadd.f32 %v3745_v6, %v12416_v28  ;;  %v8206_v7 = vld [vmem:[#allocation5 + $0x78c] ss:$16 sps:$4 sm:$0xff]   ;;  %v12420_v62 = vld [vmem:[#allocation38_spill] sm:$0xff] }
 0x279   : > { %v3747_v57 = vpop.f32.mrf.mxu0  ;;  %4764 = vmatpush2.bf16.msra.mxu0 %v8189_v27  ;;  %v12419_v63 = vld [vmem:[#allocation37_spill] sm:$0xff]  ;;  %v12422_v27 = vld [vmem:[#allocation191_spill] sm:$0xff] }
 0x27a   : > { %12415 = vst [vmem:[#allocation24_spill] sm:$0xff] %v10201_v16  ;;  %v3940_v13 = vpop.f32.mrf.mxu1  ;;  %4957 = vmatpush2.bf16.msra.mxu1 %v8192_v34  ;;  %v10204_v59 = vadd.f32 %v3938_v23, %v3746_v56  ;;  %v3748_v8 = vadd.f32 %v3747_v57, %v12418_v35  ;;  %4765 = vmatprep.subr.bf16.mxu0 %v8197_v54  ;;  %v12423_v28 = vld [vmem:[#allocation39_spill] sm:$0xff]  ;;  %v12424_v23 = vld [vmem:[#allocation40_spill] sm:$0xff] }
 0x27b   : > { %4958 = vmatprep.subr.bf16.mxu1 %v8200_v17  ;;  %v3751_v48 = vpop.f32.mrf.mxu0  ;;  %4442 = vmatmul.mubr.bf16.gmra.mxu0 %v12419_v63  ;;  %v8201_v54 = vld [vmem:[#allocation5 + $0x588] ss:$16 sps:$4 sm:$0xff]  }
 0x27c   : > { %12417 = vst [vmem:[#allocation162_spill] sm:$0xff] %v10204_v59  ;;  %v3944_v10 = vpop.f32.mrf.mxu1  ;;  %4635 = vmatmul.mubr.bf16.gmra.mxu1 %v12420_v62  ;;  %v10209_v6 = vadd.f32 %v3940_v13, %v3748_v8  ;;  %v3752_v34 = vadd.f32 %v3751_v48, %v12422_v27  ;;  %4451 = vmatprep.mubr.bf16.mxu0 %v12423_v28  ;;  %v8204_v17 = vld [vmem:[#allocation5 + $0x788] ss:$16 sps:$4 sm:$0xff]   ;;  %v12426_v59 = vld [vmem:[#allocation194_spill] sm:$0xff]  ;;  %v8209_v13 = vld [vmem:[#allocation5 + $0x56c] ss:$16 sps:$4 sm:$0xff]  }
 0x27d   : > { %4644 = vmatprep.mubr.bf16.mxu1 %v12424_v23  ;;  %v3753_v56 = vpop.f32.mrf.mxu0  ;;  %4766 = vmatpush2.bf16.msra.mxu0 %v8195_v5  ;;  %v8212_v8 = vld [vmem:[#allocation5 + $0x76c] ss:$16 sps:$4 sm:$0xff]   ;;  %v8207_v5 = vld [vmem:[#allocation5 + $0x568] ss:$16 sps:$4 sm:$0xff]  }
 0x27e   : > { %12421 = vst [vmem:[#allocation165_spill] sm:$0xff] %v10209_v6  ;;  %v3946_v57 = vpop.f32.mrf.mxu1  ;;  %4959 = vmatpush2.bf16.msra.mxu1 %v8198_v26  ;;  %v10214_v35 = vadd.f32 %v3944_v10, %v3752_v34  ;;  %v3754_v63 = vadd.f32 %v3753_v56, %v12426_v59  ;;  %4767 = vmatprep.subr.bf16.mxu0 %v8203_v55  ;;  %v12428_v28 = vld [vmem:[#allocation197_spill] sm:$0xff]  ;;  %v12430_v34 = vld [vmem:[#allocation198_spill] sm:$0xff] }
 0x27f   : > { %4960 = vmatprep.subr.bf16.mxu1 %v8206_v7  ;;  %v3755_v62 = vpop.f32.mrf.mxu0  ;;  %v8210_v26 = vld [vmem:[#allocation5 + $0x768] ss:$16 sps:$4 sm:$0xff]   ;;  %v8215_v55 = vld [vmem:[#allocation5 + $0x54c] ss:$16 sps:$4 sm:$0xff]  }
 0x280   : > { %12425 = vst [vmem:[#allocation166_spill] sm:$0xff] %v10214_v35  ;;  %v3948_v48 = vpop.f32.mrf.mxu1  ;;  %v10217_v27 = vadd.f32 %v3946_v57, %v3754_v63  ;;  %v3756_v23 = vadd.f32 %v3755_v62, %v12428_v28  ;;  %v8218_v7 = vld [vmem:[#allocation5 + $0x74c] ss:$16 sps:$4 sm:$0xff]   ;;  %v12432_v63 = vld [vmem:[#allocation42_spill] sm:$0xff] }
 0x281   : > { %v3757_v6 = vpop.f32.mrf.mxu0  ;;  %4768 = vmatpush2.bf16.msra.mxu0 %v8201_v54  ;;  %v12431_v57 = vld [vmem:[#allocation41_spill] sm:$0xff]  ;;  %v12434_v54 = vld [vmem:[#allocation199_spill] sm:$0xff] }
 0x282   : > { %12427 = vst [vmem:[#allocation25_spill] sm:$0xff] %v10217_v27  ;;  %v3950_v16 = vpop.f32.mrf.mxu1  ;;  %4961 = vmatpush2.bf16.msra.mxu1 %v8204_v17  ;;  %v10220_v10 = vadd.f32 %v3948_v48, %v3756_v23  ;;  %v3758_v59 = vadd.f32 %v3757_v6, %v12430_v34  ;;  %4769 = vmatprep.subr.bf16.mxu0 %v8209_v13  ;;  %v12435_v28 = vld [vmem:[#allocation43_spill] sm:$0xff]  ;;  %v12436_v48 = vld [vmem:[#allocation44_spill] sm:$0xff] }
 0x283   : > { %4962 = vmatprep.subr.bf16.mxu1 %v8212_v8  ;;  %v3761_v56 = vpop.f32.mrf.mxu0  ;;  %4452 = vmatmul.mubr.bf16.gmra.mxu0 %v12431_v57  ;;  %v8213_v13 = vld [vmem:[#allocation5 + $0x548] ss:$16 sps:$4 sm:$0xff]  }
 0x284   : > { %12429 = vst [vmem:[#allocation26_spill] sm:$0xff] %v10220_v10  ;;  %v3954_v35 = vpop.f32.mrf.mxu1  ;;  %4645 = vmatmul.mubr.bf16.gmra.mxu1 %v12432_v63  ;;  %v10225_v62 = vadd.f32 %v3950_v16, %v3758_v59  ;;  %v3762_v17 = vadd.f32 %v3761_v56, %v12434_v54  ;;  %4461 = vmatprep.mubr.bf16.mxu0 %v12435_v28  ;;  %v8216_v8 = vld [vmem:[#allocation5 + $0x748] ss:$16 sps:$4 sm:$0xff]   ;;  %v12438_v10 = vld [vmem:[#allocation202_spill] sm:$0xff]  ;;  %v8221_v16 = vld [vmem:[#allocation5 + $0x52c] ss:$16 sps:$4 sm:$0xff]  }
 0x285   : > { %4654 = vmatprep.mubr.bf16.mxu1 %v12436_v48  ;;  %v3763_v23 = vpop.f32.mrf.mxu0  ;;  %4770 = vmatpush2.bf16.msra.mxu0 %v8207_v5  ;;  %v8224_v59 = vld [vmem:[#allocation5 + $0x72c] ss:$16 sps:$4 sm:$0xff]   ;;  %v8219_v5 = vld [vmem:[#allocation5 + $0x528] ss:$16 sps:$4 sm:$0xff]  }
 0x286   : > { %12433 = vst [vmem:[#allocation167_spill] sm:$0xff] %v10225_v62  ;;  %v3956_v6 = vpop.f32.mrf.mxu1  ;;  %4963 = vmatpush2.bf16.msra.mxu1 %v8210_v26  ;;  %v10230_v34 = vadd.f32 %v3954_v35, %v3762_v17  ;;  %v3764_v57 = vadd.f32 %v3763_v23, %v12438_v10  ;;  %4771 = vmatprep.subr.bf16.mxu0 %v8215_v55  ;;  %v12439_v28 = vld [vmem:[#allocation205_spill] sm:$0xff]  ;;  %v12440_v17 = vld [vmem:[#allocation206_spill] sm:$0xff] }
 0x287   : > { %4964 = vmatprep.subr.bf16.mxu1 %v8218_v7  ;;  %v3765_v63 = vpop.f32.mrf.mxu0  ;;  %v8222_v26 = vld [vmem:[#allocation5 + $0x728] ss:$16 sps:$4 sm:$0xff]   ;;  %v8227_v55 = vld [vmem:[#allocation5 + $0x50c] ss:$16 sps:$4 sm:$0xff]  }
 0x288   : > { %12437 = vst [vmem:[#allocation27_spill] sm:$0xff] %v10230_v34  ;;  %v3958_v56 = vpop.f32.mrf.mxu1  ;;  %v10233_v54 = vadd.f32 %v3956_v6, %v3764_v57  ;;  %v3766_v48 = vadd.f32 %v3765_v63, %v12439_v28  ;;  %v8230_v7 = vld [vmem:[#allocation5 + $0x70c] ss:$16 sps:$4 sm:$0xff]   ;;  %v12442_v57 = vld [vmem:[#allocation46_spill] sm:$0xff] }
 0x289   : > { %v3767_v62 = vpop.f32.mrf.mxu0  ;;  %4772 = vmatpush2.bf16.msra.mxu0 %v8213_v13  ;;  %v12441_v6 = vld [vmem:[#allocation45_spill] sm:$0xff] }
 0x28a   : > { %v3960_v27 = vpop.f32.mrf.mxu1  ;;  %4965 = vmatpush2.bf16.msra.mxu1 %v8216_v8  ;;  %v10236_v35 = vadd.f32 %v3958_v56, %v3766_v48  ;;  %v3768_v10 = vadd.f32 %v3767_v62, %v12440_v17  ;;  %4773 = vmatprep.subr.bf16.mxu0 %v8221_v16  ;;  %v12443_v8 = vld [vmem:[#allocation47_spill] sm:$0xff]  ;;  %v12444_v56 = vld [vmem:[#allocation48_spill] sm:$0xff] }
 0x28b   : > { %4966 = vmatprep.subr.bf16.mxu1 %v8224_v59  ;;  %v3771_v23 = vpop.f32.mrf.mxu0  ;;  %4462 = vmatmul.mubr.bf16.gmra.mxu0 %v12441_v6  ;;  %v8225_v16 = vld [vmem:[#allocation5 + $0x508] ss:$16 sps:$4 sm:$0xff]  }
 0x28c   : > { %v3964_v34 = vpop.f32.mrf.mxu1  ;;  %4655 = vmatmul.mubr.bf16.gmra.mxu1 %v12442_v57  ;;  %v10241_v63 = vadd.f32 %v3960_v27, %v3768_v10  ;;  %v3772_v13 = vadd.f32 %v3771_v23, %v9871_v53  ;;  %4471 = vmatprep.mubr.bf16.mxu0 %v12443_v8  ;;  %v8228_v59 = vld [vmem:[#allocation5 + $0x708] ss:$16 sps:$4 sm:$0xff]   ;;  %v8233_v27 = vld [vmem:[#allocation5 + $0x8ec] ss:$16 sps:$4 sm:$0xff]  }
 0x28d   : > { %4664 = vmatprep.mubr.bf16.mxu1 %v12444_v56  ;;  %v3773_v28 = vpop.f32.mrf.mxu0  ;;  %4774 = vmatpush2.bf16.msra.mxu0 %v8219_v5  ;;  %v8236_v10 = vld [vmem:[#allocation5 + $0xaec] ss:$16 sps:$4 sm:$0xff]  }
 0x28e   : > { %v3966_v62 = vpop.f32.mrf.mxu1  ;;  %4967 = vmatpush2.bf16.msra.mxu1 %v8222_v26  ;;  %v10246_v48 = vadd.f32 %v3964_v34, %v3772_v13  ;;  %v3774_v17 = vadd.f32 %v3773_v28, %v9878_v14  ;;  %4775 = vmatprep.subr.bf16.mxu0 %v8227_v55  ;;  %v12445_v55 = vld [vmem:[#allocation49_spill] sm:$0xff]  ;;  %v12447_v28 = vld [vmem:[#allocation51_spill] sm:$0xff] }
 0x28f   : > { %4968 = vmatprep.subr.bf16.mxu1 %v8230_v7  ;;  %v3775_v6 = vpop.f32.mrf.mxu0  ;;  %v12446_v7 = vld [vmem:[#allocation50_spill] sm:$0xff] }
 0x290   : > { %v3968_v53 = vpop.f32.mrf.mxu1  ;;  %v10249_v23 = vadd.f32 %v3966_v62, %v3774_v17  ;;  %v3776_v57 = vadd.f32 %v3775_v6, %v9885_v18  ;;  %v12448_v62 = vld [vmem:[#allocation52_spill] sm:$0xff] }
 0x291   : > { %v3777_v8 = vpop.f32.mrf.mxu0  ;;  %4776 = vmatpush2.bf16.msra.mxu0 %v8225_v16 }
 0x292   : > { %v3970_v56 = vpop.f32.mrf.mxu1  ;;  %4969 = vmatpush2.bf16.msra.mxu1 %v8228_v59  ;;  %v10252_v5 = vadd.f32 %v3968_v53, %v3776_v57  ;;  %v3778_v34 = vadd.f32 %v3777_v8, %v9892_v2  ;;  %5131 = vmatprep.subr.bf16.mxu0 %v8233_v27 }
 0x293   : > { %5324 = vmatprep.subr.bf16.mxu1 %v8236_v10  ;;  %v4007_v14 = vpop.f32.mrf.mxu0  ;;  %4472 = vmatmul.mubr.bf16.gmra.mxu0 %v12445_v55 }
 0x294   : > { %v4200_v26 = vpop.f32.mrf.mxu1  ;;  %4665 = vmatmul.mubr.bf16.gmra.mxu1 %v12446_v7  ;;  %v10257_v13 = vadd.f32 %v3970_v56, %v3778_v34  ;;  %v4008_v18 = vadd.f32 %v4007_v14, %v9904_v37  ;;  %4481 = vmatprep.mubr.bf16.mxu0 %v12447_v28  ;;  %v12449_v7 = vld [vmem:[#allocation53_spill] sm:$0xff]  ;;  %v12450_v28 = vld [vmem:[#allocation54_spill] sm:$0xff] }
 0x295   : > { %4674 = vmatprep.mubr.bf16.mxu1 %v12448_v62  ;;  %v4009_v16 = vpop.f32.mrf.mxu0 }
 0x296   : > { %v4202_v59 = vpop.f32.mrf.mxu1  ;;  %v4201_v17 = vadd.f32 %v4200_v26, %v4008_v18  ;;  %v4010_v2 = vadd.f32 %v4009_v16, %v9911_v61  ;;  %v12451_v18 = vld [vmem:[#allocation55_spill] sm:$0xff] }
 0x297   : > { %v4011_v27 = vpop.f32.mrf.mxu0 }
 0x298   : > { %v4204_v10 = vpop.f32.mrf.mxu1  ;;  %v4203_v6 = vadd.f32 %v4202_v59, %v4010_v2  ;;  %v4012_v53 = vadd.f32 %v4011_v27, %v9918_v20  ;;  %v5645_v57 = vmul.f32 0.2, %v4201_v17  ;;  %vm5517_vm3 = vcmp.gt.f32.partialorder %v4201_v17, 0.0  ;;  %v12452_v20 = vld [vmem:[#allocation56_spill] sm:$0xff] }
 0x299   : > { %v4013_v8 = vpop.f32.mrf.mxu0 }
 0x29a   : > { %v4206_v56 = vpop.f32.mrf.mxu1  ;;  %v4205_v34 = vadd.f32 %v4204_v10, %v4012_v53  ;;  %v4014_v37 = vadd.f32 %v4013_v8, %v9925_v22  ;;  %v10270_v62 = vsel %vm5517_vm3, %v4201_v17, %v5645_v57  ;;  %v5646_v22 = vmul.f32 0.2, %v4203_v6 }
 0x29b   : > { %v4017_v14 = vpop.f32.mrf.mxu0  ;;  %4482 = vmatmul.mubr.bf16.gmra.mxu0 %v12449_v7  ;;  %vm5518_vm5 = vcmp.gt.f32.partialorder %v4203_v6, 0.0 }
 0x29c   : > { %v4210_v55 = vpop.f32.mrf.mxu1  ;;  %4675 = vmatmul.mubr.bf16.gmra.mxu1 %v12450_v28  ;;  %vm5521_vm4 = vcmp.gt.f32.partialorder %v4205_v34, 0.0  ;;  %v5649_v61 = vmul.f32 0.2, %v4205_v34  ;;  %v4018_v26 = vadd.f32 %v4017_v14, %v9937_v52  ;;  %4491 = vmatprep.mubr.bf16.mxu0 %v12451_v18  ;;  %v4207_v16 = vadd.f32 %v4206_v56, %v4014_v37 }
 0x29d   : > { %4684 = vmatprep.mubr.bf16.mxu1 %v12452_v20  ;;  %v4019_v59 = vpop.f32.mrf.mxu0  ;;  %v12453_v20 = vld [vmem:[#allocation57_spill] sm:$0xff] }
 0x29e   : > { %v4212_v2 = vpop.f32.mrf.mxu1  ;;  %v10272_v27 = vsel %vm5521_vm4, %v4205_v34, %v5649_v61  ;;  %v4211_v10 = vadd.f32 %v4210_v55, %v4018_v26  ;;  %v4020_v53 = vadd.f32 %v4019_v59, %v9944_v51  ;;  %vm5522_vm6 = vcmp.gt.f32.partialorder %v4207_v16, 0.0  ;;  %v12454_v59 = vld [vmem:[#allocation58_spill] sm:$0xff] }
 0x29f   : > { %v5650_v52 = vmul.f32 0.2, %v4207_v16  ;;  %v4021_v14 = vpop.f32.mrf.mxu0  ;;  %v10280_v55 = vsel %vm5518_vm5, %v4203_v6, %v5646_v22 }
 0x2a0   : > { %v4214_v7 = vpop.f32.mrf.mxu1  ;;  %v4213_v28 = vadd.f32 %v4212_v2, %v4020_v53  ;;  %v4022_v17 = vadd.f32 %v4021_v14, %v9951_v39  ;;  %v5653_v57 = vmul.f32 0.2, %v4211_v10  ;;  %vm5525_vm7 = vcmp.gt.f32.partialorder %v4211_v10, 0.0  ;;  %v12455_v53 = vld [vmem:[#allocation59_spill] sm:$0xff]  ;;  %v12499_v39 = vld [vmem:[#allocation81_spill] sm:$0xff] }
 0x2a1   : > { %v4023_v56 = vpop.f32.mrf.mxu0  ;;  %v10278_v18 = vsel %vm5522_vm6, %v4207_v16, %v5650_v52  ;;  %v12456_v52 = vld [vmem:[#allocation60_spill] sm:$0xff] }
 0x2a2   : > { %v4216_v37 = vpop.f32.mrf.mxu1  ;;  %v4215_v34 = vadd.f32 %v4214_v7, %v4022_v17  ;;  %v4024_v51 = vadd.f32 %v4023_v56, %v9958_v40  ;;  %v10290_v6 = vsel %vm5525_vm7, %v4211_v10, %v5653_v57  ;;  %v5654_v7 = vmul.f32 0.2, %v4213_v28 }
 0x2a3   : > { %v4027_v61 = vpop.f32.mrf.mxu0  ;;  %4492 = vmatmul.mubr.bf16.gmra.mxu0 %v12453_v20  ;;  %12457 = vst [vmem:[#allocation28_spill] sm:$0xff] %v10290_v6  ;;  %vm5526_vm9 = vcmp.gt.f32.partialorder %v4213_v28, 0.0 }
 0x2a4   : > { %v4220_v26 = vpop.f32.mrf.mxu1  ;;  %4685 = vmatmul.mubr.bf16.gmra.mxu1 %v12454_v59  ;;  %vm5529_vm8 = vcmp.gt.f32.partialorder %v4215_v34, 0.0  ;;  %v5657_v2 = vmul.f32 0.2, %v4215_v34  ;;  %v4028_v16 = vadd.f32 %v4027_v61, %v9970_v9  ;;  %4501 = vmatprep.mubr.bf16.mxu0 %v12455_v53  ;;  %v4217_v40 = vadd.f32 %v4216_v37, %v4024_v51  ;;  %v12460_v59 = vld [vmem:[#allocation62_spill] sm:$0xff] }
 0x2a5   : > { %4694 = vmatprep.mubr.bf16.mxu1 %v12456_v52  ;;  %v4029_v22 = vpop.f32.mrf.mxu0 }
 0x2a6   : > { %v4222_v14 = vpop.f32.mrf.mxu1  ;;  %v10292_v17 = vsel %vm5529_vm8, %v4215_v34, %v5657_v2  ;;  %v4221_v56 = vadd.f32 %v4220_v26, %v4028_v16  ;;  %v4030_v20 = vadd.f32 %v4029_v22, %v9977_v24  ;;  %vm5530_vm10 = vcmp.gt.f32.partialorder %v4217_v40, 0.0  ;;  %v12459_v22 = vld [vmem:[#allocation61_spill] sm:$0xff] }
 0x2a7   : > { %12458 = vst [vmem:[#allocation170_spill] sm:$0xff] %v10292_v17  ;;  %v5658_v9 = vmul.f32 0.2, %v4217_v40  ;;  %v4031_v61 = vpop.f32.mrf.mxu0  ;;  %v10300_v26 = vsel %vm5526_vm9, %v4213_v28, %v5654_v7 }
 0x2a8   : > { %v4224_v53 = vpop.f32.mrf.mxu1  ;;  %v4223_v52 = vadd.f32 %v4222_v14, %v4030_v20  ;;  %v4032_v10 = vadd.f32 %v4031_v61, %v9984_v38  ;;  %v5661_v57 = vmul.f32 0.2, %v4221_v56  ;;  %vm5533_vm11 = vcmp.gt.f32.partialorder %v4221_v56, 0.0  ;;  %v12461_v20 = vld [vmem:[#allocation63_spill] sm:$0xff] }
 0x2a9   : > { %v4033_v37 = vpop.f32.mrf.mxu0  ;;  %v10298_v8 = vsel %vm5530_vm10, %v4217_v40, %v5658_v9  ;;  %v12462_v9 = vld [vmem:[#allocation64_spill] sm:$0xff] }
 0x2aa   : > { %v4226_v51 = vpop.f32.mrf.mxu1  ;;  %v4225_v34 = vadd.f32 %v4224_v53, %v4032_v10  ;;  %v4034_v24 = vadd.f32 %v4033_v37, %v9991_v46  ;;  %v10310_v28 = vsel %vm5533_vm11, %v4221_v56, %v5661_v57  ;;  %v5662_v53 = vmul.f32 0.2, %v4223_v52 }
 0x2ab   : > { %v4037_v2 = vpop.f32.mrf.mxu0  ;;  %4502 = vmatmul.mubr.bf16.gmra.mxu0 %v12459_v22  ;;  %12463 = vst [vmem:[#allocation173_spill] sm:$0xff] %v10310_v28  ;;  %vm5534_vm13 = vcmp.gt.f32.partialorder %v4223_v52, 0.0  ;;  %v12468_v22 = vld [vmem:[#allocation66_spill] sm:$0xff] }
 0x2ac   : > { %v4230_v16 = vpop.f32.mrf.mxu1  ;;  %4695 = vmatmul.mubr.bf16.gmra.mxu1 %v12460_v59  ;;  %vm5537_vm12 = vcmp.gt.f32.partialorder %v4225_v34, 0.0  ;;  %v5665_v14 = vmul.f32 0.2, %v4225_v34  ;;  %v4038_v40 = vadd.f32 %v4037_v2, %v10003_v31  ;;  %4511 = vmatprep.mubr.bf16.mxu0 %v12461_v20  ;;  %v4227_v46 = vadd.f32 %v4226_v51, %v4034_v24 }
 0x2ad   : > { %4704 = vmatprep.mubr.bf16.mxu1 %v12462_v9  ;;  %v4039_v7 = vpop.f32.mrf.mxu0 }
 0x2ae   : > { %v4232_v61 = vpop.f32.mrf.mxu1  ;;  %v10312_v10 = vsel %vm5537_vm12, %v4225_v34, %v5665_v14  ;;  %v4231_v59 = vadd.f32 %v4230_v16, %v4038_v40  ;;  %v4040_v37 = vadd.f32 %v4039_v7, %v10010_v21  ;;  %vm5538_vm14 = vcmp.gt.f32.partialorder %v4227_v46, 0.0  ;;  %v12467_v7 = vld [vmem:[#allocation65_spill] sm:$0xff] }
 0x2af   : > { %12464 = vst [vmem:[#allocation174_spill] sm:$0xff] %v10312_v10  ;;  %v5666_v31 = vmul.f32 0.2, %v4227_v46  ;;  %v4041_v2 = vpop.f32.mrf.mxu0  ;;  %v10320_v16 = vsel %vm5534_vm13, %v4223_v52, %v5662_v53 }
 0x2b0   : > { %v4234_v20 = vpop.f32.mrf.mxu1  ;;  %v4233_v9 = vadd.f32 %v4232_v61, %v4040_v37  ;;  %v4042_v56 = vadd.f32 %v4041_v2, %v10017_v29  ;;  %v5669_v57 = vmul.f32 0.2, %v4231_v59  ;;  %vm5541_vm15 = vcmp.gt.f32.partialorder %v4231_v59, 0.0  ;;  %12466 = vst [vmem:[#allocation30_spill] sm:$0xff] %v10320_v16  ;;  %v12469_v37 = vld [vmem:[#allocation67_spill] sm:$0xff] }
 0x2b1   : > { %v4043_v51 = vpop.f32.mrf.mxu0  ;;  %v10318_v38 = vsel %vm5538_vm14, %v4227_v46, %v5666_v31  ;;  %v12470_v31 = vld [vmem:[#allocation68_spill] sm:$0xff] }
 0x2b2   : > { %v4236_v24 = vpop.f32.mrf.mxu1  ;;  %12465 = vst [vmem:[#allocation29_spill] sm:$0xff] %v10318_v38  ;;  %v4235_v34 = vadd.f32 %v4234_v20, %v4042_v56  ;;  %v4044_v21 = vadd.f32 %v4043_v51, %v10024_v30  ;;  %v10330_v52 = vsel %vm5541_vm15, %v4231_v59, %v5669_v57  ;;  %v5670_v20 = vmul.f32 0.2, %v4233_v9 }
 0x2b3   : > { %v4047_v14 = vpop.f32.mrf.mxu0  ;;  %4512 = vmatmul.mubr.bf16.gmra.mxu0 %v12467_v7  ;;  %12471 = vst [vmem:[#allocation175_spill] sm:$0xff] %v10330_v52  ;;  %vm5542_vm1 = vcmp.gt.f32.partialorder %v4233_v9, 0.0  ;;  %v12476_v7 = vld [vmem:[#allocation70_spill] sm:$0xff]  ;;  %v12620_v52 = vld [vmem:[#allocation148_spill] sm:$0xff] }
 0x2b4   : > { %v4240_v40 = vpop.f32.mrf.mxu1  ;;  %4705 = vmatmul.mubr.bf16.gmra.mxu1 %v12468_v22  ;;  %vm5545_vm0 = vcmp.gt.f32.partialorder %v4235_v34, 0.0  ;;  %v5673_v61 = vmul.f32 0.2, %v4235_v34  ;;  %v4048_v46 = vadd.f32 %v4047_v14, %v10036_v1  ;;  %4521 = vmatprep.mubr.bf16.mxu0 %v12469_v37  ;;  %v4237_v30 = vadd.f32 %v4236_v24, %v4044_v21 }
 0x2b5   : > { %4714 = vmatprep.mubr.bf16.mxu1 %v12470_v31  ;;  %v4049_v53 = vpop.f32.mrf.mxu0 }
 0x2b6   : > { %v4242_v2 = vpop.f32.mrf.mxu1  ;;  %v10332_v56 = vsel %vm5545_vm0, %v4235_v34, %v5673_v61  ;;  %v4241_v22 = vadd.f32 %v4240_v40, %v4048_v46  ;;  %v4050_v51 = vadd.f32 %v4049_v53, %v10043_v11  ;;  %vm5546_vm3 = vcmp.gt.f32.partialorder %v4237_v30, 0.0  ;;  %v12475_v53 = vld [vmem:[#allocation69_spill] sm:$0xff] }
 0x2b7   : > { %12472 = vst [vmem:[#allocation31_spill] sm:$0xff] %v10332_v56  ;;  %v5674_v1 = vmul.f32 0.2, %v4237_v30  ;;  %v4051_v14 = vpop.f32.mrf.mxu0  ;;  %v10340_v40 = vsel %vm5542_vm1, %v4233_v9, %v5670_v20  ;;  %v12623_v56 = vld [vmem:[#allocation151_spill] sm:$0xff] }
 0x2b8   : > { %v4244_v37 = vpop.f32.mrf.mxu1  ;;  %v4243_v31 = vadd.f32 %v4242_v2, %v4050_v51  ;;  %v4052_v59 = vadd.f32 %v4051_v14, %v10050_v25  ;;  %v5677_v57 = vmul.f32 0.2, %v4241_v22  ;;  %vm5549_vm4 = vcmp.gt.f32.partialorder %v4241_v22, 0.0  ;;  %12474 = vst [vmem:[#allocation178_spill] sm:$0xff] %v10340_v40  ;;  %v12477_v51 = vld [vmem:[#allocation71_spill] sm:$0xff] }
 0x2b9   : > { %v4053_v24 = vpop.f32.mrf.mxu0  ;;  %v10338_v29 = vsel %vm5546_vm3, %v4237_v30, %v5674_v1  ;;  %v12478_v1 = vld [vmem:[#allocation72_spill] sm:$0xff] }
 0x2ba   : > { %v4246_v21 = vpop.f32.mrf.mxu1  ;;  %12473 = vst [vmem:[#allocation32_spill] sm:$0xff] %v10338_v29  ;;  %v4245_v34 = vadd.f32 %v4244_v37, %v4052_v59  ;;  %v4054_v11 = vadd.f32 %v4053_v24, %v10057_v60  ;;  %v10350_v9 = vsel %vm5549_vm4, %v4241_v22, %v5677_v57  ;;  %v5678_v37 = vmul.f32 0.2, %v4243_v31  ;;  %v8333_v40 = vld [vmem:[#allocation8 + $0x160] ss:$8 sps:$4 sm:$0xff]  }
 0x2bb   : > { %v4057_v61 = vpop.f32.mrf.mxu0  ;;  %4522 = vmatmul.mubr.bf16.gmra.mxu0 %v12475_v53  ;;  %12479 = vst [vmem:[#allocation181_spill] sm:$0xff] %v10350_v9  ;;  %vm5550_vm6 = vcmp.gt.f32.partialorder %v4243_v31, 0.0  ;;  %v12484_v53 = vld [vmem:[#allocation74_spill] sm:$0xff] }
 0x2bc   : > { %v4250_v46 = vpop.f32.mrf.mxu1  ;;  %4715 = vmatmul.mubr.bf16.gmra.mxu1 %v12476_v7  ;;  %vm5553_vm5 = vcmp.gt.f32.partialorder %v4245_v34, 0.0  ;;  %v5681_v2 = vmul.f32 0.2, %v4245_v34  ;;  %v4058_v30 = vadd.f32 %v4057_v61, %v10069_v32  ;;  %4531 = vmatprep.mubr.bf16.mxu0 %v12477_v51  ;;  %v4247_v60 = vadd.f32 %v4246_v21, %v4054_v11 }
 0x2bd   : > { %4724 = vmatprep.mubr.bf16.mxu1 %v12478_v1  ;;  %v4059_v20 = vpop.f32.mrf.mxu0 }
 0x2be   : > { %v4252_v14 = vpop.f32.mrf.mxu1  ;;  %v10352_v59 = vsel %vm5553_vm5, %v4245_v34, %v5681_v2  ;;  %v4251_v7 = vadd.f32 %v4250_v46, %v4058_v30  ;;  %v4060_v24 = vadd.f32 %v4059_v20, %v10076_v47  ;;  %vm5554_vm7 = vcmp.gt.f32.partialorder %v4247_v60, 0.0  ;;  %v12483_v20 = vld [vmem:[#allocation73_spill] sm:$0xff] }
 0x2bf   : > { %12480 = vst [vmem:[#allocation182_spill] sm:$0xff] %v10352_v59  ;;  %v5682_v32 = vmul.f32 0.2, %v4247_v60  ;;  %v4061_v61 = vpop.f32.mrf.mxu0  ;;  %v10360_v46 = vsel %vm5550_vm6, %v4243_v31, %v5678_v37  ;;  %v8324_v59 = vld [vmem:[#allocation8 + $0x170] ss:$8 sps:$4 sm:$0xff]  }
 0x2c0   : > { %v4254_v51 = vpop.f32.mrf.mxu1  ;;  %v4253_v1 = vadd.f32 %v4252_v14, %v4060_v24  ;;  %v4062_v22 = vadd.f32 %v4061_v61, %v10083_v58  ;;  %v5685_v57 = vmul.f32 0.2, %v4251_v7  ;;  %vm5557_vm8 = vcmp.gt.f32.partialorder %v4251_v7, 0.0  ;;  %12482 = vst [vmem:[#allocation34_spill] sm:$0xff] %v10360_v46  ;;  %v12485_v24 = vld [vmem:[#allocation75_spill] sm:$0xff] }
 0x2c1   : > { %v4063_v21 = vpop.f32.mrf.mxu0  ;;  %v10358_v25 = vsel %vm5554_vm7, %v4247_v60, %v5682_v32  ;;  %v12486_v32 = vld [vmem:[#allocation76_spill] sm:$0xff]  ;;  %v8314_v46 = vld [vmem:[#allocation8 + $0x64] ss:$8 sps:$4 sm:$0xff]  }
 0x2c2   : > { %v4256_v11 = vpop.f32.mrf.mxu1  ;;  %12481 = vst [vmem:[#allocation33_spill] sm:$0xff] %v10358_v25  ;;  %v4255_v34 = vadd.f32 %v4254_v51, %v4062_v22  ;;  %v4064_v47 = vadd.f32 %v4063_v21, %v10089_v44  ;;  %v10370_v31 = vsel %vm5557_vm8, %v4251_v7, %v5685_v57  ;;  %v5686_v51 = vmul.f32 0.2, %v4253_v1  ;;  %v8335_v25 = vld [vmem:[#allocation8 + $0x164] ss:$8 sps:$4 sm:$0xff]  }
 0x2c3   : > { %v4067_v2 = vpop.f32.mrf.mxu0  ;;  %4532 = vmatmul.mubr.bf16.gmra.mxu0 %v12483_v20  ;;  %12487 = vst [vmem:[#allocation183_spill] sm:$0xff] %v10370_v31  ;;  %vm5558_vm10 = vcmp.gt.f32.partialorder %v4253_v1, 0.0  ;;  %v12492_v20 = vld [vmem:[#allocation78_spill] sm:$0xff] }
 0x2c4   : > { %v4260_v30 = vpop.f32.mrf.mxu1  ;;  %4725 = vmatmul.mubr.bf16.gmra.mxu1 %v12484_v53  ;;  %vm5561_vm9 = vcmp.gt.f32.partialorder %v4255_v34, 0.0  ;;  %v5689_v14 = vmul.f32 0.2, %v4255_v34  ;;  %v4068_v60 = vadd.f32 %v4067_v2, %v10098_v12  ;;  %4541 = vmatprep.mubr.bf16.mxu0 %v12485_v24  ;;  %v4257_v44 = vadd.f32 %v4256_v11, %v4064_v47 }
 0x2c5   : > { %4734 = vmatprep.mubr.bf16.mxu1 %v12486_v32  ;;  %v4069_v37 = vpop.f32.mrf.mxu0 }
 0x2c6   : > { %v4262_v61 = vpop.f32.mrf.mxu1  ;;  %v10372_v22 = vsel %vm5561_vm9, %v4255_v34, %v5689_v14  ;;  %v4261_v53 = vadd.f32 %v4260_v30, %v4068_v60  ;;  %v4070_v21 = vadd.f32 %v4069_v37, %v10105_v43  ;;  %vm5562_vm11 = vcmp.gt.f32.partialorder %v4257_v44, 0.0  ;;  %v12491_v37 = vld [vmem:[#allocation77_spill] sm:$0xff] }
 0x2c7   : > { %12488 = vst [vmem:[#allocation35_spill] sm:$0xff] %v10372_v22  ;;  %v5690_v12 = vmul.f32 0.2, %v4257_v44  ;;  %v4071_v2 = vpop.f32.mrf.mxu0  ;;  %v10380_v30 = vsel %vm5558_vm10, %v4253_v1, %v5686_v51 }
 0x2c8   : > { %v4264_v24 = vpop.f32.mrf.mxu1  ;;  %v4263_v32 = vadd.f32 %v4262_v61, %v4070_v21  ;;  %v4072_v7 = vadd.f32 %v4071_v2, %v10108_v3  ;;  %v5693_v57 = vmul.f32 0.2, %v4261_v53  ;;  %vm5565_vm12 = vcmp.gt.f32.partialorder %v4261_v53, 0.0  ;;  %12490 = vst [vmem:[#allocation186_spill] sm:$0xff] %v10380_v30  ;;  %v12493_v21 = vld [vmem:[#allocation79_spill] sm:$0xff]  ;;  %v12616_v30 = vld [vmem:[#allocation144_spill] sm:$0xff] }
 0x2c9   : > { %v4073_v11 = vpop.f32.mrf.mxu0  ;;  %v10378_v58 = vsel %vm5562_vm11, %v4257_v44, %v5690_v12  ;;  %v12494_v12 = vld [vmem:[#allocation80_spill] sm:$0xff] }
 0x2ca   : > { %v4266_v47 = vpop.f32.mrf.mxu1  ;;  %12489 = vst [vmem:[#allocation36_spill] sm:$0xff] %v10378_v58  ;;  %v4265_v34 = vadd.f32 %v4264_v24, %v4072_v7  ;;  %v4074_v43 = vadd.f32 %v4073_v11, %v10113_v36  ;;  %v10390_v1 = vsel %vm5565_vm12, %v4261_v53, %v5693_v57  ;;  %v5694_v24 = vmul.f32 0.2, %v4263_v32  ;;  %v8231_v57 = vld [vmem:[#allocation5 + $0x8e8] ss:$16 sps:$4 sm:$0xff]  }
 0x2cb   : > { %v4077_v14 = vpop.f32.mrf.mxu0  ;;  %4542 = vmatmul.mubr.bf16.gmra.mxu0 %v12491_v37  ;;  %12495 = vst [vmem:[#allocation189_spill] sm:$0xff] %v10390_v1  ;;  %vm5566_vm14 = vcmp.gt.f32.partialorder %v4263_v32, 0.0  ;;  %v8245_v1 = vld [vmem:[#allocation5 + $0x8ac] ss:$16 sps:$4 sm:$0xff]  }
 0x2cc   : > { %v4270_v60 = vpop.f32.mrf.mxu1  ;;  %4735 = vmatmul.mubr.bf16.gmra.mxu1 %v12492_v20  ;;  %vm5569_vm13 = vcmp.gt.f32.partialorder %v4265_v34, 0.0  ;;  %v5697_v61 = vmul.f32 0.2, %v4265_v34  ;;  %v4078_v44 = vadd.f32 %v4077_v14, %v10118_v50  ;;  %4777 = vmatprep.mubr.bf16.mxu0 %v12493_v21  ;;  %v4267_v36 = vadd.f32 %v4266_v47, %v4074_v43  ;;  %v8234_v47 = vld [vmem:[#allocation5 + $0xae8] ss:$16 sps:$4 sm:$0xff]  }
 0x2cd   : > { %4970 = vmatprep.mubr.bf16.mxu1 %v12494_v12  ;;  %v4079_v51 = vpop.f32.mrf.mxu0  ;;  %v10403_v37 = vsel %vm5566_vm14, %v4263_v32, %v5694_v24  ;;  %v8240_v32 = vld [vmem:[#allocation5 + $0xac8] ss:$16 sps:$4 sm:$0xff]  }
 0x2ce   : > { %v4272_v2 = vpop.f32.mrf.mxu1  ;;  %v10392_v7 = vsel %vm5569_vm13, %v4265_v34, %v5697_v61  ;;  %v4271_v20 = vadd.f32 %v4270_v60, %v4078_v44  ;;  %v4080_v11 = vadd.f32 %v4079_v51, %v10121_v0  ;;  %vm5570_vm15 = vcmp.gt.f32.partialorder %v4267_v36, 0.0  ;;  %v8239_v44 = vld [vmem:[#allocation5 + $0x8cc] ss:$16 sps:$4 sm:$0xff]   ;;  %12498 = vst [vmem:[#allocation38_spill] sm:$0xff] %v10403_v37 }
 0x2cf   : > { %12496 = vst [vmem:[#allocation190_spill] sm:$0xff] %v10392_v7  ;;  %v5698_v50 = vmul.f32 0.2, %v4267_v36  ;;  %v4081_v14 = vpop.f32.mrf.mxu0  ;;  %v8242_v51 = vld [vmem:[#allocation5 + $0xacc] ss:$16 sps:$4 sm:$0xff]  }
 0x2d0   : > { %v4274_v21 = vpop.f32.mrf.mxu1  ;;  %v10397_v12 = vadd.f32 %v4272_v2, %v4080_v11  ;;  %v4082_v53 = vadd.f32 %v4081_v14, %v10124_v4  ;;  %v5701_v43 = vmul.f32 0.2, %v4271_v20  ;;  %vm5573_vm0 = vcmp.gt.f32.partialorder %v4271_v20, 0.0  ;;  %v12500_v4 = vld [vmem:[#allocation82_spill] sm:$0xff]  ;;  %v8237_v14 = vld [vmem:[#allocation5 + $0x8c8] ss:$16 sps:$4 sm:$0xff]  }
 0x2d1   : > { %v4083_v34 = vpop.f32.mrf.mxu0  ;;  %v10400_v60 = vsel %vm5570_vm15, %v4267_v36, %v5698_v50  ;;  %v8251_v7 = vld [vmem:[#allocation5 + $0xaac] ss:$16 sps:$4 sm:$0xff]  }
 0x2d2   : > { %v4276_v61 = vpop.f32.mrf.mxu1  ;;  %12497 = vst [vmem:[#allocation37_spill] sm:$0xff] %v10400_v60  ;;  %v4275_v0 = vadd.f32 %v4274_v21, %v4082_v53  ;;  %v4084_v3 = vadd.f32 %v4083_v34, %v10129_v45  ;;  %v10412_v24 = vsel %vm5573_vm0, %v4271_v20, %v5701_v43  ;;  %v5702_v36 = vmul.f32 0.2, %v10397_v12 }
 0x2d3   : > { %v4087_v2 = vpop.f32.mrf.mxu0  ;;  %4778 = vmatmul.mubr.bf16.vlgmr.msra.gmra.mxu0 %v12499_v39  ;;  %12501 = vst [vmem:[#allocation191_spill] sm:$0xff] %v10412_v24  ;;  %v12502_v39 = vld [vmem:[#allocation83_spill] sm:$0xff]  ;;  %vm5574_vm3 = vcmp.gt.f32.partialorder %v10397_v12, 0.0 }
 0x2d4   : > { %v4280_v11 = vpop.f32.mrf.mxu1  ;;  %4971 = vmatmul.mubr.bf16.vlgmr.msra.gmra.mxu1 %v12500_v4  ;;  %vm5577_vm1 = vcmp.gt.f32.partialorder %v4275_v0, 0.0  ;;  %v5705_v50 = vmul.f32 0.2, %v4275_v0  ;;  %v4088_v21 = vadd.f32 %v4087_v2, %v10134_v41  ;;  %5132 = vmatpush1.bf16.msra.mxu0 %v8231_v57  ;;  %v4277_v45 = vadd.f32 %v4276_v61, %v4084_v3  ;;  %v12503_v4 = vld [vmem:[#allocation84_spill] sm:$0xff] }
 0x2d5   : > { %5325 = vmatpush1.bf16.msra.mxu1 %v8234_v47  ;;  %v4089_v53 = vpop.f32.mrf.mxu0  ;;  %4787 = vmatprep.mubr.bf16.mxu0 %v12502_v39  ;;  %v8260_v39 = vld [vmem:[#allocation5 + $0xa8c] ss:$16 sps:$4 sm:$0xff]  }
 0x2d6   : > { %v4282_v34 = vpop.f32.mrf.mxu1  ;;  %4980 = vmatprep.mubr.bf16.mxu1 %v12503_v4  ;;  %v10417_v37 = vsel %vm5577_vm1, %v4275_v0, %v5705_v50  ;;  %v4281_v41 = vadd.f32 %v4280_v11, %v4088_v21  ;;  %v4090_v57 = vadd.f32 %v4089_v53, %v10137_v15  ;;  %5133 = vmatprep.subr.bf16.mxu0 %v8239_v44  ;;  %vm5578_vm4 = vcmp.gt.f32.partialorder %v4277_v45, 0.0  ;;  %v8243_v44 = vld [vmem:[#allocation5 + $0x8a8] ss:$16 sps:$4 sm:$0xff]   ;;  %v8248_v53 = vld [vmem:[#allocation5 + $0x88c] ss:$16 sps:$4 sm:$0xff]  }
 0x2d7   : > { %12504 = vst [vmem:[#allocation39_spill] sm:$0xff] %v10417_v37  ;;  %5326 = vmatprep.subr.bf16.mxu1 %v8242_v51  ;;  %v5706_v20 = vmul.f32 0.2, %v4277_v45  ;;  %v4091_v47 = vpop.f32.mrf.mxu0  ;;  %v8249_v51 = vld [vmem:[#allocation5 + $0xaa8] ss:$16 sps:$4 sm:$0xff]  }
 0x2d8   : > { %v4284_v43 = vpop.f32.mrf.mxu1  ;;  %v10423_v61 = vadd.f32 %v4282_v34, %v4090_v57  ;;  %v4092_v2 = vadd.f32 %v4091_v47, %v10140_v49  ;;  %5134 = vmatpush1.bf16.msra.mxu0 %v8237_v14  ;;  %v5709_v0 = vmul.f32 0.2, %v4281_v41  ;;  %vm5581_vm5 = vcmp.gt.f32.partialorder %v4281_v41, 0.0  ;;  %v12507_v4 = vld [vmem:[#allocation85_spill] sm:$0xff]  ;;  %v12510_v47 = vld [vmem:[#allocation88_spill] sm:$0xff] }
 0x2d9   : > { %5327 = vmatpush1.bf16.msra.mxu1 %v8240_v32  ;;  %v4093_v11 = vpop.f32.mrf.mxu0  ;;  %5135 = vmatprep.subr.bf16.mxu0 %v8245_v1  ;;  %v10426_v50 = vsel %vm5578_vm4, %v4277_v45, %v5706_v20  ;;  %v10431_v34 = vsel %vm5574_vm3, %v10397_v12, %v5702_v36  ;;  %v12508_v1 = vld [vmem:[#allocation86_spill] sm:$0xff]  ;;  %v12509_v20 = vld [vmem:[#allocation87_spill] sm:$0xff] }
 0x2da   : > { %v4286_v15 = vpop.f32.mrf.mxu1  ;;  %5328 = vmatprep.subr.bf16.mxu1 %v8251_v7  ;;  %12505 = vst [vmem:[#allocation40_spill] sm:$0xff] %v10426_v50  ;;  %v4285_v21 = vadd.f32 %v4284_v43, %v4092_v2  ;;  %12506 = vst [vmem:[#allocation194_spill] sm:$0xff] %v10431_v34  ;;  %v4094_v49 = vadd.f32 %v4093_v11, %v10145_v33  ;;  %v10442_v12 = vsel %vm5581_vm5, %v4281_v41, %v5709_v0  ;;  %v8246_v2 = vld [vmem:[#allocation5 + $0x888] ss:$16 sps:$4 sm:$0xff]   ;;  %v8275_v41 = vld [vmem:[#allocation5 + $0xa4c] ss:$16 sps:$4 sm:$0xff]  }
 0x2db   : > { %v4097_v14 = vpop.f32.mrf.mxu0  ;;  %4788 = vmatmul.mubr.bf16.gmra.mxu0 %v12507_v4  ;;  %12511 = vst [vmem:[#allocation197_spill] sm:$0xff] %v10442_v12  ;;  %v8258_v11 = vld [vmem:[#allocation5 + $0xa88] ss:$16 sps:$4 sm:$0xff]   ;;  %v5710_v4 = vmul.f32 0.2, %v10423_v61  ;;  %vm5582_vm7 = vcmp.gt.f32.partialorder %v10423_v61, 0.0 }
 0x2dc   : > { %v4290_v32 = vpop.f32.mrf.mxu1  ;;  %4981 = vmatmul.mubr.bf16.gmra.mxu1 %v12508_v1  ;;  %vm5585_vm6 = vcmp.gt.f32.partialorder %v4285_v21, 0.0  ;;  %v5713_v45 = vmul.f32 0.2, %v4285_v21  ;;  %v4098_v57 = vadd.f32 %v4097_v14, %v10150_v42  ;;  %4797 = vmatprep.mubr.bf16.mxu0 %v12509_v20  ;;  %v4287_v33 = vadd.f32 %v4286_v15, %v4094_v49  ;;  %v8254_v14 = vld [vmem:[#allocation5 + $0x86c] ss:$16 sps:$4 sm:$0xff]   ;;  %v12612_v50 = vld [vmem:[#allocation140_spill] sm:$0xff] }
 0x2dd   : > { %4990 = vmatprep.mubr.bf16.mxu1 %v12510_v47  ;;  %v4099_v36 = vpop.f32.mrf.mxu0  ;;  %5136 = vmatpush1.bf16.msra.mxu0 %v8243_v44  ;;  %v8266_v20 = vld [vmem:[#allocation5 + $0xa6c] ss:$16 sps:$4 sm:$0xff]  }
 0x2de   : > { %v4292_v43 = vpop.f32.mrf.mxu1  ;;  %5329 = vmatpush1.bf16.msra.mxu1 %v8249_v51  ;;  %v10445_v1 = vsel %vm5585_vm6, %v4285_v21, %v5713_v45  ;;  %v4291_v3 = vadd.f32 %v4290_v32, %v4098_v57  ;;  %v4100_v42 = vadd.f32 %v4099_v36, %v10153_v19  ;;  %5137 = vmatprep.subr.bf16.mxu0 %v8248_v53  ;;  %vm5586_vm8 = vcmp.gt.f32.partialorder %v4287_v33, 0.0  ;;  %v12513_v21 = vld [vmem:[#allocation17_spill] sm:$0xff] }
 0x2df   : > { %12512 = vst [vmem:[#allocation198_spill] sm:$0xff] %v10445_v1  ;;  %5330 = vmatprep.subr.bf16.mxu1 %v8260_v39  ;;  %v5714_v0 = vmul.f32 0.2, %v4287_v33  ;;  %v4101_v15 = vpop.f32.mrf.mxu0  ;;  %v8252_v53 = vld [vmem:[#allocation5 + $0x868] ss:$16 sps:$4 sm:$0xff]  }
 0x2e0   : > { %v4294_v44 = vpop.f32.mrf.mxu1  ;;  %v10451_v51 = vadd.f32 %v4292_v43, %v4100_v42  ;;  %v4102_v49 = vadd.f32 %v4101_v15, %v12513_v21  ;;  %v5717_v32 = vmul.f32 0.2, %v4291_v3  ;;  %v8264_v39 = vld [vmem:[#allocation5 + $0xa68] ss:$16 sps:$4 sm:$0xff]   ;;  %vm5589_vm9 = vcmp.gt.f32.partialorder %v4291_v3, 0.0  ;;  %v12516_v42 = vld [vmem:[#allocation18_spill] sm:$0xff] }
 0x2e1   : > { %v4103_v45 = vpop.f32.mrf.mxu0  ;;  %5138 = vmatpush1.bf16.msra.mxu0 %v8246_v2  ;;  %v10454_v57 = vsel %vm5586_vm8, %v4287_v33, %v5714_v0  ;;  %v8257_v36 = vld [vmem:[#allocation5 + $0x84c] ss:$16 sps:$4 sm:$0xff]   ;;  %v10459_v43 = vsel %vm5582_vm7, %v10423_v61, %v5710_v4 }
 0x2e2   : > { %v4296_v19 = vpop.f32.mrf.mxu1  ;;  %5331 = vmatpush1.bf16.msra.mxu1 %v8258_v11  ;;  %12514 = vst [vmem:[#allocation41_spill] sm:$0xff] %v10454_v57  ;;  %v4295_v47 = vadd.f32 %v4294_v44, %v4102_v49  ;;  %5139 = vmatprep.subr.bf16.mxu0 %v8254_v14  ;;  %12515 = vst [vmem:[#allocation42_spill] sm:$0xff] %v10459_v43  ;;  %v4104_v15 = vadd.f32 %v4103_v45, %v12516_v42  ;;  %v12517_v7 = vld [vmem:[#allocation89_spill] sm:$0xff]  ;;  %v12518_v11 = vld [vmem:[#allocation90_spill] sm:$0xff]  ;;  %v5718_v33 = vmul.f32 0.2, %v10451_v51 }
 0x2e3   : > { %5332 = vmatprep.subr.bf16.mxu1 %v8266_v20  ;;  %v4107_v21 = vpop.f32.mrf.mxu0  ;;  %4798 = vmatmul.mubr.bf16.gmra.mxu0 %v12517_v7  ;;  %v12519_v20 = vld [vmem:[#allocation19_spill] sm:$0xff]  ;;  %v12521_v49 = vld [vmem:[#allocation92_spill] sm:$0xff]  ;;  %v10470_v61 = vsel %vm5589_vm9, %v4291_v3, %v5717_v32  ;;  %vm5590_vm11 = vcmp.gt.f32.partialorder %v10451_v51, 0.0 }
 0x2e4   : > { %v4300_v2 = vpop.f32.mrf.mxu1  ;;  %4991 = vmatmul.mubr.bf16.gmra.mxu1 %v12518_v11  ;;  %vm5593_vm10 = vcmp.gt.f32.partialorder %v4295_v47, 0.0  ;;  %v5721_v14 = vmul.f32 0.2, %v4295_v47  ;;  %v4108_v0 = vadd.f32 %v4107_v21, %v12519_v20  ;;  %v12520_v44 = vld [vmem:[#allocation91_spill] sm:$0xff]  ;;  %12522 = vst [vmem:[#allocation199_spill] sm:$0xff] %v10470_v61  ;;  %v4297_v4 = vadd.f32 %v4296_v19, %v4104_v15  ;;  %v12524_v21 = vld [vmem:[#allocation20_spill] sm:$0xff] }
 0x2e5   : > { %4807 = vmatprep.mubr.bf16.mxu0 %v12520_v44  ;;  %5000 = vmatprep.mubr.bf16.mxu1 %v12521_v49  ;;  %v4109_v45 = vpop.f32.mrf.mxu0  ;;  %v8255_v7 = vld [vmem:[#allocation5 + $0x848] ss:$16 sps:$4 sm:$0xff]   ;;  %v8263_v44 = vld [vmem:[#allocation5 + $0x82c] ss:$16 sps:$4 sm:$0xff]  }
 0x2e6   : > { %v4302_v42 = vpop.f32.mrf.mxu1  ;;  %5140 = vmatpush1.bf16.msra.mxu0 %v8252_v53  ;;  %5333 = vmatpush1.bf16.msra.mxu1 %v8264_v39  ;;  %v8273_v11 = vld [vmem:[#allocation5 + $0xa48] ss:$16 sps:$4 sm:$0xff]   ;;  %v10473_v12 = vsel %vm5593_vm10, %v4295_v47, %v5721_v14  ;;  %v4301_v1 = vadd.f32 %v4300_v2, %v4108_v0  ;;  %v4110_v20 = vadd.f32 %v4109_v45, %v12524_v21  ;;  %v8281_v49 = vld [vmem:[#allocation5 + $0xa2c] ss:$16 sps:$4 sm:$0xff]   ;;  %vm5594_vm12 = vcmp.gt.f32.partialorder %v4297_v4, 0.0 }
 0x2e7   : > { %12523 = vst [vmem:[#allocation43_spill] sm:$0xff] %v10473_v12  ;;  %5141 = vmatprep.subr.bf16.mxu0 %v8257_v36  ;;  %5334 = vmatprep.subr.bf16.mxu1 %v8275_v41  ;;  %v5722_v32 = vmul.f32 0.2, %v4297_v4  ;;  %v4111_v19 = vpop.f32.mrf.mxu0  ;;  %v12525_v47 = vld [vmem:[#allocation155_spill] sm:$0xff] }
 0x2e8   : > { %v4304_v53 = vpop.f32.mrf.mxu1  ;;  %v10479_v39 = vadd.f32 %v4302_v42, %v4110_v20  ;;  %v4112_v15 = vadd.f32 %v4111_v19, %v12525_v47  ;;  %v8261_v2 = vld [vmem:[#allocation5 + $0x828] ss:$16 sps:$4 sm:$0xff]   ;;  %v5725_v0 = vmul.f32 0.2, %v4301_v1  ;;  %vm5597_vm13 = vcmp.gt.f32.partialorder %v4301_v1, 0.0 }
 0x2e9   : > { %v8279_v14 = vld [vmem:[#allocation5 + $0xa28] ss:$16 sps:$4 sm:$0xff]   ;;  %v4113_v36 = vpop.f32.mrf.mxu0  ;;  %v8299_v41 = vld [vmem:[#allocation5 + $0xb2c] ss:$16 sps:$4 sm:$0x1f]   ;;  %v10482_v21 = vsel %vm5594_vm12, %v4297_v4, %v5722_v32  ;;  %v10487_v42 = vsel %vm5590_vm11, %v10451_v51, %v5718_v33 }
 0x2ea   : > { %v4306_v45 = vpop.f32.mrf.mxu1  ;;  %5142 = vmatpush1.bf16.msra.mxu0 %v8255_v7  ;;  %5335 = vmatpush1.bf16.msra.mxu1 %v8273_v11  ;;  %12526 = vst [vmem:[#allocation44_spill] sm:$0xff] %v10482_v21  ;;  %v4305_v3 = vadd.f32 %v4304_v53, %v4112_v15  ;;  %v8269_v61 = vld [vmem:[#allocation5 + $0x80c] ss:$16 sps:$4 sm:$0xff]   ;;  %12527 = vst [vmem:[#allocation202_spill] sm:$0xff] %v10487_v42  ;;  %v12530_v11 = vld [vmem:[#allocation94_spill] sm:$0xff]  ;;  %v10498_v33 = vsel %vm5597_vm13, %v4301_v1, %v5725_v0  ;;  %vm5598_vm15 = vcmp.gt.f32.partialorder %v10479_v39, 0.0 }
 0x2eb   : > { %5143 = vmatprep.subr.bf16.mxu0 %v8263_v44  ;;  %5336 = vmatprep.subr.bf16.mxu1 %v8281_v49  ;;  %v8290_v12 = vld [vmem:[#allocation5 + $0xa0c] ss:$16 sps:$4 sm:$0xff]   ;;  %v4117_v47 = vpop.f32.mrf.mxu0  ;;  %v12531_v49 = vld [vmem:[#allocation158_spill] sm:$0xff]  ;;  %v12533_v15 = vld [vmem:[#allocation96_spill] sm:$0xff]  ;;  %12534 = vst [vmem:[#allocation205_spill] sm:$0xff] %v10498_v33 }
 0x2ec   : > { %v12528_v20 = vld [vmem:[#allocation157_spill] sm:$0xff]  ;;  %v4310_v43 = vpop.f32.mrf.mxu1  ;;  %5001 = vmatmul.mubr.bf16.gmra.mxu1 %v12530_v11  ;;  %vm5601_vm14 = vcmp.gt.f32.partialorder %v4305_v3, 0.0  ;;  %v5729_v44 = vmul.f32 0.2, %v4305_v3  ;;  %v4118_v32 = vadd.f32 %v4117_v47, %v12531_v49  ;;  %v12532_v53 = vld [vmem:[#allocation95_spill] sm:$0xff] }
 0x2ed   : > { %v4114_v19 = vadd.f32 %v4113_v36, %v12528_v20  ;;  %v12529_v7 = vld [vmem:[#allocation93_spill] sm:$0xff]  ;;  %5010 = vmatprep.mubr.bf16.mxu1 %v12533_v15  ;;  %v4119_v20 = vpop.f32.mrf.mxu0  ;;  %v5726_v21 = vmul.f32 0.2, %v10479_v39 }
 0x2ee   : > { %4808 = vmatmul.mubr.bf16.gmra.mxu0 %v12529_v7  ;;  %v8267_v51 = vld [vmem:[#allocation5 + $0x808] ss:$16 sps:$4 sm:$0xff]   ;;  %v4312_v7 = vpop.f32.mrf.mxu1  ;;  %5337 = vmatpush1.bf16.msra.mxu1 %v8279_v14  ;;  %v10503_v47 = vsel %vm5601_vm14, %v4305_v3, %v5729_v44  ;;  %v4311_v49 = vadd.f32 %v4310_v43, %v4118_v32  ;;  %v8272_v1 = vld [vmem:[#allocation5 + $0x9ec] ss:$16 sps:$4 sm:$0xff]  }
 0x2ef   : > { %4817 = vmatprep.mubr.bf16.mxu0 %v12532_v53  ;;  %v4307_v36 = vadd.f32 %v4306_v45, %v4114_v19  ;;  %5144 = vmatpush1.bf16.msra.mxu0 %v8261_v2  ;;  %v8288_v11 = vld [vmem:[#allocation5 + $0xa08] ss:$16 sps:$4 sm:$0xff]   ;;  %12536 = vst [vmem:[#allocation206_spill] sm:$0xff] %v10503_v47  ;;  %v4121_v0 = vpop.f32.mrf.mxu0  ;;  %v12538_v19 = vld [vmem:[#allocation22_spill] sm:$0xff]  ;;  %v8278_v2 = vld [vmem:[#allocation5 + $0x9cc] ss:$16 sps:$4 sm:$0xff]  }
 0x2f0   : > { %v8297_v57 = vld [vmem:[#allocation5 + $0xb28] ss:$16 sps:$4 sm:$0x1f]   ;;  %5145 = vmatprep.subr.bf16.mxu0 %v8269_v61  ;;  %5338 = vmatprep.subr.bf16.mxu1 %v8290_v12  ;;  %v4314_v45 = vpop.f32.mrf.mxu1  ;;  %v4122_v3 = vadd.f32 %v4121_v0, %v12538_v19  ;;  %v5733_v44 = vmul.f32 0.2, %v4311_v49  ;;  %vm5605_vm1 = vcmp.gt.f32.partialorder %v4311_v49, 0.0 }
 0x2f1   : > { %v12535_v4 = vld [vmem:[#allocation97_spill] sm:$0xff]  ;;  %vm5602_vm0 = vcmp.gt.f32.partialorder %v4307_v36, 0.0  ;;  %v5730_v14 = vmul.f32 0.2, %v4307_v36  ;;  %v4123_v43 = vpop.f32.mrf.mxu0 }
 0x2f2   : > { %v3199_v42 = vand.u32 %v8299_v41, %v12535_v4  ;;  %v12537_v53 = vld [vmem:[#allocation21_spill] sm:$0xff]  ;;  %v4316_v32 = vpop.f32.mrf.mxu1  ;;  %5339 = vmatpush1.bf16.msra.mxu1 %v8288_v11  ;;  %v3196_v12 = vand.u32 %v8297_v57, %v12535_v4  ;;  %v12542_v11 = vld [vmem:[#allocation98_spill] sm:$0xff]  ;;  %v12543_v57 = vld [vmem:[#allocation99_spill] sm:$0xff] }
 0x2f3   : > { %v4120_v15 = vadd.f32 %v4119_v20, %v12537_v53  ;;  %5146 = vmatpush1.bf16.msra.mxu0 %v8267_v51  ;;  %v8270_v61 = vld [vmem:[#allocation5 + $0x9e8] ss:$16 sps:$4 sm:$0xff]   ;;  %v10513_v20 = vsel %vm5602_vm0, %v4307_v36, %v5730_v14  ;;  %v4315_v53 = vadd.f32 %v4314_v45, %v4122_v3  ;;  %v8305_v33 = vld [vmem:[#allocation5 + $0xb0c] ss:$16 sps:$4 sm:$0xff]   ;;  %v4127_v51 = vpop.f32.mrf.mxu0  ;;  %v12545_v14 = vld [vmem:[#allocation100_spill] sm:$0xff] }
 0x2f4   : > { %12539 = vst [vmem:[#allocation45_spill] sm:$0xff] %v10513_v20  ;;  %5147 = vmatprep.subr.bf16.mxu0 %v8272_v1  ;;  %5352 = vmatprep.subr.bf16.mxu1 %v3199_v42  ;;  %v4320_v19 = vpop.f32.mrf.mxu1  ;;  %v12544_v42 = vld [vmem:[#allocation23_spill] sm:$0xff]  ;;  %v12546_v45 = vld [vmem:[#allocation101_spill] sm:$0xff]  ;;  %v12608_v20 = vld [vmem:[#allocation136_spill] sm:$0xff] }
 0x2f5   : > { %v10509_v41 = vadd.f32 %v4312_v7, %v4120_v15  ;;  %v10518_v7 = vsel %vm5598_vm15, %v10479_v39, %v5726_v21  ;;  %v12541_v15 = vld [vmem:[#allocation159_spill] sm:$0xff]  ;;  %5011 = vmatmul.mubr.bf16.gmra.mxu1 %v12543_v57  ;;  %vm5609_vm3 = vcmp.gt.f32.partialorder %v4315_v53, 0.0  ;;  %v5737_v36 = vmul.f32 0.2, %v4315_v53  ;;  %v4129_v3 = vpop.f32.mrf.mxu0 }
 0x2f6   : > { %12540 = vst [vmem:[#allocation46_spill] sm:$0xff] %v10518_v7  ;;  %v4124_v0 = vadd.f32 %v4123_v43, %v12541_v15  ;;  %4818 = vmatmul.mubr.bf16.gmra.mxu0 %v12542_v11  ;;  %v4128_v1 = vadd.f32 %v4127_v51, %v12544_v42  ;;  %5020 = vmatprep.mubr.bf16.mxu1 %v12546_v45  ;;  %v4322_v43 = vpop.f32.mrf.mxu1  ;;  %v8276_v15 = vld [vmem:[#allocation5 + $0x9c8] ss:$16 sps:$4 sm:$0xff]   ;;  %v12549_v51 = vld [vmem:[#allocation24_spill] sm:$0xff] }
 0x2f7   : > { %4827 = vmatprep.mubr.bf16.mxu0 %v12545_v14  ;;  %v10529_v39 = vsel %vm5605_vm1, %v4311_v49, %v5733_v44  ;;  %5148 = vmatpush2.bf16.msra.mxu0 %v8270_v61  ;;  %v8303_v11 = vld [vmem:[#allocation5 + $0xb08] ss:$16 sps:$4 sm:$0xff]   ;;  %v5734_v57 = vmul.f32 0.2, %v10509_v41  ;;  %v10532_v4 = vsel %vm5609_vm3, %v4315_v53, %v5737_v36  ;;  %v4130_v42 = vadd.f32 %v4129_v3, %v12549_v51  ;;  %v8284_v14 = vld [vmem:[#allocation5 + $0x9ac] ss:$16 sps:$4 sm:$0xff]  }
 0x2f8   : > { %12547 = vst [vmem:[#allocation47_spill] sm:$0xff] %v10529_v39  ;;  %v4317_v21 = vadd.f32 %v4316_v32, %v4124_v0  ;;  %5353 = vmatpush2.bf16.msra.mxu1 %v3196_v12  ;;  %12548 = vst [vmem:[#allocation48_spill] sm:$0xff] %v10532_v4  ;;  %v4321_v47 = vadd.f32 %v4320_v19, %v4128_v1  ;;  %5149 = vmatprep.subr.bf16.mxu0 %v8278_v2  ;;  %vm5606_vm4 = vcmp.gt.f32.partialorder %v10509_v41, 0.0  ;;  %v4131_v32 = vpop.f32.mrf.mxu0  ;;  %v4324_v61 = vpop.f32.mrf.mxu1  ;;  %v12550_v0 = vld [vmem:[#allocation162_spill] sm:$0xff]  ;;  %v8282_v1 = vld [vmem:[#allocation5 + $0x9a8] ss:$16 sps:$4 sm:$0xff]  }
 0x2f9   : > { %5354 = vmatprep.subr.bf16.mxu1 %v8305_v33  ;;  %v4323_v12 = vadd.f32 %v4322_v43, %v4130_v42  ;;  %v4132_v45 = vadd.f32 %v4131_v32, %v12550_v0  ;;  %v8287_v3 = vld [vmem:[#allocation5 + $0x98c] ss:$16 sps:$4 sm:$0xff]   ;;  %v10544_v51 = vsel %vm5606_vm4, %v10509_v41, %v5734_v57  ;;  %v12554_v49 = vld [vmem:[#allocation102_spill] sm:$0xff] }
 0x2fa   : > { %vm5610_vm5 = vcmp.gt.f32.partialorder %v4317_v21, 0.0  ;;  %v5738_v44 = vmul.f32 0.2, %v4317_v21  ;;  %v5741_v53 = vmul.f32 0.2, %v4321_v47  ;;  %v4133_v36 = vpop.f32.mrf.mxu0  ;;  %v4326_v19 = vpop.f32.mrf.mxu1  ;;  %vm5613_vm6 = vcmp.gt.f32.partialorder %v4321_v47, 0.0 }
 0x2fb   : > { %5150 = vmatpush2.bf16.msra.mxu0 %v8276_v15  ;;  %v4325_v33 = vadd.f32 %v4324_v61, %v4132_v45  ;;  %12552 = vst [vmem:[#allocation50_spill] sm:$0xff] %v10544_v51  ;;  %v12553_v43 = vld [vmem:[#allocation165_spill] sm:$0xff]  ;;  %v12555_v15 = vld [vmem:[#allocation103_spill] sm:$0xff]  ;;  %v12557_v61 = vld [vmem:[#allocation104_spill] sm:$0xff]  ;;  %vm5614_vm8 = vcmp.gt.f32.partialorder %v4323_v12, 0.0 }
 0x2fc   : > { %5355 = vmatpush2.bf16.msra.mxu1 %v8303_v11  ;;  %v10539_v2 = vsel %vm5610_vm5, %v4317_v21, %v5738_v44  ;;  %5151 = vmatprep.subr.bf16.mxu0 %v8284_v14  ;;  %v4134_v42 = vadd.f32 %v4133_v36, %v12553_v43  ;;  %v4137_v32 = vpop.f32.mrf.mxu0  ;;  %v4330_v0 = vpop.f32.mrf.mxu1  ;;  %v12556_v14 = vld [vmem:[#allocation166_spill] sm:$0xff]  ;;  %v12558_v45 = vld [vmem:[#allocation105_spill] sm:$0xff]  ;;  %v10555_v41 = vsel %vm5613_vm6, %v4321_v47, %v5741_v53 }
 0x2fd   : > { %12551 = vst [vmem:[#allocation49_spill] sm:$0xff] %v10539_v2  ;;  %5021 = vmatmul.mubr.bf16.gmra.mxu1 %v12555_v15  ;;  %vm5617_vm7 = vcmp.gt.f32.partialorder %v4325_v33, 0.0  ;;  %v5745_v11 = vmul.f32 0.2, %v4325_v33  ;;  %v4138_v44 = vadd.f32 %v4137_v32, %v12556_v14  ;;  %12559 = vst [vmem:[#allocation51_spill] sm:$0xff] %v10555_v41  ;;  %v12561_v4 = vld [vmem:[#allocation25_spill] sm:$0xff] }
 0x2fe   : > { %4828 = vmatmul.mubr.bf16.gmra.mxu0 %v12554_v49  ;;  %5030 = vmatprep.mubr.bf16.mxu1 %v12558_v45  ;;  %v4327_v57 = vadd.f32 %v4326_v19, %v4134_v42  ;;  %v4139_v36 = vpop.f32.mrf.mxu0  ;;  %v4332_v43 = vpop.f32.mrf.mxu1  ;;  %v8285_v49 = vld [vmem:[#allocation5 + $0x988] ss:$16 sps:$4 sm:$0xff]   ;;  %v5742_v15 = vmul.f32 0.2, %v4323_v12  ;;  %v8293_v32 = vld [vmem:[#allocation5 + $0x96c] ss:$16 sps:$4 sm:$0xff]  }
 0x2ff   : > { %4837 = vmatprep.mubr.bf16.mxu0 %v12557_v61  ;;  %5152 = vmatpush2.bf16.msra.mxu0 %v8282_v1  ;;  %v10557_v39 = vsel %vm5617_vm7, %v4325_v33, %v5745_v11  ;;  %v4331_v21 = vadd.f32 %v4330_v0, %v4138_v44  ;;  %v4140_v51 = vadd.f32 %v4139_v36, %v12561_v4  ;;  %v12562_v61 = vld [vmem:[#allocation26_spill] sm:$0xff]  ;;  %v8291_v0 = vld [vmem:[#allocation5 + $0x968] ss:$16 sps:$4 sm:$0xff]  }
 0x300   : > { %12560 = vst [vmem:[#allocation52_spill] sm:$0xff] %v10557_v39  ;;  %5153 = vmatprep.subr.bf16.mxu0 %v8287_v3  ;;  %vm5618_vm9 = vcmp.gt.f32.partialorder %v4327_v57, 0.0  ;;  %v5746_v47 = vmul.f32 0.2, %v4327_v57  ;;  %v4141_v53 = vpop.f32.mrf.mxu0  ;;  %v4334_v19 = vpop.f32.mrf.mxu1  ;;  %v8296_v3 = vld [vmem:[#allocation5 + $0x94c] ss:$16 sps:$4 sm:$0xff]   ;;  %v10566_v44 = vsel %vm5614_vm8, %v4323_v12, %v5742_v15 }
 0x301   : > { %v4333_v42 = vadd.f32 %v4332_v43, %v4140_v51  ;;  %v4142_v1 = vadd.f32 %v4141_v53, %v12562_v61  ;;  %v5749_v45 = vmul.f32 0.2, %v4331_v21  ;;  %vm5621_vm10 = vcmp.gt.f32.partialorder %v4331_v21, 0.0  ;;  %12564 = vst [vmem:[#allocation54_spill] sm:$0xff] %v10566_v44  ;;  %v12565_v36 = vld [vmem:[#allocation167_spill] sm:$0xff]  ;;  %v12566_v43 = vld [vmem:[#allocation106_spill] sm:$0xff] }
 0x302   : > { %v4143_v2 = vpop.f32.mrf.mxu0  ;;  %v4336_v33 = vpop.f32.mrf.mxu1  ;;  %v10563_v11 = vsel %vm5618_vm9, %v4327_v57, %v5746_v47  ;;  %v12567_v53 = vld [vmem:[#allocation107_spill] sm:$0xff]  ;;  %v12570_v61 = vld [vmem:[#allocation109_spill] sm:$0xff] }
 0x303   : > { %5154 = vmatpush2.bf16.msra.mxu0 %v8285_v49  ;;  %12563 = vst [vmem:[#allocation53_spill] sm:$0xff] %v10563_v11  ;;  %v4335_v4 = vadd.f32 %v4334_v19, %v4142_v1  ;;  %v4144_v14 = vadd.f32 %v4143_v2, %v12565_v36  ;;  %v12568_v47 = vld [vmem:[#allocation27_spill] sm:$0xff]  ;;  %v10577_v12 = vsel %vm5621_vm10, %v4331_v21, %v5749_v45  ;;  %vm5622_vm12 = vcmp.gt.f32.partialorder %v4333_v42, 0.0 }
 0x304   : > { %5155 = vmatprep.subr.bf16.mxu0 %v8293_v32  ;;  %v4147_v41 = vpop.f32.mrf.mxu0  ;;  %v4340_v51 = vpop.f32.mrf.mxu1  ;;  %v12569_v32 = vld [vmem:[#allocation108_spill] sm:$0xff]  ;;  %12571 = vst [vmem:[#allocation55_spill] sm:$0xff] %v10577_v12  ;;  %v8294_v36 = vld [vmem:[#allocation5 + $0x948] ss:$16 sps:$4 sm:$0xff]  }
 0x305   : > { %5031 = vmatmul.mubr.bf16.gmra.mxu1 %v12567_v53  ;;  %vm5625_vm11 = vcmp.gt.f32.partialorder %v4335_v4, 0.0  ;;  %v5753_v57 = vmul.f32 0.2, %v4335_v4  ;;  %v4148_v19 = vadd.f32 %v4147_v41, %v12568_v47  ;;  %v4337_v2 = vadd.f32 %v4336_v33, %v4144_v14  ;;  %v8302_v41 = vld [vmem:[#allocation5 + $0x92c] ss:$16 sps:$4 sm:$0xff]  }
 0x306   : > { %4838 = vmatmul.mubr.bf16.gmra.mxu0 %v12566_v43  ;;  %5040 = vmatprep.mubr.bf16.mxu1 %v12570_v61  ;;  %v4149_v15 = vpop.f32.mrf.mxu0  ;;  %v4342_v1 = vpop.f32.mrf.mxu1  ;;  %v5750_v43 = vmul.f32 0.2, %v4333_v42 }
 0x307   : > { %4847 = vmatprep.mubr.bf16.mxu0 %v12569_v32  ;;  %5156 = vmatpush2.bf16.msra.mxu0 %v8291_v0  ;;  %v10579_v53 = vsel %vm5625_vm11, %v4335_v4, %v5753_v57  ;;  %v4341_v49 = vadd.f32 %v4340_v51, %v4148_v19  ;;  %v4150_v39 = vadd.f32 %v4149_v15, %v10233_v54  ;;  %vm5626_vm13 = vcmp.gt.f32.partialorder %v4337_v2, 0.0  ;;  %v8300_v51 = vld [vmem:[#allocation5 + $0x928] ss:$16 sps:$4 sm:$0xff]  }
 0x308   : > { %12572 = vst [vmem:[#allocation56_spill] sm:$0xff] %v10579_v53  ;;  %5157 = vmatprep.subr.bf16.mxu0 %v8296_v3  ;;  %v5754_v21 = vmul.f32 0.2, %v4337_v2  ;;  %v4151_v45 = vpop.f32.mrf.mxu0  ;;  %v4344_v14 = vpop.f32.mrf.mxu1  ;;  %v8308_v3 = vld [vmem:[#allocation5 + $0x90c] ss:$16 sps:$4 sm:$0xff]   ;;  %v10588_v19 = vsel %vm5622_vm12, %v4333_v42, %v5750_v43  ;;  %v12579_v42 = vld [vmem:[#allocation114_spill] sm:$0xff] }
 0x309   : > { %v4343_v33 = vadd.f32 %v4342_v1, %v4150_v39  ;;  %v4152_v0 = vadd.f32 %v4151_v45, %v10236_v35  ;;  %v5757_v32 = vmul.f32 0.2, %v4341_v49  ;;  %vm5629_vm14 = vcmp.gt.f32.partialorder %v4341_v49, 0.0  ;;  %12574 = vst [vmem:[#allocation58_spill] sm:$0xff] %v10588_v19  ;;  %v12575_v1 = vld [vmem:[#allocation110_spill] sm:$0xff]  ;;  %v12576_v35 = vld [vmem:[#allocation111_spill] sm:$0xff] }
 0x30a   : > { %v4153_v61 = vpop.f32.mrf.mxu0  ;;  %v4346_v4 = vpop.f32.mrf.mxu1  ;;  %v10585_v57 = vsel %vm5626_vm13, %v4337_v2, %v5754_v21  ;;  %v12578_v45 = vld [vmem:[#allocation113_spill] sm:$0xff]  ;;  %v1330_v43 = vsub.s32 2, %v12579_v42 }
 0x30b   : > { %5158 = vmatpush2.bf16.msra.mxu0 %v8294_v36  ;;  %12573 = vst [vmem:[#allocation57_spill] sm:$0xff] %v10585_v57  ;;  %v4345_v54 = vadd.f32 %v4344_v14, %v4152_v0  ;;  %v4154_v15 = vadd.f32 %v4153_v61, %v10241_v63  ;;  %v10600_v63 = vsel %vm5629_vm14, %v4341_v49, %v5757_v32  ;;  %v5758_v36 = vmul.f32 0.2, %v4343_v33  ;;  %v12604_v57 = vld [vmem:[#allocation132_spill] sm:$0xff] }
 0x30c   : > { %5159 = vmatprep.subr.bf16.mxu0 %v8302_v41  ;;  %v4157_v47 = vpop.f32.mrf.mxu0  ;;  %v4350_v39 = vpop.f32.mrf.mxu1  ;;  %v12577_v41 = vld [vmem:[#allocation112_spill] sm:$0xff]  ;;  %12580 = vst [vmem:[#allocation59_spill] sm:$0xff] %v10600_v63  ;;  %vm5630_vm0 = vcmp.gt.f32.partialorder %v4343_v33, 0.0 }
 0x30d   : > { %5041 = vmatmul.mubr.bf16.gmra.mxu1 %v12576_v35  ;;  %vm5633_vm15 = vcmp.gt.f32.partialorder %v4345_v54, 0.0  ;;  %v5761_v2 = vmul.f32 0.2, %v4345_v54  ;;  %v4158_v21 = vadd.f32 %v4157_v47, %v10246_v48  ;;  %v4347_v14 = vadd.f32 %v4346_v4, %v4154_v15  ;;  %v8306_v35 = vld [vmem:[#allocation5 + $0x908] ss:$16 sps:$4 sm:$0xff]  }
 0x30e   : > { %4848 = vmatmul.mubr.bf16.gmra.mxu0 %v12575_v1  ;;  %5050 = vmatprep.mubr.bf16.mxu1 %v12578_v45  ;;  %v4159_v0 = vpop.f32.mrf.mxu0  ;;  %v4352_v61 = vpop.f32.mrf.mxu1  ;;  %v1334_v1 = vsub.s32 3, %v12579_v42 }
 0x30f   : > { %4857 = vmatprep.mubr.bf16.mxu0 %v12577_v41  ;;  %5160 = vmatpush2.bf16.msra.mxu0 %v8300_v51  ;;  %v10603_v12 = vsel %vm5633_vm15, %v4345_v54, %v5761_v2  ;;  %v4351_v48 = vadd.f32 %v4350_v39, %v4158_v21  ;;  %v4160_v47 = vadd.f32 %v4159_v0, %v10249_v23  ;;  %vm5634_vm1 = vcmp.gt.f32.partialorder %v4347_v14, 0.0  ;;  %v8413_v51 = vld [vmem:[#allocation7] sm:$0xf] }
 0x310   : > { %12581 = vst [vmem:[#allocation60_spill] sm:$0xff] %v10603_v12  ;;  %5161 = vmatprep.subr.bf16.mxu0 %v8308_v3  ;;  %v5762_v49 = vmul.f32 0.2, %v4347_v14  ;;  %v4161_v32 = vpop.f32.mrf.mxu0  ;;  %v4354_v4 = vpop.f32.mrf.mxu1  ;;  %v10609_v42 = vrot.slane %v8413_v51, %v1330_v43  ;;  %v10613_v21 = vrot.slane %v8413_v51, %v1334_v1  ;;  %v8311_v0 = vld [vmem:[#allocation8 + $0x74] ss:$8 sps:$4 sm:$0xff]   ;;  %v10616_v41 = vsel %vm5630_vm0, %v4343_v33, %v5758_v36 }
 0x311   : > { %v4353_v15 = vadd.f32 %v4352_v61, %v4160_v47  ;;  %v4162_v45 = vadd.f32 %v4161_v32, %v10252_v5  ;;  %v5765_v54 = vmul.f32 0.2, %v4351_v48  ;;  %vm5637_vm3 = vcmp.gt.f32.partialorder %v4351_v48, 0.0  ;;  %12583 = vst [vmem:[#allocation62_spill] sm:$0xff] %v10616_v41  ;;  %v12584_v43 = vld [vmem:[#allocation116_spill] sm:$0xff]  ;;  %v12585_v32 = vld [vmem:[#allocation117_spill] sm:$0xff] }
 0x312   : > { %v4163_v2 = vpop.f32.mrf.mxu0  ;;  %v4356_v39 = vpop.f32.mrf.mxu1  ;;  %v10611_v23 = vsel %vm5634_vm1, %v4347_v14, %v5762_v49  ;;  %v12586_v49 = vld [vmem:[#allocation118_spill] sm:$0xff] }
 0x313   : > { %5162 = vmatpush2.bf16.msra.mxu0 %v8306_v35  ;;  %12582 = vst [vmem:[#allocation61_spill] sm:$0xff] %v10611_v23  ;;  %v4355_v3 = vadd.f32 %v4354_v4, %v4162_v45  ;;  %v4164_v61 = vadd.f32 %v4163_v2, %v10257_v13  ;;  %v12587_v4 = vld [vmem:[#allocation119_spill] sm:$0xff]  ;;  %v10627_v33 = vsel %vm5637_vm3, %v4351_v48, %v5765_v54  ;;  %v5766_v13 = vmul.f32 0.2, %v4353_v15 }
 0x314   : > { %v4393_v5 = vpop.f32.mrf.mxu0  ;;  %v4586_v47 = vpop.f32.mrf.mxu1  ;;  %12588 = vst [vmem:[#allocation63_spill] sm:$0xff] %v10627_v33  ;;  %6361 = vmatprep.subr.bf16.mxu0 %v8311_v0  ;;  %vm5638_vm5 = vcmp.gt.f32.partialorder %v4353_v15, 0.0  ;;  %v12592_v33 = vld [vmem:[#allocation120_spill] sm:$0xff] }
 0x315   : > { %5051 = vmatmul.mubr.bf16.gmra.mxu1 %v12585_v32  ;;  %vm5641_vm4 = vcmp.gt.f32.partialorder %v4355_v3, 0.0  ;;  %v5769_v35 = vmul.f32 0.2, %v4355_v3  ;;  %v4394_v1 = vadd.f32 %v4393_v5, %v10609_v42  ;;  %v4357_v36 = vadd.f32 %v4356_v39, %v4164_v61 }
 0x316   : > { %4858 = vmatmul.mubr.bf16.gmra.mxu0 %v12584_v43  ;;  %5060 = vmatprep.mubr.bf16.mxu1 %v12587_v4  ;;  %v4395_v45 = vpop.f32.mrf.mxu0  ;;  %v4588_v51 = vpop.f32.mrf.mxu1  ;;  %v10639_v14 = vsel %vm5638_vm5, %v4353_v15, %v5766_v13  ;;  %v12594_v13 = vld [vmem:[#allocation122_spill] sm:$0xff] }
 0x317   : > { %4867 = vmatprep.mubr.bf16.mxu0 %v12586_v49  ;;  %v10629_v2 = vsel %vm5641_vm4, %v4355_v3, %v5769_v35  ;;  %v10631_v43 = vadd.f32 %v4586_v47, %v4394_v1  ;;  %v4396_v32 = vadd.f32 %v4395_v45, %v10613_v21  ;;  %vm5642_vm6 = vcmp.gt.f32.partialorder %v4357_v36, 0.0  ;;  %12590 = vst [vmem:[#allocation65_spill] sm:$0xff] %v10639_v14  ;;  %v12596_v14 = vld [vmem:[#allocation124_spill] sm:$0xff] }
 0x318   : > { %12589 = vst [vmem:[#allocation64_spill] sm:$0xff] %v10629_v2  ;;  %v5770_v49 = vmul.f32 0.2, %v4357_v36  ;;  %v4397_v4 = vpop.f32.mrf.mxu0  ;;  %v4590_v48 = vpop.f32.mrf.mxu1 }
 0x319   : > { %v10636_v54 = vadd.f32 %v4588_v51, %v4396_v32  ;;  %v4398_v39 = vadd.f32 %v4397_v4, %v10609_v42  ;;  %v12593_v51 = vld [vmem:[#allocation121_spill] sm:$0xff] }
 0x31a   : > { %v4399_v61 = vpop.f32.mrf.mxu0  ;;  %v4592_v0 = vpop.f32.mrf.mxu1  ;;  %v10641_v3 = vsel %vm5642_vm6, %v4357_v36, %v5770_v49  ;;  %v12595_v36 = vld [vmem:[#allocation123_spill] sm:$0xff] }
 0x31b   : > { %12591 = vst [vmem:[#allocation66_spill] sm:$0xff] %v10641_v3  ;;  %v10643_v47 = vadd.f32 %v4590_v48, %v4398_v39  ;;  %v4400_v35 = vadd.f32 %v4399_v61, %v10613_v21 }
 0x31c   : > { %v4403_v45 = vpop.f32.mrf.mxu0  ;;  %v4596_v5 = vpop.f32.mrf.mxu1 }
 0x31d   : > { %5061 = vmatmul.mubr.bf16.gmra.mxu1 %v12593_v51  ;;  %v10650_v32 = vadd.f32 %v4592_v0, %v4400_v35  ;;  %v4404_v15 = vadd.f32 %v4403_v45, %v10609_v42 }
 0x31e   : > { %4868 = vmatmul.mubr.bf16.gmra.mxu0 %v12592_v33  ;;  %5070 = vmatprep.mubr.bf16.mxu1 %v12595_v36  ;;  %v4405_v49 = vpop.f32.mrf.mxu0  ;;  %v4598_v4 = vpop.f32.mrf.mxu1 }
 0x31f   : > { %4877 = vmatprep.mubr.bf16.mxu0 %v12594_v13  ;;  %v10655_v48 = vadd.f32 %v4596_v5, %v4404_v15  ;;  %v4406_v39 = vadd.f32 %v4405_v49, %v10613_v21  ;;  %v12597_v5 = vld [vmem:[#allocation125_spill] sm:$0xff] }
 0x320   : > { %v4407_v61 = vpop.f32.mrf.mxu0  ;;  %v4600_v1 = vpop.f32.mrf.mxu1 }
 0x321   : > { %v10658_v2 = vadd.f32 %v4598_v4, %v4406_v39  ;;  %v4408_v33 = vadd.f32 %v4407_v61, %v10609_v42  ;;  %v12598_v4 = vld [vmem:[#allocation126_spill] sm:$0xff]  ;;  %v12599_v39 = vld [vmem:[#allocation127_spill] sm:$0xff] }
 0x322   : > { %v4409_v0 = vpop.f32.mrf.mxu0  ;;  %v4602_v35 = vpop.f32.mrf.mxu1 }
 0x323   : > { %v10661_v51 = vadd.f32 %v4600_v1, %v4408_v33  ;;  %v4410_v45 = vadd.f32 %v4409_v0, %v10613_v21  ;;  %v8326_v0 = vld [vmem:[#allocation8 + $0x174] ss:$8 sps:$4 sm:$0xff]  }
 0x324   : > { %v4413_v13 = vpop.f32.mrf.mxu0  ;;  %v4606_v36 = vpop.f32.mrf.mxu1  ;;  %6554 = vmatprep.subr.bf16.mxu1 %v8326_v0 }
 0x325   : > { %5071 = vmatmul.mubr.bf16.gmra.mxu1 %v12597_v5  ;;  %v10666_v15 = vadd.f32 %v4602_v35, %v4410_v45  ;;  %v4414_v49 = vadd.f32 %v4413_v13, %v10609_v42 }
 0x326   : > { %4878 = vmatmul.mubr.bf16.gmra.mxu0 %v12596_v14  ;;  %5080 = vmatprep.mubr.bf16.mxu1 %v12599_v39  ;;  %v4415_v61 = vpop.f32.mrf.mxu0  ;;  %v4608_v3 = vpop.f32.mrf.mxu1 }
 0x327   : > { %4887 = vmatprep.mubr.bf16.mxu0 %v12598_v4  ;;  %v10671_v1 = vadd.f32 %v4606_v36, %v4414_v49  ;;  %v4416_v33 = vadd.f32 %v4415_v61, %v10613_v21  ;;  %v12600_v36 = vld [vmem:[#allocation128_spill] sm:$0xff]  ;;  %v12601_v49 = vld [vmem:[#allocation129_spill] sm:$0xff] }
 0x328   : > { %v4417_v63 = vpop.f32.mrf.mxu0  ;;  %v4610_v12 = vpop.f32.mrf.mxu1 }
 0x329   : > { %v10674_v14 = vadd.f32 %v4608_v3, %v4416_v33  ;;  %v4418_v35 = vadd.f32 %v4417_v63, %v10609_v42  ;;  %v12602_v33 = vld [vmem:[#allocation130_spill] sm:$0xff]  ;;  %v12603_v63 = vld [vmem:[#allocation131_spill] sm:$0xff] }
 0x32a   : > { %v4419_v45 = vpop.f32.mrf.mxu0  ;;  %v4612_v13 = vpop.f32.mrf.mxu1 }
 0x32b   : > { %v10677_v5 = vadd.f32 %v4610_v12, %v4418_v35  ;;  %v4420_v4 = vadd.f32 %v4419_v45, %v10613_v21 }
 0x32c   : > { %v4423_v39 = vpop.f32.mrf.mxu0  ;;  %v4616_v41 = vpop.f32.mrf.mxu1 }
 0x32d   : > { %5081 = vmatmul.mubr.bf16.gmra.mxu1 %v12601_v49  ;;  %v10682_v61 = vadd.f32 %v4612_v13, %v4420_v4  ;;  %v4424_v3 = vadd.f32 %v4423_v39, %v10609_v42 }
 0x32e   : > { %4888 = vmatmul.mubr.bf16.gmra.mxu0 %v12600_v36  ;;  %5090 = vmatprep.mubr.bf16.mxu1 %v12603_v63  ;;  %v4425_v0 = vpop.f32.mrf.mxu0  ;;  %v4618_v23 = vpop.f32.mrf.mxu1 }
 0x32f   : > { %4897 = vmatprep.mubr.bf16.mxu0 %v12602_v33  ;;  %v10687_v12 = vadd.f32 %v4616_v41, %v4424_v3  ;;  %v4426_v35 = vadd.f32 %v4425_v0, %v10613_v21  ;;  %v12605_v41 = vld [vmem:[#allocation133_spill] sm:$0xff] }
 0x330   : > { %v4427_v45 = vpop.f32.mrf.mxu0  ;;  %v4620_v53 = vpop.f32.mrf.mxu1 }
 0x331   : > { %v10690_v19 = vadd.f32 %v4618_v23, %v4426_v35  ;;  %v4428_v36 = vadd.f32 %v4427_v45, %v10609_v42  ;;  %v12606_v23 = vld [vmem:[#allocation134_spill] sm:$0xff]  ;;  %v12607_v35 = vld [vmem:[#allocation135_spill] sm:$0xff] }
 0x332   : > { %v4429_v13 = vpop.f32.mrf.mxu0  ;;  %v4622_v4 = vpop.f32.mrf.mxu1 }
 0x333   : > { %v10693_v49 = vadd.f32 %v4620_v53, %v4428_v36  ;;  %v4430_v39 = vadd.f32 %v4429_v13, %v10613_v21 }
 0x334   : > { %v4433_v33 = vpop.f32.mrf.mxu0  ;;  %v4626_v63 = vpop.f32.mrf.mxu1 }
 0x335   : > { %5091 = vmatmul.mubr.bf16.gmra.mxu1 %v12605_v41  ;;  %v10698_v3 = vadd.f32 %v4622_v4, %v4430_v39  ;;  %v4434_v0 = vadd.f32 %v4433_v33, %v10609_v42 }
 0x336   : > { %4898 = vmatmul.mubr.bf16.gmra.mxu0 %v12604_v57  ;;  %5100 = vmatprep.mubr.bf16.mxu1 %v12607_v35  ;;  %v4435_v45 = vpop.f32.mrf.mxu0  ;;  %v4628_v44 = vpop.f32.mrf.mxu1 }
 0x337   : > { %4907 = vmatprep.mubr.bf16.mxu0 %v12606_v23  ;;  %v10703_v53 = vadd.f32 %v4626_v63, %v4434_v0  ;;  %v4436_v36 = vadd.f32 %v4435_v45, %v10613_v21  ;;  %v12609_v63 = vld [vmem:[#allocation137_spill] sm:$0xff] }
 0x338   : > { %v4437_v13 = vpop.f32.mrf.mxu0  ;;  %v4630_v11 = vpop.f32.mrf.mxu1 }
 0x339   : > { %v10706_v7 = vadd.f32 %v4628_v44, %v4436_v36  ;;  %v4438_v57 = vadd.f32 %v4437_v13, %v10609_v42  ;;  %v12610_v44 = vld [vmem:[#allocation138_spill] sm:$0xff]  ;;  %v12611_v36 = vld [vmem:[#allocation139_spill] sm:$0xff] }
 0x33a   : > { %v4439_v4 = vpop.f32.mrf.mxu0  ;;  %v4632_v39 = vpop.f32.mrf.mxu1 }
 0x33b   : > { %v10709_v41 = vadd.f32 %v4630_v11, %v4438_v57  ;;  %v4440_v33 = vadd.f32 %v4439_v4, %v10613_v21 }
 0x33c   : > { %v4443_v23 = vpop.f32.mrf.mxu0  ;;  %v4636_v35 = vpop.f32.mrf.mxu1 }
 0x33d   : > { %5101 = vmatmul.mubr.bf16.gmra.mxu1 %v12609_v63  ;;  %v10714_v0 = vadd.f32 %v4632_v39, %v4440_v33  ;;  %v4444_v45 = vadd.f32 %v4443_v23, %v10609_v42 }
 0x33e   : > { %4908 = vmatmul.mubr.bf16.gmra.mxu0 %v12608_v20  ;;  %5110 = vmatprep.mubr.bf16.mxu1 %v12611_v36  ;;  %v4445_v13 = vpop.f32.mrf.mxu0  ;;  %v4638_v24 = vpop.f32.mrf.mxu1 }
 0x33f   : > { %4917 = vmatprep.mubr.bf16.mxu0 %v12610_v44  ;;  %v10719_v11 = vadd.f32 %v4636_v35, %v4444_v45  ;;  %v4446_v57 = vadd.f32 %v4445_v13, %v10613_v21  ;;  %v12613_v35 = vld [vmem:[#allocation141_spill] sm:$0xff] }
 0x340   : > { %v4447_v4 = vpop.f32.mrf.mxu0  ;;  %v4640_v37 = vpop.f32.mrf.mxu1 }
 0x341   : > { %v10722_v34 = vadd.f32 %v4638_v24, %v4446_v57  ;;  %v4448_v20 = vadd.f32 %v4447_v4, %v10609_v42  ;;  %v12614_v24 = vld [vmem:[#allocation142_spill] sm:$0xff]  ;;  %v12615_v57 = vld [vmem:[#allocation143_spill] sm:$0xff] }
 0x342   : > { %v4449_v39 = vpop.f32.mrf.mxu0  ;;  %v4642_v33 = vpop.f32.mrf.mxu1 }
 0x343   : > { %v10725_v63 = vadd.f32 %v4640_v37, %v4448_v20  ;;  %v4450_v23 = vadd.f32 %v4449_v39, %v10613_v21 }
 0x344   : > { %v4453_v44 = vpop.f32.mrf.mxu0  ;;  %v4646_v36 = vpop.f32.mrf.mxu1 }
 0x345   : > { %5111 = vmatmul.mubr.bf16.gmra.mxu1 %v12613_v35  ;;  %v10730_v45 = vadd.f32 %v4642_v33, %v4450_v23  ;;  %v4454_v13 = vadd.f32 %v4453_v44, %v10609_v42 }
 0x346   : > { %4918 = vmatmul.mubr.bf16.gmra.mxu0 %v12612_v50  ;;  %5120 = vmatprep.mubr.bf16.mxu1 %v12615_v57  ;;  %v4455_v4 = vpop.f32.mrf.mxu0  ;;  %v4648_v60 = vpop.f32.mrf.mxu1 }
 0x347   : > { %4927 = vmatprep.mubr.bf16.mxu0 %v12614_v24  ;;  %v10735_v37 = vadd.f32 %v4646_v36, %v4454_v13  ;;  %v4456_v20 = vadd.f32 %v4455_v4, %v10613_v21  ;;  %v12617_v36 = vld [vmem:[#allocation145_spill] sm:$0xff] }
 0x348   : > { %v4457_v39 = vpop.f32.mrf.mxu0  ;;  %v4650_v31 = vpop.f32.mrf.mxu1 }
 0x349   : > { %v10738_v22 = vadd.f32 %v4648_v60, %v4456_v20  ;;  %v4458_v50 = vadd.f32 %v4457_v39, %v10609_v42  ;;  %v12618_v60 = vld [vmem:[#allocation146_spill] sm:$0xff]  ;;  %v12619_v20 = vld [vmem:[#allocation147_spill] sm:$0xff] }
 0x34a   : > { %v4459_v33 = vpop.f32.mrf.mxu0  ;;  %v4652_v23 = vpop.f32.mrf.mxu1 }
 0x34b   : > { %v10741_v35 = vadd.f32 %v4650_v31, %v4458_v50  ;;  %v4460_v44 = vadd.f32 %v4459_v33, %v10613_v21 }
 0x34c   : > { %v4463_v24 = vpop.f32.mrf.mxu0  ;;  %v4656_v57 = vpop.f32.mrf.mxu1 }
 0x34d   : > { %5121 = vmatmul.mubr.bf16.gmra.mxu1 %v12617_v36  ;;  %v10746_v13 = vadd.f32 %v4652_v23, %v4460_v44  ;;  %v4464_v4 = vadd.f32 %v4463_v24, %v10609_v42  ;;  %v8309_v24 = vld [vmem:[#allocation8 + $0x70] ss:$8 sps:$4 sm:$0xff]  }
 0x34e   : > { %4928 = vmatmul.mubr.bf16.gmra.mxu0 %v12616_v30  ;;  %7589 = vmatprep.mubr.msk.bf16.mxu1 %vm3136_vm2, %v12619_v20  ;;  %v4465_v39 = vpop.f32.mrf.mxu0  ;;  %v4658_v31 = vpop.f32.mrf.mxu1 }
 0x34f   : > { %5163 = vmatprep.mubr.bf16.mxu0 %v12618_v60  ;;  %v10752_v50 = vadd.f32 %v4656_v57, %v4464_v4  ;;  %v4466_v33 = vadd.f32 %v4465_v39, %v10613_v21  ;;  %v12621_v39 = vld [vmem:[#allocation149_spill] sm:$0xff] }
 0x350   : > { %v4467_v58 = vpop.f32.mrf.mxu0  ;;  %v4660_v9 = vpop.f32.mrf.mxu1 }
 0x351   : > { %v10755_v30 = vadd.f32 %v4658_v31, %v4466_v33  ;;  %v4468_v23 = vadd.f32 %v4467_v58, %v10609_v42  ;;  %v12622_v33 = vld [vmem:[#allocation150_spill] sm:$0xff] }
 0x352   : > { %v4469_v44 = vpop.f32.mrf.mxu0  ;;  %v4662_v36 = vpop.f32.mrf.mxu1 }
 0x353   : > { %v10758_v60 = vadd.f32 %v4660_v9, %v4468_v23  ;;  %v4470_v20 = vadd.f32 %v4469_v44, %v10613_v21  ;;  %v8312_v44 = vld [vmem:[#allocation8 + $0x60] ss:$8 sps:$4 sm:$0xff]  }
 0x354   : > { %v4473_v57 = vpop.f32.mrf.mxu0  ;;  %v4666_v4 = vpop.f32.mrf.mxu1 }
 0x355   : > { %5357 = vmatmul.mubr.bf16.vlgmr.msra.gmra.mxu1 %v12621_v39  ;;  %v10763_v31 = vadd.f32 %v4662_v36, %v4470_v20  ;;  %v4474_v58 = vadd.f32 %v4473_v57, %v10609_v42  ;;  %v8317_v36 = vld [vmem:[#allocation8 + $0x54] ss:$8 sps:$4 sm:$0xff]  }
 0x356   : > { %5164 = vmatmul.mubr.bf16.vlgmr.msra.gmra.mxu0 %v12620_v52  ;;  %7590 = vmatprep.mubr.msk.bf16.mxu1 %vm3136_vm2, %v12623_v56  ;;  %v4475_v9 = vpop.f32.mrf.mxu0  ;;  %v4668_v23 = vpop.f32.mrf.mxu1  ;;  %v8344_v20 = vld [vmem:[#allocation8 + $0x154] ss:$8 sps:$4 sm:$0xff]  }
 0x357   : > { %5173 = vmatprep.mubr.bf16.mxu0 %v12622_v33  ;;  %6362 = vmatpush1.bf16.msra.mxu0 %v8309_v24  ;;  %v10769_v29 = vadd.f32 %v4666_v4, %v4474_v58  ;;  %v4476_v52 = vadd.f32 %v4475_v9, %v10613_v21  ;;  %v8315_v24 = vld [vmem:[#allocation8 + $0x50] ss:$8 sps:$4 sm:$0xff]  }
 0x358   : > { %6555 = vmatpush1.bf16.msra.mxu1 %v8324_v59  ;;  %6363 = vmatprep.subr.bf16.mxu0 %v8314_v46  ;;  %v4477_v57 = vpop.f32.mrf.mxu0  ;;  %v4670_v39 = vpop.f32.mrf.mxu1  ;;  %v8342_v59 = vld [vmem:[#allocation8 + $0x150] ss:$8 sps:$4 sm:$0xff]   ;;  %v8320_v46 = vld [vmem:[#allocation8 + $0x44] ss:$8 sps:$4 sm:$0xff]  }
 0x359   : > { %6556 = vmatprep.subr.bf16.mxu1 %v8335_v25  ;;  %v10772_v33 = vadd.f32 %v4668_v23, %v4476_v52  ;;  %v4478_v56 = vadd.f32 %v4477_v57, %v10609_v42  ;;  %v8353_v25 = vld [vmem:[#allocation8 + $0x144] ss:$8 sps:$4 sm:$0xff]   ;;  %v12624_v23 = vld [vmem:[#allocation152_spill] sm:$0xff] }
 0x35a   : > { %v4479_v28 = vpop.f32.mrf.mxu0  ;;  %v4672_v10 = vpop.f32.mrf.mxu1  ;;  %v12625_v52 = vld [vmem:[#allocation153_spill] sm:$0xff] }
 0x35b   : > { %6364 = vmatpush1.bf16.msra.mxu0 %v8312_v44  ;;  %v10775_v4 = vadd.f32 %v4670_v39, %v4478_v56  ;;  %v4480_v58 = vadd.f32 %v4479_v28, %v10613_v21  ;;  %v12627_v39 = vld [vmem:[#allocation156_spill] sm:$0xff] }
 0x35c   : > { %6557 = vmatpush1.bf16.msra.mxu1 %v8333_v40  ;;  %6365 = vmatprep.subr.bf16.mxu0 %v8317_v36  ;;  %v4483_v9 = vpop.f32.mrf.mxu0  ;;  %v4676_v16 = vpop.f32.mrf.mxu1  ;;  %v12626_v40 = vld [vmem:[#allocation154_spill] sm:$0xff]  ;;  %v8351_v56 = vld [vmem:[#allocation8 + $0x140] ss:$8 sps:$4 sm:$0xff]  }
 0x35d   : > { %6558 = vmatprep.subr.bf16.mxu1 %v8344_v20  ;;  %5367 = vmatmul.mubr.bf16.gmra.mxu1 %v12625_v52  ;;  %v10780_v57 = vadd.f32 %v4672_v10, %v4480_v58  ;;  %v4484_v44 = vadd.f32 %v4483_v9, %v10609_v42  ;;  %v8318_v20 = vld [vmem:[#allocation8 + $0x40] ss:$8 sps:$4 sm:$0xff]   ;;  %v8323_v10 = vld [vmem:[#allocation8 + $0x34] ss:$8 sps:$4 sm:$0xff]  }
 0x35e   : > { %5174 = vmatmul.mubr.bf16.gmra.mxu0 %v12624_v23  ;;  %7591 = vmatprep.mubr.msk.bf16.mxu1 %vm3136_vm2, %v12627_v39  ;;  %v4485_v28 = vpop.f32.mrf.mxu0  ;;  %v4678_v36 = vpop.f32.mrf.mxu1  ;;  %v8362_v58 = vld [vmem:[#allocation8 + $0x134] ss:$8 sps:$4 sm:$0xff]  }
 0x35f   : > { %5183 = vmatprep.mubr.bf16.mxu0 %v12626_v40  ;;  %6366 = vmatpush1.bf16.msra.mxu0 %v8315_v24  ;;  %v10786_v38 = vadd.f32 %v4676_v16, %v4484_v44  ;;  %v4486_v23 = vadd.f32 %v4485_v28, %v10613_v21  ;;  %v8321_v24 = vld [vmem:[#allocation8 + $0x30] ss:$8 sps:$4 sm:$0xff]  }
 0x360   : > { %6559 = vmatpush1.bf16.msra.mxu1 %v8342_v59  ;;  %6367 = vmatprep.subr.bf16.mxu0 %v8320_v46  ;;  %v4487_v9 = vpop.f32.mrf.mxu0  ;;  %v4680_v52 = vpop.f32.mrf.mxu1  ;;  %v8360_v59 = vld [vmem:[#allocation8 + $0x130] ss:$8 sps:$4 sm:$0xff]   ;;  %v8329_v46 = vld [vmem:[#allocation8 + $0x24] ss:$8 sps:$4 sm:$0xff]  }
 0x361   : > { %12628 = vst [vmem:[#allocation67_spill] sm:$0xff] %v10786_v38  ;;  %6560 = vmatprep.subr.bf16.mxu1 %v8353_v25  ;;  %v10789_v40 = vadd.f32 %v4678_v36, %v4486_v23  ;;  %v4488_v39 = vadd.f32 %v4487_v9, %v10609_v42  ;;  %v8371_v25 = vld [vmem:[#allocation8 + $0x124] ss:$8 sps:$4 sm:$0xff]   ;;  %v12631_v36 = vld [vmem:[#allocation160_spill] sm:$0xff] }
 0x362   : > { %v4489_v6 = vpop.f32.mrf.mxu0  ;;  %v4682_v17 = vpop.f32.mrf.mxu1  ;;  %v12632_v23 = vld [vmem:[#allocation161_spill] sm:$0xff] }
 0x363   : > { %12629 = vst [vmem:[#allocation68_spill] sm:$0xff] %v10789_v40  ;;  %6368 = vmatpush1.bf16.msra.mxu0 %v8318_v20  ;;  %v10792_v16 = vadd.f32 %v4680_v52, %v4488_v39  ;;  %v4490_v44 = vadd.f32 %v4489_v6, %v10613_v21  ;;  %v12635_v52 = vld [vmem:[#allocation164_spill] sm:$0xff] }
 0x364   : > { %6561 = vmatpush1.bf16.msra.mxu1 %v8351_v56  ;;  %6369 = vmatprep.subr.bf16.mxu0 %v8323_v10  ;;  %v4493_v28 = vpop.f32.mrf.mxu0  ;;  %v4686_v38 = vpop.f32.mrf.mxu1  ;;  %v12634_v56 = vld [vmem:[#allocation163_spill] sm:$0xff]  ;;  %v8369_v39 = vld [vmem:[#allocation8 + $0x120] ss:$8 sps:$4 sm:$0xff]  }
 0x365   : > { %12630 = vst [vmem:[#allocation69_spill] sm:$0xff] %v10792_v16  ;;  %6562 = vmatprep.subr.bf16.mxu1 %v8362_v58  ;;  %5377 = vmatmul.mubr.bf16.gmra.mxu1 %v12632_v23  ;;  %v10797_v9 = vadd.f32 %v4682_v17, %v4490_v44  ;;  %v4494_v20 = vadd.f32 %v4493_v28, %v10609_v42  ;;  %v8327_v58 = vld [vmem:[#allocation8 + $0x20] ss:$8 sps:$4 sm:$0xff]   ;;  %v8332_v17 = vld [vmem:[#allocation8 + $0x14] ss:$8 sps:$4 sm:$0xff]  }
 0x366   : > { %5184 = vmatmul.mubr.bf16.gmra.mxu0 %v12631_v36  ;;  %7592 = vmatprep.mubr.msk.bf16.mxu1 %vm3136_vm2, %v12635_v52  ;;  %v4495_v6 = vpop.f32.mrf.mxu0  ;;  %v4688_v10 = vpop.f32.mrf.mxu1  ;;  %v8377_v44 = vld [vmem:[#allocation8 + $0x114] ss:$8 sps:$4 sm:$0xff]  }
 0x367   : > { %12633 = vst [vmem:[#allocation70_spill] sm:$0xff] %v10797_v9  ;;  %5193 = vmatprep.mubr.bf16.mxu0 %v12634_v56  ;;  %6370 = vmatpush1.bf16.msra.mxu0 %v8321_v24  ;;  %v10803_v16 = vadd.f32 %v4686_v38, %v4494_v20  ;;  %v4496_v36 = vadd.f32 %v4495_v6, %v10613_v21  ;;  %v8330_v24 = vld [vmem:[#allocation8 + $0x10] ss:$8 sps:$4 sm:$0xff]  }
 0x368   : > { %6563 = vmatpush1.bf16.msra.mxu1 %v8360_v59  ;;  %6371 = vmatprep.subr.bf16.mxu0 %v8329_v46  ;;  %v4497_v28 = vpop.f32.mrf.mxu0  ;;  %v4690_v23 = vpop.f32.mrf.mxu1  ;;  %v8375_v59 = vld [vmem:[#allocation8 + $0x110] ss:$8 sps:$4 sm:$0xff]   ;;  %v8338_v46 = vld [vmem:[#allocation8 + $0x4] ss:$8 sps:$4 sm:$0xff]  }
 0x369   : > { %12636 = vst [vmem:[#allocation71_spill] sm:$0xff] %v10803_v16  ;;  %6564 = vmatprep.subr.bf16.mxu1 %v8371_v25  ;;  %v10806_v56 = vadd.f32 %v4688_v10, %v4496_v36  ;;  %v4498_v52 = vadd.f32 %v4497_v28, %v10609_v42  ;;  %v8380_v25 = vld [vmem:[#allocation8 + $0x104] ss:$8 sps:$4 sm:$0xff]   ;;  %v12639_v10 = vld [vmem:[#allocation168_spill] sm:$0xff] }
 0x36a   : > { %v4499_v9 = vpop.f32.mrf.mxu0  ;;  %v4692_v40 = vpop.f32.mrf.mxu1  ;;  %v12640_v36 = vld [vmem:[#allocation169_spill] sm:$0xff] }
 0x36b   : > { %12637 = vst [vmem:[#allocation72_spill] sm:$0xff] %v10806_v56  ;;  %6372 = vmatpush1.bf16.msra.mxu0 %v8327_v58  ;;  %v10809_v38 = vadd.f32 %v4690_v23, %v4498_v52  ;;  %v4500_v20 = vadd.f32 %v4499_v9, %v10613_v21  ;;  %v12643_v23 = vld [vmem:[#allocation172_spill] sm:$0xff] }
 0x36c   : > { %6565 = vmatpush1.bf16.msra.mxu1 %v8369_v39  ;;  %6373 = vmatprep.subr.bf16.mxu0 %v8332_v17  ;;  %v4503_v6 = vpop.f32.mrf.mxu0  ;;  %v4696_v16 = vpop.f32.mrf.mxu1  ;;  %v12642_v39 = vld [vmem:[#allocation171_spill] sm:$0xff]  ;;  %v8378_v52 = vld [vmem:[#allocation8 + $0x100] ss:$8 sps:$4 sm:$0xff]  }
 0x36d   : > { %12638 = vst [vmem:[#allocation73_spill] sm:$0xff] %v10809_v38  ;;  %6566 = vmatprep.subr.bf16.mxu1 %v8377_v44  ;;  %5387 = vmatmul.mubr.bf16.gmra.mxu1 %v12640_v36  ;;  %v10814_v28 = vadd.f32 %v4692_v40, %v4500_v20  ;;  %v4504_v58 = vadd.f32 %v4503_v6, %v10609_v42  ;;  %v8336_v44 = vld [vmem:[#allocation8] ss:$8 sps:$4 sm:$0xff]   ;;  %v8341_v40 = vld [vmem:[#allocation8 + $0xf4] ss:$8 sps:$4 sm:$0xff]  }
 0x36e   : > { %5194 = vmatmul.mubr.bf16.gmra.mxu0 %v12639_v10  ;;  %7593 = vmatprep.mubr.msk.bf16.mxu1 %vm3136_vm2, %v12643_v23  ;;  %v4505_v9 = vpop.f32.mrf.mxu0  ;;  %v4698_v17 = vpop.f32.mrf.mxu1  ;;  %v8383_v20 = vld [vmem:[#allocation8 + $0x1f4] ss:$8 sps:$4 sm:$0xff]  }
 0x36f   : > { %12641 = vst [vmem:[#allocation74_spill] sm:$0xff] %v10814_v28  ;;  %5203 = vmatprep.mubr.bf16.mxu0 %v12642_v39  ;;  %6374 = vmatpush1.bf16.msra.mxu0 %v8330_v24  ;;  %v10820_v38 = vadd.f32 %v4696_v16, %v4504_v58  ;;  %v4506_v10 = vadd.f32 %v4505_v9, %v10613_v21  ;;  %v8339_v24 = vld [vmem:[#allocation8 + $0xf0] ss:$8 sps:$4 sm:$0xff]  }
 0x370   : > { %6567 = vmatpush1.bf16.msra.mxu1 %v8375_v59  ;;  %6375 = vmatprep.subr.bf16.mxu0 %v8338_v46  ;;  %v4507_v6 = vpop.f32.mrf.mxu0  ;;  %v4700_v36 = vpop.f32.mrf.mxu1  ;;  %v8381_v59 = vld [vmem:[#allocation8 + $0x1f0] ss:$8 sps:$4 sm:$0xff]   ;;  %v8347_v46 = vld [vmem:[#allocation8 + $0xe4] ss:$8 sps:$4 sm:$0xff]  }
 0x371   : > { %12644 = vst [vmem:[#allocation75_spill] sm:$0xff] %v10820_v38  ;;  %6568 = vmatprep.subr.bf16.mxu1 %v8380_v25  ;;  %v10823_v39 = vadd.f32 %v4698_v17, %v4506_v10  ;;  %v4508_v23 = vadd.f32 %v4507_v6, %v10609_v42  ;;  %v8386_v25 = vld [vmem:[#allocation8 + $0x1e4] ss:$8 sps:$4 sm:$0xff]   ;;  %v12647_v17 = vld [vmem:[#allocation176_spill] sm:$0xff] }
 0x372   : > { %v4509_v28 = vpop.f32.mrf.mxu0  ;;  %v4702_v56 = vpop.f32.mrf.mxu1  ;;  %v12648_v10 = vld [vmem:[#allocation177_spill] sm:$0xff] }
 0x373   : > { %12645 = vst [vmem:[#allocation76_spill] sm:$0xff] %v10823_v39  ;;  %6376 = vmatpush1.bf16.msra.mxu0 %v8336_v44  ;;  %v10826_v16 = vadd.f32 %v4700_v36, %v4508_v23  ;;  %v4510_v58 = vadd.f32 %v4509_v28, %v10613_v21  ;;  %v12651_v36 = vld [vmem:[#allocation180_spill] sm:$0xff] }
 0x374   : > { %6569 = vmatpush1.bf16.msra.mxu1 %v8378_v52  ;;  %6377 = vmatprep.subr.bf16.mxu0 %v8341_v40  ;;  %v4513_v9 = vpop.f32.mrf.mxu0  ;;  %v4706_v38 = vpop.f32.mrf.mxu1  ;;  %v12650_v52 = vld [vmem:[#allocation179_spill] sm:$0xff]  ;;  %v8384_v23 = vld [vmem:[#allocation8 + $0x1e0] ss:$8 sps:$4 sm:$0xff]  }
 0x375   : > { %12646 = vst [vmem:[#allocation77_spill] sm:$0xff] %v10826_v16  ;;  %6570 = vmatprep.subr.bf16.mxu1 %v8383_v20  ;;  %5397 = vmatmul.mubr.bf16.gmra.mxu1 %v12648_v10  ;;  %v10831_v6 = vadd.f32 %v4702_v56, %v4510_v58  ;;  %v4514_v44 = vadd.f32 %v4513_v9, %v10609_v42  ;;  %v8345_v20 = vld [vmem:[#allocation8 + $0xe0] ss:$8 sps:$4 sm:$0xff]   ;;  %v8350_v56 = vld [vmem:[#allocation8 + $0xd4] ss:$8 sps:$4 sm:$0xff]  }
 0x376   : > { %5204 = vmatmul.mubr.bf16.gmra.mxu0 %v12647_v17  ;;  %7594 = vmatprep.mubr.msk.bf16.mxu1 %vm3136_vm2, %v12651_v36  ;;  %v4515_v28 = vpop.f32.mrf.mxu0  ;;  %v4708_v40 = vpop.f32.mrf.mxu1  ;;  %v8389_v58 = vld [vmem:[#allocation8 + $0x1d4] ss:$8 sps:$4 sm:$0xff]  }
 0x377   : > { %12649 = vst [vmem:[#allocation78_spill] sm:$0xff] %v10831_v6  ;;  %5213 = vmatprep.mubr.bf16.mxu0 %v12650_v52  ;;  %6378 = vmatpush2.bf16.msra.mxu0 %v8339_v24  ;;  %v10837_v16 = vadd.f32 %v4706_v38, %v4514_v44  ;;  %v4516_v17 = vadd.f32 %v4515_v28, %v10613_v21  ;;  %v8348_v24 = vld [vmem:[#allocation8 + $0xd0] ss:$8 sps:$4 sm:$0xff]  }
 0x378   : > { %6571 = vmatpush2.bf16.msra.mxu1 %v8381_v59  ;;  %6379 = vmatprep.subr.bf16.mxu0 %v8347_v46  ;;  %v4517_v9 = vpop.f32.mrf.mxu0  ;;  %v4710_v10 = vpop.f32.mrf.mxu1  ;;  %v8387_v59 = vld [vmem:[#allocation8 + $0x1d0] ss:$8 sps:$4 sm:$0xff]   ;;  %v8356_v46 = vld [vmem:[#allocation8 + $0xc4] ss:$8 sps:$4 sm:$0xff]  }
 0x379   : > { %12652 = vst [vmem:[#allocation79_spill] sm:$0xff] %v10837_v16  ;;  %6572 = vmatprep.subr.bf16.mxu1 %v8386_v25  ;;  %v10840_v52 = vadd.f32 %v4708_v40, %v4516_v17  ;;  %v4518_v36 = vadd.f32 %v4517_v9, %v10609_v42  ;;  %v12654_v16 = vld [vmem:[#allocation184_spill] sm:$0xff]  ;;  %v12655_v40 = vld [vmem:[#allocation185_spill] sm:$0xff]  ;;  %v12657_v9 = vld [vmem:[#allocation187_spill] sm:$0xff] }
 0x37a   : > { %v4519_v6 = vpop.f32.mrf.mxu0  ;;  %v4712_v39 = vpop.f32.mrf.mxu1 }
 0x37b   : > { %6380 = vmatpush2.bf16.msra.mxu0 %v8345_v20  ;;  %v10843_v38 = vadd.f32 %v4710_v10, %v4518_v36  ;;  %v4520_v44 = vadd.f32 %v4519_v6, %v10613_v21  ;;  %v8359_v36 = vld [vmem:[#allocation8 + $0xb4] ss:$8 sps:$4 sm:$0xff]  }
 0x37c   : > { %6573 = vmatpush2.bf16.msra.mxu1 %v8384_v23  ;;  %6381 = vmatprep.subr.bf16.mxu0 %v8350_v56  ;;  %v4523_v25 = vpop.f32.mrf.mxu0  ;;  %v4716_v28 = vpop.f32.mrf.mxu1  ;;  %v12658_v23 = vld [vmem:[#allocation188_spill] sm:$0xff] }
 0x37d   : > { %12653 = vst [vmem:[#allocation80_spill] sm:$0xff] %v10843_v38  ;;  %6574 = vmatprep.subr.bf16.mxu1 %v8389_v58  ;;  %5407 = vmatmul.mubr.bf16.gmra.mxu1 %v12655_v40  ;;  %v10848_v17 = vadd.f32 %v4712_v39, %v4520_v44  ;;  %v4524_v20 = vadd.f32 %v4523_v25, %v10609_v42  ;;  %v8354_v56 = vld [vmem:[#allocation8 + $0xc0] ss:$8 sps:$4 sm:$0xff]   ;;  %v8392_v44 = vld [vmem:[#allocation8 + $0x1c4] ss:$8 sps:$4 sm:$0xff]  }
 0x37e   : > { %5214 = vmatmul.mubr.bf16.gmra.mxu0 %v12654_v16  ;;  %7595 = vmatprep.mubr.msk.bf16.mxu1 %vm3136_vm2, %v12658_v23  ;;  %v4525_v10 = vpop.f32.mrf.mxu0  ;;  %v4718_v6 = vpop.f32.mrf.mxu1  ;;  %v8390_v39 = vld [vmem:[#allocation8 + $0x1c0] ss:$8 sps:$4 sm:$0xff]  }
 0x37f   : > { %12656 = vst [vmem:[#allocation81_spill] sm:$0xff] %v10848_v17  ;;  %5223 = vmatprep.mubr.bf16.mxu0 %v12657_v9  ;;  %6382 = vmatpush2.bf16.msra.mxu0 %v8348_v24  ;;  %v10854_v58 = vadd.f32 %v4716_v28, %v4524_v20  ;;  %v4526_v16 = vadd.f32 %v4525_v10, %v10613_v21  ;;  %v8357_v24 = vld [vmem:[#allocation8 + $0xb0] ss:$8 sps:$4 sm:$0xff]  }
 0x380   : > { %6575 = vmatpush2.bf16.msra.mxu1 %v8387_v59  ;;  %6383 = vmatprep.subr.bf16.mxu0 %v8356_v46  ;;  %v4527_v40 = vpop.f32.mrf.mxu0  ;;  %v4720_v25 = vpop.f32.mrf.mxu1  ;;  %v8365_v46 = vld [vmem:[#allocation8 + $0xa4] ss:$8 sps:$4 sm:$0xff]  }
 0x381   : > { %12659 = vst [vmem:[#allocation82_spill] sm:$0xff] %v10854_v58  ;;  %v10857_v17 = vadd.f32 %v4718_v6, %v4526_v16  ;;  %v4528_v9 = vadd.f32 %v4527_v40, %v10609_v42  ;;  %6576 = vmatprep.subr.bf16.mxu1 %v8392_v44  ;;  %v12662_v58 = vld [vmem:[#allocation192_spill] sm:$0xff]  ;;  %v12663_v6 = vld [vmem:[#allocation193_spill] sm:$0xff]  ;;  %v12665_v40 = vld [vmem:[#allocation195_spill] sm:$0xff] }
 0x382   : > { %v4529_v23 = vpop.f32.mrf.mxu0  ;;  %v4722_v38 = vpop.f32.mrf.mxu1 }
 0x383   : > { %12660 = vst [vmem:[#allocation83_spill] sm:$0xff] %v10857_v17  ;;  %6384 = vmatpush2.bf16.msra.mxu0 %v8354_v56  ;;  %v10860_v59 = vadd.f32 %v4720_v25, %v4528_v9  ;;  %v4530_v28 = vadd.f32 %v4529_v23, %v10613_v21  ;;  %v12666_v56 = vld [vmem:[#allocation196_spill] sm:$0xff] }
 0x384   : > { %6577 = vmatpush2.bf16.msra.mxu1 %v8390_v39  ;;  %6385 = vmatprep.subr.bf16.mxu0 %v8359_v36  ;;  %v4533_v20 = vpop.f32.mrf.mxu0  ;;  %v4726_v10 = vpop.f32.mrf.mxu1  ;;  %v8363_v36 = vld [vmem:[#allocation8 + $0xa0] ss:$8 sps:$4 sm:$0xff]  }
 0x385   : > { %12661 = vst [vmem:[#allocation84_spill] sm:$0xff] %v10860_v59  ;;  %5417 = vmatmul.mubr.bf16.gmra.mxu1 %v12663_v6  ;;  %v10865_v16 = vadd.f32 %v4722_v38, %v4530_v28  ;;  %v4534_v44 = vadd.f32 %v4533_v20, %v10609_v42  ;;  %v8393_v6 = vld [vmem:[#allocation8 + $0x1b0] ss:$8 sps:$4 sm:$0xff]   ;;  %v8395_v38 = vld [vmem:[#allocation8 + $0x1b4] ss:$8 sps:$4 sm:$0xff]  }
 0x386   : > { %5224 = vmatmul.mubr.bf16.gmra.mxu0 %v12662_v58  ;;  %7596 = vmatprep.mubr.msk.bf16.mxu1 %vm3136_vm2, %v12666_v56  ;;  %v4535_v39 = vpop.f32.mrf.mxu0  ;;  %v4728_v25 = vpop.f32.mrf.mxu1  ;;  %v8368_v58 = vld [vmem:[#allocation8 + $0x94] ss:$8 sps:$4 sm:$0xff]  }
 0x387   : > { %12664 = vst [vmem:[#allocation85_spill] sm:$0xff] %v10865_v16  ;;  %5233 = vmatprep.mubr.bf16.mxu0 %v12665_v40  ;;  %6386 = vmatpush2.bf16.msra.mxu0 %v8357_v24  ;;  %v10871_v9 = vadd.f32 %v4726_v10, %v4534_v44  ;;  %v4536_v23 = vadd.f32 %v4535_v39, %v10613_v21  ;;  %v8366_v24 = vld [vmem:[#allocation8 + $0x90] ss:$8 sps:$4 sm:$0xff]   ;;  %v12669_v17 = vld [vmem:[#allocation200_spill] sm:$0xff] }
 0x388   : > { %6387 = vmatprep.subr.bf16.mxu0 %v8365_v46  ;;  %v4537_v28 = vpop.f32.mrf.mxu0  ;;  %v4730_v16 = vpop.f32.mrf.mxu1  ;;  %6578 = vmatprep.subr.bf16.mxu1 %v8395_v38  ;;  %v8374_v46 = vld [vmem:[#allocation8 + $0x84] ss:$8 sps:$4 sm:$0xff]  }
 0x389   : > { %12667 = vst [vmem:[#allocation86_spill] sm:$0xff] %v10871_v9  ;;  %v10874_v20 = vadd.f32 %v4728_v25, %v4536_v23  ;;  %v4538_v40 = vadd.f32 %v4537_v28, %v10609_v42  ;;  %6579 = vmatpush2.bf16.msra.mxu1 %v8393_v6  ;;  %v12670_v25 = vld [vmem:[#allocation201_spill] sm:$0xff]  ;;  %v12672_v28 = vld [vmem:[#allocation203_spill] sm:$0xff] }
 0x38a   : > { %v4539_v56 = vpop.f32.mrf.mxu0  ;;  %v4732_v59 = vpop.f32.mrf.mxu1 }
 0x38b   : > { %6388 = vmatpush2.bf16.msra.mxu0 %v8363_v36  ;;  %v10877_v10 = vadd.f32 %v4730_v16, %v4538_v40  ;;  %v4540_v44 = vadd.f32 %v4539_v56, %v10613_v21  ;;  %v12673_v36 = vld [vmem:[#allocation204_spill] sm:$0xff] }
 0x38c   : > { %6389 = vmatprep.subr.bf16.mxu0 %v8368_v58  ;;  %v4543_v39 = vpop.f32.mrf.mxu0  ;;  %v4736_v9 = vpop.f32.mrf.mxu1  ;;  %v8372_v58 = vld [vmem:[#allocation8 + $0x80] ss:$8 sps:$4 sm:$0xff]  }
 0x38d   : > { %12668 = vst [vmem:[#allocation87_spill] sm:$0xff] %v10877_v10  ;;  %5427 = vmatmul.mubr.bf16.gmra.mxu1 %v12670_v25  ;;  %v10882_v23 = vadd.f32 %v4732_v59, %v4540_v44  ;;  %v4544_v38 = vadd.f32 %v4543_v39, %v10609_v42  ;;  %v8398_v25 = vld [vmem:[#allocation8 + $0x1a4] ss:$8 sps:$4 sm:$0xff]  }
 0x38e   : > { %5234 = vmatmul.mubr.bf16.gmra.mxu0 %v12669_v17  ;;  %7597 = vmatprep.mubr.msk.bf16.mxu1 %vm3136_vm2, %v12673_v36  ;;  %v4545_v16 = vpop.f32.mrf.mxu0  ;;  %v4738_v6 = vpop.f32.mrf.mxu1  ;;  %v8396_v17 = vld [vmem:[#allocation8 + $0x1a0] ss:$8 sps:$4 sm:$0xff]  }
 0x38f   : > { %12671 = vst [vmem:[#allocation88_spill] sm:$0xff] %v10882_v23  ;;  %5243 = vmatprep.mubr.bf16.mxu0 %v12672_v28  ;;  %6390 = vmatpush2.bf16.msra.mxu0 %v8366_v24  ;;  %v10888_v40 = vadd.f32 %v4736_v9, %v4544_v38  ;;  %v4546_v56 = vadd.f32 %v4545_v16, %v10613_v21 }
 0x390   : > { %6391 = vmatprep.subr.bf16.mxu0 %v8374_v46  ;;  %v4547_v59 = vpop.f32.mrf.mxu0  ;;  %v4740_v44 = vpop.f32.mrf.mxu1  ;;  %6580 = vmatprep.subr.bf16.mxu1 %v8398_v25  ;;  %v12675_v46 = vld [vmem:[#allocation207_spill] sm:$0xff] }
 0x391   : > { %12674 = vst [vmem:[#allocation17_spill] sm:$0xff] %v10888_v40  ;;  %v10891_v23 = vadd.f32 %v4738_v6, %v4546_v56  ;;  %v4548_v39 = vadd.f32 %v4547_v59, %v10609_v42  ;;  %6581 = vmatpush2.bf16.msra.mxu1 %v8396_v17  ;;  %v12676_v40 = vld [vmem:[#allocation208_spill] sm:$0xff]  ;;  %v12677_v42 = vld [vmem:[#allocation209_spill] sm:$0xff]  ;;  %v12678_v56 = vld [vmem:[#allocation210_spill] sm:$0xff] }
 0x392   : > { %v4549_v28 = vpop.f32.mrf.mxu0  ;;  %v4742_v36 = vpop.f32.mrf.mxu1 }
 0x393   : > { %6392 = vmatpush2.bf16.msra.mxu0 %v8372_v58  ;;  %v10894_v24 = vadd.f32 %v4740_v44, %v4548_v39  ;;  %v4550_v9 = vadd.f32 %v4549_v28, %v10613_v21 }
 0x394   : > { %v4779_v38 = vpop.f32.mrf.mxu0  ;;  %v4972_v16 = vpop.f32.mrf.mxu1 }
 0x395   : > { %5437 = vmatmul.mubr.bf16.gmra.mxu1 %v12676_v40  ;;  %v10899_v10 = vadd.f32 %v4742_v36, %v4550_v9  ;;  %v4780_v6 = vadd.f32 %v4779_v38, %v10631_v43  ;;  %v8399_v38 = vld [vmem:[#allocation8 + $0x190] ss:$8 sps:$4 sm:$0xff]  }
 0x396   : > { %5244 = vmatmul.mubr.bf16.gmra.mxu0 %v12675_v46  ;;  %7598 = vmatprep.mubr.msk.bf16.mxu1 %vm3136_vm2, %v12678_v56  ;;  %v4781_v58 = vpop.f32.mrf.mxu0  ;;  %v4974_v17 = vpop.f32.mrf.mxu1  ;;  %v8401_v46 = vld [vmem:[#allocation8 + $0x194] ss:$8 sps:$4 sm:$0xff]  }
 0x397   : > { %5253 = vmatprep.mubr.bf16.mxu0 %v12677_v42  ;;  %v10905_v25 = vadd.f32 %v4972_v16, %v4780_v6  ;;  %v4782_v21 = vadd.f32 %v4781_v58, %v10636_v54  ;;  %v12679_v16 = vld [vmem:[#allocation211_spill] sm:$0xff]  ;;  %v12680_v6 = vld [vmem:[#allocation212_spill] sm:$0xff]  ;;  %6582 = vmatprep.subr.bf16.mxu1 %v8401_v46 }
 0x398   : > { %v4783_v59 = vpop.f32.mrf.mxu0  ;;  %v4976_v44 = vpop.f32.mrf.mxu1  ;;  %6583 = vmatpush2.bf16.msra.mxu1 %v8399_v38 }
 0x399   : > { %v10908_v39 = vadd.f32 %v4974_v17, %v4782_v21  ;;  %v4784_v40 = vadd.f32 %v4783_v59, %v10643_v47  ;;  %v12681_v17 = vld [vmem:[#allocation213_spill] sm:$0xff]  ;;  %v12682_v47 = vld [vmem:[#allocation214_spill] sm:$0xff] }
 0x39a   : > { %v4785_v28 = vpop.f32.mrf.mxu0  ;;  %v4978_v36 = vpop.f32.mrf.mxu1 }
 0x39b   : > { %v10911_v43 = vadd.f32 %v4976_v44, %v4784_v40  ;;  %v4786_v9 = vadd.f32 %v4785_v28, %v10650_v32 }
 0x39c   : > { %v4789_v42 = vpop.f32.mrf.mxu0  ;;  %v4982_v56 = vpop.f32.mrf.mxu1 }
 0x39d   : > { %5447 = vmatmul.mubr.bf16.gmra.mxu1 %v12680_v6  ;;  %v10916_v54 = vadd.f32 %v4978_v36, %v4786_v9  ;;  %v4790_v58 = vadd.f32 %v4789_v42, %v10655_v48  ;;  %v8404_v48 = vld [vmem:[#allocation8 + $0x184] ss:$8 sps:$4 sm:$0xff]   ;;  %v8402_v6 = vld [vmem:[#allocation8 + $0x180] ss:$8 sps:$4 sm:$0xff]  }
 0x39e   : > { %5254 = vmatmul.mubr.bf16.gmra.mxu0 %v12679_v16  ;;  %7599 = vmatprep.mubr.msk.bf16.mxu1 %vm3136_vm2, %v12682_v47  ;;  %v4791_v21 = vpop.f32.mrf.mxu0  ;;  %v4984_v59 = vpop.f32.mrf.mxu1 }
 0x39f   : > { %5263 = vmatprep.mubr.bf16.mxu0 %v12681_v17  ;;  %v10922_v32 = vadd.f32 %v4982_v56, %v4790_v58  ;;  %v4792_v44 = vadd.f32 %v4791_v21, %v10658_v2  ;;  %6584 = vmatprep.subr.bf16.mxu1 %v8404_v48  ;;  %v12683_v58 = vld [vmem:[#allocation215_spill] sm:$0xff]  ;;  %v12684_v2 = vld [vmem:[#allocation216_spill] sm:$0xff] }
 0x3a0   : > { %v4793_v40 = vpop.f32.mrf.mxu0  ;;  %v4986_v28 = vpop.f32.mrf.mxu1  ;;  %6585 = vmatpush2.bf16.msra.mxu1 %v8402_v6  ;;  %v12688_v6 = vld [vmem:[#allocation220_spill] sm:$0xff] }
 0x3a1   : > { %v10925_v16 = vadd.f32 %v4984_v59, %v4792_v44  ;;  %v4794_v36 = vadd.f32 %v4793_v40, %v10661_v51  ;;  %v12685_v51 = vld [vmem:[#allocation217_spill] sm:$0xff]  ;;  %v12686_v59 = vld [vmem:[#allocation218_spill] sm:$0xff] }
 0x3a2   : > { %v4795_v9 = vpop.f32.mrf.mxu0  ;;  %v4988_v42 = vpop.f32.mrf.mxu1 }
 0x3a3   : > { %v10928_v17 = vadd.f32 %v4986_v28, %v4794_v36  ;;  %v4796_v47 = vadd.f32 %v4795_v9, %v10666_v15 }
 0x3a4   : > { %v4799_v46 = vpop.f32.mrf.mxu0  ;;  %v4992_v56 = vpop.f32.mrf.mxu1 }
 0x3a5   : > { %5457 = vmatmul.mubr.bf16.gmra.mxu1 %v12684_v2  ;;  %v10933_v38 = vadd.f32 %v4988_v42, %v4796_v47  ;;  %v4800_v21 = vadd.f32 %v4799_v46, %v10671_v1 }
 0x3a6   : > { %5264 = vmatmul.mubr.bf16.gmra.mxu0 %v12683_v58  ;;  %7600 = vmatprep.mubr.msk.bf16.mxu1 %vm3136_vm2, %v12686_v59  ;;  %v4801_v44 = vpop.f32.mrf.mxu0  ;;  %v4994_v40 = vpop.f32.mrf.mxu1  ;;  %v12687_v59 = vld [vmem:[#allocation219_spill] sm:$0xff] }
 0x3a7   : > { %5273 = vmatprep.mubr.bf16.mxu0 %v12685_v51  ;;  %v10939_v15 = vadd.f32 %v4992_v56, %v4800_v21  ;;  %v4802_v28 = vadd.f32 %v4801_v44, %v10674_v14  ;;  %v12689_v21 = vld [vmem:[#allocation221_spill] sm:$0xff]  ;;  %v12690_v44 = vld [vmem:[#allocation222_spill] sm:$0xff] }
 0x3a8   : > { %v4803_v36 = vpop.f32.mrf.mxu0  ;;  %v4996_v48 = vpop.f32.mrf.mxu1 }
 0x3a9   : > { %v10942_v9 = vadd.f32 %v4994_v40, %v4802_v28  ;;  %v4804_v42 = vadd.f32 %v4803_v36, %v10677_v5 }
 0x3aa   : > { %v4805_v47 = vpop.f32.mrf.mxu0  ;;  %v4998_v1 = vpop.f32.mrf.mxu1 }
 0x3ab   : > { %v10945_v46 = vadd.f32 %v4996_v48, %v4804_v42  ;;  %v4806_v58 = vadd.f32 %v4805_v47, %v10682_v61 }
 0x3ac   : > { %v5002_v51 = vpop.f32.mrf.mxu1 }
 0x3ad   : > { %5467 = vmatmul.mubr.bf16.gmra.mxu1 %v12688_v6  ;;  %v10950_v56 = vadd.f32 %v4998_v1, %v4806_v58 }
 0x3ae   : > { %v4809_v2 = vpop.f32.mrf.mxu0  ;;  %5274 = vmatmul.mubr.bf16.gmra.mxu0 %v12687_v59  ;;  %7601 = vmatprep.mubr.msk.bf16.mxu1 %vm3136_vm2, %v12690_v44  ;;  %v5004_v40 = vpop.f32.mrf.mxu1  ;;  %v12693_v44 = vld [vmem:[#allocation225_spill] sm:$0xff] }
 0x3af   : > { %v4810_v14 = vadd.f32 %v4809_v2, %v10687_v12  ;;  %5283 = vmatprep.mubr.bf16.mxu0 %v12689_v21  ;;  %v12691_v21 = vld [vmem:[#allocation223_spill] sm:$0xff] }
 0x3b0   : > { %v4811_v5 = vpop.f32.mrf.mxu0  ;;  %v5006_v48 = vpop.f32.mrf.mxu1 }
 0x3b1   : > { %v10956_v28 = vadd.f32 %v5002_v51, %v4810_v14  ;;  %v4812_v61 = vadd.f32 %v4811_v5, %v10690_v19  ;;  %v12692_v51 = vld [vmem:[#allocation224_spill] sm:$0xff]  ;;  %v12694_v5 = vld [vmem:[#allocation226_spill] sm:$0xff] }
 0x3b2   : > { %v4813_v36 = vpop.f32.mrf.mxu0  ;;  %v5008_v58 = vpop.f32.mrf.mxu1 }
 0x3b3   : > { %v10959_v42 = vadd.f32 %v5004_v40, %v4812_v61  ;;  %v4814_v47 = vadd.f32 %v4813_v36, %v10693_v49 }
 0x3b4   : > { %v4815_v1 = vpop.f32.mrf.mxu0 }
 0x3b5   : > { %v10962_v12 = vadd.f32 %v5006_v48, %v4814_v47  ;;  %v4816_v2 = vadd.f32 %v4815_v1, %v10698_v3  ;;  %v5012_v6 = vpop.f32.mrf.mxu1  ;;  %5477 = vmatmul.mubr.bf16.gmra.mxu1 %v12692_v51 }
 0x3b6   : > { %v4819_v59 = vpop.f32.mrf.mxu0  ;;  %5284 = vmatmul.mubr.bf16.gmra.mxu0 %v12691_v21  ;;  %7602 = vmatprep.mubr.msk.bf16.mxu1 %vm3136_vm2, %v12694_v5  ;;  %v12698_v5 = vld [vmem:[#allocation230_spill] sm:$0xff] }
 0x3b7   : > { %v10967_v14 = vadd.f32 %v5008_v58, %v4816_v2  ;;  %v4820_v19 = vadd.f32 %v4819_v59, %v10703_v53  ;;  %5293 = vmatprep.mubr.bf16.mxu0 %v12693_v44  ;;  %v5014_v40 = vpop.f32.mrf.mxu1  ;;  %v12697_v44 = vld [vmem:[#allocation229_spill] sm:$0xff] }
 0x3b8   : > { %v4821_v49 = vpop.f32.mrf.mxu0 }
 0x3b9   : > { %v10973_v61 = vadd.f32 %v5012_v6, %v4820_v19  ;;  %v4822_v3 = vadd.f32 %v4821_v49, %v10706_v7  ;;  %v5016_v48 = vpop.f32.mrf.mxu1  ;;  %v12695_v6 = vld [vmem:[#allocation227_spill] sm:$0xff]  ;;  %v12696_v19 = vld [vmem:[#allocation228_spill] sm:$0xff] }
 0x3ba   : > { %v4823_v36 = vpop.f32.mrf.mxu0 }
 0x3bb   : > { %v10976_v47 = vadd.f32 %v5014_v40, %v4822_v3  ;;  %v4824_v1 = vadd.f32 %v4823_v36, %v10709_v41  ;;  %v10979_v2 = vpop.f32.mrf.mxu1 }
 0x3bc   : > { %v4825_v58 = vpop.f32.mrf.mxu0 }
 0x3bd   : > { %v10981_v53 = vadd.f32 %v5016_v48, %v4824_v1  ;;  %v10984_v59 = vadd.f32 %v4825_v58, %v10714_v0  ;;  %v5022_v51 = vpop.f32.mrf.mxu1  ;;  %5487 = vmatmul.mubr.bf16.gmra.mxu1 %v12696_v19 }
 0x3be   : > { %v4829_v21 = vpop.f32.mrf.mxu0  ;;  %5294 = vmatmul.mubr.bf16.gmra.mxu0 %v12695_v6  ;;  %7603 = vmatprep.mubr.msk.bf16.mxu1 %vm3136_vm2, %v12698_v5  ;;  %v12701_v5 = vld [vmem:[#allocation233_spill] sm:$0xff] }
 0x3bf   : > { %v4830_v7 = vadd.f32 %v4829_v21, %v10719_v11  ;;  %5303 = vmatprep.mubr.bf16.mxu0 %v12697_v44  ;;  %v5024_v49 = vpop.f32.mrf.mxu1 }
 0x3c0   : > { %v4831_v41 = vpop.f32.mrf.mxu0 }
 0x3c1   : > { %v10992_v40 = vadd.f32 %v5022_v51, %v4830_v7  ;;  %v4832_v0 = vadd.f32 %v4831_v41, %v10722_v34  ;;  %v5026_v36 = vpop.f32.mrf.mxu1  ;;  %v12699_v51 = vld [vmem:[#allocation231_spill] sm:$0xff]  ;;  %v12700_v7 = vld [vmem:[#allocation232_spill] sm:$0xff]  ;;  %v12702_v41 = vld [vmem:[#allocation234_spill] sm:$0xff] }
 0x3c2   : > { %v4833_v3 = vpop.f32.mrf.mxu0 }
 0x3c3   : > { %v10995_v48 = vadd.f32 %v5024_v49, %v4832_v0  ;;  %v4834_v1 = vadd.f32 %v4833_v3, %v10725_v63  ;;  %v10998_v6 = vpop.f32.mrf.mxu1 }
 0x3c4   : > { %v4835_v58 = vpop.f32.mrf.mxu0 }
 0x3c5   : > { %v11000_v11 = vadd.f32 %v5026_v36, %v4834_v1  ;;  %v11003_v21 = vadd.f32 %v4835_v58, %v10730_v45  ;;  %v5032_v44 = vpop.f32.mrf.mxu1  ;;  %5497 = vmatmul.mubr.bf16.gmra.mxu1 %v12700_v7 }
 0x3c6   : > { %v4839_v19 = vpop.f32.mrf.mxu0  ;;  %5304 = vmatmul.mubr.bf16.gmra.mxu0 %v12699_v51  ;;  %7604 = vmatprep.mubr.msk.bf16.mxu1 %vm3136_vm2, %v12702_v41 }
 0x3c7   : > { %v4840_v34 = vadd.f32 %v4839_v19, %v10735_v37  ;;  %5313 = vmatprep.mubr.bf16.mxu0 %v12701_v5  ;;  %v5034_v49 = vpop.f32.mrf.mxu1 }
 0x3c8   : > { %v4841_v63 = vpop.f32.mrf.mxu0 }
 0x3c9   : > { %v11011_v0 = vadd.f32 %v5032_v44, %v4840_v34  ;;  %v4842_v45 = vadd.f32 %v4841_v63, %v10738_v22  ;;  %v5036_v36 = vpop.f32.mrf.mxu1  ;;  %v12703_v44 = vld [vmem:[#allocation235_spill] sm:$0xff]  ;;  %v12704_v34 = vld [vmem:[#allocation236_spill] sm:$0xff]  ;;  %v12705_v63 = vpack.c.bf16 %v10278_v18, %v10280_v55 }
 0x3ca   : > { %v4843_v3 = vpop.f32.mrf.mxu0 }
 0x3cb   : > { %v11014_v1 = vadd.f32 %v5034_v49, %v4842_v45  ;;  %v4844_v58 = vadd.f32 %v4843_v3, %v10741_v35  ;;  %v11017_v7 = vpop.f32.mrf.mxu1 }
 0x3cc   : > { %v4845_v51 = vpop.f32.mrf.mxu0 }
 0x3cd   : > { %v11019_v37 = vadd.f32 %v5036_v36, %v4844_v58  ;;  %v11022_v19 = vadd.f32 %v4845_v51, %v10746_v13  ;;  %v5042_v41 = vpop.f32.mrf.mxu1  ;;  %5507 = vmatmul.mubr.bf16.gmra.mxu1 %v12704_v34 }
 0x3ce   : > { %v4849_v5 = vpop.f32.mrf.mxu0  ;;  %5314 = vmatmul.mubr.bf16.gmra.mxu0 %v12703_v44 }
 0x3cf   : > { %v4850_v22 = vadd.f32 %v4849_v5, %v10752_v50  ;;  %6393 = vmatprep.mubr.bf16.mxu0 %v12705_v63  ;;  %v5044_v49 = vpop.f32.mrf.mxu1 }
 0x3d0   : > { %v4851_v35 = vpop.f32.mrf.mxu0 }
 0x3d1   : > { %v11030_v45 = vadd.f32 %v5042_v41, %v4850_v22  ;;  %v4852_v3 = vadd.f32 %v4851_v35, %v10755_v30  ;;  %v5046_v36 = vpop.f32.mrf.mxu1  ;;  %v12706_v41 = vpack.c.bf16 %v10272_v27, %v10270_v62  ;;  %v12707_v22 = vpack.c.bf16 %v10298_v8, %v10300_v26 }
 0x3d2   : > { %v4853_v13 = vpop.f32.mrf.mxu0 }
 0x3d3   : > { %v11033_v58 = vadd.f32 %v5044_v49, %v4852_v3  ;;  %v4854_v51 = vadd.f32 %v4853_v13, %v10758_v60  ;;  %v11036_v34 = vpop.f32.mrf.mxu1 }
 0x3d4   : > { %v4855_v44 = vpop.f32.mrf.mxu0 }
 0x3d5   : > { %v11038_v50 = vadd.f32 %v5046_v36, %v4854_v51  ;;  %v11041_v18 = vadd.f32 %v4855_v44, %v10763_v31  ;;  %v5052_v5 = vpop.f32.mrf.mxu1  ;;  %v12710_v44 = vld [vmem:[#allocation170_spill] sm:$0xff] }
 0x3d6   : > { %v4859_v55 = vpop.f32.mrf.mxu0  ;;  %6394 = vmatmul.mubr.bf16.vlgmr.msra.gmra.mxu0 %v12706_v41 }
 0x3d7   : > { %v4860_v30 = vadd.f32 %v4859_v55, %v10769_v29  ;;  %6403 = vmatprep.mubr.bf16.mxu0 %v12707_v22  ;;  %v5054_v63 = vpop.f32.mrf.mxu1  ;;  %v12711_v55 = vld [vmem:[#allocation28_spill] sm:$0xff]  ;;  %v12715_v22 = vld [vmem:[#allocation30_spill] sm:$0xff] }
 0x3d8   : > { %v4861_v60 = vpop.f32.mrf.mxu0 }
 0x3d9   : > { %v11050_v35 = vadd.f32 %v5052_v5, %v4860_v30  ;;  %v4862_v49 = vadd.f32 %v4861_v60, %v10772_v33  ;;  %v5056_v3 = vpop.f32.mrf.mxu1  ;;  %v12712_v5 = vpack.c.bf16 %v12710_v44, %v12711_v55  ;;  %v12713_v33 = vld [vmem:[#allocation67_spill] sm:$0xff]  ;;  %v12714_v30 = vld [vmem:[#allocation29_spill] sm:$0xff] }
 0x3da   : > { %v4863_v31 = vpop.f32.mrf.mxu0  ;;  %v12716_v60 = vpack.c.bf16 %v12714_v30, %v12715_v22 }
 0x3db   : > { %v11053_v13 = vadd.f32 %v5054_v63, %v4862_v49  ;;  %v4864_v36 = vadd.f32 %v4863_v31, %v10775_v4  ;;  %v11056_v27 = vpop.f32.mrf.mxu1  ;;  %v12718_v31 = vld [vmem:[#allocation68_spill] sm:$0xff] }
 0x3dc   : > { %v4865_v62 = vpop.f32.mrf.mxu0  ;;  %12708 = vst [vmem:[#allocation18_spill] sm:$0xff] %v11056_v27  ;;  %v12720_v27 = vld [vmem:[#allocation69_spill] sm:$0xff] }
 0x3dd   : > { %v11058_v29 = vadd.f32 %v5056_v3, %v4864_v36  ;;  %v11061_v8 = vadd.f32 %v4865_v62, %v10780_v57  ;;  %v5062_v51 = vpop.f32.mrf.mxu1 }
 0x3de   : > { %v4869_v26 = vpop.f32.mrf.mxu0  ;;  %6404 = vmatmul.mubr.bf16.gmra.mxu0 %v12712_v5  ;;  %v12723_v5 = vld [vmem:[#allocation70_spill] sm:$0xff] }
 0x3df   : > { %12709 = vst [vmem:[#allocation89_spill] sm:$0xff] %v11061_v8  ;;  %v4870_v41 = vadd.f32 %v4869_v26, %v12713_v33  ;;  %6413 = vmatprep.mubr.bf16.mxu0 %v12716_v60  ;;  %v5064_v63 = vpop.f32.mrf.mxu1 }
 0x3e0   : > { %v4871_v4 = vpop.f32.mrf.mxu0 }
 0x3e1   : > { %v11070_v49 = vadd.f32 %v5062_v51, %v4870_v41  ;;  %v4872_v3 = vadd.f32 %v4871_v4, %v12718_v31  ;;  %v5066_v36 = vpop.f32.mrf.mxu1  ;;  %v12725_v51 = vld [vmem:[#allocation174_spill] sm:$0xff]  ;;  %v12726_v41 = vld [vmem:[#allocation173_spill] sm:$0xff]  ;;  %v12728_v4 = vld [vmem:[#allocation71_spill] sm:$0xff] }
 0x3e2   : > { %v4873_v57 = vpop.f32.mrf.mxu0  ;;  %v12727_v60 = vpack.c.bf16 %v12725_v51, %v12726_v41 }
 0x3e3   : > { %12717 = vst [vmem:[#allocation90_spill] sm:$0xff] %v11070_v49  ;;  %v11073_v62 = vadd.f32 %v5064_v63, %v4872_v3  ;;  %v4874_v8 = vadd.f32 %v4873_v57, %v12720_v27  ;;  %v11076_v55 = vpop.f32.mrf.mxu1  ;;  %v12729_v63 = vld [vmem:[#allocation32_spill] sm:$0xff]  ;;  %v12730_v3 = vld [vmem:[#allocation178_spill] sm:$0xff] }
 0x3e4   : > { %v4875_v44 = vpop.f32.mrf.mxu0  ;;  %12721 = vst [vmem:[#allocation91_spill] sm:$0xff] %v11076_v55 }
 0x3e5   : > { %12719 = vst [vmem:[#allocation19_spill] sm:$0xff] %v11073_v62  ;;  %v11078_v26 = vadd.f32 %v5066_v36, %v4874_v8  ;;  %v11081_v33 = vadd.f32 %v4875_v44, %v12723_v5  ;;  %v5072_v22 = vpop.f32.mrf.mxu1  ;;  %v12731_v62 = vpack.c.bf16 %v12729_v63, %v12730_v3  ;;  %v12733_v8 = vld [vmem:[#allocation72_spill] sm:$0xff] }
 0x3e6   : > { %v4879_v30 = vpop.f32.mrf.mxu0  ;;  %6414 = vmatmul.mubr.bf16.gmra.mxu0 %v12727_v60  ;;  %v12738_v60 = vld [vmem:[#allocation74_spill] sm:$0xff] }
 0x3e7   : > { %12722 = vst [vmem:[#allocation92_spill] sm:$0xff] %v11078_v26  ;;  %12724 = vst [vmem:[#allocation20_spill] sm:$0xff] %v11081_v33  ;;  %v4880_v31 = vadd.f32 %v4879_v30, %v12728_v4  ;;  %6423 = vmatprep.mubr.bf16.mxu0 %v12731_v62  ;;  %v5074_v57 = vpop.f32.mrf.mxu1  ;;  %v12735_v26 = vld [vmem:[#allocation73_spill] sm:$0xff] }
 0x3e8   : > { %v4881_v27 = vpop.f32.mrf.mxu0 }
 0x3e9   : > { %v11090_v55 = vadd.f32 %v5072_v22, %v4880_v31  ;;  %v4882_v36 = vadd.f32 %v4881_v27, %v12733_v8  ;;  %v5076_v5 = vpop.f32.mrf.mxu1  ;;  %v12740_v22 = vld [vmem:[#allocation31_spill] sm:$0xff] }
 0x3ea   : > { %v4883_v44 = vpop.f32.mrf.mxu0  ;;  %v12741_v31 = vld [vmem:[#allocation175_spill] sm:$0xff] }
 0x3eb   : > { %12732 = vst [vmem:[#allocation155_spill] sm:$0xff] %v11090_v55  ;;  %v11093_v33 = vadd.f32 %v5074_v57, %v4882_v36  ;;  %v4884_v49 = vadd.f32 %v4883_v44, %v12735_v26  ;;  %v11096_v41 = vpop.f32.mrf.mxu1  ;;  %v12742_v3 = vpack.c.bf16 %v12740_v22, %v12741_v31  ;;  %v12743_v27 = vld [vmem:[#allocation75_spill] sm:$0xff]  ;;  %v12744_v57 = vld [vmem:[#allocation33_spill] sm:$0xff]  ;;  %v12745_v36 = vld [vmem:[#allocation34_spill] sm:$0xff] }
 0x3ec   : > { %v4885_v51 = vpop.f32.mrf.mxu0  ;;  %12736 = vst [vmem:[#allocation93_spill] sm:$0xff] %v11096_v41 }
 0x3ed   : > { %12734 = vst [vmem:[#allocation157_spill] sm:$0xff] %v11093_v33  ;;  %v11098_v30 = vadd.f32 %v5076_v5, %v4884_v49  ;;  %v11101_v4 = vadd.f32 %v4885_v51, %v12738_v60  ;;  %v5082_v63 = vpop.f32.mrf.mxu1  ;;  %v12746_v33 = vpack.c.bf16 %v12744_v57, %v12745_v36  ;;  %v12747_v49 = vld [vmem:[#allocation76_spill] sm:$0xff] }
 0x3ee   : > { %v4889_v62 = vpop.f32.mrf.mxu0  ;;  %6424 = vmatmul.mubr.bf16.gmra.mxu0 %v12742_v3  ;;  %v12752_v3 = vld [vmem:[#allocation78_spill] sm:$0xff] }
 0x3ef   : > { %12737 = vst [vmem:[#allocation94_spill] sm:$0xff] %v11098_v30  ;;  %12739 = vst [vmem:[#allocation158_spill] sm:$0xff] %v11101_v4  ;;  %v4890_v8 = vadd.f32 %v4889_v62, %v12743_v27  ;;  %6433 = vmatprep.mubr.bf16.mxu0 %v12746_v33  ;;  %v5084_v44 = vpop.f32.mrf.mxu1  ;;  %v12749_v30 = vld [vmem:[#allocation77_spill] sm:$0xff] }
 0x3f0   : > { %v4891_v26 = vpop.f32.mrf.mxu0 }
 0x3f1   : > { %v11110_v41 = vadd.f32 %v5082_v63, %v4890_v8  ;;  %v4892_v5 = vadd.f32 %v4891_v26, %v12747_v49  ;;  %v5086_v60 = vpop.f32.mrf.mxu1  ;;  %v12754_v63 = vld [vmem:[#allocation182_spill] sm:$0xff]  ;;  %v12755_v8 = vld [vmem:[#allocation181_spill] sm:$0xff]  ;;  %v12757_v26 = vld [vmem:[#allocation79_spill] sm:$0xff] }
 0x3f2   : > { %v4893_v51 = vpop.f32.mrf.mxu0  ;;  %v12756_v36 = vpack.c.bf16 %v12754_v63, %v12755_v8 }
 0x3f3   : > { %v11113_v4 = vadd.f32 %v5084_v44, %v4892_v5  ;;  %v4894_v55 = vadd.f32 %v4893_v51, %v12749_v30  ;;  %v11116_v31 = vpop.f32.mrf.mxu1  ;;  %v12758_v44 = vld [vmem:[#allocation36_spill] sm:$0xff]  ;;  %v12759_v5 = vld [vmem:[#allocation186_spill] sm:$0xff] }
 0x3f4   : > { %v4895_v22 = vpop.f32.mrf.mxu0  ;;  %12750 = vst [vmem:[#allocation96_spill] sm:$0xff] %v11116_v31 }
 0x3f5   : > { %12748 = vst [vmem:[#allocation95_spill] sm:$0xff] %v11113_v4  ;;  %v11118_v62 = vadd.f32 %v5086_v60, %v4894_v55  ;;  %v11121_v27 = vadd.f32 %v4895_v22, %v12752_v3  ;;  %v5092_v57 = vpop.f32.mrf.mxu1  ;;  %v12760_v4 = vpack.c.bf16 %v12758_v44, %v12759_v5 }
 0x3f6   : > { %v4899_v33 = vpop.f32.mrf.mxu0  ;;  %6434 = vmatmul.mubr.bf16.gmra.mxu0 %v12756_v36  ;;  %v12766_v36 = vld [vmem:[#allocation81_spill] sm:$0xff] }
 0x3f7   : > { %12751 = vst [vmem:[#allocation97_spill] sm:$0xff] %v11118_v62  ;;  %12753 = vst [vmem:[#allocation21_spill] sm:$0xff] %v11121_v27  ;;  %v4900_v49 = vadd.f32 %v4899_v33, %v12757_v26  ;;  %6443 = vmatprep.mubr.bf16.mxu0 %v12760_v4  ;;  %v5094_v51 = vpop.f32.mrf.mxu1  ;;  %v12763_v27 = vld [vmem:[#allocation80_spill] sm:$0xff] }
 0x3f8   : > { %v4901_v30 = vpop.f32.mrf.mxu0 }
 0x3f9   : > { %v11130_v31 = vadd.f32 %v5092_v57, %v4900_v49  ;;  %v4902_v55 = vadd.f32 %v4901_v30, %v10840_v52  ;;  %v5096_v22 = vpop.f32.mrf.mxu1  ;;  %v12768_v57 = vld [vmem:[#allocation35_spill] sm:$0xff]  ;;  %v12771_v52 = vld [vmem:[#allocation82_spill] sm:$0xff] }
 0x3fa   : > { %v4903_v60 = vpop.f32.mrf.mxu0  ;;  %v12769_v49 = vld [vmem:[#allocation183_spill] sm:$0xff] }
 0x3fb   : > { %12761 = vst [vmem:[#allocation22_spill] sm:$0xff] %v11130_v31  ;;  %v11133_v3 = vadd.f32 %v5094_v51, %v4902_v55  ;;  %v4904_v62 = vadd.f32 %v4903_v60, %v12763_v27  ;;  %v11136_v8 = vpop.f32.mrf.mxu1  ;;  %v12770_v5 = vpack.c.bf16 %v12768_v57, %v12769_v49  ;;  %v12772_v51 = vld [vmem:[#allocation37_spill] sm:$0xff]  ;;  %v12773_v55 = vld [vmem:[#allocation38_spill] sm:$0xff] }
 0x3fc   : > { %v4905_v63 = vpop.f32.mrf.mxu0  ;;  %12764 = vst [vmem:[#allocation98_spill] sm:$0xff] %v11136_v8 }
 0x3fd   : > { %12762 = vst [vmem:[#allocation159_spill] sm:$0xff] %v11133_v3  ;;  %v11138_v33 = vadd.f32 %v5096_v22, %v4904_v62  ;;  %v11141_v26 = vadd.f32 %v4905_v63, %v12766_v36  ;;  %v5102_v44 = vpop.f32.mrf.mxu1  ;;  %v12774_v3 = vpack.c.bf16 %v12772_v51, %v12773_v55  ;;  %v12775_v62 = vld [vmem:[#allocation83_spill] sm:$0xff] }
 0x3fe   : > { %v4909_v4 = vpop.f32.mrf.mxu0  ;;  %6444 = vmatmul.mubr.bf16.gmra.mxu0 %v12770_v5  ;;  %v12780_v5 = vld [vmem:[#allocation85_spill] sm:$0xff] }
 0x3ff   : > { %12765 = vst [vmem:[#allocation99_spill] sm:$0xff] %v11138_v33  ;;  %12767 = vst [vmem:[#allocation23_spill] sm:$0xff] %v11141_v26  ;;  %v4910_v30 = vadd.f32 %v4909_v4, %v12771_v52  ;;  %6453 = vmatprep.mubr.bf16.mxu0 %v12774_v3  ;;  %v5104_v60 = vpop.f32.mrf.mxu1  ;;  %v12777_v33 = vld [vmem:[#allocation84_spill] sm:$0xff] }
 0x400   : > { %v4911_v27 = vpop.f32.mrf.mxu0 }
 0x401   : > { %v11150_v8 = vadd.f32 %v5102_v44, %v4910_v30  ;;  %v4912_v22 = vadd.f32 %v4911_v27, %v12775_v62  ;;  %v5106_v36 = vpop.f32.mrf.mxu1  ;;  %v12782_v44 = vld [vmem:[#allocation190_spill] sm:$0xff]  ;;  %v12783_v30 = vld [vmem:[#allocation189_spill] sm:$0xff] }
 0x402   : > { %v4913_v63 = vpop.f32.mrf.mxu0  ;;  %v12784_v55 = vpack.c.bf16 %v12782_v44, %v12783_v30  ;;  %v12785_v27 = vld [vmem:[#allocation86_spill] sm:$0xff] }
 0x403   : > { %v11153_v26 = vadd.f32 %v5104_v60, %v4912_v22  ;;  %v4914_v31 = vadd.f32 %v4913_v63, %v12777_v33  ;;  %v11156_v49 = vpop.f32.mrf.mxu1  ;;  %v12786_v60 = vld [vmem:[#allocation40_spill] sm:$0xff]  ;;  %v12787_v22 = vld [vmem:[#allocation194_spill] sm:$0xff] }
 0x404   : > { %v4915_v57 = vpop.f32.mrf.mxu0  ;;  %12778 = vst [vmem:[#allocation101_spill] sm:$0xff] %v11156_v49 }
 0x405   : > { %12776 = vst [vmem:[#allocation100_spill] sm:$0xff] %v11153_v26  ;;  %v11158_v4 = vadd.f32 %v5106_v36, %v4914_v31  ;;  %v11161_v52 = vadd.f32 %v4915_v57, %v12780_v5  ;;  %v5112_v51 = vpop.f32.mrf.mxu1  ;;  %v12788_v26 = vpack.c.bf16 %v12786_v60, %v12787_v22 }
 0x406   : > { %v4919_v3 = vpop.f32.mrf.mxu0  ;;  %6454 = vmatmul.mubr.bf16.gmra.mxu0 %v12784_v55  ;;  %v12792_v55 = vld [vmem:[#allocation88_spill] sm:$0xff] }
 0x407   : > { %12779 = vst [vmem:[#allocation24_spill] sm:$0xff] %v11158_v4  ;;  %12781 = vst [vmem:[#allocation162_spill] sm:$0xff] %v11161_v52  ;;  %v4920_v62 = vadd.f32 %v4919_v3, %v12785_v27  ;;  %6463 = vmatprep.mubr.bf16.mxu0 %v12788_v26  ;;  %v5114_v63 = vpop.f32.mrf.mxu1  ;;  %v12790_v52 = vld [vmem:[#allocation87_spill] sm:$0xff] }
 0x408   : > { %v4921_v33 = vpop.f32.mrf.mxu0 }
 0x409   : > { %v11170_v49 = vadd.f32 %v5112_v51, %v4920_v62  ;;  %v4922_v31 = vadd.f32 %v4921_v33, %v10874_v20  ;;  %v5116_v57 = vpop.f32.mrf.mxu1  ;;  %v12794_v51 = vld [vmem:[#allocation39_spill] sm:$0xff]  ;;  %v12797_v20 = vld [vmem:[#allocation17_spill] sm:$0xff] }
 0x40a   : > { %v4923_v36 = vpop.f32.mrf.mxu0  ;;  %v12795_v62 = vld [vmem:[#allocation191_spill] sm:$0xff] }
 0x40b   : > { %v11173_v5 = vadd.f32 %v5114_v63, %v4922_v31  ;;  %v4924_v4 = vadd.f32 %v4923_v36, %v12790_v52  ;;  %v11176_v30 = vpop.f32.mrf.mxu1  ;;  %v12796_v22 = vpack.c.bf16 %v12794_v51, %v12795_v62  ;;  %v12798_v63 = vld [vmem:[#allocation41_spill] sm:$0xff]  ;;  %v12799_v31 = vld [vmem:[#allocation42_spill] sm:$0xff] }
 0x40c   : > { %v4925_v44 = vpop.f32.mrf.mxu0  ;;  %12791 = vst [vmem:[#allocation102_spill] sm:$0xff] %v11176_v30 }
 0x40d   : > { %12789 = vst [vmem:[#allocation165_spill] sm:$0xff] %v11173_v5  ;;  %v11178_v3 = vadd.f32 %v5116_v57, %v4924_v4  ;;  %v11181_v27 = vadd.f32 %v4925_v44, %v12792_v55  ;;  %v5122_v60 = vpop.f32.mrf.mxu1  ;;  %v12800_v5 = vpack.c.bf16 %v12798_v63, %v12799_v31  ;;  %v12809_v31 = vld [vmem:[#allocation44_spill] sm:$0xff] }
 0x40e   : > { %v4929_v26 = vpop.f32.mrf.mxu0  ;;  %6464 = vmatmul.mubr.bf16.gmra.mxu0 %v12796_v22 }
 0x40f   : > { %12793 = vst [vmem:[#allocation103_spill] sm:$0xff] %v11181_v27  ;;  %v4930_v33 = vadd.f32 %v4929_v26, %v12797_v20  ;;  %6473 = vmatprep.mubr.bf16.mxu0 %v12800_v5  ;;  %v5124_v36 = vpop.f32.mrf.mxu1 }
 0x410   : > { %v4931_v52 = vpop.f32.mrf.mxu0 }
 0x411   : > { %v11190_v30 = vadd.f32 %v5122_v60, %v4930_v33  ;;  %v4932_v4 = vadd.f32 %v4931_v52, %v10891_v23  ;;  %v5126_v44 = vpop.f32.mrf.mxu1  ;;  %v12806_v60 = vld [vmem:[#allocation198_spill] sm:$0xff]  ;;  %v12807_v33 = vld [vmem:[#allocation197_spill] sm:$0xff] }
 0x412   : > { %v4933_v57 = vpop.f32.mrf.mxu0  ;;  %v12808_v63 = vpack.c.bf16 %v12806_v60, %v12807_v33  ;;  %v12810_v52 = vld [vmem:[#allocation202_spill] sm:$0xff] }
 0x413   : > { %12801 = vst [vmem:[#allocation166_spill] sm:$0xff] %v11190_v30  ;;  %v11193_v55 = vadd.f32 %v5124_v36, %v4932_v4  ;;  %v4934_v27 = vadd.f32 %v4933_v57, %v10894_v24  ;;  %v11196_v62 = vpop.f32.mrf.mxu1  ;;  %v12811_v36 = vpack.c.bf16 %v12809_v31, %v12810_v52  ;;  %v12812_v31 = vld [vmem:[#allocation43_spill] sm:$0xff] }
 0x414   : > { %v4935_v51 = vpop.f32.mrf.mxu0  ;;  %12803 = vst [vmem:[#allocation105_spill] sm:$0xff] %v11196_v62  ;;  %v12813_v52 = vld [vmem:[#allocation199_spill] sm:$0xff] }
 0x415   : > { %12802 = vst [vmem:[#allocation104_spill] sm:$0xff] %v11193_v55  ;;  %v11198_v26 = vadd.f32 %v5126_v44, %v4934_v27  ;;  %v11201_v22 = vadd.f32 %v4935_v51, %v10899_v10  ;;  %v5358_v20 = vpop.f32.mrf.mxu1 }
 0x416   : > { %v5165_v5 = vpop.f32.mrf.mxu0  ;;  %6474 = vmatmul.mubr.bf16.gmra.mxu0 %v12808_v63 }
 0x417   : > { %12804 = vst [vmem:[#allocation25_spill] sm:$0xff] %v11198_v26  ;;  %12805 = vst [vmem:[#allocation26_spill] sm:$0xff] %v11201_v22  ;;  %v5166_v23 = vadd.f32 %v5165_v5, %v10905_v25  ;;  %6483 = vmatprep.mubr.bf16.mxu0 %v12811_v36  ;;  %v5360_v4 = vpop.f32.mrf.mxu1  ;;  %v12814_v36 = vpack.c.bf16 %v12812_v31, %v12813_v52 }
 0x418   : > { %v5167_v24 = vpop.f32.mrf.mxu0 }
 0x419   : > { %v5359_v57 = vadd.f32 %v5358_v20, %v5166_v23  ;;  %v5168_v27 = vadd.f32 %v5167_v24, %v10908_v39  ;;  %v5362_v10 = vpop.f32.mrf.mxu1  ;;  %v12815_v23 = vld [vmem:[#allocation45_spill] sm:$0xff] }
 0x41a   : > { %v5169_v44 = vpop.f32.mrf.mxu0 }
 0x41b   : > { %v5170_v51 = vadd.f32 %v5169_v44, %v10911_v43  ;;  %v5647_v62 = vmul.f32 0.2, %v5359_v57  ;;  %v5364_v26 = vpop.f32.mrf.mxu1  ;;  %vm5519_vm2 = vcmp.gt.f32.partialorder %v5359_v57, 0.0  ;;  %v5361_v60 = vadd.f32 %v5360_v4, %v5168_v27  ;;  %v12816_v43 = vld [vmem:[#allocation46_spill] sm:$0xff] }
 0x41c   : > { %v5171_v22 = vpop.f32.mrf.mxu0  ;;  %v12817_v24 = vpack.c.bf16 %v12815_v23, %v12816_v43 }
 0x41d   : > { %v5363_v33 = vadd.f32 %v5362_v10, %v5170_v51  ;;  %v5172_v25 = vadd.f32 %v5171_v22, %v10916_v54  ;;  %v5368_v63 = vpop.f32.mrf.mxu1  ;;  %v5775_v44 = vsel %vm5519_vm2, %v5359_v57, %v5647_v62  ;;  %v5648_v10 = vmul.f32 0.2, %v5361_v60 }
 0x41e   : > { %v5175_v5 = vpop.f32.mrf.mxu0  ;;  %6484 = vmatmul.mubr.bf16.gmra.mxu0 %v12814_v36  ;;  %vm5520_vm8 = vcmp.gt.f32.partialorder %v5361_v60, 0.0 }
 0x41f   : > { %vm5523_vm7 = vcmp.gt.f32.partialorder %v5363_v33, 0.0  ;;  %v5651_v39 = vmul.f32 0.2, %v5363_v33  ;;  %v5176_v20 = vadd.f32 %v5175_v5, %v10922_v32  ;;  %6493 = vmatprep.mubr.bf16.mxu0 %v12817_v24  ;;  %v5365_v55 = vadd.f32 %v5364_v26, %v5172_v25  ;;  %v5370_v27 = vpop.f32.mrf.mxu1 }
 0x420   : > { %v5177_v4 = vpop.f32.mrf.mxu0  ;;  %v5776_v25 = vsel %vm5520_vm8, %v5361_v60, %v5648_v10 }
 0x421   : > { %v5779_v54 = vsel %vm5523_vm7, %v5363_v33, %v5651_v39  ;;  %v5369_v22 = vadd.f32 %v5368_v63, %v5176_v20  ;;  %v5178_v51 = vadd.f32 %v5177_v4, %v10925_v16  ;;  %vm5524_vm9 = vcmp.gt.f32.partialorder %v5365_v55, 0.0  ;;  %v5372_v30 = vpop.f32.mrf.mxu1  ;;  %v12818_v39 = vld [vmem:[#allocation206_spill] sm:$0xff]  ;;  %v12819_v20 = vld [vmem:[#allocation205_spill] sm:$0xff] }
 0x422   : > { %v5903_v31 = vpack.c.bf16 %v5779_v54, %v5775_v44  ;;  %v5652_v52 = vmul.f32 0.2, %v5365_v55  ;;  %v5179_v36 = vpop.f32.mrf.mxu0  ;;  %v12820_v24 = vpack.c.bf16 %v12818_v39, %v12819_v20  ;;  %v12821_v54 = vld [vmem:[#allocation49_spill] sm:$0xff] }
 0x423   : > { %v5180_v32 = vadd.f32 %v5179_v36, %v10928_v17  ;;  %v5655_v5 = vmul.f32 0.2, %v5369_v22  ;;  %v5374_v43 = vpop.f32.mrf.mxu1  ;;  %vm5527_vm10 = vcmp.gt.f32.partialorder %v5369_v22, 0.0  ;;  %v5371_v26 = vadd.f32 %v5370_v27, %v5178_v51  ;;  %v12822_v36 = vld [vmem:[#allocation50_spill] sm:$0xff] }
 0x424   : > { %v5181_v23 = vpop.f32.mrf.mxu0  ;;  %v5780_v62 = vsel %vm5524_vm9, %v5365_v55, %v5652_v52  ;;  %v12823_v55 = vpack.c.bf16 %v12821_v54, %v12822_v36  ;;  %v12827_v36 = vld [vmem:[#allocation53_spill] sm:$0xff] }
 0x425   : > { %v5373_v57 = vadd.f32 %v5372_v30, %v5180_v32  ;;  %v5182_v33 = vadd.f32 %v5181_v23, %v10933_v38  ;;  %v5378_v16 = vpop.f32.mrf.mxu1  ;;  %v5904_v44 = vpack.c.bf16 %v5780_v62, %v5776_v25  ;;  %v5783_v27 = vsel %vm5527_vm10, %v5369_v22, %v5655_v5 }
 0x426   : > { %v5185_v63 = vpop.f32.mrf.mxu0  ;;  %6494 = vmatmul.mubr.bf16.gmra.mxu0 %v12820_v24  ;;  %v5656_v10 = vmul.f32 0.2, %v5371_v26  ;;  %vm5528_vm12 = vcmp.gt.f32.partialorder %v5371_v26, 0.0  ;;  %v12824_v24 = vld [vmem:[#allocation48_spill] sm:$0xff] }
 0x427   : > { %vm5531_vm11 = vcmp.gt.f32.partialorder %v5373_v57, 0.0  ;;  %v5659_v4 = vmul.f32 0.2, %v5373_v57  ;;  %v5186_v17 = vadd.f32 %v5185_v63, %v10939_v15  ;;  %6503 = vmatprep.mubr.bf16.mxu0 %v12823_v55  ;;  %v5375_v30 = vadd.f32 %v5374_v43, %v5182_v33  ;;  %6586 = vmatprep.mubr.bf16.mxu1 %v5904_v44  ;;  %v5380_v38 = vpop.f32.mrf.mxu1  ;;  %v12825_v44 = vld [vmem:[#allocation47_spill] sm:$0xff]  ;;  %v12828_v55 = vld [vmem:[#allocation54_spill] sm:$0xff] }
 0x428   : > { %v5187_v60 = vpop.f32.mrf.mxu0  ;;  %6587 = vmatmul.mubr.bf16.vlgmr.msra.gmra.mxu1 %v5903_v31 }
 0x429   : > { %v5787_v51 = vsel %vm5531_vm11, %v5373_v57, %v5659_v4  ;;  %v5379_v52 = vadd.f32 %v5378_v16, %v5186_v17  ;;  %v5188_v32 = vadd.f32 %v5187_v60, %v10942_v9  ;;  %vm5532_vm13 = vcmp.gt.f32.partialorder %v5375_v30, 0.0  ;;  %v5382_v25 = vpop.f32.mrf.mxu1 }
 0x42a   : > { %v5907_v23 = vpack.c.bf16 %v5787_v51, %v5783_v27  ;;  %v5660_v62 = vmul.f32 0.2, %v5375_v30  ;;  %v5189_v15 = vpop.f32.mrf.mxu0  ;;  %v5784_v57 = vsel %vm5528_vm12, %v5371_v26, %v5656_v10  ;;  %v12826_v4 = vpack.c.bf16 %v12824_v24, %v12825_v44 }
 0x42b   : > { %v5190_v63 = vadd.f32 %v5189_v15, %v10945_v46  ;;  %v5663_v39 = vmul.f32 0.2, %v5379_v52  ;;  %v5384_v5 = vpop.f32.mrf.mxu1  ;;  %vm5535_vm14 = vcmp.gt.f32.partialorder %v5379_v52, 0.0  ;;  %v5381_v33 = vadd.f32 %v5380_v38, %v5188_v32 }
 0x42c   : > { %v5191_v22 = vpop.f32.mrf.mxu0  ;;  %v5788_v43 = vsel %vm5532_vm13, %v5375_v30, %v5660_v62  ;;  %v12829_v27 = vpack.c.bf16 %v12827_v36, %v12828_v55 }
 0x42d   : > { %v5383_v20 = vadd.f32 %v5382_v25, %v5190_v63  ;;  %v5192_v31 = vadd.f32 %v5191_v22, %v10950_v56  ;;  %v5388_v9 = vpop.f32.mrf.mxu1  ;;  %v5908_v17 = vpack.c.bf16 %v5788_v43, %v5784_v57  ;;  %v5791_v30 = vsel %vm5535_vm14, %v5379_v52, %v5663_v39 }
 0x42e   : > { %v5195_v16 = vpop.f32.mrf.mxu0  ;;  %6504 = vmatmul.mubr.bf16.gmra.mxu0 %v12826_v4  ;;  %v5664_v38 = vmul.f32 0.2, %v5381_v33  ;;  %vm5536_vm0 = vcmp.gt.f32.partialorder %v5381_v33, 0.0 }
 0x42f   : > { %vm5539_vm15 = vcmp.gt.f32.partialorder %v5383_v20, 0.0  ;;  %v5667_v54 = vmul.f32 0.2, %v5383_v20  ;;  %v5196_v46 = vadd.f32 %v5195_v16, %v10956_v28  ;;  %6513 = vmatprep.mubr.bf16.mxu0 %v12829_v27  ;;  %v5385_v60 = vadd.f32 %v5384_v5, %v5192_v31  ;;  %6596 = vmatprep.mubr.bf16.mxu1 %v5908_v17  ;;  %v5390_v56 = vpop.f32.mrf.mxu1  ;;  %v12830_v16 = vld [vmem:[#allocation52_spill] sm:$0xff]  ;;  %v12833_v17 = vld [vmem:[#allocation57_spill] sm:$0xff] }
 0x430   : > { %v5197_v26 = vpop.f32.mrf.mxu0  ;;  %6597 = vmatmul.mubr.bf16.gmra.mxu1 %v5907_v23 }
 0x431   : > { %v5795_v10 = vsel %vm5539_vm15, %v5383_v20, %v5667_v54  ;;  %v5389_v51 = vadd.f32 %v5388_v9, %v5196_v46  ;;  %v5198_v32 = vadd.f32 %v5197_v26, %v10959_v42  ;;  %vm5540_vm1 = vcmp.gt.f32.partialorder %v5385_v60, 0.0  ;;  %v5392_v25 = vpop.f32.mrf.mxu1  ;;  %v12831_v9 = vld [vmem:[#allocation51_spill] sm:$0xff]  ;;  %v12834_v54 = vld [vmem:[#allocation58_spill] sm:$0xff] }
 0x432   : > { %v5911_v62 = vpack.c.bf16 %v5795_v10, %v5791_v30  ;;  %v5668_v15 = vmul.f32 0.2, %v5385_v60  ;;  %v5199_v28 = vpop.f32.mrf.mxu0  ;;  %v5792_v20 = vsel %vm5536_vm0, %v5381_v33, %v5664_v38  ;;  %v12832_v24 = vpack.c.bf16 %v12830_v16, %v12831_v9 }
 0x433   : > { %v5200_v63 = vadd.f32 %v5199_v28, %v10962_v12  ;;  %v5671_v22 = vmul.f32 0.2, %v5389_v51  ;;  %v5394_v39 = vpop.f32.mrf.mxu1  ;;  %vm5543_vm3 = vcmp.gt.f32.partialorder %v5389_v51, 0.0  ;;  %v5391_v43 = vadd.f32 %v5390_v56, %v5198_v32 }
 0x434   : > { %v5201_v52 = vpop.f32.mrf.mxu0  ;;  %v5796_v5 = vsel %vm5540_vm1, %v5385_v60, %v5668_v15  ;;  %v12835_v46 = vpack.c.bf16 %v12833_v17, %v12834_v54 }
 0x435   : > { %v5393_v57 = vadd.f32 %v5392_v25, %v5200_v63  ;;  %v5202_v23 = vadd.f32 %v5201_v52, %v10967_v14  ;;  %v5398_v42 = vpop.f32.mrf.mxu1  ;;  %v5912_v44 = vpack.c.bf16 %v5796_v5, %v5792_v20  ;;  %v5799_v36 = vsel %vm5543_vm3, %v5389_v51, %v5671_v22  ;;  %v12837_v20 = vld [vmem:[#allocation55_spill] sm:$0xff] }
 0x436   : > { %v5205_v31 = vpop.f32.mrf.mxu0  ;;  %6514 = vmatmul.mubr.bf16.gmra.mxu0 %v12832_v24  ;;  %v5672_v27 = vmul.f32 0.2, %v5391_v43  ;;  %vm5544_vm5 = vcmp.gt.f32.partialorder %v5391_v43, 0.0  ;;  %v5019_v51 = vadd.f32 %v10979_v2, %v10984_v59  ;;  %v12839_v59 = vld [vmem:[#allocation61_spill] sm:$0xff] }
 0x437   : > { %vm5547_vm4 = vcmp.gt.f32.partialorder %v5393_v57, 0.0  ;;  %v5675_v4 = vmul.f32 0.2, %v5393_v57  ;;  %v5206_v12 = vadd.f32 %v5205_v31, %v10973_v61  ;;  %6523 = vmatprep.mubr.bf16.mxu0 %v12835_v46  ;;  %v5395_v55 = vadd.f32 %v5394_v39, %v5202_v23  ;;  %6606 = vmatprep.mubr.bf16.mxu1 %v5912_v44  ;;  %v5400_v14 = vpop.f32.mrf.mxu1 }
 0x438   : > { %v5207_v33 = vpop.f32.mrf.mxu0  ;;  %6607 = vmatmul.mubr.bf16.gmra.mxu1 %v5911_v62  ;;  %v5800_v52 = vsel %vm5544_vm5, %v5391_v43, %v5672_v27 }
 0x439   : > { %v5803_v30 = vsel %vm5547_vm4, %v5393_v57, %v5675_v4  ;;  %v5399_v60 = vadd.f32 %v5398_v42, %v5206_v12  ;;  %v5208_v26 = vadd.f32 %v5207_v33, %v10976_v47  ;;  %vm5548_vm6 = vcmp.gt.f32.partialorder %v5395_v55, 0.0  ;;  %v5402_v10 = vpop.f32.mrf.mxu1  ;;  %v12836_v57 = vld [vmem:[#allocation56_spill] sm:$0xff]  ;;  %v12840_v42 = vld [vmem:[#allocation62_spill] sm:$0xff] }
 0x43a   : > { %v5915_v56 = vpack.c.bf16 %v5803_v30, %v5799_v36  ;;  %v5676_v38 = vmul.f32 0.2, %v5395_v55  ;;  %v5209_v61 = vpop.f32.mrf.mxu0  ;;  %v12838_v23 = vpack.c.bf16 %v12836_v57, %v12837_v20  ;;  %v12841_v16 = vpack.c.bf16 %v12839_v59, %v12840_v42 }
 0x43b   : > { %v5210_v32 = vadd.f32 %v5209_v61, %v10981_v53  ;;  %v5679_v15 = vmul.f32 0.2, %v5399_v60  ;;  %v5404_v25 = vpop.f32.mrf.mxu1  ;;  %vm5551_vm2 = vcmp.gt.f32.partialorder %v5399_v60, 0.0  ;;  %v5401_v22 = vadd.f32 %v5400_v14, %v5208_v26 }
 0x43c   : > { %v5211_v28 = vpop.f32.mrf.mxu0  ;;  %v5804_v63 = vsel %vm5548_vm6, %v5395_v55, %v5676_v38  ;;  %v5029_v14 = vadd.f32 %v10998_v6, %v11003_v21  ;;  %v12845_v21 = vld [vmem:[#allocation66_spill] sm:$0xff]  ;;  %v5039_v42 = vadd.f32 %v11017_v7, %v11022_v19 }
 0x43d   : > { %v5403_v62 = vadd.f32 %v5402_v10, %v5210_v32  ;;  %v5212_v47 = vadd.f32 %v5211_v28, %v5019_v51  ;;  %v5408_v5 = vpop.f32.mrf.mxu1  ;;  %v5916_v31 = vpack.c.bf16 %v5804_v63, %v5800_v52  ;;  %v5807_v9 = vsel %vm5551_vm2, %v5399_v60, %v5679_v15  ;;  %v12842_v51 = vld [vmem:[#allocation60_spill] sm:$0xff]  ;;  %v12843_v15 = vld [vmem:[#allocation59_spill] sm:$0xff]  ;;  %v12846_v63 = vld [vmem:[#allocation65_spill] sm:$0xff] }
 0x43e   : > { %v5215_v39 = vpop.f32.mrf.mxu0  ;;  %6524 = vmatmul.mubr.bf16.gmra.mxu0 %v12838_v23  ;;  %v5680_v4 = vmul.f32 0.2, %v5401_v22  ;;  %vm5552_vm8 = vcmp.gt.f32.partialorder %v5401_v22, 0.0  ;;  %v12844_v28 = vpack.c.bf16 %v12842_v51, %v12843_v15 }
 0x43f   : > { %vm5555_vm7 = vcmp.gt.f32.partialorder %v5403_v62, 0.0  ;;  %v5683_v53 = vmul.f32 0.2, %v5403_v62  ;;  %v5216_v2 = vadd.f32 %v5215_v39, %v10992_v40  ;;  %6533 = vmatprep.mubr.bf16.mxu0 %v12841_v16  ;;  %v5405_v24 = vadd.f32 %v5404_v25, %v5212_v47  ;;  %6616 = vmatprep.mubr.bf16.mxu1 %v5916_v31  ;;  %v5410_v44 = vpop.f32.mrf.mxu1 }
 0x440   : > { %v5217_v43 = vpop.f32.mrf.mxu0  ;;  %6617 = vmatmul.mubr.bf16.gmra.mxu1 %v5915_v56  ;;  %v5808_v61 = vsel %vm5552_vm8, %v5401_v22, %v5680_v4 }
 0x441   : > { %v5811_v12 = vsel %vm5555_vm7, %v5403_v62, %v5683_v53  ;;  %v5409_v17 = vadd.f32 %v5408_v5, %v5216_v2  ;;  %v5218_v54 = vadd.f32 %v5217_v43, %v10995_v48  ;;  %vm5556_vm9 = vcmp.gt.f32.partialorder %v5405_v24, 0.0  ;;  %v5412_v55 = vpop.f32.mrf.mxu1 }
 0x442   : > { %v5919_v46 = vpack.c.bf16 %v5811_v12, %v5807_v9  ;;  %v5684_v36 = vmul.f32 0.2, %v5405_v24  ;;  %v5219_v40 = vpop.f32.mrf.mxu0  ;;  %v12847_v62 = vpack.c.bf16 %v12845_v21, %v12846_v63 }
 0x443   : > { %v5220_v33 = vadd.f32 %v5219_v40, %v11000_v11  ;;  %v5687_v27 = vmul.f32 0.2, %v5409_v17  ;;  %v5414_v60 = vpop.f32.mrf.mxu1  ;;  %vm5559_vm10 = vcmp.gt.f32.partialorder %v5409_v17, 0.0  ;;  %v5411_v38 = vadd.f32 %v5410_v44, %v5218_v54 }
 0x444   : > { %v5221_v30 = vpop.f32.mrf.mxu0  ;;  %v5812_v26 = vsel %vm5556_vm9, %v5405_v24, %v5684_v36  ;;  %v12849_v36 = vld [vmem:[#allocation63_spill] sm:$0xff] }
 0x445   : > { %v5413_v56 = vadd.f32 %v5412_v55, %v5220_v33  ;;  %v5222_v48 = vadd.f32 %v5221_v30, %v5029_v14  ;;  %v5418_v32 = vpop.f32.mrf.mxu1  ;;  %v5920_v25 = vpack.c.bf16 %v5812_v26, %v5808_v61  ;;  %v5815_v52 = vsel %vm5559_vm10, %v5409_v17, %v5687_v27 }
 0x446   : > { %v5225_v10 = vpop.f32.mrf.mxu0  ;;  %6534 = vmatmul.mubr.bf16.gmra.mxu0 %v12844_v28  ;;  %v5688_v5 = vmul.f32 0.2, %v5411_v38  ;;  %vm5560_vm12 = vcmp.gt.f32.partialorder %v5411_v38, 0.0 }
 0x447   : > { %vm5563_vm11 = vcmp.gt.f32.partialorder %v5413_v56, 0.0  ;;  %v5691_v11 = vmul.f32 0.2, %v5413_v56  ;;  %v5226_v6 = vadd.f32 %v5225_v10, %v11011_v0  ;;  %6543 = vmatprep.mubr.bf16.mxu0 %v12847_v62  ;;  %v5415_v47 = vadd.f32 %v5414_v60, %v5222_v48  ;;  %6626 = vmatprep.mubr.bf16.mxu1 %v5920_v25  ;;  %v5420_v39 = vpop.f32.mrf.mxu1 }
 0x448   : > { %v5227_v22 = vpop.f32.mrf.mxu0  ;;  %6627 = vmatmul.mubr.bf16.gmra.mxu1 %v5919_v46  ;;  %v5816_v12 = vsel %vm5560_vm12, %v5411_v38, %v5688_v5  ;;  %v12848_v46 = vld [vmem:[#allocation64_spill] sm:$0xff] }
 0x449   : > { %v5819_v57 = vsel %vm5563_vm11, %v5413_v56, %v5691_v11  ;;  %v5419_v20 = vadd.f32 %v5418_v32, %v5226_v6  ;;  %v5228_v23 = vadd.f32 %v5227_v22, %v11014_v1  ;;  %vm5564_vm13 = vcmp.gt.f32.partialorder %v5415_v47, 0.0  ;;  %v5422_v2 = vpop.f32.mrf.mxu1 }
 0x44a   : > { %v5923_v31 = vpack.c.bf16 %v5819_v57, %v5815_v52  ;;  %v5692_v53 = vmul.f32 0.2, %v5415_v47  ;;  %v5229_v0 = vpop.f32.mrf.mxu0  ;;  %v12850_v40 = vpack.c.bf16 %v12848_v46, %v12849_v36 }
 0x44b   : > { %v5230_v59 = vadd.f32 %v5229_v0, %v11019_v37  ;;  %v5695_v16 = vmul.f32 0.2, %v5419_v20  ;;  %v5424_v24 = vpop.f32.mrf.mxu1  ;;  %vm5567_vm14 = vcmp.gt.f32.partialorder %v5419_v20, 0.0  ;;  %v5421_v44 = vadd.f32 %v5420_v39, %v5228_v23 }
 0x44c   : > { %v5231_v9 = vpop.f32.mrf.mxu0  ;;  %v5820_v43 = vsel %vm5564_vm13, %v5415_v47, %v5692_v53 }
 0x44d   : > { %v5423_v4 = vadd.f32 %v5422_v2, %v5230_v59  ;;  %v5232_v1 = vadd.f32 %v5231_v9, %v5039_v42  ;;  %v5428_v54 = vpop.f32.mrf.mxu1  ;;  %v5924_v55 = vpack.c.bf16 %v5820_v43, %v5816_v12  ;;  %v5823_v19 = vsel %vm5567_vm14, %v5419_v20, %v5695_v16  ;;  %v12852_v42 = vld [vmem:[#allocation18_spill] sm:$0xff] }
 0x44e   : > { %v5235_v17 = vpop.f32.mrf.mxu0  ;;  %6544 = vmatmul.mubr.bf16.gmra.mxu0 %v12850_v40  ;;  %v5696_v30 = vmul.f32 0.2, %v5421_v44  ;;  %vm5568_vm0 = vcmp.gt.f32.partialorder %v5421_v44, 0.0  ;;  %v12853_v40 = vld [vmem:[#allocation90_spill] sm:$0xff] }
 0x44f   : > { %vm5571_vm15 = vcmp.gt.f32.partialorder %v5423_v4, 0.0  ;;  %v5699_v37 = vmul.f32 0.2, %v5423_v4  ;;  %v5236_v7 = vadd.f32 %v5235_v17, %v11030_v45  ;;  %v5425_v33 = vadd.f32 %v5424_v24, %v5232_v1  ;;  %6636 = vmatprep.mubr.bf16.mxu1 %v5924_v55  ;;  %v5430_v27 = vpop.f32.mrf.mxu1 }
 0x450   : > { %v5237_v14 = vpop.f32.mrf.mxu0  ;;  %6637 = vmatmul.mubr.bf16.gmra.mxu1 %v5923_v31  ;;  %v5049_v45 = vadd.f32 %v11036_v34, %v11041_v18  ;;  %v5824_v21 = vsel %vm5568_vm0, %v5421_v44, %v5696_v30  ;;  %v12854_v30 = vld [vmem:[#allocation19_spill] sm:$0xff] }
 0x451   : > { %v5827_v60 = vsel %vm5571_vm15, %v5423_v4, %v5699_v37  ;;  %v5429_v26 = vadd.f32 %v5428_v54, %v5236_v7  ;;  %v5238_v38 = vadd.f32 %v5237_v14, %v11033_v58  ;;  %vm5572_vm1 = vcmp.gt.f32.partialorder %v5425_v33, 0.0  ;;  %v5432_v10 = vpop.f32.mrf.mxu1 }
 0x452   : > { %v5927_v56 = vpack.c.bf16 %v5827_v60, %v5823_v19  ;;  %v5700_v61 = vmul.f32 0.2, %v5425_v33  ;;  %v5239_v48 = vpop.f32.mrf.mxu0 }
 0x453   : > { %v5240_v32 = vadd.f32 %v5239_v48, %v11038_v50  ;;  %v5703_v51 = vmul.f32 0.2, %v5429_v26  ;;  %v5434_v28 = vpop.f32.mrf.mxu1  ;;  %vm5575_vm3 = vcmp.gt.f32.partialorder %v5429_v26, 0.0  ;;  %v5431_v11 = vadd.f32 %v5430_v27, %v5238_v38  ;;  %v12855_v48 = vld [vmem:[#allocation92_spill] sm:$0xff] }
 0x454   : > { %v5241_v15 = vpop.f32.mrf.mxu0  ;;  %v5828_v25 = vsel %vm5572_vm1, %v5425_v33, %v5700_v61 }
 0x455   : > { %v5433_v6 = vadd.f32 %v5432_v10, %v5240_v32  ;;  %v5242_v58 = vadd.f32 %v5241_v15, %v5049_v45  ;;  %v5438_v62 = vpop.f32.mrf.mxu1  ;;  %v5928_v52 = vpack.c.bf16 %v5828_v25, %v5824_v21  ;;  %v5831_v50 = vsel %vm5575_vm3, %v5429_v26, %v5703_v51  ;;  %v12856_v32 = vld [vmem:[#allocation20_spill] sm:$0xff]  ;;  %v12857_v45 = vld [vmem:[#allocation91_spill] sm:$0xff] }
 0x456   : > { %v5245_v63 = vpop.f32.mrf.mxu0  ;;  %v5704_v5 = vmul.f32 0.2, %v5431_v11  ;;  %vm5576_vm5 = vcmp.gt.f32.partialorder %v5431_v11, 0.0  ;;  %v5069_v51 = vadd.f32 %v12857_v45, %v12856_v32  ;;  %v12864_v45 = vld [vmem:[#allocation97_spill] sm:$0xff] }
 0x457   : > { %vm5579_vm4 = vcmp.gt.f32.partialorder %v5433_v6, 0.0  ;;  %v5707_v47 = vmul.f32 0.2, %v5433_v6  ;;  %v5246_v22 = vadd.f32 %v5245_v63, %v11050_v35  ;;  %v5435_v39 = vadd.f32 %v5434_v28, %v5242_v58  ;;  %6646 = vmatprep.mubr.bf16.mxu1 %v5928_v52  ;;  %v5440_v18 = vpop.f32.mrf.mxu1  ;;  %v12851_v35 = vld [vmem:[#allocation89_spill] sm:$0xff] }
 0x458   : > { %v5247_v34 = vpop.f32.mrf.mxu0  ;;  %6647 = vmatmul.mubr.bf16.gmra.mxu1 %v5927_v56  ;;  %v5059_v16 = vadd.f32 %v12852_v42, %v12851_v35  ;;  %v5832_v1 = vsel %vm5576_vm5, %v5431_v11, %v5704_v5 }
 0x459   : > { %v5835_v57 = vsel %vm5579_vm4, %v5433_v6, %v5707_v47  ;;  %v5439_v20 = vadd.f32 %v5438_v62, %v5246_v22  ;;  %v5248_v23 = vadd.f32 %v5247_v34, %v11053_v13  ;;  %vm5580_vm6 = vcmp.gt.f32.partialorder %v5435_v39, 0.0  ;;  %v5442_v2 = vpop.f32.mrf.mxu1 }
 0x45a   : > { %v5931_v31 = vpack.c.bf16 %v5835_v57, %v5831_v50  ;;  %v5708_v53 = vmul.f32 0.2, %v5435_v39  ;;  %v5249_v0 = vpop.f32.mrf.mxu0  ;;  %v12858_v50 = vld [vmem:[#allocation155_spill] sm:$0xff] }
 0x45b   : > { %v5250_v59 = vadd.f32 %v5249_v0, %v11058_v29  ;;  %v5711_v9 = vmul.f32 0.2, %v5439_v20  ;;  %v5444_v43 = vpop.f32.mrf.mxu1  ;;  %vm5583_vm2 = vcmp.gt.f32.partialorder %v5439_v20, 0.0  ;;  %v5441_v4 = vadd.f32 %v5440_v18, %v5248_v23 }
 0x45c   : > { %v5251_v24 = vpop.f32.mrf.mxu0  ;;  %v5836_v44 = vsel %vm5580_vm6, %v5435_v39, %v5708_v53  ;;  %v12859_v53 = vld [vmem:[#allocation157_spill] sm:$0xff] }
 0x45d   : > { %v5443_v12 = vadd.f32 %v5442_v2, %v5250_v59  ;;  %v5252_v13 = vadd.f32 %v5251_v24, %v5059_v16  ;;  %v5448_v54 = vpop.f32.mrf.mxu1  ;;  %v5932_v46 = vpack.c.bf16 %v5836_v44, %v5832_v1  ;;  %v5839_v29 = vsel %vm5583_vm2, %v5439_v20, %v5711_v9  ;;  %v12860_v16 = vld [vmem:[#allocation94_spill] sm:$0xff] }
 0x45e   : > { %v5255_v17 = vpop.f32.mrf.mxu0  ;;  %v5712_v33 = vmul.f32 0.2, %v5441_v4  ;;  %vm5584_vm8 = vcmp.gt.f32.partialorder %v5441_v4, 0.0  ;;  %v12861_v24 = vld [vmem:[#allocation158_spill] sm:$0xff] }
 0x45f   : > { %vm5587_vm7 = vcmp.gt.f32.partialorder %v5443_v12, 0.0  ;;  %v5715_v36 = vmul.f32 0.2, %v5443_v12  ;;  %v5256_v55 = vadd.f32 %v5255_v17, %v12853_v40  ;;  %v5445_v37 = vadd.f32 %v5444_v43, %v5252_v13  ;;  %6656 = vmatprep.mubr.bf16.mxu1 %v5932_v46  ;;  %v5450_v19 = vpop.f32.mrf.mxu1  ;;  %v12862_v43 = vld [vmem:[#allocation93_spill] sm:$0xff] }
 0x460   : > { %v5257_v7 = vpop.f32.mrf.mxu0  ;;  %6657 = vmatmul.mubr.bf16.gmra.mxu1 %v5931_v31  ;;  %v5840_v58 = vsel %vm5584_vm8, %v5441_v4, %v5712_v33  ;;  %v5079_v44 = vadd.f32 %v12862_v43, %v12861_v24  ;;  %v12869_v24 = vld [vmem:[#allocation99_spill] sm:$0xff] }
 0x461   : > { %v5843_v14 = vsel %vm5587_vm7, %v5443_v12, %v5715_v36  ;;  %v5449_v27 = vadd.f32 %v5448_v54, %v5256_v55  ;;  %v5258_v60 = vadd.f32 %v5257_v7, %v12854_v30  ;;  %vm5588_vm9 = vcmp.gt.f32.partialorder %v5445_v37, 0.0  ;;  %v5452_v61 = vpop.f32.mrf.mxu1 }
 0x462   : > { %v5935_v26 = vpack.c.bf16 %v5843_v14, %v5839_v29  ;;  %v5716_v38 = vmul.f32 0.2, %v5445_v37  ;;  %v5259_v56 = vpop.f32.mrf.mxu0 }
 0x463   : > { %v5260_v10 = vadd.f32 %v5259_v56, %v12855_v48  ;;  %v5719_v15 = vmul.f32 0.2, %v5449_v27  ;;  %v5454_v25 = vpop.f32.mrf.mxu1  ;;  %vm5591_vm10 = vcmp.gt.f32.partialorder %v5449_v27, 0.0  ;;  %v5451_v6 = vadd.f32 %v5450_v19, %v5258_v60 }
 0x464   : > { %v5261_v28 = vpop.f32.mrf.mxu0  ;;  %v5844_v11 = vsel %vm5588_vm9, %v5445_v37, %v5716_v38  ;;  %v12863_v38 = vld [vmem:[#allocation95_spill] sm:$0xff] }
 0x465   : > { %v5453_v21 = vadd.f32 %v5452_v61, %v5260_v10  ;;  %v5262_v63 = vadd.f32 %v5261_v28, %v5069_v51  ;;  %v5458_v52 = vpop.f32.mrf.mxu1  ;;  %v5936_v47 = vpack.c.bf16 %v5844_v11, %v5840_v58  ;;  %v5847_v34 = vsel %vm5591_vm10, %v5449_v27, %v5719_v15  ;;  %v12866_v15 = vld [vmem:[#allocation96_spill] sm:$0xff] }
 0x466   : > { %v5265_v62 = vpop.f32.mrf.mxu0  ;;  %v5720_v20 = vmul.f32 0.2, %v5451_v6  ;;  %vm5592_vm12 = vcmp.gt.f32.partialorder %v5451_v6, 0.0 }
 0x467   : > { %vm5595_vm11 = vcmp.gt.f32.partialorder %v5453_v21, 0.0  ;;  %v5723_v22 = vmul.f32 0.2, %v5453_v21  ;;  %v5266_v39 = vadd.f32 %v5265_v62, %v12858_v50  ;;  %v5455_v18 = vadd.f32 %v5454_v25, %v5262_v63  ;;  %6666 = vmatprep.mubr.bf16.mxu1 %v5936_v47  ;;  %v5460_v57 = vpop.f32.mrf.mxu1 }
 0x468   : > { %v5267_v5 = vpop.f32.mrf.mxu0  ;;  %6667 = vmatmul.mubr.bf16.gmra.mxu1 %v5935_v26  ;;  %v5848_v46 = vsel %vm5592_vm12, %v5451_v6, %v5720_v20 }
 0x469   : > { %v5851_v23 = vsel %vm5595_vm11, %v5453_v21, %v5723_v22  ;;  %v5459_v31 = vadd.f32 %v5458_v52, %v5266_v39  ;;  %v5268_v0 = vadd.f32 %v5267_v5, %v12859_v53  ;;  %vm5596_vm13 = vcmp.gt.f32.partialorder %v5455_v18, 0.0  ;;  %v5462_v42 = vpop.f32.mrf.mxu1 }
 0x46a   : > { %v5939_v2 = vpack.c.bf16 %v5851_v23, %v5847_v34  ;;  %v5724_v59 = vmul.f32 0.2, %v5455_v18  ;;  %v5269_v35 = vpop.f32.mrf.mxu0  ;;  %v12867_v34 = vld [vmem:[#allocation22_spill] sm:$0xff] }
 0x46b   : > { %v5270_v9 = vadd.f32 %v5269_v35, %v12860_v16  ;;  %v5727_v4 = vmul.f32 0.2, %v5459_v31  ;;  %v5464_v1 = vpop.f32.mrf.mxu1  ;;  %vm5599_vm14 = vcmp.gt.f32.partialorder %v5459_v31, 0.0  ;;  %v5461_v17 = vadd.f32 %v5460_v57, %v5268_v0 }
 0x46c   : > { %v5271_v12 = vpop.f32.mrf.mxu0  ;;  %v5852_v13 = vsel %vm5596_vm13, %v5455_v18, %v5724_v59 }
 0x46d   : > { %v5463_v54 = vadd.f32 %v5462_v42, %v5270_v9  ;;  %v5272_v36 = vadd.f32 %v5271_v12, %v5079_v44  ;;  %v5468_v55 = vpop.f32.mrf.mxu1  ;;  %v5940_v29 = vpack.c.bf16 %v5852_v13, %v5848_v46  ;;  %v5855_v19 = vsel %vm5599_vm14, %v5459_v31, %v5727_v4  ;;  %v12870_v44 = vld [vmem:[#allocation23_spill] sm:$0xff]  ;;  %v12871_v4 = vld [vmem:[#allocation98_spill] sm:$0xff] }
 0x46e   : > { %v5275_v40 = vpop.f32.mrf.mxu0  ;;  %v5728_v30 = vmul.f32 0.2, %v5461_v17  ;;  %vm5600_vm0 = vcmp.gt.f32.partialorder %v5461_v17, 0.0  ;;  %v5099_v12 = vadd.f32 %v12871_v4, %v12870_v44 }
 0x46f   : > { %vm5603_vm15 = vcmp.gt.f32.partialorder %v5463_v54, 0.0  ;;  %v5731_v37 = vmul.f32 0.2, %v5463_v54  ;;  %v5276_v7 = vadd.f32 %v5275_v40, %v11110_v41  ;;  %v5465_v33 = vadd.f32 %v5464_v1, %v5272_v36  ;;  %6676 = vmatprep.mubr.bf16.mxu1 %v5940_v29  ;;  %v5470_v27 = vpop.f32.mrf.mxu1  ;;  %v12865_v41 = vld [vmem:[#allocation21_spill] sm:$0xff] }
 0x470   : > { %v5277_v14 = vpop.f32.mrf.mxu0  ;;  %6677 = vmatmul.mubr.bf16.gmra.mxu1 %v5939_v2  ;;  %v5089_v28 = vadd.f32 %v12866_v15, %v12865_v41  ;;  %v5856_v62 = vsel %vm5600_vm0, %v5461_v17, %v5728_v30  ;;  %v12868_v2 = vld [vmem:[#allocation159_spill] sm:$0xff]  ;;  %v12873_v41 = vld [vmem:[#allocation24_spill] sm:$0xff] }
 0x471   : > { %v5859_v60 = vsel %vm5603_vm15, %v5463_v54, %v5731_v37  ;;  %v5469_v26 = vadd.f32 %v5468_v55, %v5276_v7  ;;  %v5278_v56 = vadd.f32 %v5277_v14, %v12863_v38  ;;  %vm5604_vm1 = vcmp.gt.f32.partialorder %v5465_v33, 0.0  ;;  %v5472_v32 = vpop.f32.mrf.mxu1 }
 0x472   : > { %v5943_v61 = vpack.c.bf16 %v5859_v60, %v5855_v19  ;;  %v5732_v48 = vmul.f32 0.2, %v5465_v33  ;;  %v5279_v10 = vpop.f32.mrf.mxu0 }
 0x473   : > { %v5280_v51 = vadd.f32 %v5279_v10, %v12864_v45  ;;  %v5735_v25 = vmul.f32 0.2, %v5469_v26  ;;  %v5474_v6 = vpop.f32.mrf.mxu1  ;;  %vm5607_vm3 = vcmp.gt.f32.partialorder %v5469_v26, 0.0  ;;  %v5471_v58 = vadd.f32 %v5470_v27, %v5278_v56 }
 0x474   : > { %v5281_v11 = vpop.f32.mrf.mxu0  ;;  %v5860_v21 = vsel %vm5604_vm1, %v5465_v33, %v5732_v48 }
 0x475   : > { %v5473_v63 = vadd.f32 %v5472_v32, %v5280_v51  ;;  %v5282_v52 = vadd.f32 %v5281_v11, %v5089_v28  ;;  %v5478_v22 = vpop.f32.mrf.mxu1  ;;  %v5944_v50 = vpack.c.bf16 %v5860_v21, %v5856_v62  ;;  %v5863_v5 = vsel %vm5607_vm3, %v5469_v26, %v5735_v25  ;;  %v12875_v28 = vld [vmem:[#allocation101_spill] sm:$0xff] }
 0x476   : > { %v5285_v47 = vpop.f32.mrf.mxu0  ;;  %v5736_v31 = vmul.f32 0.2, %v5471_v58  ;;  %vm5608_vm5 = vcmp.gt.f32.partialorder %v5471_v58, 0.0 }
 0x477   : > { %vm5611_vm4 = vcmp.gt.f32.partialorder %v5473_v63, 0.0  ;;  %v5739_v39 = vmul.f32 0.2, %v5473_v63  ;;  %v5286_v18 = vadd.f32 %v5285_v47, %v12867_v34  ;;  %v5475_v57 = vadd.f32 %v5474_v6, %v5282_v52  ;;  %6686 = vmatprep.mubr.bf16.mxu1 %v5944_v50  ;;  %v5480_v23 = vpop.f32.mrf.mxu1 }
 0x478   : > { %v5287_v20 = vpop.f32.mrf.mxu0  ;;  %6687 = vmatmul.mubr.bf16.gmra.mxu1 %v5943_v61  ;;  %v5864_v40 = vsel %vm5608_vm5, %v5471_v58, %v5736_v31  ;;  %v12872_v61 = vld [vmem:[#allocation100_spill] sm:$0xff] }
 0x479   : > { %v5867_v53 = vsel %vm5611_vm4, %v5473_v63, %v5739_v39  ;;  %v5479_v0 = vadd.f32 %v5478_v22, %v5286_v18  ;;  %v5288_v59 = vadd.f32 %v5287_v20, %v12868_v2  ;;  %vm5612_vm6 = vcmp.gt.f32.partialorder %v5475_v57, 0.0  ;;  %v5482_v9 = vpop.f32.mrf.mxu1  ;;  %v12876_v2 = vld [vmem:[#allocation165_spill] sm:$0xff] }
 0x47a   : > { %v5947_v35 = vpack.c.bf16 %v5867_v53, %v5863_v5  ;;  %v5740_v42 = vmul.f32 0.2, %v5475_v57  ;;  %v5289_v16 = vpop.f32.mrf.mxu0 }
 0x47b   : > { %v5290_v43 = vadd.f32 %v5289_v16, %v12869_v24  ;;  %v5743_v1 = vmul.f32 0.2, %v5479_v0  ;;  %v5484_v17 = vpop.f32.mrf.mxu1  ;;  %vm5615_vm2 = vcmp.gt.f32.partialorder %v5479_v0, 0.0  ;;  %v5481_v46 = vadd.f32 %v5480_v23, %v5288_v59 }
 0x47c   : > { %v5291_v13 = vpop.f32.mrf.mxu0  ;;  %v5868_v54 = vsel %vm5612_vm6, %v5475_v57, %v5740_v42 }
 0x47d   : > { %v5483_v36 = vadd.f32 %v5482_v9, %v5290_v43  ;;  %v5292_v55 = vadd.f32 %v5291_v13, %v5099_v12  ;;  %v5488_v37 = vpop.f32.mrf.mxu1  ;;  %v5948_v7 = vpack.c.bf16 %v5868_v54, %v5864_v40  ;;  %v5871_v14 = vsel %vm5615_vm2, %v5479_v0, %v5743_v1  ;;  %v12878_v43 = vld [vmem:[#allocation102_spill] sm:$0xff] }
 0x47e   : > { %v5295_v29 = vpop.f32.mrf.mxu0  ;;  %v5744_v26 = vmul.f32 0.2, %v5481_v46  ;;  %vm5616_vm8 = vcmp.gt.f32.partialorder %v5481_v46, 0.0 }
 0x47f   : > { %vm5619_vm7 = vcmp.gt.f32.partialorder %v5483_v36, 0.0  ;;  %v5747_v19 = vmul.f32 0.2, %v5483_v36  ;;  %v5296_v33 = vadd.f32 %v5295_v29, %v11150_v8  ;;  %v5485_v27 = vadd.f32 %v5484_v17, %v5292_v55  ;;  %6696 = vmatprep.mubr.bf16.mxu1 %v5948_v7  ;;  %v5490_v60 = vpop.f32.mrf.mxu1  ;;  %v12874_v8 = vld [vmem:[#allocation162_spill] sm:$0xff] }
 0x480   : > { %v5297_v30 = vpop.f32.mrf.mxu0  ;;  %6697 = vmatmul.mubr.bf16.gmra.mxu1 %v5947_v35  ;;  %v5109_v25 = vadd.f32 %v12875_v28, %v12874_v8  ;;  %v5872_v52 = vsel %vm5616_vm8, %v5481_v46, %v5744_v26  ;;  %v12879_v7 = vld [vmem:[#allocation166_spill] sm:$0xff] }
 0x481   : > { %v5875_v38 = vsel %vm5619_vm7, %v5483_v36, %v5747_v19  ;;  %v5489_v56 = vadd.f32 %v5488_v37, %v5296_v33  ;;  %v5298_v48 = vadd.f32 %v5297_v30, %v12872_v61  ;;  %vm5620_vm9 = vcmp.gt.f32.partialorder %v5485_v27, 0.0  ;;  %v5492_v51 = vpop.f32.mrf.mxu1 }
 0x482   : > { %v5951_v10 = vpack.c.bf16 %v5875_v38, %v5871_v14  ;;  %v5748_v32 = vmul.f32 0.2, %v5485_v27  ;;  %v5299_v45 = vpop.f32.mrf.mxu0  ;;  %v12880_v38 = vld [vmem:[#allocation104_spill] sm:$0xff] }
 0x483   : > { %v5300_v15 = vadd.f32 %v5299_v45, %v12873_v41  ;;  %v5751_v11 = vmul.f32 0.2, %v5489_v56  ;;  %v5494_v21 = vpop.f32.mrf.mxu1  ;;  %vm5623_vm10 = vcmp.gt.f32.partialorder %v5489_v56, 0.0  ;;  %v5491_v63 = vadd.f32 %v5490_v60, %v5298_v48  ;;  %v12882_v41 = vld [vmem:[#allocation26_spill] sm:$0xff] }
 0x484   : > { %v5301_v6 = vpop.f32.mrf.mxu0  ;;  %v5876_v58 = vsel %vm5620_vm9, %v5485_v27, %v5748_v32  ;;  %v12881_v32 = vld [vmem:[#allocation25_spill] sm:$0xff] }
 0x485   : > { %v5493_v62 = vadd.f32 %v5492_v51, %v5300_v15  ;;  %v5302_v47 = vadd.f32 %v5301_v6, %v5109_v25  ;;  %v5498_v50 = vpop.f32.mrf.mxu1  ;;  %v5952_v39 = vpack.c.bf16 %v5876_v58, %v5872_v52  ;;  %v5879_v5 = vsel %vm5623_vm10, %v5489_v56, %v5751_v11  ;;  %v12883_v15 = vld [vmem:[#allocation105_spill] sm:$0xff] }
 0x486   : > { %v5305_v22 = vpop.f32.mrf.mxu0  ;;  %v5752_v31 = vmul.f32 0.2, %v5491_v63  ;;  %vm5624_vm12 = vcmp.gt.f32.partialorder %v5491_v63, 0.0  ;;  %v5129_v8 = vadd.f32 %v12883_v15, %v12882_v41 }
 0x487   : > { %vm5627_vm11 = vcmp.gt.f32.partialorder %v5493_v62, 0.0  ;;  %v5755_v34 = vmul.f32 0.2, %v5493_v62  ;;  %v5306_v18 = vadd.f32 %v5305_v22, %v11170_v49  ;;  %v5495_v57 = vadd.f32 %v5494_v21, %v5302_v47  ;;  %6706 = vmatprep.mubr.bf16.mxu1 %v5952_v39  ;;  %v5500_v23 = vpop.f32.mrf.mxu1  ;;  %v12877_v49 = vld [vmem:[#allocation103_spill] sm:$0xff] }
 0x488   : > { %v5307_v20 = vpop.f32.mrf.mxu0  ;;  %6707 = vmatmul.mubr.bf16.gmra.mxu1 %v5951_v10  ;;  %v5119_v44 = vadd.f32 %v12878_v43, %v12877_v49  ;;  %v5880_v46 = vsel %vm5624_vm12, %v5491_v63, %v5752_v31 }
 0x489   : > { %v5883_v53 = vsel %vm5627_vm11, %v5493_v62, %v5755_v34  ;;  %v5499_v0 = vadd.f32 %v5498_v50, %v5306_v18  ;;  %v5308_v59 = vadd.f32 %v5307_v20, %v12876_v2  ;;  %vm5628_vm13 = vcmp.gt.f32.partialorder %v5495_v57, 0.0  ;;  %v5502_v9 = vpop.f32.mrf.mxu1 }
 0x48a   : > { %v5955_v35 = vpack.c.bf16 %v5883_v53, %v5879_v5  ;;  %v5756_v42 = vmul.f32 0.2, %v5495_v57  ;;  %v5309_v16 = vpop.f32.mrf.mxu0 }
 0x48b   : > { %v5310_v24 = vadd.f32 %v5309_v16, %v11178_v3  ;;  %v5759_v4 = vmul.f32 0.2, %v5499_v0  ;;  %v5504_v1 = vpop.f32.mrf.mxu1  ;;  %vm5631_vm14 = vcmp.gt.f32.partialorder %v5499_v0, 0.0  ;;  %v5501_v17 = vadd.f32 %v5500_v23, %v5308_v59 }
 0x48c   : > { %v5311_v12 = vpop.f32.mrf.mxu0  ;;  %v5884_v13 = vsel %vm5628_vm13, %v5495_v57, %v5756_v42 }
 0x48d   : > { %v5503_v54 = vadd.f32 %v5502_v9, %v5310_v24  ;;  %v5312_v36 = vadd.f32 %v5311_v12, %v5119_v44  ;;  %v5508_v55 = vpop.f32.mrf.mxu1  ;;  %v5956_v29 = vpack.c.bf16 %v5884_v13, %v5880_v46  ;;  %v5887_v3 = vsel %vm5631_vm14, %v5499_v0, %v5759_v4 }
 0x48e   : > { %v5315_v40 = vpop.f32.mrf.mxu0  ;;  %v5760_v30 = vmul.f32 0.2, %v5501_v17  ;;  %vm5632_vm0 = vcmp.gt.f32.partialorder %v5501_v17, 0.0 }
 0x48f   : > { %vm5635_vm15 = vcmp.gt.f32.partialorder %v5503_v54, 0.0  ;;  %v5763_v37 = vmul.f32 0.2, %v5503_v54  ;;  %v5316_v19 = vadd.f32 %v5315_v40, %v12879_v7  ;;  %v5505_v33 = vadd.f32 %v5504_v1, %v5312_v36  ;;  %6716 = vmatprep.mubr.bf16.mxu1 %v5956_v29  ;;  %v5510_v27 = vpop.f32.mrf.mxu1 }
 0x490   : > { %v5317_v14 = vpop.f32.mrf.mxu0  ;;  %6717 = vmatmul.mubr.bf16.gmra.mxu1 %v5955_v35  ;;  %v5888_v58 = vsel %vm5632_vm0, %v5501_v17, %v5760_v30  ;;  %v6029_v30 = vld [vmem:[#allocation10] sm:$0x3] }
 0x491   : > { %v5891_v60 = vsel %vm5635_vm15, %v5503_v54, %v5763_v37  ;;  %v5509_v26 = vadd.f32 %v5508_v55, %v5316_v19  ;;  %v5318_v56 = vadd.f32 %v5317_v14, %v12880_v38  ;;  %vm5636_vm1 = vcmp.gt.f32.partialorder %v5505_v33, 0.0  ;;  %v5512_v51 = vpop.f32.mrf.mxu1 }
 0x492   : > { %v5959_v61 = vpack.c.bf16 %v5891_v60, %v5887_v3  ;;  %v5764_v48 = vmul.f32 0.2, %v5505_v33  ;;  %v5319_v10 = vpop.f32.mrf.mxu0 }
 0x493   : > { %v5320_v45 = vadd.f32 %v5319_v10, %v12881_v32  ;;  %v5511_v28 = vadd.f32 %v5510_v27, %v5318_v56  ;;  %v5767_v6 = vmul.f32 0.2, %v5509_v26  ;;  %vm5639_vm3 = vcmp.gt.f32.partialorder %v5509_v26, 0.0  ;;  %v5514_v22 = vpop.f32.mrf.mxu1  ;;  %v12885_v56 = vld [vmem:[#allocation114_spill] sm:$0xff] }
 0x494   : > { %v5321_v25 = vpop.f32.mrf.mxu0  ;;  %v5892_v11 = vsel %vm5636_vm1, %v5505_v33, %v5764_v48 }
 0x495   : > { %v5513_v21 = vadd.f32 %v5512_v51, %v5320_v45  ;;  %v5322_v63 = vadd.f32 %v5321_v25, %v5129_v8  ;;  %v5960_v52 = vpack.c.bf16 %v5892_v11, %v5888_v58  ;;  %v5768_v50 = vmul.f32 0.2, %v5511_v28 }
 0x496   : > { %v6395_v62 = vpop.f32.mrf.mxu0  ;;  %v5895_v18 = vsel %vm5639_vm3, %v5509_v26, %v5767_v6  ;;  %vm5640_vm5 = vcmp.gt.f32.partialorder %v5511_v28, 0.0  ;;  %v12884_v26 = vld [vmem:[#allocation115_spill] sm:$0xff] }
 0x497   : > { %vm5643_vm4 = vcmp.gt.f32.partialorder %v5513_v21, 0.0  ;;  %v5771_v47 = vmul.f32 0.2, %v5513_v21  ;;  %v5515_v39 = vadd.f32 %v5514_v22, %v5322_v63  ;;  %6726 = vmatprep.mubr.bf16.mxu1 %v5960_v52  ;;  %v5896_v53 = vsel %vm5640_vm5, %v5511_v28, %v5768_v50 }
 0x498   : > { %v6397_v34 = vpop.f32.mrf.mxu0  ;;  %6727 = vmatmul.mubr.bf16.gmra.mxu1 %v5959_v61  ;;  %v11375_v38 = vrot.slane %v6029_v30, %v12884_v26  ;;  %v12886_v61 = vsub.s32 1, %v12885_v56 }
 0x499   : > { %v5899_v5 = vsel %vm5643_vm4, %v5513_v21, %v5771_v47  ;;  %vm5644_vm6 = vcmp.gt.f32.partialorder %v5515_v39, 0.0  ;;  %v5772_v20 = vmul.f32 0.2, %v5515_v39 }
 0x49a   : > { %v5963_v57 = vpack.c.bf16 %v5899_v5, %v5895_v18  ;;  %v6399_v23 = vpop.f32.mrf.mxu0  ;;  %v11379_v48 = vrot.slane %v6029_v30, %v12886_v61  ;;  %v6396_v32 = vadd.f32 %v6395_v62, %v11375_v38 }
 0x49b   : > { %v5900_v0 = vsel %vm5644_vm6, %v5515_v39, %v5772_v20  ;;  %v6400_v28 = vadd.f32 %v6399_v23, %v11375_v38 }
 0x49c   : > { %v6401_v31 = vpop.f32.mrf.mxu0  ;;  %v5964_v2 = vpack.c.bf16 %v5900_v0, %v5896_v53  ;;  %12887 = vst [vmem:[#allocation167_spill] sm:$0xff] %v11379_v48  ;;  %v6398_v51 = vadd.f32 %v6397_v34, %v11379_v48 }
 0x49d   : > { %v6402_v21 = vadd.f32 %v6401_v31, %v11379_v48 }
 0x49e   : > { %v6405_v59 = vpop.f32.mrf.mxu0  ;;  %6736 = vmatprep.mubr.bf16.mxu1 %v5964_v2 }
 0x49f   : > { %v6406_v63 = vadd.f32 %v6405_v59, %v11375_v38 }
 0x4a0   : > { %v6407_v35 = vpop.f32.mrf.mxu0  ;;  %6737 = vmatmul.mubr.bf16.gmra.mxu1 %v5963_v57 }
 0x4a1   : > { %v6408_v39 = vadd.f32 %v6407_v35, %v11379_v48 }
 0x4a2   : > { %v6409_v42 = vpop.f32.mrf.mxu0 }
 0x4a3   : > { %v6410_v0 = vadd.f32 %v6409_v42, %v11375_v38 }
 0x4a4   : > { %v11324_v16 = vpop.f32.mrf.mxu0 }
 0x4a6   : > { %v11326_v9 = vpop.f32.mrf.mxu0 }
 0x4a8   : > { %v11328_v24 = vpop.f32.mrf.mxu0 }
 0x4aa   : > { %v11330_v49 = vpop.f32.mrf.mxu0 }
 0x4ac   : > { %v11332_v43 = vpop.f32.mrf.mxu0 }
 0x4ae   : > { %v11334_v44 = vpop.f32.mrf.mxu0 }
 0x4b0   : > { %v11336_v4 = vpop.f32.mrf.mxu0 }
 0x4b2   : > { %v11338_v12 = vpop.f32.mrf.mxu0 }
 0x4b4   : > { %v11340_v1 = vpop.f32.mrf.mxu0 }
 0x4b6   : > { %v11342_v13 = vpop.f32.mrf.mxu0 }
 0x4b8   : > { %v11344_v17 = vpop.f32.mrf.mxu0 }
 0x4ba   : > { %v11346_v54 = vpop.f32.mrf.mxu0 }
 0x4bc   : > { %v11348_v46 = vpop.f32.mrf.mxu0 }
 0x4be   : > { %v11350_v36 = vpop.f32.mrf.mxu0 }
 0x4c0   : > { %v11352_v40 = vpop.f32.mrf.mxu0 }
 0x4c2   : > { %v11354_v55 = vpop.f32.mrf.mxu0 }
 0x4c4   : > { %v11356_v29 = vpop.f32.mrf.mxu0 }
 0x4c6   : > { %v11358_v37 = vpop.f32.mrf.mxu0 }
 0x4c8   : > { %v11360_v7 = vpop.f32.mrf.mxu0 }
 0x4ca   : > { %v11362_v19 = vpop.f32.mrf.mxu0 }
 0x4cc   : > { %v11364_v3 = vpop.f32.mrf.mxu0 }
 0x4ce   : > { %v11366_v33 = vpop.f32.mrf.mxu0 }
 0x4d0   : > { %v11368_v14 = vpop.f32.mrf.mxu0 }
 0x4d2   : > { %v11370_v27 = vpop.f32.mrf.mxu0 }
 0x4d4   : > { %v11372_v60 = vpop.f32.mrf.mxu0 }
 0x4d6   : > { %v11381_v10 = vpop.f32.mrf.mxu0 }
 0x4d8   : > { %v11385_v15 = vpop.f32.mrf.mxu0 }
 0x4da   : > { %v11390_v52 = vpop.f32.mrf.mxu0 }
 0x4dc   : > { %v11397_v23 = vpop.f32.mrf.mxu0 }
 0x4e8   : > { %v6588_v45 = vpop.f32.mrf.mxu1 }
 0x4e9   : > { %v6589_v41 = vadd.f32 %v6588_v45, %v6396_v32  ;;  %v6412_v45 = vadd.f32 %v11324_v16, %v11379_v48 }
 0x4ea   : > { %v6590_v8 = vpop.f32.mrf.mxu1 }
 0x4eb   : > { %v6591_v25 = vadd.f32 %v6590_v8, %v6398_v51  ;;  %v6811_v11 = vmul.f32 0.2, %v6589_v41  ;;  %vm6747_vm2 = vcmp.gt.f32.partialorder %v6589_v41, 0.0  ;;  %v11412_v8 = vpop.f32.mrf.mxu0 }
 0x4ec   : > { %v6592_v6 = vpop.f32.mrf.mxu1 }
 0x4ed   : > { %v6593_v58 = vadd.f32 %v6592_v6, %v6400_v28  ;;  %v6812_v47 = vmul.f32 0.2, %v6591_v25  ;;  %v11393_v34 = vsel %vm6747_vm2, %v6589_v41, %v6811_v11  ;;  %vm6748_vm8 = vcmp.gt.f32.partialorder %v6591_v25, 0.0 }
 0x4ee   : > { %v6594_v62 = vpop.f32.mrf.mxu1  ;;  %12888 = vst [vmem:[#allocation106_spill] sm:$0xff] %v11393_v34  ;;  %v6416_v41 = vadd.f32 %v11326_v9, %v11375_v38  ;;  %v6418_v6 = vadd.f32 %v11328_v24, %v11379_v48  ;;  %v11420_v9 = vpop.f32.mrf.mxu0 }
 0x4ef   : > { %vm6749_vm7 = vcmp.gt.f32.partialorder %v6593_v58, 0.0  ;;  %v6813_v22 = vmul.f32 0.2, %v6593_v58  ;;  %v6595_v50 = vadd.f32 %v6594_v62, %v6402_v21  ;;  %v11402_v59 = vsel %vm6748_vm8, %v6591_v25, %v6812_v47 }
 0x4f0   : > { %v6598_v18 = vpop.f32.mrf.mxu1  ;;  %12890 = vst [vmem:[#allocation27_spill] sm:$0xff] %v11402_v59 }
 0x4f1   : > { %v11395_v5 = vsel %vm6749_vm7, %v6593_v58, %v6813_v22  ;;  %vm6750_vm9 = vcmp.gt.f32.partialorder %v6595_v50, 0.0  ;;  %v6814_v57 = vmul.f32 0.2, %v6595_v50  ;;  %v6599_v20 = vadd.f32 %v6598_v18, %v6406_v63 }
 0x4f2   : > { %12889 = vst [vmem:[#allocation107_spill] sm:$0xff] %v11395_v5  ;;  %v6600_v53 = vpop.f32.mrf.mxu1  ;;  %v11484_v5 = vadd.f32 %v11346_v54, %v11375_v38  ;;  %v6456_v54 = vadd.f32 %v11358_v37, %v11375_v38  ;;  %v6470_v37 = vadd.f32 %v11370_v27, %v11375_v38  ;;  %v11536_v27 = vadd.f32 %v11412_v8, %v11375_v38 }
 0x4f3   : > { %v6601_v2 = vadd.f32 %v6600_v53, %v6408_v39  ;;  %v11404_v35 = vsel %vm6750_vm9, %v6595_v50, %v6814_v57  ;;  %v6815_v30 = vmul.f32 0.2, %v6599_v20  ;;  %vm6751_vm10 = vcmp.gt.f32.partialorder %v6599_v20, 0.0 }
 0x4f4   : > { %12891 = vst [vmem:[#allocation108_spill] sm:$0xff] %v11404_v35  ;;  %v6602_v61 = vpop.f32.mrf.mxu1  ;;  %v6420_v50 = vadd.f32 %v11330_v49, %v11375_v38  ;;  %v6476_v35 = vadd.f32 %v11381_v10, %v11375_v38  ;;  %v11542_v10 = vadd.f32 %v11420_v9, %v11379_v48 }
 0x4f5   : > { %v6603_v51 = vadd.f32 %v6602_v61, %v6410_v0  ;;  %v6816_v28 = vmul.f32 0.2, %v6601_v2  ;;  %v11416_v21 = vsel %vm6751_vm10, %v6599_v20, %v6815_v30  ;;  %vm6752_vm12 = vcmp.gt.f32.partialorder %v6601_v2, 0.0 }
 0x4f6   : > { %v6604_v42 = vpop.f32.mrf.mxu1  ;;  %12892 = vst [vmem:[#allocation109_spill] sm:$0xff] %v11416_v21  ;;  %v6422_v0 = vadd.f32 %v11332_v43, %v11379_v48  ;;  %v6426_v61 = vadd.f32 %v11334_v44, %v11375_v38 }
 0x4f7   : > { %vm6753_vm11 = vcmp.gt.f32.partialorder %v6603_v51, 0.0  ;;  %v6817_v25 = vmul.f32 0.2, %v6603_v51  ;;  %v6605_v11 = vadd.f32 %v6604_v42, %v6412_v45  ;;  %v11426_v24 = vsel %vm6752_vm12, %v6601_v2, %v6816_v28  ;;  %v11436_v45 = vpop.f32.mrf.mxu0 }
 0x4f8   : > { %v6608_v58 = vpop.f32.mrf.mxu1  ;;  %12894 = vst [vmem:[#allocation111_spill] sm:$0xff] %v11426_v24 }
 0x4f9   : > { %v11418_v16 = vsel %vm6753_vm11, %v6603_v51, %v6817_v25  ;;  %vm6754_vm13 = vcmp.gt.f32.partialorder %v6605_v11, 0.0  ;;  %v6818_v63 = vmul.f32 0.2, %v6605_v11  ;;  %v6609_v62 = vadd.f32 %v6608_v58, %v6416_v41 }
 0x4fa   : > { %12893 = vst [vmem:[#allocation110_spill] sm:$0xff] %v11418_v16  ;;  %v6610_v22 = vpop.f32.mrf.mxu1 }
 0x4fb   : > { %v6611_v39 = vadd.f32 %v6610_v22, %v6418_v6  ;;  %v11428_v18 = vsel %vm6754_vm13, %v6605_v11, %v6818_v63  ;;  %v6819_v57 = vmul.f32 0.2, %v6609_v62  ;;  %vm6755_vm14 = vcmp.gt.f32.partialorder %v6609_v62, 0.0  ;;  %v6491_v6 = vpop.f32.mrf.mxu0 }
 0x4fc   : > { %12895 = vst [vmem:[#allocation112_spill] sm:$0xff] %v11428_v18  ;;  %v6612_v20 = vpop.f32.mrf.mxu1  ;;  %v6430_v63 = vadd.f32 %v11338_v12, %v11375_v38 }
 0x4fd   : > { %v6613_v30 = vadd.f32 %v6612_v20, %v6420_v50  ;;  %v6820_v2 = vmul.f32 0.2, %v6611_v39  ;;  %v11438_v42 = vsel %vm6755_vm14, %v6609_v62, %v6819_v57  ;;  %vm6756_vm0 = vcmp.gt.f32.partialorder %v6611_v39, 0.0 }
 0x4fe   : > { %v6614_v49 = vpop.f32.mrf.mxu1  ;;  %12896 = vst [vmem:[#allocation113_spill] sm:$0xff] %v11438_v42  ;;  %v11476_v57 = vadd.f32 %v11342_v13, %v11375_v38  ;;  %v6448_v13 = vadd.f32 %v11352_v40, %v11379_v48  ;;  %v6462_v40 = vadd.f32 %v11364_v3, %v11379_v48 }
 0x4ff   : > { %vm6757_vm15 = vcmp.gt.f32.partialorder %v6613_v30, 0.0  ;;  %v6821_v51 = vmul.f32 0.2, %v6613_v30  ;;  %v6615_v41 = vadd.f32 %v6614_v49, %v6422_v0  ;;  %v11446_v22 = vsel %vm6756_vm0, %v6611_v39, %v6820_v2 }
 0x500   : > { %v6618_v28 = vpop.f32.mrf.mxu1  ;;  %12898 = vst [vmem:[#allocation117_spill] sm:$0xff] %v11446_v22  ;;  %v6438_v2 = vadd.f32 %v11344_v17, %v11379_v48  ;;  %v11496_v17 = vadd.f32 %v11354_v55, %v11375_v38  ;;  %v6466_v55 = vadd.f32 %v11366_v33, %v11375_v38  ;;  %v11528_v33 = vadd.f32 %v11390_v52, %v11375_v38 }
 0x501   : > { %v11440_v25 = vsel %vm6757_vm15, %v6613_v30, %v6821_v51  ;;  %vm6758_vm1 = vcmp.gt.f32.partialorder %v6615_v41, 0.0  ;;  %v6822_v43 = vmul.f32 0.2, %v6615_v41  ;;  %v6619_v11 = vadd.f32 %v6618_v28, %v6426_v61  ;;  %v6495_v30 = vpop.f32.mrf.mxu0 }
 0x502   : > { %12897 = vst [vmem:[#allocation116_spill] sm:$0xff] %v11440_v25  ;;  %v6620_v58 = vpop.f32.mrf.mxu1  ;;  %v11549_v52 = vadd.f32 %v6491_v6, %v11379_v48  ;;  %v11554_v24 = vadd.f32 %v6495_v30, %v11375_v38 }
 0x503   : > { %v11448_v50 = vsel %vm6758_vm1, %v6615_v41, %v6822_v43  ;;  %v6823_v20 = vmul.f32 0.2, %v6619_v11  ;;  %vm6759_vm3 = vcmp.gt.f32.partialorder %v6619_v11, 0.0  ;;  %v6497_v39 = vpop.f32.mrf.mxu0 }
 0x504   : > { %12899 = vst [vmem:[#allocation118_spill] sm:$0xff] %v11448_v50  ;;  %v6622_v62 = vpop.f32.mrf.mxu1  ;;  %v11561_v9 = vadd.f32 %v6497_v39, %v11379_v48 }
 0x505   : > { %v6623_v0 = vadd.f32 %v6622_v62, %v6430_v63  ;;  %v11456_v28 = vsel %vm6759_vm3, %v6619_v11, %v6823_v20  ;;  %v6499_v63 = vpop.f32.mrf.mxu0 }
 0x506   : > { %v11452_v61 = vpop.f32.mrf.mxu1  ;;  %12900 = vst [vmem:[#allocation119_spill] sm:$0xff] %v11456_v28 }
 0x507   : > { %vm6761_vm4 = vcmp.gt.f32.partialorder %v6623_v0, 0.0  ;;  %v6825_v49 = vmul.f32 0.2, %v6623_v0  ;;  %v6501_v32 = vpop.f32.mrf.mxu0 }
 0x508   : > { %v11454_v51 = vpop.f32.mrf.mxu1  ;;  %v11569_v42 = vadd.f32 %v6501_v32, %v11379_v48 }
 0x509   : > { %v11458_v12 = vsel %vm6761_vm4, %v6623_v0, %v6825_v49  ;;  %v6505_v44 = vpop.f32.mrf.mxu0  ;;  %v6428_v0 = vadd.f32 %v11336_v4, %v11379_v48  ;;  %v6432_v49 = vadd.f32 %v11340_v1, %v11379_v48  ;;  %v6442_v4 = vadd.f32 %v11348_v46, %v11379_v48 }
 0x50a   : > { %12901 = vst [vmem:[#allocation120_spill] sm:$0xff] %v11458_v12  ;;  %v6630_v41 = vpop.f32.mrf.mxu1  ;;  %v11490_v1 = vadd.f32 %v11350_v36, %v11375_v38  ;;  %v6458_v46 = vadd.f32 %v11360_v7, %v11379_v48  ;;  %v11508_v36 = vadd.f32 %v11362_v19, %v11375_v38  ;;  %v6472_v7 = vadd.f32 %v11372_v60, %v11379_v48 }
 0x50b   : > { %v11480_v26 = vpop.f32.mrf.mxu0  ;;  %v6478_v19 = vadd.f32 %v11385_v15, %v11379_v48  ;;  %v11538_v60 = vadd.f32 %v6620_v58, %v6428_v0  ;;  %v11546_v15 = vadd.f32 %v11436_v45, %v11375_v38  ;;  %v11551_v16 = vadd.f32 %v6630_v41, %v6438_v2 }
 0x50c   : > { %v11462_v43 = vpop.f32.mrf.mxu1  ;;  %12902 = vst [vmem:[#allocation121_spill] sm:$0xff] %v11480_v26  ;;  %v6452_v26 = vadd.f32 %v11356_v29, %v11379_v48  ;;  %v6468_v29 = vadd.f32 %v11368_v14, %v11379_v48  ;;  %v11532_v14 = vadd.f32 %v11397_v23, %v11379_v48  ;;  %v11564_v45 = vadd.f32 %v6499_v63, %v11375_v38 }
 0x50d   : > { %v11524_v21 = vpop.f32.mrf.mxu0  ;;  %v11578_v30 = vadd.f32 %v11452_v61, %v6432_v49  ;;  %v11581_v39 = vmul.f32 0.2, %v11551_v16 }
 0x50e   : > { %v6634_v62 = vpop.f32.mrf.mxu1 }
 0x50f   : > { %v11566_v18 = vpop.f32.mrf.mxu0  ;;  %v11583_v63 = vadd.f32 %v6634_v62, %v6442_v4 }
 0x510   : > { %v11464_v31 = vpop.f32.mrf.mxu1  ;;  %12903 = vst [vmem:[#allocation122_spill] sm:$0xff] %v11566_v18 }
 0x511   : > { %vm6766_vm14 = vcmp.gt.f32.partialorder %v11583_v63, 0.0 }
 0x512   : > { %v6640_v47 = vpop.f32.mrf.mxu1 }
 0x513   : > { %v11556_v8 = vadd.f32 %v6640_v47, %v6448_v13  ;;  %v11572_v47 = vadd.f32 %v6505_v44, %v11375_v38 }
 0x514   : > { %v11466_v53 = vpop.f32.mrf.mxu1 }
 0x515   : > { %v11586_v13 = vmul.f32 0.2, %v11556_v8  ;;  %vm6768_vm3 = vcmp.gt.f32.partialorder %v11556_v8, 0.0 }
 0x516   : > { %v6644_v11 = vpop.f32.mrf.mxu1 }
 0x517   : > { %v11558_v58 = vadd.f32 %v6644_v11, %v6452_v26  ;;  %v11575_v26 = vmul.f32 0.2, %v11538_v60 }
 0x518   : > { %v11468_v20 = vpop.f32.mrf.mxu1 }
 0x519   : > { %v11589_v32 = vmul.f32 0.2, %v11558_v58  ;;  %vm6770_vm2 = vcmp.gt.f32.partialorder %v11558_v58, 0.0 }
 0x51a   : > { %v6650_v34 = vpop.f32.mrf.mxu1 }
 0x51b   : > { %v6651_v0 = vadd.f32 %v6650_v34, %v6458_v46  ;;  %v11591_v46 = vpop.f32.mrf.mxu0 }
 0x51c   : > { %v11504_v59 = vpop.f32.mrf.mxu1  ;;  %12904 = vst [vmem:[#allocation123_spill] sm:$0xff] %v11591_v46 }
 0x51d   : > { %vm6772_vm5 = vcmp.gt.f32.partialorder %v6651_v0, 0.0 }
 0x51e   : > { %v6654_v3 = vpop.f32.mrf.mxu1 }
 0x51f   : > { %v6655_v6 = vadd.f32 %v6654_v3, %v6462_v40  ;;  %v6836_v40 = vmul.f32 0.2, %v6651_v0 }
 0x520   : > { %v6658_v23 = vpop.f32.mrf.mxu1 }
 0x521   : > { %v6659_v2 = vadd.f32 %v6658_v23, %v6466_v55  ;;  %v6838_v55 = vmul.f32 0.2, %v6655_v6  ;;  %vm6774_vm7 = vcmp.gt.f32.partialorder %v6655_v6, 0.0 }
 0x522   : > { %v6660_v41 = vpop.f32.mrf.mxu1 }
 0x523   : > { %v6661_v34 = vadd.f32 %v6660_v41, %v6468_v29  ;;  %v6839_v61 = vmul.f32 0.2, %v6659_v2  ;;  %v8631_v29 = vmov 1966171168   ;;  %v11595_v41 = vadd.f32 %v11468_v20, %v6456_v54 }
 0x524   : > { %v6662_v11 = vpop.f32.mrf.mxu1  ;;  %v6992_v3 = vunpack.c.l.s4 %v8631_v29  ;;  %vm6775_vm9 = vcmp.gt.f32.partialorder %v6659_v2, 0.0  ;;  %v11599_v29 = vpop.f32.mrf.mxu0  ;;  %v6902_v28 = vsel %vm6774_vm7, %v6655_v6, %v6838_v55  ;;  %v6643_v55 = vadd.f32 %v11466_v53, %v11496_v17 }
 0x525   : > { %v6663_v44 = vadd.f32 %v6662_v11, %v6470_v37  ;;  %v6840_v23 = vmul.f32 0.2, %v6661_v34  ;;  %vm6776_vm8 = vcmp.gt.f32.partialorder %v6661_v34, 0.0  ;;  %12906 = vst [vmem:[#allocation125_spill] sm:$0xff] %v11599_v29  ;;  %vm6771_vm15 = vcmp.gt.f32.partialorder %v11595_v41, 0.0 }
 0x526   : > { %v6664_v49 = vpop.f32.mrf.mxu1  ;;  %v11597_v11 = vld.sshfl [vmem:[#allocation11] sm:$0x11 pattern:$0x75316420]  ;;  %v6993_v46 = vunpack.c.0.s8 %v6992_v3  ;;  %v6639_v53 = vadd.f32 %v11464_v31, %v11490_v1  ;;  %v6830_v31 = vmul.f32 0.2, %v11583_v63 }
 0x527   : > { %vm6777_vm6 = vcmp.gt.f32.partialorder %v6663_v44, 0.0  ;;  %v6841_v62 = vmul.f32 0.2, %v6663_v44  ;;  %v6665_v4 = vadd.f32 %v6664_v49, %v6472_v7  ;;  %12905 = vst [vmem:[#allocation124_spill] sm:$0xff] %v11597_v11  ;;  %v6653_v7 = vadd.f32 %v11504_v59, %v11508_v36 }
 0x528   : > { %v6668_v37 = vpop.f32.mrf.mxu1  ;;  %v6990_v20 = vcombine.high %v11597_v11, %v11597_v11  ;;  %v11607_v54 = vsub.s32 %v6993_v46, %v12885_v56  ;;  %v6904_v3 = vsel %vm6776_vm8, %v6661_v34, %v6840_v23  ;;  %v11613_v11 = vpop.f32.mrf.mxu0  ;;  %v8632_v34 = vmov 0  }
 0x529   : > { %vm6778_vm10 = vcmp.gt.f32.partialorder %v6665_v4, 0.0  ;;  %v6842_v18 = vmul.f32 0.2, %v6665_v4  ;;  %v6669_v48 = vadd.f32 %v6668_v37, %v6476_v35  ;;  %v6905_v49 = vsel %vm6777_vm6, %v6663_v44, %v6841_v62  ;;  %7768 = vset.pattern.permute.xlu0 %v8632_v34 }
 0x52a   : > { %v6670_v25 = vpop.f32.mrf.mxu1  ;;  %12907 = vst [vmem:[#allocation126_spill] sm:$0xff] %v11607_v54  ;;  %v6903_v35 = vsel %vm6775_vm9, %v6659_v2, %v6839_v61  ;;  %v7004_v59 = vrot.slane %v6990_v20, %v11607_v54  ;;  %v6900_v62 = vsel %vm6772_vm5, %v6651_v0, %v6836_v40  ;;  %vm6773_vm12 = vcmp.gt.f32.partialorder %v6653_v7, 0.0  ;;  %v11625_v40 = vpop.f32.mrf.mxu0 }
 0x52b   : > { %v6671_v22 = vadd.f32 %v6670_v25, %v6478_v19  ;;  %v6906_v50 = vsel %vm6778_vm10, %v6665_v4, %v6842_v18  ;;  %v6843_v37 = vmul.f32 0.2, %v6669_v48  ;;  %v6954_v36 = vpack.c.bf16 %v6905_v49, %v6903_v35  ;;  %v6972_v19 = vld [vmem:[#allocation2] sm:$0x1] }
 0x52c   : > { %v6672_v29 = vpop.f32.mrf.mxu1  ;;  %v6955_v12 = vpack.c.bf16 %v6906_v50, %v6904_v3  ;;  %vm6779_vm11 = vcmp.gt.f32.partialorder %v6669_v48, 0.0  ;;  %v6837_v56 = vmul.f32 0.2, %v6653_v7  ;;  %v6953_v18 = vpack.c.bf16 %v6902_v28, %v6900_v62  ;;  %7039 = vmatprep.mubr.bf16.mxu0 %v7004_v59  ;;  %6975 = vperm.xlu0 %7768, %v6972_v19  }
 0x52d   : > { %v6673_v44 = vadd.f32 %v6672_v29, %v11528_v33  ;;  %v6844_v6 = vmul.f32 0.2, %v6671_v22  ;;  %v6835_v33 = vmul.f32 0.2, %v11595_v41  ;;  %v11620_v0 = vsel %vm6779_vm11, %v6669_v48, %v6843_v37 }
 0x52e   : > { %v6674_v25 = vpop.f32.mrf.mxu1  ;;  %7007 = vmatprep.subr.bf16.mxu0 %v6955_v12  ;;  %vm6780_vm0 = vcmp.gt.f32.partialorder %v6671_v22, 0.0  ;;  %v6901_v48 = vsel %vm6773_vm12, %v6653_v7, %v6837_v56  ;;  %vm6769_vm5 = vcmp.gt.f32.partialorder %v6643_v55, 0.0  ;;  %v6833_v1 = vmul.f32 0.2, %v6643_v55 }
 0x52f   : > { %vm6781_vm13 = vcmp.gt.f32.partialorder %v6673_v44, 0.0  ;;  %v6845_v50 = vmul.f32 0.2, %v6673_v44  ;;  %v6675_v2 = vadd.f32 %v6674_v25, %v11532_v14  ;;  %7008 = vmatpush1.bf16.xpose.msra.mxu0 %v6954_v36  ;;  %v11639_v29 = vsel %vm6780_vm0, %v6671_v22, %v6844_v6 }
 0x530   : > { %v6678_v28 = vpop.f32.mrf.mxu1  ;;  %7009 = vmatprep.subr.bf16.mxu0 %v6953_v18  ;;  %v6899_v17 = vsel %vm6771_vm15, %v11595_v41, %v6835_v33  ;;  %v6896_v22 = vsel %vm6768_vm3, %v11556_v8, %v11586_v13  ;;  %vm6767_vm7 = vcmp.gt.f32.partialorder %v6639_v53, 0.0  ;;  %vm6764_vm10 = vcmp.gt.f32.partialorder %v11551_v16, 0.0 }
 0x531   : > { %v11622_v12 = vsel %vm6781_vm13, %v6673_v44, %v6845_v50  ;;  %vm6782_vm1 = vcmp.gt.f32.partialorder %v6675_v2, 0.0  ;;  %v6846_v14 = vmul.f32 0.2, %v6675_v2  ;;  %v6679_v46 = vadd.f32 %v6678_v28, %v11536_v27 }
 0x532   : > { %v6680_v23 = vpop.f32.mrf.mxu1  ;;  %v6898_v27 = vsel %vm6770_vm2, %v11558_v58, %v11589_v32  ;;  %v6952_v3 = vpack.c.bf16 %v6901_v48, %v6899_v17  ;;  %v11655_v32 = vpop.f32.mrf.mxu0  ;;  %vm6762_vm2 = vcmp.gt.f32.partialorder %v11578_v30, 0.0  ;;  %v6897_v18 = vsel %vm6769_vm5, %v6643_v55, %v6833_v1 }
 0x533   : > { %v6681_v4 = vadd.f32 %v6680_v23, %v11542_v10  ;;  %v11641_v49 = vsel %vm6782_vm1, %v6675_v2, %v6846_v14  ;;  %v6847_v7 = vmul.f32 0.2, %v6679_v46  ;;  %vm6783_vm4 = vcmp.gt.f32.partialorder %v6679_v46, 0.0 }
 0x534   : > { %v6682_v20 = vpop.f32.mrf.mxu1  ;;  %v6951_v35 = vpack.c.bf16 %v6898_v27, %v6896_v22  ;;  %v11666_v25 = vpop.f32.mrf.mxu0  ;;  %v6894_v2 = vsel %vm6766_vm14, %v11583_v63, %v6830_v31  ;;  %v6629_v33 = vadd.f32 %v11454_v51, %v11476_v57  ;;  %v6892_v63 = vsel %vm6764_vm10, %v11551_v16, %v11581_v39 }
 0x535   : > { %v6683_v58 = vadd.f32 %v6682_v20, %v11546_v15  ;;  %v6848_v37 = vmul.f32 0.2, %v6681_v4  ;;  %v6831_v15 = vmul.f32 0.2, %v6639_v53  ;;  %v11661_v8 = vsel %vm6783_vm4, %v6679_v46, %v6847_v7 }
 0x536   : > { %v6684_v41 = vpop.f32.mrf.mxu1  ;;  %vm6784_vm8 = vcmp.gt.f32.partialorder %v6681_v4, 0.0  ;;  %v11692_v55 = vpop.f32.mrf.mxu0  ;;  %v6826_v57 = vmul.f32 0.2, %v11578_v30  ;;  %v6949_v23 = vpack.c.bf16 %v6894_v2, %v6892_v63  ;;  %vm6763_vm14 = vcmp.gt.f32.partialorder %v6629_v33, 0.0 }
 0x537   : > { %vm6785_vm6 = vcmp.gt.f32.partialorder %v6683_v58, 0.0  ;;  %v6849_v59 = vmul.f32 0.2, %v6683_v58  ;;  %v6685_v36 = vadd.f32 %v6684_v41, %v11549_v52  ;;  %7010 = vmatpush1.bf16.xpose.msra.mxu0 %v6952_v3  ;;  %v6633_v52 = vadd.f32 %v11462_v43, %v11484_v5 }
 0x538   : > { %v6688_v13 = vpop.f32.mrf.mxu1  ;;  %7011 = vmatprep.subr.bf16.mxu0 %v6951_v35  ;;  %v6895_v5 = vsel %vm6767_vm7, %v6639_v53, %v6831_v15  ;;  %vm6760_vm1 = vcmp.gt.f32.partialorder %v11538_v60, 0.0  ;;  %v11703_v3 = vpop.f32.mrf.mxu0  ;;  %v6510_v31 = vadd.f32 %v11524_v21, %v11375_v38  ;;  %v6890_v1 = vsel %vm6762_vm2, %v11578_v30, %v6826_v57  ;;  %v12911_v57 = vld [vmem:[#allocation118_spill] sm:$0xff] }
 0x539   : > { %v11663_v44 = vsel %vm6785_vm6, %v6683_v58, %v6849_v59  ;;  %vm6786_vm9 = vcmp.gt.f32.partialorder %v6685_v36, 0.0  ;;  %v6850_v62 = vmul.f32 0.2, %v6685_v36  ;;  %v6689_v56 = vadd.f32 %v6688_v13, %v11554_v24 }
 0x53a   : > { %v6690_v6 = vpop.f32.mrf.mxu1  ;;  %v11678_v24 = vsel %vm6784_vm8, %v6681_v4, %v6848_v37  ;;  %v6950_v46 = vpack.c.bf16 %v6897_v18, %v6895_v5  ;;  %vm6765_vm12 = vcmp.gt.f32.partialorder %v6633_v52, 0.0  ;;  %v6829_v51 = vmul.f32 0.2, %v6633_v52 }
 0x53b   : > { %v6691_v50 = vadd.f32 %v6690_v6, %v11561_v9  ;;  %v11680_v34 = vsel %vm6786_vm9, %v6685_v36, %v6850_v62  ;;  %v6851_v43 = vmul.f32 0.2, %v6689_v56  ;;  %vm6787_vm11 = vcmp.gt.f32.partialorder %v6689_v56, 0.0  ;;  %v11724_v62 = vpop.f32.mrf.mxu0 }
 0x53c   : > { %v6692_v28 = vpop.f32.mrf.mxu1  ;;  %v6888_v21 = vsel %vm6760_vm1, %v11538_v60, %v11575_v26 }
 0x53d   : > { %v6693_v9 = vadd.f32 %v6692_v28, %v11564_v45  ;;  %v6852_v4 = vmul.f32 0.2, %v6691_v50  ;;  %v6827_v45 = vmul.f32 0.2, %v6629_v33  ;;  %v11697_v17 = vsel %vm6787_vm11, %v6689_v56, %v6851_v43  ;;  %v6537_v2 = vpop.f32.mrf.mxu0  ;;  %v12908_v28 = vld [vmem:[#allocation120_spill] sm:$0xff] }
 0x53e   : > { %v6694_v48 = vpop.f32.mrf.mxu1  ;;  %vm6788_vm15 = vcmp.gt.f32.partialorder %v6691_v50, 0.0  ;;  %v6947_v56 = vpack.c.bf16 %v6890_v1, %v6888_v21  ;;  %v12918_v1 = vld [vmem:[#allocation111_spill] sm:$0xff] }
 0x53f   : > { %vm6789_vm13 = vcmp.gt.f32.partialorder %v6693_v9, 0.0  ;;  %v6853_v27 = vmul.f32 0.2, %v6693_v9  ;;  %v6695_v53 = vadd.f32 %v6694_v48, %v11569_v42  ;;  %7012 = vmatpush1.bf16.xpose.msra.mxu0 %v6950_v46  ;;  %v6893_v42 = vsel %vm6765_vm12, %v6633_v52, %v6829_v51  ;;  %v6539_v5 = vpop.f32.mrf.mxu0  ;;  %v12909_v46 = vld [vmem:[#allocation119_spill] sm:$0xff]  ;;  %v12912_v51 = vld [vmem:[#allocation117_spill] sm:$0xff] }
 0x540   : > { %v6698_v16 = vpop.f32.mrf.mxu1  ;;  %7013 = vmatprep.subr.bf16.mxu0 %v6949_v23  ;;  %v11715_v41 = vsel %vm6788_vm15, %v6691_v50, %v6852_v4  ;;  %v6891_v35 = vsel %vm6763_vm14, %v6629_v33, %v6827_v45  ;;  %v12913_v48 = vpack.c.bf16 %v12911_v57, %v12912_v51  ;;  %v12924_v51 = vld [vmem:[#allocation108_spill] sm:$0xff] }
 0x541   : > { %v11699_v39 = vsel %vm6789_vm13, %v6693_v9, %v6853_v27  ;;  %vm6790_vm0 = vcmp.gt.f32.partialorder %v6695_v53, 0.0  ;;  %v6854_v7 = vmul.f32 0.2, %v6695_v53  ;;  %v6699_v20 = vadd.f32 %v6698_v16, %v11572_v47  ;;  %v6541_v23 = vpop.f32.mrf.mxu0  ;;  %v12914_v16 = vld [vmem:[#allocation116_spill] sm:$0xff] }
 0x542   : > { %v11708_v22 = vpop.f32.mrf.mxu1  ;;  %v6948_v36 = vpack.c.bf16 %v6893_v42, %v6891_v35  ;;  %v12910_v9 = vpack.c.bf16 %v12908_v28, %v12909_v46  ;;  %v12923_v46 = vld [vmem:[#allocation167_spill] sm:$0xff] }
 0x543   : > { %v11717_v47 = vsel %vm6790_vm0, %v6695_v53, %v6854_v7  ;;  %v6855_v15 = vmul.f32 0.2, %v6699_v20  ;;  %vm6791_vm3 = vcmp.gt.f32.partialorder %v6699_v20, 0.0  ;;  %v6545_v53 = vpop.f32.mrf.mxu0  ;;  %v12915_v7 = vld [vmem:[#allocation113_spill] sm:$0xff]  ;;  %v6538_v61 = vadd.f32 %v6537_v2, %v12923_v46 }
 0x544   : > { %v6702_v37 = vpop.f32.mrf.mxu1 }
 0x545   : > { %v6703_v13 = vadd.f32 %v6702_v37, %v6510_v31  ;;  %v11730_v6 = vsel %vm6791_vm3, %v6699_v20, %v6855_v15  ;;  %v12916_v20 = vpack.c.bf16 %v12914_v16, %v12915_v7  ;;  %v12917_v31 = vld [vmem:[#allocation112_spill] sm:$0xff]  ;;  %v6547_v37 = vpop.f32.mrf.mxu0 }
 0x546   : > { %v11726_v30 = vpop.f32.mrf.mxu1  ;;  %v12919_v35 = vpack.c.bf16 %v12917_v31, %v12918_v1  ;;  %v6548_v7 = vadd.f32 %v6547_v37, %v12923_v46 }
 0x547   : > { %vm6793_vm4 = vcmp.gt.f32.partialorder %v6703_v13, 0.0  ;;  %v6857_v52 = vmul.f32 0.2, %v6703_v13  ;;  %7014 = vmatpush1.bf16.xpose.msra.mxu0 %v6948_v36 }
 0x548   : > { %v11728_v18 = vpop.f32.mrf.mxu1  ;;  %7015 = vmatprep.subr.bf16.mxu0 %v6947_v56  ;;  %v12920_v56 = vld [vmem:[#allocation110_spill] sm:$0xff] }
 0x549   : > { %v11732_v50 = vsel %vm6793_vm4, %v6703_v13, %v6857_v52  ;;  %v6549_v13 = vpop.f32.mrf.mxu0  ;;  %v12921_v52 = vld [vmem:[#allocation109_spill] sm:$0xff] }
 0x54a   : > { %v11736_v26 = vpop.f32.mrf.mxu1  ;;  %v12922_v28 = vpack.c.bf16 %v12920_v56, %v12921_v52  ;;  %v6550_v10 = vadd.f32 %v6549_v13, %v11375_v38  ;;  %v12927_v13 = vld [vmem:[#allocation107_spill] sm:$0xff] }
 0x54b   : > { %v6551_v31 = vpop.f32.mrf.mxu0 }
 0x54c   : > { %v11738_v33 = vpop.f32.mrf.mxu1 }
 0x54e   : > { %v11740_v43 = vpop.f32.mrf.mxu1 }
 0x54f   : > { %7016 = vmatpush1.bf16.xpose.msra.mxu0 %v12910_v9  ;;  %v6542_v9 = vadd.f32 %v6541_v23, %v12923_v46  ;;  %v6552_v23 = vadd.f32 %v6551_v31, %v12923_v46 }
 0x550   : > { %v11745_v63 = vpop.f32.mrf.mxu1  ;;  %7017 = vmatprep.subr.bf16.mxu0 %v12913_v48  ;;  %v12925_v48 = vld [vmem:[#allocation27_spill] sm:$0xff] }
 0x551   : > { %v12926_v16 = vpack.c.bf16 %v12924_v51, %v12925_v48  ;;  %v6528_v51 = vadd.f32 %v11666_v25, %v12923_v46 }
 0x552   : > { %v6720_v4 = vpop.f32.mrf.mxu1 }
 0x554   : > { %v11750_v27 = vpop.f32.mrf.mxu1 }
 0x556   : > { %v6724_v45 = vpop.f32.mrf.mxu1 }
 0x557   : > { %7018 = vmatpush1.bf16.xpose.msra.mxu0 %v12916_v20  ;;  %v6546_v20 = vadd.f32 %v6545_v53, %v11375_v38  ;;  %v6532_v53 = vadd.f32 %v11703_v3, %v12923_v46  ;;  %v6536_v3 = vadd.f32 %v11724_v62, %v11375_v38  ;;  %v6530_v62 = vadd.f32 %v11692_v55, %v11375_v38 }
 0x558   : > { %v6728_v42 = vpop.f32.mrf.mxu1  ;;  %7019 = vmatprep.subr.bf16.mxu0 %v12919_v35 }
 0x559   : > { %v6725_v31 = vadd.f32 %v6724_v45, %v6532_v53  ;;  %v6522_v45 = vadd.f32 %v11625_v40, %v12923_v46 }
 0x55a   : > { %v6730_v36 = vpop.f32.mrf.mxu1 }
 0x55b   : > { %v6731_v19 = vadd.f32 %v6730_v36, %v6538_v61  ;;  %v6866_v54 = vmul.f32 0.2, %v6725_v31  ;;  %vm6802_vm11 = vcmp.gt.f32.partialorder %v6725_v31, 0.0  ;;  %v6715_v55 = vadd.f32 %v11740_v43, %v6522_v45 }
 0x55c   : > { %v6732_v15 = vpop.f32.mrf.mxu1  ;;  %v12938_v45 = vpack.c.bf16 %v11663_v44, %v11661_v8 }
 0x55d   : > { %vm6804_vm9 = vcmp.gt.f32.partialorder %v6731_v19, 0.0  ;;  %vm6798_vm15 = vcmp.gt.f32.partialorder %v6715_v55, 0.0 }
 0x55e   : > { %v6734_v21 = vpop.f32.mrf.mxu1 }
 0x55f   : > { %7020 = vmatpush1.bf16.xpose.msra.mxu0 %v12922_v28  ;;  %v6735_v1 = vadd.f32 %v6734_v21, %v6542_v9 }
 0x560   : > { %v6738_v57 = vpop.f32.mrf.mxu1  ;;  %7021 = vmatprep.subr.bf16.mxu0 %v12926_v16  ;;  %v12928_v16 = vld [vmem:[#allocation106_spill] sm:$0xff] }
 0x561   : > { %v6739_v52 = vadd.f32 %v6738_v57, %v6546_v20  ;;  %v6870_v37 = vmul.f32 0.2, %v6735_v1  ;;  %v12929_v57 = vpack.c.bf16 %v12927_v13, %v12928_v16  ;;  %vm6806_vm6 = vcmp.gt.f32.partialorder %v6735_v1, 0.0 }
 0x562   : > { %v6740_v35 = vpop.f32.mrf.mxu1  ;;  %v6721_v16 = vadd.f32 %v6720_v4, %v6528_v51 }
 0x563   : > { %v6741_v56 = vadd.f32 %v6740_v35, %v6548_v7  ;;  %v6540_v7 = vadd.f32 %v6539_v5, %v11375_v38  ;;  %v6871_v61 = vmul.f32 0.2, %v6739_v52  ;;  %vm6807_vm7 = vcmp.gt.f32.partialorder %v6739_v52, 0.0 }
 0x564   : > { %v6742_v28 = vpop.f32.mrf.mxu1  ;;  %vm6800_vm13 = vcmp.gt.f32.partialorder %v6721_v16, 0.0 }
 0x565   : > { %v6743_v14 = vadd.f32 %v6742_v28, %v6550_v10  ;;  %v6872_v9 = vmul.f32 0.2, %v6741_v56  ;;  %vm6808_vm2 = vcmp.gt.f32.partialorder %v6741_v56, 0.0  ;;  %v6868_v10 = vmul.f32 0.2, %v6731_v19 }
 0x566   : > { %v6744_v21 = vpop.f32.mrf.mxu1  ;;  %v6733_v36 = vadd.f32 %v6732_v15, %v6540_v7  ;;  %v6935_v13 = vsel %vm6807_vm7, %v6739_v52, %v6871_v61  ;;  %v12930_v15 = vld [vmem:[#allocation125_spill] sm:$0xff] }
 0x567   : > { %vm6809_vm5 = vcmp.gt.f32.partialorder %v6743_v14, 0.0  ;;  %v6873_v2 = vmul.f32 0.2, %v6743_v14  ;;  %v6745_v48 = vadd.f32 %v6744_v21, %v6552_v23  ;;  %7022 = vmatpush1.bf16.xpose.msra.mxu0 %v12929_v57  ;;  %v6936_v35 = vsel %vm6808_vm2, %v6741_v56, %v6872_v9  ;;  %v12933_v61 = vld [vmem:[#allocation121_spill] sm:$0xff] }
 0x568   : > { %v6934_v23 = vsel %vm6806_vm6, %v6735_v1, %v6870_v37  ;;  %v6729_v21 = vadd.f32 %v6728_v42, %v6536_v3  ;;  %v6932_v58 = vsel %vm6804_vm9, %v6731_v19, %v6868_v10  ;;  %v6869_v59 = vmul.f32 0.2, %v6733_v36 }
 0x569   : > { %vm6810_vm8 = vcmp.gt.f32.partialorder %v6745_v48, 0.0  ;;  %v6874_v25 = vmul.f32 0.2, %v6745_v48  ;;  %v6937_v20 = vsel %vm6809_vm5, %v6743_v14, %v6873_v2  ;;  %v6969_v60 = vpack.c.bf16 %v6934_v23, %v6932_v58 }
 0x56a   : > { %v6970_v57 = vpack.c.bf16 %v6937_v20, %v6935_v13  ;;  %vm6805_vm10 = vcmp.gt.f32.partialorder %v6733_v36, 0.0  ;;  %v6867_v14 = vmul.f32 0.2, %v6729_v21  ;;  %v6864_v42 = vmul.f32 0.2, %v6721_v16 }
 0x56b   : > { %v6938_v28 = vsel %vm6810_vm8, %v6745_v48, %v6874_v25  ;;  %vm6803_vm12 = vcmp.gt.f32.partialorder %v6729_v21, 0.0  ;;  %v6526_v19 = vadd.f32 %v11655_v32, %v11375_v38  ;;  %v6723_v58 = vadd.f32 %v11750_v27, %v6530_v62 }
 0x56c   : > { %v6971_v5 = vpack.c.bf16 %v6938_v28, %v6936_v35  ;;  %v6933_v4 = vsel %vm6805_vm10, %v6733_v36, %v6869_v59  ;;  %v6518_v1 = vadd.f32 %v12930_v15, %v12923_v46  ;;  %v6930_v56 = vsel %vm6802_vm11, %v6725_v31, %v6866_v54  ;;  %v12931_v54 = vld [vmem:[#allocation122_spill] sm:$0xff] }
 0x56d   : > { %v6931_v52 = vsel %vm6803_vm12, %v6729_v21, %v6867_v14  ;;  %v6928_v53 = vsel %vm6800_vm13, %v6721_v16, %v6864_v42  ;;  %v6865_v37 = vmul.f32 0.2, %v6723_v58  ;;  %v6862_v32 = vmul.f32 0.2, %v6715_v55  ;;  %v12943_v42 = vld [vmem:[#allocation115_spill] sm:$0xff] }
 0x56e   : > { %7023 = vmatprep.subr.bf16.mxu0 %v6971_v5  ;;  %v6711_v40 = vadd.f32 %v11736_v26, %v6518_v1  ;;  %v6968_v51 = vpack.c.bf16 %v6933_v4, %v6931_v52  ;;  %v6967_v9 = vpack.c.bf16 %v6930_v56, %v6928_v53  ;;  %vm6801_vm14 = vcmp.gt.f32.partialorder %v6723_v58, 0.0  ;;  %v12932_v26 = vld [vmem:[#allocation123_spill] sm:$0xff] }
 0x56f   : > { %7024 = vmatpush2.bf16.xpose.msra.mxu0 %v6970_v57  ;;  %v6520_v59 = vadd.f32 %v11613_v11, %v11375_v38  ;;  %v6512_v43 = vadd.f32 %v12931_v54, %v12923_v46  ;;  %v6516_v2 = vadd.f32 %v12932_v26, %v11375_v38  ;;  %v6929_v7 = vsel %vm6801_vm14, %v6723_v58, %v6865_v37 }
 0x570   : > { %7025 = vmatprep.subr.bf16.mxu0 %v6969_v60  ;;  %v6719_v60 = vadd.f32 %v11745_v63, %v6526_v19  ;;  %v6860_v63 = vmul.f32 0.2, %v6711_v40  ;;  %vm6796_vm1 = vcmp.gt.f32.partialorder %v6711_v40, 0.0  ;;  %v6508_v10 = vadd.f32 %v12933_v61, %v12923_v46 }
 0x571   : > { %v6713_v48 = vadd.f32 %v11738_v33, %v6520_v59  ;;  %v6705_v11 = vadd.f32 %v11726_v30, %v6512_v43  ;;  %v6926_v25 = vsel %vm6798_vm15, %v6715_v55, %v6862_v32  ;;  %v6709_v3 = vadd.f32 %v11728_v18, %v6516_v2 }
 0x572   : > { %v6863_v27 = vmul.f32 0.2, %v6719_v60  ;;  %vm6799_vm0 = vcmp.gt.f32.partialorder %v6719_v60, 0.0  ;;  %v6701_v20 = vadd.f32 %v11708_v22, %v6508_v10  ;;  %v6924_v35 = vsel %vm6796_vm1, %v6711_v40, %v6860_v63 }
 0x573   : > { %v6861_v28 = vmul.f32 0.2, %v6713_v48  ;;  %v6965_v23 = vpack.c.bf16 %v6926_v25, %v6924_v35  ;;  %v6858_v38 = vmul.f32 0.2, %v6705_v11  ;;  %vm6797_vm3 = vcmp.gt.f32.partialorder %v6713_v48, 0.0 }
 0x574   : > { %v6927_v36 = vsel %vm6799_vm0, %v6719_v60, %v6863_v27  ;;  %vm6794_vm4 = vcmp.gt.f32.partialorder %v6705_v11, 0.0  ;;  %v6859_v33 = vmul.f32 0.2, %v6709_v3  ;;  %v6856_v21 = vmul.f32 0.2, %v6701_v20 }
 0x575   : > { %v6966_v31 = vpack.c.bf16 %v6929_v7, %v6927_v36  ;;  %vm6795_vm5 = vcmp.gt.f32.partialorder %v6709_v3, 0.0  ;;  %vm6792_vm6 = vcmp.gt.f32.partialorder %v6701_v20, 0.0  ;;  %v6925_v30 = vsel %vm6797_vm3, %v6713_v48, %v6861_v28 }
 0x576   : > { %v6922_v46 = vsel %vm6794_vm4, %v6705_v11, %v6858_v38  ;;  %v6923_v13 = vsel %vm6795_vm5, %v6709_v3, %v6859_v33  ;;  %v6920_v5 = vsel %vm6792_vm6, %v6701_v20, %v6856_v21  ;;  %v12934_v22 = vpack.c.bf16 %v11732_v50, %v11730_v6  ;;  %v12942_v50 = vld [vmem:[#allocation124_spill] sm:$0xff] }
 0x577   : > { %7026 = vmatpush2.bf16.xpose.msra.mxu0 %v6968_v51  ;;  %v6964_v18 = vpack.c.bf16 %v6925_v30, %v6923_v13  ;;  %v6963_v16 = vpack.c.bf16 %v6922_v46, %v6920_v5  ;;  %v12935_v57 = vpack.c.bf16 %v11717_v47, %v11715_v41  ;;  %v12936_v62 = vpack.c.bf16 %v11699_v39, %v11697_v17  ;;  %v12941_v47 = vld [vmem:[#allocation126_spill] sm:$0xff] }
 0x578   : > { %7027 = vmatprep.subr.bf16.mxu0 %v6967_v9  ;;  %v12937_v14 = vpack.c.bf16 %v11680_v34, %v11678_v24  ;;  %v12939_v6 = vpack.c.bf16 %v11641_v49, %v11639_v29  ;;  %v12940_v41 = vpack.c.bf16 %v11622_v12, %v11620_v0  ;;  %v6997_v17 = vrot.slane %v12942_v50, %v12941_v47 }
 0x579   : > { %v12944_v53 = vlaneseq }
 0x57b   : > { %vm7078_vm2 = vcmp.lt.s32.totalorder %v12944_v53, 256 }
 0x57f   : > { %7028 = vmatpush2.bf16.xpose.msra.mxu0 %v6966_v31 }
 0x580   : > { %7029 = vmatprep.subr.bf16.mxu0 %v6965_v23 }
 0x587   : > { %7030 = vmatpush2.bf16.xpose.msra.mxu0 %v6964_v18 }
 0x588   : > { %7031 = vmatprep.subr.bf16.mxu0 %v6963_v16 }
 0x58f   : > { %7032 = vmatpush2.bf16.xpose.msra.mxu0 %v12934_v22 }
 0x590   : > { %7033 = vmatprep.subr.bf16.mxu0 %v12935_v57 }
 0x597   : > { %7034 = vmatpush2.bf16.xpose.msra.mxu0 %v12936_v62 }
 0x598   : > { %7035 = vmatprep.subr.bf16.mxu0 %v12937_v14 }
 0x59f   : > { %7036 = vmatpush2.bf16.xpose.msra.mxu0 %v12938_v45 }
 0x5a0   : > { %7037 = vmatprep.subr.bf16.mxu0 %v12939_v6 }
 0x5a7   : > { %7038 = vmatpush2.bf16.xpose.msra.mxu0 %v12940_v41  ;;  %v6976_v39 = vpop.permute.xlu0 %6975 }
 0x5a8   : > { %v6981_v24 = vrot.slane %v6976_v39, %v12943_v42 }
 0x5ae   : > { %7040 = vmatmul.mubr.bf16.vlgmr.msra.gmra.mxu0 %v6997_v17 }
 0x66e   : > { %v7041_v34 = vpop.f32.mrf.mxu0 }
 0x66f   : > { %v7042_v19 = vadd.f32 %v7041_v34, %v6981_v24 }
 0x670   : > { %v7043_v58 = vpop.f32.mrf.mxu0 }
 0x671   : > { %v7048_v8 = vsub.f32 0.0, %v7042_v19  ;;  %v7044_v44 = vadd.f32 %v7043_v58, %v6981_v24 }
 0x672   : > { %v7045_v4 = vpop.f32.mrf.mxu0 }
 0x673   : > { %v7050_v29 = vmul.f32 1.442695, %v7048_v8  ;;  %v7049_v49 = vsub.f32 0.0, %v7044_v44 }
 0x674   : > { %v7046_v15 = vpop.f32.mrf.mxu0 }
 0x675   : > { %8405 = vpow2.f32 %v7050_v29  ;;  %v7052_v0 = vmul.f32 1.442695, %v7049_v49 }
 0x677   : > { %8407 = vpow2.f32 %v7052_v0 }
 0x682   : > { %v8406_v12 = vpop.eup %8405 }
 0x683   : > { %v7054_v1 = vadd.f32 1.0, %v8406_v12 }
 0x684   : > { %v8408_v55 = vpop.eup %8407 }
 0x685   : > { %v7055_v56 = vadd.f32 1.0, %v8408_v55  ;;  %8409 = vrcp.f32 %v7054_v1 }
 0x687   : > { %8411 = vrcp.f32 %v7055_v56 }
 0x692   : > { %v8410_v60 = vpop.eup %8409 }
 0x694   : > { %v8412_v52 = vpop.eup %8411 }
 0x695   : > { %v7060_v40 = vcombine.low %v8410_v60, %v8412_v52 }
 0x697   : > { %v7067_v51 = vrot.slane %v7060_v40, %v12941_v47 }
 0x699   : > { %v7074_v37 = vrot.slane %v7067_v51, %v12941_v47 }
 0x69b   : > { %7080 = vst.msk [vmem:[%s379_s19] sm:$0x3] %vm7078_vm2, %v7074_v37 }
 0x69c PF: > { %p22_p1 = scmp.ge.s32.totalorder %s8696_s30, 4   ;;  %s12945_s26 = smov %s8608_s27 }
 0x69d   : > { %s12946_s27 = smov %s8612_s28  ;;  %s12947_s28 = smov %s8706_s10 }
 0x69e   : > { %s12948_s29 = smov %s8696_s30  ;;  %24 = sbr.rel (!%p22_p1) target bundleno = 9 (0x9), region = 108 }
 0x6a3   :  { %7101 = vsyncpa [#allocation4], 1 }
 0x6a4   :  { %7103 = vsyncpa [#allocation4 + $0x1], 1 }
 0x6a5   :  { %7104 = vsyncpa [#allocation6], 1 }
 0x6a6   :  { %7105 = vsyncpa [#allocation9], 1 }
 0x6a7   :  { %7106 = vsyncpa [#allocation12], 1 }

</bundles_post_ra>
